<compile_context>
chip_gen: v6e
topology: v6e:2x2x1
jax: 0.10.0
libtpu: 0.0.40
codegen_flags: <defaults>
</compile_context>

<pallas_src>
import functools

import jax
import jax.numpy as jnp
from jax import lax
from jax.experimental import pallas as pl
from jax.experimental.pallas import tpu as pltpu


def _round_up(x, m):
    return (x + m - 1) // m * m


# ---------------------------------------------------------------- Pallas kernel

def _conv_fused_kernel(x_ref, w_ref, b_ref, o_ref, *, taps, l_win, wq, wo,
                       use_in, use_lrelu, pool, eps, slope):
    """Fused 4x4 conv (tap-accumulated GEMMs) + bias + [InstanceNorm] +
    [LeakyReLU] + [global average pool] for ONE batch sample.

    x_ref : (1, P, L, Cin_p)   padded, phase-decomposed, spatially flattened input
    w_ref : (16, Cin_p, Cout_p)
    b_ref : (1, Cout_p)        float32
    o_ref : (1, l_win, Cout_p) or (1, 1, Cout_p) when pooling
    """
    cout = w_ref.shape[2]

    # conv as a sum of 16 per-tap GEMMs over contiguous flat spatial windows
    acc = None
    for t, (p, off) in enumerate(taps):
        lhs = x_ref[0, p, pl.ds(off, l_win), :]           # (l_win, Cin_p)
        part = jnp.dot(lhs, w_ref[t], preferred_element_type=jnp.float32)
        acc = part if acc is None else acc + part
    acc = acc + b_ref[...]                                 # f32 epilogue from here

    # rows with (m % wq) >= wo are "overhang" columns of the flat-window trick;
    # they never correspond to valid outputs and are masked out of statistics.
    ho = l_win // wq
    inv_count = 1.0 / float(ho * wo)
    col = lax.broadcasted_iota(jnp.int32, (l_win, cout), 0) % wq
    valid = col < wo

    if use_in:                                             # InstanceNorm2d (no affine)
        mean = jnp.sum(jnp.where(valid, acc, 0.0), axis=0, keepdims=True) * inv_count
        diff = acc - mean
        var = jnp.sum(jnp.where(valid, diff * diff, 0.0), axis=0,
                      keepdims=True) * inv_count
        acc = diff * lax.rsqrt(var + eps)
    if use_lrelu:
        acc = jnp.where(acc >= 0.0, acc, slope * acc)

    if pool:                                               # fused global avg-pool
        pooled = jnp.sum(jnp.where(valid, acc, 0.0), axis=0,
                         keepdims=True) * inv_count
        o_ref[0] = pooled.astype(o_ref.dtype)
    else:
        o_ref[0] = acc.astype(o_ref.dtype)


# ---------------------------------------------------------------- layer wrapper

def _prep_stride1(x, cin_p):
    """k=4, stride=1, pad=1: zero-pad (plus overhang rows), pad channels, flatten."""
    B, H, W, C = x.shape
    Ho, Wo = H - 1, W - 1
    Hp, Wp = H + 3, W + 2                       # Hp = Ho + 4, Wp = Wo + 3
    xp = jnp.pad(x, ((0, 0), (1, 2), (1, 1), (0, cin_p - C)))
    xf = xp.reshape(B, 1, Hp * Wp, cin_p)       # single "phase"
    taps = tuple((0, kh * Wp + kw) for kh in range(4) for kw in range(4))
    return xf, taps, Ho, Wo, Wp


def _prep_stride2(x, cin_p):
    """k=4, stride=2, pad=1: zero-pad, split into the 4 stride-2 phases, flatten."""
    B, H, W, C = x.shape
    assert H % 2 == 0 and W % 2 == 0, "stride-2 layers expect even spatial dims"
    Ho, Wo = H // 2, W // 2
    Hp, Wp = H + 4, W + 2
    Hh, Wh = Hp // 2, Wp // 2                   # Hh = Ho + 2, Wh = Wo + 1
    xp = jnp.pad(x, ((0, 0), (1, 3), (1, 1), (0, cin_p - C)))
    xph = xp.reshape(B, Hh, 2, Wh, 2, cin_p).transpose(0, 2, 4, 1, 3, 5)
    xf = xph.reshape(B, 4, Hh * Wh, cin_p)
    taps = tuple(((kh % 2) * 2 + (kw % 2), (kh // 2) * Wh + (kw // 2))
                 for kh in range(4) for kw in range(4))
    return xf, taps, Ho, Wo, Wh


def conv_layer(x, w, b, *, stride, use_in, use_lrelu, pool=False,
               compute_dtype=jnp.bfloat16):
    """x: (B, H, W, Cin) NHWC. w: (Cout, Cin, 4, 4) PyTorch OIHW. b: (Cout,)."""
    B = x.shape[0]
    Cout, Cin, KH, KW = w.shape
    cin_p = max(8, _round_up(Cin, 8))           # K-padding with zeros is exact
    cout_p = max(8, _round_up(Cout, 8))

    if stride == 2:
        xf, taps, Ho, Wo, Wq = _prep_stride2(x, cin_p)
    else:
        xf, taps, Ho, Wo, Wq = _prep_stride1(x, cin_p)
    xf = xf.astype(compute_dtype)
    P, L = xf.shape[1], xf.shape[2]
    l_win = Ho * Wq

    wt = jnp.transpose(w, (2, 3, 1, 0)).reshape(KH * KW, Cin, Cout)
    wt = jnp.pad(wt, ((0, 0), (0, cin_p - Cin), (0, cout_p - Cout))).astype(compute_dtype)
    bt = jnp.pad(b, (0, cout_p - Cout)).reshape(1, cout_p).astype(jnp.float32)

    if pool:
        out_shape = jax.ShapeDtypeStruct((B, 1, cout_p), jnp.float32)
        out_block = (1, 1, cout_p)
    else:
        out_shape = jax.ShapeDtypeStruct((B, l_win, cout_p), compute_dtype)
        out_block = (1, l_win, cout_p)

    kernel = functools.partial(
        _conv_fused_kernel, taps=taps, l_win=l_win, wq=Wq, wo=Wo,
        use_in=use_in, use_lrelu=use_lrelu, pool=pool, eps=1e-5, slope=0.2)

    out = pl.pallas_call(
        kernel,
        out_shape=out_shape,
        grid=(B,),
        in_specs=[
            pl.BlockSpec((1, P, L, cin_p), lambda i: (i, 0, 0, 0)),
            pl.BlockSpec((KH * KW, cin_p, cout_p), lambda i: (0, 0, 0)),
            pl.BlockSpec((1, cout_p), lambda i: (0, 0)),
        ],
        out_specs=pl.BlockSpec(out_block, lambda i: (i, 0, 0)),
        compiler_params=pltpu.CompilerParams(dimension_semantics=("parallel",)),
    )(xf, wt, bt)

    if pool:
        return out.reshape(B, cout_p)[:, :Cout]            # (B, Cout)
    # strip overhang columns, stay NHWC for the next layer
    return out.reshape(B, Ho, Wq, cout_p)[:, :, :Wo, :Cout]


# ---------------------------------------------------------------- model

def init_params(key, in_channels=1, n_filters=8):
    dims = [
        (n_filters, in_channels),
        (2 * n_filters, n_filters),
        (4 * n_filters, 2 * n_filters),
        (8 * n_filters, 4 * n_filters),
        (1, 8 * n_filters),
    ]
    params = {}
    keys = jax.random.split(key, 2 * len(dims))
    for i, (co, ci) in enumerate(dims):
        params[f"w{i + 1}"] = 0.05 * jax.random.normal(keys[2 * i], (co, ci, 4, 4), jnp.float32)
        params[f"b{i + 1}"] = 0.01 * jax.random.normal(keys[2 * i + 1], (co,), jnp.float32)
    return params


def discriminator_forward(x, params, compute_dtype=jnp.bfloat16):
    """x: (B, Cin, H, W) NCHW, like the PyTorch module. Returns (B, 1)."""
    h = jnp.transpose(x, (0, 2, 3, 1))          # NCHW -> NHWC once at the boundary
    h = conv_layer(h, params["w1"], params["b1"], stride=2, use_in=False,
                   use_lrelu=True, compute_dtype=compute_dtype)
    h = conv_layer(h, params["w2"], params["b2"], stride=2, use_in=True,
                   use_lrelu=True, compute_dtype=compute_dtype)
    h = conv_layer(h, params["w3"], params["b3"], stride=2, use_in=True,
                   use_lrelu=True, compute_dtype=compute_dtype)
    h = conv_layer(h, params["w4"], params["b4"], stride=1, use_in=True,
                   use_lrelu=True, compute_dtype=compute_dtype)
    out = conv_layer(h, params["w5"], params["b5"], stride=1, use_in=False,
                     use_lrelu=False, pool=True, compute_dtype=compute_dtype)
    return out                                   # (B, 1) float32


# ---------------------------------------------------------------- pure-JAX reference

def reference_forward(x, params):
    def conv(x, w, b, stride):
        y = jax.lax.conv_general_dilated(
            x, w, (stride, stride), ((1, 1), (1, 1)),
            dimension_numbers=("NCHW", "OIHW", "NCHW"))
        return y + b[None, :, None, None]

    def lrelu(v):
        return jnp.where(v >= 0, v, 0.2 * v)

    def inorm(v, eps=1e-5):
        m = v.mean(axis=(2, 3), keepdims=True)
        var = ((v - m) ** 2).mean(axis=(2, 3), keepdims=True)
        return (v - m) * jax.lax.rsqrt(var + eps)

    x = lrelu(conv(x, params["w1"], params["b1"], 2))
    x = lrelu(inorm(conv(x, params["w2"], params["b2"], 2)))
    x = lrelu(inorm(conv(x, params["w3"], params["b3"], 2)))
    x = lrelu(inorm(conv(x, params["w4"], params["b4"], 1)))
    x = conv(x, params["w5"], params["b5"], 1)
    return x.mean(axis=(2, 3))


if __name__ == "__main__":
    key = jax.random.PRNGKey(0)
    kp, kx = jax.random.split(key)

    # Small shapes consistent with the module: batch=2, in_channels=1,
    # spatial=32 (must be >= 32 so all five k=4 convs stay valid), n_filters=8.
    params = init_params(kp, in_channels=1, n_filters=8)
    x = jax.random.normal(kx, (2, 1, 32, 32), jnp.float32)

    fwd = jax.jit(discriminator_forward, static_argnames=("compute_dtype",))
    ref = jax.block_until_ready(reference_forward(x, params))

    # Exact mode (f32 GEMM operands): tight check proves the kernel math.
    out_f32 = jax.block_until_ready(fwd(x, params, compute_dtype=jnp.float32))
    assert out_f32.shape == (2, 1), f"bad output shape {out_f32.shape}"
    assert jnp.allclose(out_f32, ref, atol=1e-4, rtol=1e-4), "f32 mismatch vs reference"

    # Performance mode (bf16 GEMM operands, f32 accumulation/epilogue).
    # Loose tolerance only reflects bf16 operand rounding across 5 layers.
    out_bf16 = jax.block_until_ready(fwd(x, params, compute_dtype=jnp.bfloat16))
    assert out_bf16.shape == (2, 1), f"bad output shape {out_bf16.shape}"
    assert jnp.allclose(out_bf16, ref, atol=2e-1, rtol=2e-1), "bf16 mismatch vs reference"

    print("KERNEL_OK")
</pallas_src>

<mosaic_0001>
module attributes {stable_mosaic.version = 11 : i64} {
  func.func @_conv_fused_kernel(%arg0: i32, %arg1: memref<1x4x306x8xf32, #tpu.memory_space<vmem>>, %arg2: memref<16x8x8xf32, #tpu.memory_space<vmem>>, %arg3: memref<1x8xf32, #tpu.memory_space<vmem>>, %arg4: memref<1x272x8xf32, #tpu.memory_space<vmem>>) attributes {dimension_semantics = [#tpu.dimension_semantics<parallel>], iteration_bounds = array<i64: 2>, scalar_prefetch = 0 : i64, scratch_operands = 0 : i64, tpu.core_type = #tpu.core_type<tc>, window_params = [{transform_indices = @transform_0, window_bounds = array<i64: 1, 4, 306, 8>}, {pipeline_mode = #tpu.pipeline_mode<synchronous>, transform_indices = @transform_1, window_bounds = array<i64: 16, 8, 8>}, {pipeline_mode = #tpu.pipeline_mode<synchronous>, transform_indices = @transform_2, window_bounds = array<i64: 1, 8>}, {transform_indices = @transform_3, window_bounds = array<i64: 1, 272, 8>}]} {
    %c0 = arith.constant 0 : index
    %c0_0 = arith.constant 0 : index
    %c0_1 = arith.constant 0 : index
    %c0_2 = arith.constant 0 : index
    %0 = vector.load %arg1[%c0, %c0_0, %c0_1, %c0_2] : memref<1x4x306x8xf32, #tpu.memory_space<vmem>>, vector<1x1x272x8xf32>
    %1 = vector.shape_cast %0 : vector<1x1x272x8xf32> to vector<272x8xf32>
    %c0_3 = arith.constant 0 : index
    %c0_4 = arith.constant 0 : index
    %c0_5 = arith.constant 0 : index
    %2 = vector.load %arg2[%c0_3, %c0_4, %c0_5] : memref<16x8x8xf32, #tpu.memory_space<vmem>>, vector<1x8x8xf32>
    %3 = vector.shape_cast %2 : vector<1x8x8xf32> to vector<8x8xf32>
    %cst = arith.constant dense<0.000000e+00> : vector<272x8xf32>
    %4 = tpu.matmul %1, %3, %cst {dimension_numbers = #tpu.dot_dimension_numbers<[1], [0], [0], [1], [0, 0, 1, 1], [], []>} : vector<272x8xf32>, vector<8x8xf32>, vector<272x8xf32> -> vector<272x8xf32>
    %c0_6 = arith.constant 0 : index
    %c1 = arith.constant 1 : index
    %c0_7 = arith.constant 0 : index
    %c0_8 = arith.constant 0 : index
    %5 = vector.load %arg1[%c0_6, %c1, %c0_7, %c0_8] : memref<1x4x306x8xf32, #tpu.memory_space<vmem>>, vector<1x1x272x8xf32>
    %6 = vector.shape_cast %5 : vector<1x1x272x8xf32> to vector<272x8xf32>
    %c1_9 = arith.constant 1 : index
    %c0_10 = arith.constant 0 : index
    %c0_11 = arith.constant 0 : index
    %7 = vector.load %arg2[%c1_9, %c0_10, %c0_11] : memref<16x8x8xf32, #tpu.memory_space<vmem>>, vector<1x8x8xf32>
    %8 = vector.shape_cast %7 : vector<1x8x8xf32> to vector<8x8xf32>
    %cst_12 = arith.constant dense<0.000000e+00> : vector<272x8xf32>
    %9 = tpu.matmul %6, %8, %cst_12 {dimension_numbers = #tpu.dot_dimension_numbers<[1], [0], [0], [1], [0, 0, 1, 1], [], []>} : vector<272x8xf32>, vector<8x8xf32>, vector<272x8xf32> -> vector<272x8xf32>
    %10 = arith.addf %4, %9 : vector<272x8xf32>
    %c0_13 = arith.constant 0 : index
    %c0_14 = arith.constant 0 : index
    %c1_15 = arith.constant 1 : index
    %c0_16 = arith.constant 0 : index
    %11 = vector.load %arg1[%c0_13, %c0_14, %c1_15, %c0_16] : memref<1x4x306x8xf32, #tpu.memory_space<vmem>>, vector<1x1x272x8xf32>
    %12 = vector.shape_cast %11 : vector<1x1x272x8xf32> to vector<272x8xf32>
    %c2 = arith.constant 2 : index
    %c0_17 = arith.constant 0 : index
    %c0_18 = arith.constant 0 : index
    %13 = vector.load %arg2[%c2, %c0_17, %c0_18] : memref<16x8x8xf32, #tpu.memory_space<vmem>>, vector<1x8x8xf32>
    %14 = vector.shape_cast %13 : vector<1x8x8xf32> to vector<8x8xf32>
    %cst_19 = arith.constant dense<0.000000e+00> : vector<272x8xf32>
    %15 = tpu.matmul %12, %14, %cst_19 {dimension_numbers = #tpu.dot_dimension_numbers<[1], [0], [0], [1], [0, 0, 1, 1], [], []>} : vector<272x8xf32>, vector<8x8xf32>, vector<272x8xf32> -> vector<272x8xf32>
    %16 = arith.addf %10, %15 : vector<272x8xf32>
    %c0_20 = arith.constant 0 : index
    %c1_21 = arith.constant 1 : index
    %c1_22 = arith.constant 1 : index
    %c0_23 = arith.constant 0 : index
    %17 = vector.load %arg1[%c0_20, %c1_21, %c1_22, %c0_23] : memref<1x4x306x8xf32, #tpu.memory_space<vmem>>, vector<1x1x272x8xf32>
    %18 = vector.shape_cast %17 : vector<1x1x272x8xf32> to vector<272x8xf32>
    %c3 = arith.constant 3 : index
    %c0_24 = arith.constant 0 : index
    %c0_25 = arith.constant 0 : index
    %19 = vector.load %arg2[%c3, %c0_24, %c0_25] : memref<16x8x8xf32, #tpu.memory_space<vmem>>, vector<1x8x8xf32>
    %20 = vector.shape_cast %19 : vector<1x8x8xf32> to vector<8x8xf32>
    %cst_26 = arith.constant dense<0.000000e+00> : vector<272x8xf32>
    %21 = tpu.matmul %18, %20, %cst_26 {dimension_numbers = #tpu.dot_dimension_numbers<[1], [0], [0], [1], [0, 0, 1, 1], [], []>} : vector<272x8xf32>, vector<8x8xf32>, vector<272x8xf32> -> vector<272x8xf32>
    %22 = arith.addf %16, %21 : vector<272x8xf32>
    %c0_27 = arith.constant 0 : index
    %c2_28 = arith.constant 2 : index
    %c0_29 = arith.constant 0 : index
    %c0_30 = arith.constant 0 : index
    %23 = vector.load %arg1[%c0_27, %c2_28, %c0_29, %c0_30] : memref<1x4x306x8xf32, #tpu.memory_space<vmem>>, vector<1x1x272x8xf32>
    %24 = vector.shape_cast %23 : vector<1x1x272x8xf32> to vector<272x8xf32>
    %c4 = arith.constant 4 : index
    %c0_31 = arith.constant 0 : index
    %c0_32 = arith.constant 0 : index
    %25 = vector.load %arg2[%c4, %c0_31, %c0_32] : memref<16x8x8xf32, #tpu.memory_space<vmem>>, vector<1x8x8xf32>
    %26 = vector.shape_cast %25 : vector<1x8x8xf32> to vector<8x8xf32>
    %cst_33 = arith.constant dense<0.000000e+00> : vector<272x8xf32>
    %27 = tpu.matmul %24, %26, %cst_33 {dimension_numbers = #tpu.dot_dimension_numbers<[1], [0], [0], [1], [0, 0, 1, 1], [], []>} : vector<272x8xf32>, vector<8x8xf32>, vector<272x8xf32> -> vector<272x8xf32>
    %28 = arith.addf %22, %27 : vector<272x8xf32>
    %c0_34 = arith.constant 0 : index
    %c3_35 = arith.constant 3 : index
    %c0_36 = arith.constant 0 : index
    %c0_37 = arith.constant 0 : index
    %29 = vector.load %arg1[%c0_34, %c3_35, %c0_36, %c0_37] : memref<1x4x306x8xf32, #tpu.memory_space<vmem>>, vector<1x1x272x8xf32>
    %30 = vector.shape_cast %29 : vector<1x1x272x8xf32> to vector<272x8xf32>
    %c5 = arith.constant 5 : index
    %c0_38 = arith.constant 0 : index
    %c0_39 = arith.constant 0 : index
    %31 = vector.load %arg2[%c5, %c0_38, %c0_39] : memref<16x8x8xf32, #tpu.memory_space<vmem>>, vector<1x8x8xf32>
    %32 = vector.shape_cast %31 : vector<1x8x8xf32> to vector<8x8xf32>
    %cst_40 = arith.constant dense<0.000000e+00> : vector<272x8xf32>
    %33 = tpu.matmul %30, %32, %cst_40 {dimension_numbers = #tpu.dot_dimension_numbers<[1], [0], [0], [1], [0, 0, 1, 1], [], []>} : vector<272x8xf32>, vector<8x8xf32>, vector<272x8xf32> -> vector<272x8xf32>
    %34 = arith.addf %28, %33 : vector<272x8xf32>
    %c0_41 = arith.constant 0 : index
    %c2_42 = arith.constant 2 : index
    %c1_43 = arith.constant 1 : index
    %c0_44 = arith.constant 0 : index
    %35 = vector.load %arg1[%c0_41, %c2_42, %c1_43, %c0_44] : memref<1x4x306x8xf32, #tpu.memory_space<vmem>>, vector<1x1x272x8xf32>
    %36 = vector.shape_cast %35 : vector<1x1x272x8xf32> to vector<272x8xf32>
    %c6 = arith.constant 6 : index
    %c0_45 = arith.constant 0 : index
    %c0_46 = arith.constant 0 : index
    %37 = vector.load %arg2[%c6, %c0_45, %c0_46] : memref<16x8x8xf32, #tpu.memory_space<vmem>>, vector<1x8x8xf32>
    %38 = vector.shape_cast %37 : vector<1x8x8xf32> to vector<8x8xf32>
    %cst_47 = arith.constant dense<0.000000e+00> : vector<272x8xf32>
    %39 = tpu.matmul %36, %38, %cst_47 {dimension_numbers = #tpu.dot_dimension_numbers<[1], [0], [0], [1], [0, 0, 1, 1], [], []>} : vector<272x8xf32>, vector<8x8xf32>, vector<272x8xf32> -> vector<272x8xf32>
    %40 = arith.addf %34, %39 : vector<272x8xf32>
    %c0_48 = arith.constant 0 : index
    %c3_49 = arith.constant 3 : index
    %c1_50 = arith.constant 1 : index
    %c0_51 = arith.constant 0 : index
    %41 = vector.load %arg1[%c0_48, %c3_49, %c1_50, %c0_51] : memref<1x4x306x8xf32, #tpu.memory_space<vmem>>, vector<1x1x272x8xf32>
    %42 = vector.shape_cast %41 : vector<1x1x272x8xf32> to vector<272x8xf32>
    %c7 = arith.constant 7 : index
    %c0_52 = arith.constant 0 : index
    %c0_53 = arith.constant 0 : index
    %43 = vector.load %arg2[%c7, %c0_52, %c0_53] : memref<16x8x8xf32, #tpu.memory_space<vmem>>, vector<1x8x8xf32>
    %44 = vector.shape_cast %43 : vector<1x8x8xf32> to vector<8x8xf32>
    %cst_54 = arith.constant dense<0.000000e+00> : vector<272x8xf32>
    %45 = tpu.matmul %42, %44, %cst_54 {dimension_numbers = #tpu.dot_dimension_numbers<[1], [0], [0], [1], [0, 0, 1, 1], [], []>} : vector<272x8xf32>, vector<8x8xf32>, vector<272x8xf32> -> vector<272x8xf32>
    %46 = arith.addf %40, %45 : vector<272x8xf32>
    %c0_55 = arith.constant 0 : index
    %c0_56 = arith.constant 0 : index
    %c17 = arith.constant 17 : index
    %c0_57 = arith.constant 0 : index
    %47 = vector.load %arg1[%c0_55, %c0_56, %c17, %c0_57] : memref<1x4x306x8xf32, #tpu.memory_space<vmem>>, vector<1x1x272x8xf32>
    %48 = vector.shape_cast %47 : vector<1x1x272x8xf32> to vector<272x8xf32>
    %c8 = arith.constant 8 : index
    %c0_58 = arith.constant 0 : index
    %c0_59 = arith.constant 0 : index
    %49 = vector.load %arg2[%c8, %c0_58, %c0_59] : memref<16x8x8xf32, #tpu.memory_space<vmem>>, vector<1x8x8xf32>
    %50 = vector.shape_cast %49 : vector<1x8x8xf32> to vector<8x8xf32>
    %cst_60 = arith.constant dense<0.000000e+00> : vector<272x8xf32>
    %51 = tpu.matmul %48, %50, %cst_60 {dimension_numbers = #tpu.dot_dimension_numbers<[1], [0], [0], [1], [0, 0, 1, 1], [], []>} : vector<272x8xf32>, vector<8x8xf32>, vector<272x8xf32> -> vector<272x8xf32>
    %52 = arith.addf %46, %51 : vector<272x8xf32>
    %c0_61 = arith.constant 0 : index
    %c1_62 = arith.constant 1 : index
    %c17_63 = arith.constant 17 : index
    %c0_64 = arith.constant 0 : index
    %53 = vector.load %arg1[%c0_61, %c1_62, %c17_63, %c0_64] : memref<1x4x306x8xf32, #tpu.memory_space<vmem>>, vector<1x1x272x8xf32>
    %54 = vector.shape_cast %53 : vector<1x1x272x8xf32> to vector<272x8xf32>
    %c9 = arith.constant 9 : index
    %c0_65 = arith.constant 0 : index
    %c0_66 = arith.constant 0 : index
    %55 = vector.load %arg2[%c9, %c0_65, %c0_66] : memref<16x8x8xf32, #tpu.memory_space<vmem>>, vector<1x8x8xf32>
    %56 = vector.shape_cast %55 : vector<1x8x8xf32> to vector<8x8xf32>
    %cst_67 = arith.constant dense<0.000000e+00> : vector<272x8xf32>
    %57 = tpu.matmul %54, %56, %cst_67 {dimension_numbers = #tpu.dot_dimension_numbers<[1], [0], [0], [1], [0, 0, 1, 1], [], []>} : vector<272x8xf32>, vector<8x8xf32>, vector<272x8xf32> -> vector<272x8xf32>
    %58 = arith.addf %52, %57 : vector<272x8xf32>
    %c0_68 = arith.constant 0 : index
    %c0_69 = arith.constant 0 : index
    %c18 = arith.constant 18 : index
    %c0_70 = arith.constant 0 : index
    %59 = vector.load %arg1[%c0_68, %c0_69, %c18, %c0_70] : memref<1x4x306x8xf32, #tpu.memory_space<vmem>>, vector<1x1x272x8xf32>
    %60 = vector.shape_cast %59 : vector<1x1x272x8xf32> to vector<272x8xf32>
    %c10 = arith.constant 10 : index
    %c0_71 = arith.constant 0 : index
    %c0_72 = arith.constant 0 : index
    %61 = vector.load %arg2[%c10, %c0_71, %c0_72] : memref<16x8x8xf32, #tpu.memory_space<vmem>>, vector<1x8x8xf32>
    %62 = vector.shape_cast %61 : vector<1x8x8xf32> to vector<8x8xf32>
    %cst_73 = arith.constant dense<0.000000e+00> : vector<272x8xf32>
    %63 = tpu.matmul %60, %62, %cst_73 {dimension_numbers = #tpu.dot_dimension_numbers<[1], [0], [0], [1], [0, 0, 1, 1], [], []>} : vector<272x8xf32>, vector<8x8xf32>, vector<272x8xf32> -> vector<272x8xf32>
    %64 = arith.addf %58, %63 : vector<272x8xf32>
    %c0_74 = arith.constant 0 : index
    %c1_75 = arith.constant 1 : index
    %c18_76 = arith.constant 18 : index
    %c0_77 = arith.constant 0 : index
    %65 = vector.load %arg1[%c0_74, %c1_75, %c18_76, %c0_77] : memref<1x4x306x8xf32, #tpu.memory_space<vmem>>, vector<1x1x272x8xf32>
    %66 = vector.shape_cast %65 : vector<1x1x272x8xf32> to vector<272x8xf32>
    %c11 = arith.constant 11 : index
    %c0_78 = arith.constant 0 : index
    %c0_79 = arith.constant 0 : index
    %67 = vector.load %arg2[%c11, %c0_78, %c0_79] : memref<16x8x8xf32, #tpu.memory_space<vmem>>, vector<1x8x8xf32>
    %68 = vector.shape_cast %67 : vector<1x8x8xf32> to vector<8x8xf32>
    %cst_80 = arith.constant dense<0.000000e+00> : vector<272x8xf32>
    %69 = tpu.matmul %66, %68, %cst_80 {dimension_numbers = #tpu.dot_dimension_numbers<[1], [0], [0], [1], [0, 0, 1, 1], [], []>} : vector<272x8xf32>, vector<8x8xf32>, vector<272x8xf32> -> vector<272x8xf32>
    %70 = arith.addf %64, %69 : vector<272x8xf32>
    %c0_81 = arith.constant 0 : index
    %c2_82 = arith.constant 2 : index
    %c17_83 = arith.constant 17 : index
    %c0_84 = arith.constant 0 : index
    %71 = vector.load %arg1[%c0_81, %c2_82, %c17_83, %c0_84] : memref<1x4x306x8xf32, #tpu.memory_space<vmem>>, vector<1x1x272x8xf32>
    %72 = vector.shape_cast %71 : vector<1x1x272x8xf32> to vector<272x8xf32>
    %c12 = arith.constant 12 : index
    %c0_85 = arith.constant 0 : index
    %c0_86 = arith.constant 0 : index
    %73 = vector.load %arg2[%c12, %c0_85, %c0_86] : memref<16x8x8xf32, #tpu.memory_space<vmem>>, vector<1x8x8xf32>
    %74 = vector.shape_cast %73 : vector<1x8x8xf32> to vector<8x8xf32>
    %cst_87 = arith.constant dense<0.000000e+00> : vector<272x8xf32>
    %75 = tpu.matmul %72, %74, %cst_87 {dimension_numbers = #tpu.dot_dimension_numbers<[1], [0], [0], [1], [0, 0, 1, 1], [], []>} : vector<272x8xf32>, vector<8x8xf32>, vector<272x8xf32> -> vector<272x8xf32>
    %76 = arith.addf %70, %75 : vector<272x8xf32>
    %c0_88 = arith.constant 0 : index
    %c3_89 = arith.constant 3 : index
    %c17_90 = arith.constant 17 : index
    %c0_91 = arith.constant 0 : index
    %77 = vector.load %arg1[%c0_88, %c3_89, %c17_90, %c0_91] : memref<1x4x306x8xf32, #tpu.memory_space<vmem>>, vector<1x1x272x8xf32>
    %78 = vector.shape_cast %77 : vector<1x1x272x8xf32> to vector<272x8xf32>
    %c13 = arith.constant 13 : index
    %c0_92 = arith.constant 0 : index
    %c0_93 = arith.constant 0 : index
    %79 = vector.load %arg2[%c13, %c0_92, %c0_93] : memref<16x8x8xf32, #tpu.memory_space<vmem>>, vector<1x8x8xf32>
    %80 = vector.shape_cast %79 : vector<1x8x8xf32> to vector<8x8xf32>
    %cst_94 = arith.constant dense<0.000000e+00> : vector<272x8xf32>
    %81 = tpu.matmul %78, %80, %cst_94 {dimension_numbers = #tpu.dot_dimension_numbers<[1], [0], [0], [1], [0, 0, 1, 1], [], []>} : vector<272x8xf32>, vector<8x8xf32>, vector<272x8xf32> -> vector<272x8xf32>
    %82 = arith.addf %76, %81 : vector<272x8xf32>
    %c0_95 = arith.constant 0 : index
    %c2_96 = arith.constant 2 : index
    %c18_97 = arith.constant 18 : index
    %c0_98 = arith.constant 0 : index
    %83 = vector.load %arg1[%c0_95, %c2_96, %c18_97, %c0_98] : memref<1x4x306x8xf32, #tpu.memory_space<vmem>>, vector<1x1x272x8xf32>
    %84 = vector.shape_cast %83 : vector<1x1x272x8xf32> to vector<272x8xf32>
    %c14 = arith.constant 14 : index
    %c0_99 = arith.constant 0 : index
    %c0_100 = arith.constant 0 : index
    %85 = vector.load %arg2[%c14, %c0_99, %c0_100] : memref<16x8x8xf32, #tpu.memory_space<vmem>>, vector<1x8x8xf32>
    %86 = vector.shape_cast %85 : vector<1x8x8xf32> to vector<8x8xf32>
    %cst_101 = arith.constant dense<0.000000e+00> : vector<272x8xf32>
    %87 = tpu.matmul %84, %86, %cst_101 {dimension_numbers = #tpu.dot_dimension_numbers<[1], [0], [0], [1], [0, 0, 1, 1], [], []>} : vector<272x8xf32>, vector<8x8xf32>, vector<272x8xf32> -> vector<272x8xf32>
    %88 = arith.addf %82, %87 : vector<272x8xf32>
    %c0_102 = arith.constant 0 : index
    %c3_103 = arith.constant 3 : index
    %c18_104 = arith.constant 18 : index
    %c0_105 = arith.constant 0 : index
    %89 = vector.load %arg1[%c0_102, %c3_103, %c18_104, %c0_105] : memref<1x4x306x8xf32, #tpu.memory_space<vmem>>, vector<1x1x272x8xf32>
    %90 = vector.shape_cast %89 : vector<1x1x272x8xf32> to vector<272x8xf32>
    %c15 = arith.constant 15 : index
    %c0_106 = arith.constant 0 : index
    %c0_107 = arith.constant 0 : index
    %91 = vector.load %arg2[%c15, %c0_106, %c0_107] : memref<16x8x8xf32, #tpu.memory_space<vmem>>, vector<1x8x8xf32>
    %92 = vector.shape_cast %91 : vector<1x8x8xf32> to vector<8x8xf32>
    %cst_108 = arith.constant dense<0.000000e+00> : vector<272x8xf32>
    %93 = tpu.matmul %90, %92, %cst_108 {dimension_numbers = #tpu.dot_dimension_numbers<[1], [0], [0], [1], [0, 0, 1, 1], [], []>} : vector<272x8xf32>, vector<8x8xf32>, vector<272x8xf32> -> vector<272x8xf32>
    %94 = arith.addf %88, %93 : vector<272x8xf32>
    %c0_109 = arith.constant 0 : index
    %c0_110 = arith.constant 0 : index
    %95 = vector.load %arg3[%c0_109, %c0_110] : memref<1x8xf32, #tpu.memory_space<vmem>>, vector<1x8xf32>
    %96 = vector.broadcast %95 : vector<1x8xf32> to vector<272x8xf32>
    %97 = arith.addf %94, %96 : vector<272x8xf32>
    %cst_111 = arith.constant 0.000000e+00 : f32
    %98 = vector.broadcast %cst_111 : f32 to vector<272x8xf32>
    %99 = arith.cmpf oge, %97, %98 : vector<272x8xf32>
    %cst_112 = arith.constant 2.000000e-01 : f32
    %100 = vector.broadcast %cst_112 : f32 to vector<272x8xf32>
    %101 = arith.mulf %100, %97 : vector<272x8xf32>
    %102 = arith.select %99, %97, %101 : vector<272x8xi1>, vector<272x8xf32>
    %c0_113 = arith.constant 0 : index
    %c0_114 = arith.constant 0 : index
    %c0_115 = arith.constant 0 : index
    %103 = vector.load %arg4[%c0_113, %c0_114, %c0_115] : memref<1x272x8xf32, #tpu.memory_space<vmem>>, vector<1x272x8xf32>
    %104 = vector.shape_cast %103 : vector<1x272x8xf32> to vector<272x8xf32>
    %105 = vector.shape_cast %102 : vector<272x8xf32> to vector<1x272x8xf32>
    tpu.vector_store %arg4[%c0_113, %c0_114, %c0_115], %105 {strides = array<i32>} : memref<1x272x8xf32, #tpu.memory_space<vmem>>, vector<1x272x8xf32>,
    return
  }
  func.func @transform_0(%arg0: i32) -> (i32, i32, i32, i32) {
    %c0_i32 = arith.constant 0 : i32
    %c0_i32_0 = arith.constant 0 : i32
    %c0_i32_1 = arith.constant 0 : i32
    %c0_i32_2 = arith.constant 0 : i32
    return %arg0, %c0_i32, %c0_i32_0, %c0_i32_1 : i32, i32, i32, i32
  }
  func.func @transform_1(%arg0: i32) -> (i32, i32, i32) {
    %c0_i32 = arith.constant 0 : i32
    %c0_i32_0 = arith.constant 0 : i32
    %c0_i32_1 = arith.constant 0 : i32
    %c0_i32_2 = arith.constant 0 : i32
    return %c0_i32, %c0_i32_0, %c0_i32_1 : i32, i32, i32
  }
  func.func @transform_2(%arg0: i32) -> (i32, i32) {
    %c0_i32 = arith.constant 0 : i32
    %c0_i32_0 = arith.constant 0 : i32
    %c0_i32_1 = arith.constant 0 : i32
    return %c0_i32, %c0_i32_0 : i32, i32
  }
  func.func @transform_3(%arg0: i32) -> (i32, i32, i32) {
    %c0_i32 = arith.constant 0 : i32
    %c0_i32_0 = arith.constant 0 : i32
    %c0_i32_1 = arith.constant 0 : i32
    return %arg0, %c0_i32, %c0_i32_0 : i32, i32, i32
  }
}

module attributes {stable_mosaic.version = 11 : i64} {
  func.func @_conv_fused_kernel(%arg0: i32, %arg1: memref<1x4x90x8xf32, #tpu.memory_space<vmem>>, %arg2: memref<16x8x16xf32, #tpu.memory_space<vmem>>, %arg3: memref<1x16xf32, #tpu.memory_space<vmem>>, %arg4: memref<1x72x16xf32, #tpu.memory_space<vmem>>) attributes {dimension_semantics = [#tpu.dimension_semantics<parallel>], iteration_bounds = array<i64: 2>, scalar_prefetch = 0 : i64, scratch_operands = 0 : i64, tpu.core_type = #tpu.core_type<tc>, window_params = [{transform_indices = @transform_0, window_bounds = array<i64: 1, 4, 90, 8>}, {pipeline_mode = #tpu.pipeline_mode<synchronous>, transform_indices = @transform_1, window_bounds = array<i64: 16, 8, 16>}, {pipeline_mode = #tpu.pipeline_mode<synchronous>, transform_indices = @transform_2, window_bounds = array<i64: 1, 16>}, {transform_indices = @transform_3, window_bounds = array<i64: 1, 72, 16>}]} {
    %c0 = arith.constant 0 : index
    %c0_0 = arith.constant 0 : index
    %c0_1 = arith.constant 0 : index
    %c0_2 = arith.constant 0 : index
    %0 = vector.load %arg1[%c0, %c0_0, %c0_1, %c0_2] : memref<1x4x90x8xf32, #tpu.memory_space<vmem>>, vector<1x1x72x8xf32>
    %1 = vector.shape_cast %0 : vector<1x1x72x8xf32> to vector<72x8xf32>
    %c0_3 = arith.constant 0 : index
    %c0_4 = arith.constant 0 : index
    %c0_5 = arith.constant 0 : index
    %2 = vector.load %arg2[%c0_3, %c0_4, %c0_5] : memref<16x8x16xf32, #tpu.memory_space<vmem>>, vector<1x8x16xf32>
    %3 = vector.shape_cast %2 : vector<1x8x16xf32> to vector<8x16xf32>
    %cst = arith.constant dense<0.000000e+00> : vector<72x16xf32>
    %4 = tpu.matmul %1, %3, %cst {dimension_numbers = #tpu.dot_dimension_numbers<[1], [0], [0], [1], [0, 0, 1, 1], [], []>} : vector<72x8xf32>, vector<8x16xf32>, vector<72x16xf32> -> vector<72x16xf32>
    %c0_6 = arith.constant 0 : index
    %c1 = arith.constant 1 : index
    %c0_7 = arith.constant 0 : index
    %c0_8 = arith.constant 0 : index
    %5 = vector.load %arg1[%c0_6, %c1, %c0_7, %c0_8] : memref<1x4x90x8xf32, #tpu.memory_space<vmem>>, vector<1x1x72x8xf32>
    %6 = vector.shape_cast %5 : vector<1x1x72x8xf32> to vector<72x8xf32>
    %c1_9 = arith.constant 1 : index
    %c0_10 = arith.constant 0 : index
    %c0_11 = arith.constant 0 : index
    %7 = vector.load %arg2[%c1_9, %c0_10, %c0_11] : memref<16x8x16xf32, #tpu.memory_space<vmem>>, vector<1x8x16xf32>
    %8 = vector.shape_cast %7 : vector<1x8x16xf32> to vector<8x16xf32>
    %cst_12 = arith.constant dense<0.000000e+00> : vector<72x16xf32>
    %9 = tpu.matmul %6, %8, %cst_12 {dimension_numbers = #tpu.dot_dimension_numbers<[1], [0], [0], [1], [0, 0, 1, 1], [], []>} : vector<72x8xf32>, vector<8x16xf32>, vector<72x16xf32> -> vector<72x16xf32>
    %10 = arith.addf %4, %9 : vector<72x16xf32>
    %c0_13 = arith.constant 0 : index
    %c0_14 = arith.constant 0 : index
    %c1_15 = arith.constant 1 : index
    %c0_16 = arith.constant 0 : index
    %11 = vector.load %arg1[%c0_13, %c0_14, %c1_15, %c0_16] : memref<1x4x90x8xf32, #tpu.memory_space<vmem>>, vector<1x1x72x8xf32>
    %12 = vector.shape_cast %11 : vector<1x1x72x8xf32> to vector<72x8xf32>
    %c2 = arith.constant 2 : index
    %c0_17 = arith.constant 0 : index
    %c0_18 = arith.constant 0 : index
    %13 = vector.load %arg2[%c2, %c0_17, %c0_18] : memref<16x8x16xf32, #tpu.memory_space<vmem>>, vector<1x8x16xf32>
    %14 = vector.shape_cast %13 : vector<1x8x16xf32> to vector<8x16xf32>
    %cst_19 = arith.constant dense<0.000000e+00> : vector<72x16xf32>
    %15 = tpu.matmul %12, %14, %cst_19 {dimension_numbers = #tpu.dot_dimension_numbers<[1], [0], [0], [1], [0, 0, 1, 1], [], []>} : vector<72x8xf32>, vector<8x16xf32>, vector<72x16xf32> -> vector<72x16xf32>
    %16 = arith.addf %10, %15 : vector<72x16xf32>
    %c0_20 = arith.constant 0 : index
    %c1_21 = arith.constant 1 : index
    %c1_22 = arith.constant 1 : index
    %c0_23 = arith.constant 0 : index
    %17 = vector.load %arg1[%c0_20, %c1_21, %c1_22, %c0_23] : memref<1x4x90x8xf32, #tpu.memory_space<vmem>>, vector<1x1x72x8xf32>
    %18 = vector.shape_cast %17 : vector<1x1x72x8xf32> to vector<72x8xf32>
    %c3 = arith.constant 3 : index
    %c0_24 = arith.constant 0 : index
    %c0_25 = arith.constant 0 : index
    %19 = vector.load %arg2[%c3, %c0_24, %c0_25] : memref<16x8x16xf32, #tpu.memory_space<vmem>>, vector<1x8x16xf32>
    %20 = vector.shape_cast %19 : vector<1x8x16xf32> to vector<8x16xf32>
    %cst_26 = arith.constant dense<0.000000e+00> : vector<72x16xf32>
    %21 = tpu.matmul %18, %20, %cst_26 {dimension_numbers = #tpu.dot_dimension_numbers<[1], [0], [0], [1], [0, 0, 1, 1], [], []>} : vector<72x8xf32>, vector<8x16xf32>, vector<72x16xf32> -> vector<72x16xf32>
    %22 = arith.addf %16, %21 : vector<72x16xf32>
    %c0_27 = arith.constant 0 : index
    %c2_28 = arith.constant 2 : index
    %c0_29 = arith.constant 0 : index
    %c0_30 = arith.constant 0 : index
    %23 = vector.load %arg1[%c0_27, %c2_28, %c0_29, %c0_30] : memref<1x4x90x8xf32, #tpu.memory_space<vmem>>, vector<1x1x72x8xf32>
    %24 = vector.shape_cast %23 : vector<1x1x72x8xf32> to vector<72x8xf32>
    %c4 = arith.constant 4 : index
    %c0_31 = arith.constant 0 : index
    %c0_32 = arith.constant 0 : index
    %25 = vector.load %arg2[%c4, %c0_31, %c0_32] : memref<16x8x16xf32, #tpu.memory_space<vmem>>, vector<1x8x16xf32>
    %26 = vector.shape_cast %25 : vector<1x8x16xf32> to vector<8x16xf32>
    %cst_33 = arith.constant dense<0.000000e+00> : vector<72x16xf32>
    %27 = tpu.matmul %24, %26, %cst_33 {dimension_numbers = #tpu.dot_dimension_numbers<[1], [0], [0], [1], [0, 0, 1, 1], [], []>} : vector<72x8xf32>, vector<8x16xf32>, vector<72x16xf32> -> vector<72x16xf32>
    %28 = arith.addf %22, %27 : vector<72x16xf32>
    %c0_34 = arith.constant 0 : index
    %c3_35 = arith.constant 3 : index
    %c0_36 = arith.constant 0 : index
    %c0_37 = arith.constant 0 : index
    %29 = vector.load %arg1[%c0_34, %c3_35, %c0_36, %c0_37] : memref<1x4x90x8xf32, #tpu.memory_space<vmem>>, vector<1x1x72x8xf32>
    %30 = vector.shape_cast %29 : vector<1x1x72x8xf32> to vector<72x8xf32>
    %c5 = arith.constant 5 : index
    %c0_38 = arith.constant 0 : index
    %c0_39 = arith.constant 0 : index
    %31 = vector.load %arg2[%c5, %c0_38, %c0_39] : memref<16x8x16xf32, #tpu.memory_space<vmem>>, vector<1x8x16xf32>
    %32 = vector.shape_cast %31 : vector<1x8x16xf32> to vector<8x16xf32>
    %cst_40 = arith.constant dense<0.000000e+00> : vector<72x16xf32>
    %33 = tpu.matmul %30, %32, %cst_40 {dimension_numbers = #tpu.dot_dimension_numbers<[1], [0], [0], [1], [0, 0, 1, 1], [], []>} : vector<72x8xf32>, vector<8x16xf32>, vector<72x16xf32> -> vector<72x16xf32>
    %34 = arith.addf %28, %33 : vector<72x16xf32>
    %c0_41 = arith.constant 0 : index
    %c2_42 = arith.constant 2 : index
    %c1_43 = arith.constant 1 : index
    %c0_44 = arith.constant 0 : index
    %35 = vector.load %arg1[%c0_41, %c2_42, %c1_43, %c0_44] : memref<1x4x90x8xf32, #tpu.memory_space<vmem>>, vector<1x1x72x8xf32>
    %36 = vector.shape_cast %35 : vector<1x1x72x8xf32> to vector<72x8xf32>
    %c6 = arith.constant 6 : index
    %c0_45 = arith.constant 0 : index
    %c0_46 = arith.constant 0 : index
    %37 = vector.load %arg2[%c6, %c0_45, %c0_46] : memref<16x8x16xf32, #tpu.memory_space<vmem>>, vector<1x8x16xf32>
    %38 = vector.shape_cast %37 : vector<1x8x16xf32> to vector<8x16xf32>
    %cst_47 = arith.constant dense<0.000000e+00> : vector<72x16xf32>
    %39 = tpu.matmul %36, %38, %cst_47 {dimension_numbers = #tpu.dot_dimension_numbers<[1], [0], [0], [1], [0, 0, 1, 1], [], []>} : vector<72x8xf32>, vector<8x16xf32>, vector<72x16xf32> -> vector<72x16xf32>
    %40 = arith.addf %34, %39 : vector<72x16xf32>
    %c0_48 = arith.constant 0 : index
    %c3_49 = arith.constant 3 : index
    %c1_50 = arith.constant 1 : index
    %c0_51 = arith.constant 0 : index
    %41 = vector.load %arg1[%c0_48, %c3_49, %c1_50, %c0_51] : memref<1x4x90x8xf32, #tpu.memory_space<vmem>>, vector<1x1x72x8xf32>
    %42 = vector.shape_cast %41 : vector<1x1x72x8xf32> to vector<72x8xf32>
    %c7 = arith.constant 7 : index
    %c0_52 = arith.constant 0 : index
    %c0_53 = arith.constant 0 : index
    %43 = vector.load %arg2[%c7, %c0_52, %c0_53] : memref<16x8x16xf32, #tpu.memory_space<vmem>>, vector<1x8x16xf32>
    %44 = vector.shape_cast %43 : vector<1x8x16xf32> to vector<8x16xf32>
    %cst_54 = arith.constant dense<0.000000e+00> : vector<72x16xf32>
    %45 = tpu.matmul %42, %44, %cst_54 {dimension_numbers = #tpu.dot_dimension_numbers<[1], [0], [0], [1], [0, 0, 1, 1], [], []>} : vector<72x8xf32>, vector<8x16xf32>, vector<72x16xf32> -> vector<72x16xf32>
    %46 = arith.addf %40, %45 : vector<72x16xf32>
    %c0_55 = arith.constant 0 : index
    %c0_56 = arith.constant 0 : index
    %c9 = arith.constant 9 : index
    %c0_57 = arith.constant 0 : index
    %47 = vector.load %arg1[%c0_55, %c0_56, %c9, %c0_57] : memref<1x4x90x8xf32, #tpu.memory_space<vmem>>, vector<1x1x72x8xf32>
    %48 = vector.shape_cast %47 : vector<1x1x72x8xf32> to vector<72x8xf32>
    %c8 = arith.constant 8 : index
    %c0_58 = arith.constant 0 : index
    %c0_59 = arith.constant 0 : index
    %49 = vector.load %arg2[%c8, %c0_58, %c0_59] : memref<16x8x16xf32, #tpu.memory_space<vmem>>, vector<1x8x16xf32>
    %50 = vector.shape_cast %49 : vector<1x8x16xf32> to vector<8x16xf32>
    %cst_60 = arith.constant dense<0.000000e+00> : vector<72x16xf32>
    %51 = tpu.matmul %48, %50, %cst_60 {dimension_numbers = #tpu.dot_dimension_numbers<[1], [0], [0], [1], [0, 0, 1, 1], [], []>} : vector<72x8xf32>, vector<8x16xf32>, vector<72x16xf32> -> vector<72x16xf32>
    %52 = arith.addf %46, %51 : vector<72x16xf32>
    %c0_61 = arith.constant 0 : index
    %c1_62 = arith.constant 1 : index
    %c9_63 = arith.constant 9 : index
    %c0_64 = arith.constant 0 : index
    %53 = vector.load %arg1[%c0_61, %c1_62, %c9_63, %c0_64] : memref<1x4x90x8xf32, #tpu.memory_space<vmem>>, vector<1x1x72x8xf32>
    %54 = vector.shape_cast %53 : vector<1x1x72x8xf32> to vector<72x8xf32>
    %c9_65 = arith.constant 9 : index
    %c0_66 = arith.constant 0 : index
    %c0_67 = arith.constant 0 : index
    %55 = vector.load %arg2[%c9_65, %c0_66, %c0_67] : memref<16x8x16xf32, #tpu.memory_space<vmem>>, vector<1x8x16xf32>
    %56 = vector.shape_cast %55 : vector<1x8x16xf32> to vector<8x16xf32>
    %cst_68 = arith.constant dense<0.000000e+00> : vector<72x16xf32>
    %57 = tpu.matmul %54, %56, %cst_68 {dimension_numbers = #tpu.dot_dimension_numbers<[1], [0], [0], [1], [0, 0, 1, 1], [], []>} : vector<72x8xf32>, vector<8x16xf32>, vector<72x16xf32> -> vector<72x16xf32>
    %58 = arith.addf %52, %57 : vector<72x16xf32>
    %c0_69 = arith.constant 0 : index
    %c0_70 = arith.constant 0 : index
    %c10 = arith.constant 10 : index
    %c0_71 = arith.constant 0 : index
    %59 = vector.load %arg1[%c0_69, %c0_70, %c10, %c0_71] : memref<1x4x90x8xf32, #tpu.memory_space<vmem>>, vector<1x1x72x8xf32>
    %60 = vector.shape_cast %59 : vector<1x1x72x8xf32> to vector<72x8xf32>
    %c10_72 = arith.constant 10 : index
    %c0_73 = arith.constant 0 : index
    %c0_74 = arith.constant 0 : index
    %61 = vector.load %arg2[%c10_72, %c0_73, %c0_74] : memref<16x8x16xf32, #tpu.memory_space<vmem>>, vector<1x8x16xf32>
    %62 = vector.shape_cast %61 : vector<1x8x16xf32> to vector<8x16xf32>
    %cst_75 = arith.constant dense<0.000000e+00> : vector<72x16xf32>
    %63 = tpu.matmul %60, %62, %cst_75 {dimension_numbers = #tpu.dot_dimension_numbers<[1], [0], [0], [1], [0, 0, 1, 1], [], []>} : vector<72x8xf32>, vector<8x16xf32>, vector<72x16xf32> -> vector<72x16xf32>
    %64 = arith.addf %58, %63 : vector<72x16xf32>
    %c0_76 = arith.constant 0 : index
    %c1_77 = arith.constant 1 : index
    %c10_78 = arith.constant 10 : index
    %c0_79 = arith.constant 0 : index
    %65 = vector.load %arg1[%c0_76, %c1_77, %c10_78, %c0_79] : memref<1x4x90x8xf32, #tpu.memory_space<vmem>>, vector<1x1x72x8xf32>
    %66 = vector.shape_cast %65 : vector<1x1x72x8xf32> to vector<72x8xf32>
    %c11 = arith.constant 11 : index
    %c0_80 = arith.constant 0 : index
    %c0_81 = arith.constant 0 : index
    %67 = vector.load %arg2[%c11, %c0_80, %c0_81] : memref<16x8x16xf32, #tpu.memory_space<vmem>>, vector<1x8x16xf32>
    %68 = vector.shape_cast %67 : vector<1x8x16xf32> to vector<8x16xf32>
    %cst_82 = arith.constant dense<0.000000e+00> : vector<72x16xf32>
    %69 = tpu.matmul %66, %68, %cst_82 {dimension_numbers = #tpu.dot_dimension_numbers<[1], [0], [0], [1], [0, 0, 1, 1], [], []>} : vector<72x8xf32>, vector<8x16xf32>, vector<72x16xf32> -> vector<72x16xf32>
    %70 = arith.addf %64, %69 : vector<72x16xf32>
    %c0_83 = arith.constant 0 : index
    %c2_84 = arith.constant 2 : index
    %c9_85 = arith.constant 9 : index
    %c0_86 = arith.constant 0 : index
    %71 = vector.load %arg1[%c0_83, %c2_84, %c9_85, %c0_86] : memref<1x4x90x8xf32, #tpu.memory_space<vmem>>, vector<1x1x72x8xf32>
    %72 = vector.shape_cast %71 : vector<1x1x72x8xf32> to vector<72x8xf32>
    %c12 = arith.constant 12 : index
    %c0_87 = arith.constant 0 : index
    %c0_88 = arith.constant 0 : index
    %73 = vector.load %arg2[%c12, %c0_87, %c0_88] : memref<16x8x16xf32, #tpu.memory_space<vmem>>, vector<1x8x16xf32>
    %74 = vector.shape_cast %73 : vector<1x8x16xf32> to vector<8x16xf32>
    %cst_89 = arith.constant dense<0.000000e+00> : vector<72x16xf32>
    %75 = tpu.matmul %72, %74, %cst_89 {dimension_numbers = #tpu.dot_dimension_numbers<[1], [0], [0], [1], [0, 0, 1, 1], [], []>} : vector<72x8xf32>, vector<8x16xf32>, vector<72x16xf32> -> vector<72x16xf32>
    %76 = arith.addf %70, %75 : vector<72x16xf32>
    %c0_90 = arith.constant 0 : index
    %c3_91 = arith.constant 3 : index
    %c9_92 = arith.constant 9 : index
    %c0_93 = arith.constant 0 : index
    %77 = vector.load %arg1[%c0_90, %c3_91, %c9_92, %c0_93] : memref<1x4x90x8xf32, #tpu.memory_space<vmem>>, vector<1x1x72x8xf32>
    %78 = vector.shape_cast %77 : vector<1x1x72x8xf32> to vector<72x8xf32>
    %c13 = arith.constant 13 : index
    %c0_94 = arith.constant 0 : index
    %c0_95 = arith.constant 0 : index
    %79 = vector.load %arg2[%c13, %c0_94, %c0_95] : memref<16x8x16xf32, #tpu.memory_space<vmem>>, vector<1x8x16xf32>
    %80 = vector.shape_cast %79 : vector<1x8x16xf32> to vector<8x16xf32>
    %cst_96 = arith.constant dense<0.000000e+00> : vector<72x16xf32>
    %81 = tpu.matmul %78, %80, %cst_96 {dimension_numbers = #tpu.dot_dimension_numbers<[1], [0], [0], [1], [0, 0, 1, 1], [], []>} : vector<72x8xf32>, vector<8x16xf32>, vector<72x16xf32> -> vector<72x16xf32>
    %82 = arith.addf %76, %81 : vector<72x16xf32>
    %c0_97 = arith.constant 0 : index
    %c2_98 = arith.constant 2 : index
    %c10_99 = arith.constant 10 : index
    %c0_100 = arith.constant 0 : index
    %83 = vector.load %arg1[%c0_97, %c2_98, %c10_99, %c0_100] : memref<1x4x90x8xf32, #tpu.memory_space<vmem>>, vector<1x1x72x8xf32>
    %84 = vector.shape_cast %83 : vector<1x1x72x8xf32> to vector<72x8xf32>
    %c14 = arith.constant 14 : index
    %c0_101 = arith.constant 0 : index
    %c0_102 = arith.constant 0 : index
    %85 = vector.load %arg2[%c14, %c0_101, %c0_102] : memref<16x8x16xf32, #tpu.memory_space<vmem>>, vector<1x8x16xf32>
    %86 = vector.shape_cast %85 : vector<1x8x16xf32> to vector<8x16xf32>
    %cst_103 = arith.constant dense<0.000000e+00> : vector<72x16xf32>
    %87 = tpu.matmul %84, %86, %cst_103 {dimension_numbers = #tpu.dot_dimension_numbers<[1], [0], [0], [1], [0, 0, 1, 1], [], []>} : vector<72x8xf32>, vector<8x16xf32>, vector<72x16xf32> -> vector<72x16xf32>
    %88 = arith.addf %82, %87 : vector<72x16xf32>
    %c0_104 = arith.constant 0 : index
    %c3_105 = arith.constant 3 : index
    %c10_106 = arith.constant 10 : index
    %c0_107 = arith.constant 0 : index
    %89 = vector.load %arg1[%c0_104, %c3_105, %c10_106, %c0_107] : memref<1x4x90x8xf32, #tpu.memory_space<vmem>>, vector<1x1x72x8xf32>
    %90 = vector.shape_cast %89 : vector<1x1x72x8xf32> to vector<72x8xf32>
    %c15 = arith.constant 15 : index
    %c0_108 = arith.constant 0 : index
    %c0_109 = arith.constant 0 : index
    %91 = vector.load %arg2[%c15, %c0_108, %c0_109] : memref<16x8x16xf32, #tpu.memory_space<vmem>>, vector<1x8x16xf32>
    %92 = vector.shape_cast %91 : vector<1x8x16xf32> to vector<8x16xf32>
    %cst_110 = arith.constant dense<0.000000e+00> : vector<72x16xf32>
    %93 = tpu.matmul %90, %92, %cst_110 {dimension_numbers = #tpu.dot_dimension_numbers<[1], [0], [0], [1], [0, 0, 1, 1], [], []>} : vector<72x8xf32>, vector<8x16xf32>, vector<72x16xf32> -> vector<72x16xf32>
    %94 = arith.addf %88, %93 : vector<72x16xf32>
    %c0_111 = arith.constant 0 : index
    %c0_112 = arith.constant 0 : index
    %95 = vector.load %arg3[%c0_111, %c0_112] : memref<1x16xf32, #tpu.memory_space<vmem>>, vector<1x16xf32>
    %96 = vector.broadcast %95 : vector<1x16xf32> to vector<72x16xf32>
    %97 = arith.addf %94, %96 : vector<72x16xf32>
    %98 = tpu.iota {dimensions = array<i32: 0>} : vector<72x16xi32>
    %c9_i32 = arith.constant 9 : i32
    %c0_i32 = arith.constant 0 : i32
    %99 = arith.cmpi eq, %c9_i32, %c0_i32 : i32
    %c1_i32 = arith.constant 1 : i32
    %100 = arith.select %99, %c1_i32, %c9_i32 : i32
    %101 = vector.broadcast %100 : i32 to vector<72x16xi32>
    %102 = arith.remsi %98, %101 : vector<72x16xi32>
    %c0_i32_113 = arith.constant 0 : i32
    %103 = vector.broadcast %c0_i32_113 : i32 to vector<72x16xi32>
    %104 = arith.cmpi ne, %102, %103 : vector<72x16xi32>
    %c0_i32_114 = arith.constant 0 : i32
    %105 = vector.broadcast %c0_i32_114 : i32 to vector<72x16xi32>
    %106 = arith.cmpi slt, %102, %105 : vector<72x16xi32>
    %c0_i32_115 = arith.constant 0 : i32
    %107 = arith.cmpi slt, %100, %c0_i32_115 : i32
    %108 = vector.broadcast %107 : i1 to vector<72x16xi1>
    %109 = vector.broadcast %108 : vector<72x16xi1> to vector<72x16xi1>
    %110 = arith.xori %106, %109 : vector<72x16xi1>
    %111 = arith.andi %110, %104 : vector<72x16xi1>
    %112 = vector.broadcast %100 : i32 to vector<72x16xi32>
    %113 = arith.addi %102, %112 : vector<72x16xi32>
    %114 = arith.select %111, %113, %102 : vector<72x16xi1>, vector<72x16xi32>
    %c8_i32 = arith.constant 8 : i32
    %115 = vector.broadcast %c8_i32 : i32 to vector<72x16xi32>
    %116 = arith.cmpi slt, %114, %115 : vector<72x16xi32>
    %cst_116 = arith.constant 0.000000e+00 : f32
    %117 = vector.broadcast %cst_116 : f32 to vector<72x16xf32>
    %118 = arith.select %116, %97, %117 : vector<72x16xi1>, vector<72x16xf32>
    %cst_117 = arith.constant dense<0.000000e+00> : vector<16xf32>
    %119 = vector.multi_reduction <add>, %118, %cst_117 [0] : vector<72x16xf32> to vector<16xf32>
    %120 = vector.shape_cast %119 : vector<16xf32> to vector<1x16xf32>
    %cst_118 = arith.constant 1.562500e-02 : f32
    %121 = vector.broadcast %cst_118 : f32 to vector<1x16xf32>
    %122 = arith.mulf %120, %121 : vector<1x16xf32>
    %123 = vector.broadcast %122 : vector<1x16xf32> to vector<72x16xf32>
    %124 = arith.subf %97, %123 : vector<72x16xf32>
    %125 = arith.mulf %124, %124 : vector<72x16xf32>
    %cst_119 = arith.constant 0.000000e+00 : f32
    %126 = vector.broadcast %cst_119 : f32 to vector<72x16xf32>
    %127 = arith.select %116, %125, %126 : vector<72x16xi1>, vector<72x16xf32>
    %cst_120 = arith.constant dense<0.000000e+00> : vector<16xf32>
    %128 = vector.multi_reduction <add>, %127, %cst_120 [0] : vector<72x16xf32> to vector<16xf32>
    %129 = vector.shape_cast %128 : vector<16xf32> to vector<1x16xf32>
    %cst_121 = arith.constant 1.562500e-02 : f32
    %130 = vector.broadcast %cst_121 : f32 to vector<1x16xf32>
    %131 = arith.mulf %129, %130 : vector<1x16xf32>
    %cst_122 = arith.constant 9.99999974E-6 : f32
    %132 = vector.broadcast %cst_122 : f32 to vector<1x16xf32>
    %133 = arith.addf %131, %132 : vector<1x16xf32>
    %134 = math.rsqrt %133 : vector<1x16xf32>
    %135 = vector.broadcast %134 : vector<1x16xf32> to vector<72x16xf32>
    %136 = arith.mulf %124, %135 : vector<72x16xf32>
    %cst_123 = arith.constant 0.000000e+00 : f32
    %137 = vector.broadcast %cst_123 : f32 to vector<72x16xf32>
    %138 = arith.cmpf oge, %136, %137 : vector<72x16xf32>
    %cst_124 = arith.constant 2.000000e-01 : f32
    %139 = vector.broadcast %cst_124 : f32 to vector<72x16xf32>
    %140 = arith.mulf %139, %136 : vector<72x16xf32>
    %141 = arith.select %138, %136, %140 : vector<72x16xi1>, vector<72x16xf32>
    %c0_125 = arith.constant 0 : index
    %c0_126 = arith.constant 0 : index
    %c0_127 = arith.constant 0 : index
    %142 = vector.load %arg4[%c0_125, %c0_126, %c0_127] : memref<1x72x16xf32, #tpu.memory_space<vmem>>, vector<1x72x16xf32>
    %143 = vector.shape_cast %142 : vector<1x72x16xf32> to vector<72x16xf32>
    %144 = vector.shape_cast %141 : vector<72x16xf32> to vector<1x72x16xf32>
    tpu.vector_store %arg4[%c0_125, %c0_126, %c0_127], %144 {strides = array<i32>} : memref<1x72x16xf32, #tpu.memory_space<vmem>>, vector<1x72x16xf32>,
    return
  }
  func.func @transform_0(%arg0: i32) -> (i32, i32, i32, i32) {
    %c0_i32 = arith.constant 0 : i32
    %c0_i32_0 = arith.constant 0 : i32
    %c0_i32_1 = arith.constant 0 : i32
    %c0_i32_2 = arith.constant 0 : i32
    return %arg0, %c0_i32, %c0_i32_0, %c0_i32_1 : i32, i32, i32, i32
  }
  func.func @transform_1(%arg0: i32) -> (i32, i32, i32) {
    %c0_i32 = arith.constant 0 : i32
    %c0_i32_0 = arith.constant 0 : i32
    %c0_i32_1 = arith.constant 0 : i32
    %c0_i32_2 = arith.constant 0 : i32
    return %c0_i32, %c0_i32_0, %c0_i32_1 : i32, i32, i32
  }
  func.func @transform_2(%arg0: i32) -> (i32, i32) {
    %c0_i32 = arith.constant 0 : i32
    %c0_i32_0 = arith.constant 0 : i32
    %c0_i32_1 = arith.constant 0 : i32
    return %c0_i32, %c0_i32_0 : i32, i32
  }
  func.func @transform_3(%arg0: i32) -> (i32, i32, i32) {
    %c0_i32 = arith.constant 0 : i32
    %c0_i32_0 = arith.constant 0 : i32
    %c0_i32_1 = arith.constant 0 : i32
    return %arg0, %c0_i32, %c0_i32_0 : i32, i32, i32
  }
}

module attributes {stable_mosaic.version = 11 : i64} {
  func.func @_conv_fused_kernel(%arg0: i32, %arg1: memref<1x4x30x16xf32, #tpu.memory_space<vmem>>, %arg2: memref<16x16x32xf32, #tpu.memory_space<vmem>>, %arg3: memref<1x32xf32, #tpu.memory_space<vmem>>, %arg4: memref<1x20x32xf32, #tpu.memory_space<vmem>>) attributes {dimension_semantics = [#tpu.dimension_semantics<parallel>], iteration_bounds = array<i64: 2>, scalar_prefetch = 0 : i64, scratch_operands = 0 : i64, tpu.core_type = #tpu.core_type<tc>, window_params = [{transform_indices = @transform_0, window_bounds = array<i64: 1, 4, 30, 16>}, {pipeline_mode = #tpu.pipeline_mode<synchronous>, transform_indices = @transform_1, window_bounds = array<i64: 16, 16, 32>}, {pipeline_mode = #tpu.pipeline_mode<synchronous>, transform_indices = @transform_2, window_bounds = array<i64: 1, 32>}, {transform_indices = @transform_3, window_bounds = array<i64: 1, 20, 32>}]} {
    %c0 = arith.constant 0 : index
    %c0_0 = arith.constant 0 : index
    %c0_1 = arith.constant 0 : index
    %c0_2 = arith.constant 0 : index
    %0 = vector.load %arg1[%c0, %c0_0, %c0_1, %c0_2] : memref<1x4x30x16xf32, #tpu.memory_space<vmem>>, vector<1x1x20x16xf32>
    %1 = vector.shape_cast %0 : vector<1x1x20x16xf32> to vector<20x16xf32>
    %c0_3 = arith.constant 0 : index
    %c0_4 = arith.constant 0 : index
    %c0_5 = arith.constant 0 : index
    %2 = vector.load %arg2[%c0_3, %c0_4, %c0_5] : memref<16x16x32xf32, #tpu.memory_space<vmem>>, vector<1x16x32xf32>
    %3 = vector.shape_cast %2 : vector<1x16x32xf32> to vector<16x32xf32>
    %cst = arith.constant dense<0.000000e+00> : vector<20x32xf32>
    %4 = tpu.matmul %1, %3, %cst {dimension_numbers = #tpu.dot_dimension_numbers<[1], [0], [0], [1], [0, 0, 1, 1], [], []>} : vector<20x16xf32>, vector<16x32xf32>, vector<20x32xf32> -> vector<20x32xf32>
    %c0_6 = arith.constant 0 : index
    %c1 = arith.constant 1 : index
    %c0_7 = arith.constant 0 : index
    %c0_8 = arith.constant 0 : index
    %5 = vector.load %arg1[%c0_6, %c1, %c0_7, %c0_8] : memref<1x4x30x16xf32, #tpu.memory_space<vmem>>, vector<1x1x20x16xf32>
    %6 = vector.shape_cast %5 : vector<1x1x20x16xf32> to vector<20x16xf32>
    %c1_9 = arith.constant 1 : index
    %c0_10 = arith.constant 0 : index
    %c0_11 = arith.constant 0 : index
    %7 = vector.load %arg2[%c1_9, %c0_10, %c0_11] : memref<16x16x32xf32, #tpu.memory_space<vmem>>, vector<1x16x32xf32>
    %8 = vector.shape_cast %7 : vector<1x16x32xf32> to vector<16x32xf32>
    %cst_12 = arith.constant dense<0.000000e+00> : vector<20x32xf32>
    %9 = tpu.matmul %6, %8, %cst_12 {dimension_numbers = #tpu.dot_dimension_numbers<[1], [0], [0], [1], [0, 0, 1, 1], [], []>} : vector<20x16xf32>, vector<16x32xf32>, vector<20x32xf32> -> vector<20x32xf32>
    %10 = arith.addf %4, %9 : vector<20x32xf32>
    %c0_13 = arith.constant 0 : index
    %c0_14 = arith.constant 0 : index
    %c1_15 = arith.constant 1 : index
    %c0_16 = arith.constant 0 : index
    %11 = vector.load %arg1[%c0_13, %c0_14, %c1_15, %c0_16] : memref<1x4x30x16xf32, #tpu.memory_space<vmem>>, vector<1x1x20x16xf32>
    %12 = vector.shape_cast %11 : vector<1x1x20x16xf32> to vector<20x16xf32>
    %c2 = arith.constant 2 : index
    %c0_17 = arith.constant 0 : index
    %c0_18 = arith.constant 0 : index
    %13 = vector.load %arg2[%c2, %c0_17, %c0_18] : memref<16x16x32xf32, #tpu.memory_space<vmem>>, vector<1x16x32xf32>
    %14 = vector.shape_cast %13 : vector<1x16x32xf32> to vector<16x32xf32>
    %cst_19 = arith.constant dense<0.000000e+00> : vector<20x32xf32>
    %15 = tpu.matmul %12, %14, %cst_19 {dimension_numbers = #tpu.dot_dimension_numbers<[1], [0], [0], [1], [0, 0, 1, 1], [], []>} : vector<20x16xf32>, vector<16x32xf32>, vector<20x32xf32> -> vector<20x32xf32>
    %16 = arith.addf %10, %15 : vector<20x32xf32>
    %c0_20 = arith.constant 0 : index
    %c1_21 = arith.constant 1 : index
    %c1_22 = arith.constant 1 : index
    %c0_23 = arith.constant 0 : index
    %17 = vector.load %arg1[%c0_20, %c1_21, %c1_22, %c0_23] : memref<1x4x30x16xf32, #tpu.memory_space<vmem>>, vector<1x1x20x16xf32>
    %18 = vector.shape_cast %17 : vector<1x1x20x16xf32> to vector<20x16xf32>
    %c3 = arith.constant 3 : index
    %c0_24 = arith.constant 0 : index
    %c0_25 = arith.constant 0 : index
    %19 = vector.load %arg2[%c3, %c0_24, %c0_25] : memref<16x16x32xf32, #tpu.memory_space<vmem>>, vector<1x16x32xf32>
    %20 = vector.shape_cast %19 : vector<1x16x32xf32> to vector<16x32xf32>
    %cst_26 = arith.constant dense<0.000000e+00> : vector<20x32xf32>
    %21 = tpu.matmul %18, %20, %cst_26 {dimension_numbers = #tpu.dot_dimension_numbers<[1], [0], [0], [1], [0, 0, 1, 1], [], []>} : vector<20x16xf32>, vector<16x32xf32>, vector<20x32xf32> -> vector<20x32xf32>
    %22 = arith.addf %16, %21 : vector<20x32xf32>
    %c0_27 = arith.constant 0 : index
    %c2_28 = arith.constant 2 : index
    %c0_29 = arith.constant 0 : index
    %c0_30 = arith.constant 0 : index
    %23 = vector.load %arg1[%c0_27, %c2_28, %c0_29, %c0_30] : memref<1x4x30x16xf32, #tpu.memory_space<vmem>>, vector<1x1x20x16xf32>
    %24 = vector.shape_cast %23 : vector<1x1x20x16xf32> to vector<20x16xf32>
    %c4 = arith.constant 4 : index
    %c0_31 = arith.constant 0 : index
    %c0_32 = arith.constant 0 : index
    %25 = vector.load %arg2[%c4, %c0_31, %c0_32] : memref<16x16x32xf32, #tpu.memory_space<vmem>>, vector<1x16x32xf32>
    %26 = vector.shape_cast %25 : vector<1x16x32xf32> to vector<16x32xf32>
    %cst_33 = arith.constant dense<0.000000e+00> : vector<20x32xf32>
    %27 = tpu.matmul %24, %26, %cst_33 {dimension_numbers = #tpu.dot_dimension_numbers<[1], [0], [0], [1], [0, 0, 1, 1], [], []>} : vector<20x16xf32>, vector<16x32xf32>, vector<20x32xf32> -> vector<20x32xf32>
    %28 = arith.addf %22, %27 : vector<20x32xf32>
    %c0_34 = arith.constant 0 : index
    %c3_35 = arith.constant 3 : index
    %c0_36 = arith.constant 0 : index
    %c0_37 = arith.constant 0 : index
    %29 = vector.load %arg1[%c0_34, %c3_35, %c0_36, %c0_37] : memref<1x4x30x16xf32, #tpu.memory_space<vmem>>, vector<1x1x20x16xf32>
    %30 = vector.shape_cast %29 : vector<1x1x20x16xf32> to vector<20x16xf32>
    %c5 = arith.constant 5 : index
    %c0_38 = arith.constant 0 : index
    %c0_39 = arith.constant 0 : index
    %31 = vector.load %arg2[%c5, %c0_38, %c0_39] : memref<16x16x32xf32, #tpu.memory_space<vmem>>, vector<1x16x32xf32>
    %32 = vector.shape_cast %31 : vector<1x16x32xf32> to vector<16x32xf32>
    %cst_40 = arith.constant dense<0.000000e+00> : vector<20x32xf32>
    %33 = tpu.matmul %30, %32, %cst_40 {dimension_numbers = #tpu.dot_dimension_numbers<[1], [0], [0], [1], [0, 0, 1, 1], [], []>} : vector<20x16xf32>, vector<16x32xf32>, vector<20x32xf32> -> vector<20x32xf32>
    %34 = arith.addf %28, %33 : vector<20x32xf32>
    %c0_41 = arith.constant 0 : index
    %c2_42 = arith.constant 2 : index
    %c1_43 = arith.constant 1 : index
    %c0_44 = arith.constant 0 : index
    %35 = vector.load %arg1[%c0_41, %c2_42, %c1_43, %c0_44] : memref<1x4x30x16xf32, #tpu.memory_space<vmem>>, vector<1x1x20x16xf32>
    %36 = vector.shape_cast %35 : vector<1x1x20x16xf32> to vector<20x16xf32>
    %c6 = arith.constant 6 : index
    %c0_45 = arith.constant 0 : index
    %c0_46 = arith.constant 0 : index
    %37 = vector.load %arg2[%c6, %c0_45, %c0_46] : memref<16x16x32xf32, #tpu.memory_space<vmem>>, vector<1x16x32xf32>
    %38 = vector.shape_cast %37 : vector<1x16x32xf32> to vector<16x32xf32>
    %cst_47 = arith.constant dense<0.000000e+00> : vector<20x32xf32>
    %39 = tpu.matmul %36, %38, %cst_47 {dimension_numbers = #tpu.dot_dimension_numbers<[1], [0], [0], [1], [0, 0, 1, 1], [], []>} : vector<20x16xf32>, vector<16x32xf32>, vector<20x32xf32> -> vector<20x32xf32>
    %40 = arith.addf %34, %39 : vector<20x32xf32>
    %c0_48 = arith.constant 0 : index
    %c3_49 = arith.constant 3 : index
    %c1_50 = arith.constant 1 : index
    %c0_51 = arith.constant 0 : index
    %41 = vector.load %arg1[%c0_48, %c3_49, %c1_50, %c0_51] : memref<1x4x30x16xf32, #tpu.memory_space<vmem>>, vector<1x1x20x16xf32>
    %42 = vector.shape_cast %41 : vector<1x1x20x16xf32> to vector<20x16xf32>
    %c7 = arith.constant 7 : index
    %c0_52 = arith.constant 0 : index
    %c0_53 = arith.constant 0 : index
    %43 = vector.load %arg2[%c7, %c0_52, %c0_53] : memref<16x16x32xf32, #tpu.memory_space<vmem>>, vector<1x16x32xf32>
    %44 = vector.shape_cast %43 : vector<1x16x32xf32> to vector<16x32xf32>
    %cst_54 = arith.constant dense<0.000000e+00> : vector<20x32xf32>
    %45 = tpu.matmul %42, %44, %cst_54 {dimension_numbers = #tpu.dot_dimension_numbers<[1], [0], [0], [1], [0, 0, 1, 1], [], []>} : vector<20x16xf32>, vector<16x32xf32>, vector<20x32xf32> -> vector<20x32xf32>
    %46 = arith.addf %40, %45 : vector<20x32xf32>
    %c0_55 = arith.constant 0 : index
    %c0_56 = arith.constant 0 : index
    %c5_57 = arith.constant 5 : index
    %c0_58 = arith.constant 0 : index
    %47 = vector.load %arg1[%c0_55, %c0_56, %c5_57, %c0_58] : memref<1x4x30x16xf32, #tpu.memory_space<vmem>>, vector<1x1x20x16xf32>
    %48 = vector.shape_cast %47 : vector<1x1x20x16xf32> to vector<20x16xf32>
    %c8 = arith.constant 8 : index
    %c0_59 = arith.constant 0 : index
    %c0_60 = arith.constant 0 : index
    %49 = vector.load %arg2[%c8, %c0_59, %c0_60] : memref<16x16x32xf32, #tpu.memory_space<vmem>>, vector<1x16x32xf32>
    %50 = vector.shape_cast %49 : vector<1x16x32xf32> to vector<16x32xf32>
    %cst_61 = arith.constant dense<0.000000e+00> : vector<20x32xf32>
    %51 = tpu.matmul %48, %50, %cst_61 {dimension_numbers = #tpu.dot_dimension_numbers<[1], [0], [0], [1], [0, 0, 1, 1], [], []>} : vector<20x16xf32>, vector<16x32xf32>, vector<20x32xf32> -> vector<20x32xf32>
    %52 = arith.addf %46, %51 : vector<20x32xf32>
    %c0_62 = arith.constant 0 : index
    %c1_63 = arith.constant 1 : index
    %c5_64 = arith.constant 5 : index
    %c0_65 = arith.constant 0 : index
    %53 = vector.load %arg1[%c0_62, %c1_63, %c5_64, %c0_65] : memref<1x4x30x16xf32, #tpu.memory_space<vmem>>, vector<1x1x20x16xf32>
    %54 = vector.shape_cast %53 : vector<1x1x20x16xf32> to vector<20x16xf32>
    %c9 = arith.constant 9 : index
    %c0_66 = arith.constant 0 : index
    %c0_67 = arith.constant 0 : index
    %55 = vector.load %arg2[%c9, %c0_66, %c0_67] : memref<16x16x32xf32, #tpu.memory_space<vmem>>, vector<1x16x32xf32>
    %56 = vector.shape_cast %55 : vector<1x16x32xf32> to vector<16x32xf32>
    %cst_68 = arith.constant dense<0.000000e+00> : vector<20x32xf32>
    %57 = tpu.matmul %54, %56, %cst_68 {dimension_numbers = #tpu.dot_dimension_numbers<[1], [0], [0], [1], [0, 0, 1, 1], [], []>} : vector<20x16xf32>, vector<16x32xf32>, vector<20x32xf32> -> vector<20x32xf32>
    %58 = arith.addf %52, %57 : vector<20x32xf32>
    %c0_69 = arith.constant 0 : index
    %c0_70 = arith.constant 0 : index
    %c6_71 = arith.constant 6 : index
    %c0_72 = arith.constant 0 : index
    %59 = vector.load %arg1[%c0_69, %c0_70, %c6_71, %c0_72] : memref<1x4x30x16xf32, #tpu.memory_space<vmem>>, vector<1x1x20x16xf32>
    %60 = vector.shape_cast %59 : vector<1x1x20x16xf32> to vector<20x16xf32>
    %c10 = arith.constant 10 : index
    %c0_73 = arith.constant 0 : index
    %c0_74 = arith.constant 0 : index
    %61 = vector.load %arg2[%c10, %c0_73, %c0_74] : memref<16x16x32xf32, #tpu.memory_space<vmem>>, vector<1x16x32xf32>
    %62 = vector.shape_cast %61 : vector<1x16x32xf32> to vector<16x32xf32>
    %cst_75 = arith.constant dense<0.000000e+00> : vector<20x32xf32>
    %63 = tpu.matmul %60, %62, %cst_75 {dimension_numbers = #tpu.dot_dimension_numbers<[1], [0], [0], [1], [0, 0, 1, 1], [], []>} : vector<20x16xf32>, vector<16x32xf32>, vector<20x32xf32> -> vector<20x32xf32>
    %64 = arith.addf %58, %63 : vector<20x32xf32>
    %c0_76 = arith.constant 0 : index
    %c1_77 = arith.constant 1 : index
    %c6_78 = arith.constant 6 : index
    %c0_79 = arith.constant 0 : index
    %65 = vector.load %arg1[%c0_76, %c1_77, %c6_78, %c0_79] : memref<1x4x30x16xf32, #tpu.memory_space<vmem>>, vector<1x1x20x16xf32>
    %66 = vector.shape_cast %65 : vector<1x1x20x16xf32> to vector<20x16xf32>
    %c11 = arith.constant 11 : index
    %c0_80 = arith.constant 0 : index
    %c0_81 = arith.constant 0 : index
    %67 = vector.load %arg2[%c11, %c0_80, %c0_81] : memref<16x16x32xf32, #tpu.memory_space<vmem>>, vector<1x16x32xf32>
    %68 = vector.shape_cast %67 : vector<1x16x32xf32> to vector<16x32xf32>
    %cst_82 = arith.constant dense<0.000000e+00> : vector<20x32xf32>
    %69 = tpu.matmul %66, %68, %cst_82 {dimension_numbers = #tpu.dot_dimension_numbers<[1], [0], [0], [1], [0, 0, 1, 1], [], []>} : vector<20x16xf32>, vector<16x32xf32>, vector<20x32xf32> -> vector<20x32xf32>
    %70 = arith.addf %64, %69 : vector<20x32xf32>
    %c0_83 = arith.constant 0 : index
    %c2_84 = arith.constant 2 : index
    %c5_85 = arith.constant 5 : index
    %c0_86 = arith.constant 0 : index
    %71 = vector.load %arg1[%c0_83, %c2_84, %c5_85, %c0_86] : memref<1x4x30x16xf32, #tpu.memory_space<vmem>>, vector<1x1x20x16xf32>
    %72 = vector.shape_cast %71 : vector<1x1x20x16xf32> to vector<20x16xf32>
    %c12 = arith.constant 12 : index
    %c0_87 = arith.constant 0 : index
    %c0_88 = arith.constant 0 : index
    %73 = vector.load %arg2[%c12, %c0_87, %c0_88] : memref<16x16x32xf32, #tpu.memory_space<vmem>>, vector<1x16x32xf32>
    %74 = vector.shape_cast %73 : vector<1x16x32xf32> to vector<16x32xf32>
    %cst_89 = arith.constant dense<0.000000e+00> : vector<20x32xf32>
    %75 = tpu.matmul %72, %74, %cst_89 {dimension_numbers = #tpu.dot_dimension_numbers<[1], [0], [0], [1], [0, 0, 1, 1], [], []>} : vector<20x16xf32>, vector<16x32xf32>, vector<20x32xf32> -> vector<20x32xf32>
    %76 = arith.addf %70, %75 : vector<20x32xf32>
    %c0_90 = arith.constant 0 : index
    %c3_91 = arith.constant 3 : index
    %c5_92 = arith.constant 5 : index
    %c0_93 = arith.constant 0 : index
    %77 = vector.load %arg1[%c0_90, %c3_91, %c5_92, %c0_93] : memref<1x4x30x16xf32, #tpu.memory_space<vmem>>, vector<1x1x20x16xf32>
    %78 = vector.shape_cast %77 : vector<1x1x20x16xf32> to vector<20x16xf32>
    %c13 = arith.constant 13 : index
    %c0_94 = arith.constant 0 : index
    %c0_95 = arith.constant 0 : index
    %79 = vector.load %arg2[%c13, %c0_94, %c0_95] : memref<16x16x32xf32, #tpu.memory_space<vmem>>, vector<1x16x32xf32>
    %80 = vector.shape_cast %79 : vector<1x16x32xf32> to vector<16x32xf32>
    %cst_96 = arith.constant dense<0.000000e+00> : vector<20x32xf32>
    %81 = tpu.matmul %78, %80, %cst_96 {dimension_numbers = #tpu.dot_dimension_numbers<[1], [0], [0], [1], [0, 0, 1, 1], [], []>} : vector<20x16xf32>, vector<16x32xf32>, vector<20x32xf32> -> vector<20x32xf32>
    %82 = arith.addf %76, %81 : vector<20x32xf32>
    %c0_97 = arith.constant 0 : index
    %c2_98 = arith.constant 2 : index
    %c6_99 = arith.constant 6 : index
    %c0_100 = arith.constant 0 : index
    %83 = vector.load %arg1[%c0_97, %c2_98, %c6_99, %c0_100] : memref<1x4x30x16xf32, #tpu.memory_space<vmem>>, vector<1x1x20x16xf32>
    %84 = vector.shape_cast %83 : vector<1x1x20x16xf32> to vector<20x16xf32>
    %c14 = arith.constant 14 : index
    %c0_101 = arith.constant 0 : index
    %c0_102 = arith.constant 0 : index
    %85 = vector.load %arg2[%c14, %c0_101, %c0_102] : memref<16x16x32xf32, #tpu.memory_space<vmem>>, vector<1x16x32xf32>
    %86 = vector.shape_cast %85 : vector<1x16x32xf32> to vector<16x32xf32>
    %cst_103 = arith.constant dense<0.000000e+00> : vector<20x32xf32>
    %87 = tpu.matmul %84, %86, %cst_103 {dimension_numbers = #tpu.dot_dimension_numbers<[1], [0], [0], [1], [0, 0, 1, 1], [], []>} : vector<20x16xf32>, vector<16x32xf32>, vector<20x32xf32> -> vector<20x32xf32>
    %88 = arith.addf %82, %87 : vector<20x32xf32>
    %c0_104 = arith.constant 0 : index
    %c3_105 = arith.constant 3 : index
    %c6_106 = arith.constant 6 : index
    %c0_107 = arith.constant 0 : index
    %89 = vector.load %arg1[%c0_104, %c3_105, %c6_106, %c0_107] : memref<1x4x30x16xf32, #tpu.memory_space<vmem>>, vector<1x1x20x16xf32>
    %90 = vector.shape_cast %89 : vector<1x1x20x16xf32> to vector<20x16xf32>
    %c15 = arith.constant 15 : index
    %c0_108 = arith.constant 0 : index
    %c0_109 = arith.constant 0 : index
    %91 = vector.load %arg2[%c15, %c0_108, %c0_109] : memref<16x16x32xf32, #tpu.memory_space<vmem>>, vector<1x16x32xf32>
    %92 = vector.shape_cast %91 : vector<1x16x32xf32> to vector<16x32xf32>
    %cst_110 = arith.constant dense<0.000000e+00> : vector<20x32xf32>
    %93 = tpu.matmul %90, %92, %cst_110 {dimension_numbers = #tpu.dot_dimension_numbers<[1], [0], [0], [1], [0, 0, 1, 1], [], []>} : vector<20x16xf32>, vector<16x32xf32>, vector<20x32xf32> -> vector<20x32xf32>
    %94 = arith.addf %88, %93 : vector<20x32xf32>
    %c0_111 = arith.constant 0 : index
    %c0_112 = arith.constant 0 : index
    %95 = vector.load %arg3[%c0_111, %c0_112] : memref<1x32xf32, #tpu.memory_space<vmem>>, vector<1x32xf32>
    %96 = vector.broadcast %95 : vector<1x32xf32> to vector<20x32xf32>
    %97 = arith.addf %94, %96 : vector<20x32xf32>
    %98 = tpu.iota {dimensions = array<i32: 0>} : vector<20x32xi32>
    %c5_i32 = arith.constant 5 : i32
    %c0_i32 = arith.constant 0 : i32
    %99 = arith.cmpi eq, %c5_i32, %c0_i32 : i32
    %c1_i32 = arith.constant 1 : i32
    %100 = arith.select %99, %c1_i32, %c5_i32 : i32
    %101 = vector.broadcast %100 : i32 to vector<20x32xi32>
    %102 = arith.remsi %98, %101 : vector<20x32xi32>
    %c0_i32_113 = arith.constant 0 : i32
    %103 = vector.broadcast %c0_i32_113 : i32 to vector<20x32xi32>
    %104 = arith.cmpi ne, %102, %103 : vector<20x32xi32>
    %c0_i32_114 = arith.constant 0 : i32
    %105 = vector.broadcast %c0_i32_114 : i32 to vector<20x32xi32>
    %106 = arith.cmpi slt, %102, %105 : vector<20x32xi32>
    %c0_i32_115 = arith.constant 0 : i32
    %107 = arith.cmpi slt, %100, %c0_i32_115 : i32
    %108 = vector.broadcast %107 : i1 to vector<20x32xi1>
    %109 = vector.broadcast %108 : vector<20x32xi1> to vector<20x32xi1>
    %110 = arith.xori %106, %109 : vector<20x32xi1>
    %111 = arith.andi %110, %104 : vector<20x32xi1>
    %112 = vector.broadcast %100 : i32 to vector<20x32xi32>
    %113 = arith.addi %102, %112 : vector<20x32xi32>
    %114 = arith.select %111, %113, %102 : vector<20x32xi1>, vector<20x32xi32>
    %c4_i32 = arith.constant 4 : i32
    %115 = vector.broadcast %c4_i32 : i32 to vector<20x32xi32>
    %116 = arith.cmpi slt, %114, %115 : vector<20x32xi32>
    %cst_116 = arith.constant 0.000000e+00 : f32
    %117 = vector.broadcast %cst_116 : f32 to vector<20x32xf32>
    %118 = arith.select %116, %97, %117 : vector<20x32xi1>, vector<20x32xf32>
    %cst_117 = arith.constant dense<0.000000e+00> : vector<32xf32>
    %119 = vector.multi_reduction <add>, %118, %cst_117 [0] : vector<20x32xf32> to vector<32xf32>
    %120 = vector.shape_cast %119 : vector<32xf32> to vector<1x32xf32>
    %cst_118 = arith.constant 6.250000e-02 : f32
    %121 = vector.broadcast %cst_118 : f32 to vector<1x32xf32>
    %122 = arith.mulf %120, %121 : vector<1x32xf32>
    %123 = vector.broadcast %122 : vector<1x32xf32> to vector<20x32xf32>
    %124 = arith.subf %97, %123 : vector<20x32xf32>
    %125 = arith.mulf %124, %124 : vector<20x32xf32>
    %cst_119 = arith.constant 0.000000e+00 : f32
    %126 = vector.broadcast %cst_119 : f32 to vector<20x32xf32>
    %127 = arith.select %116, %125, %126 : vector<20x32xi1>, vector<20x32xf32>
    %cst_120 = arith.constant dense<0.000000e+00> : vector<32xf32>
    %128 = vector.multi_reduction <add>, %127, %cst_120 [0] : vector<20x32xf32> to vector<32xf32>
    %129 = vector.shape_cast %128 : vector<32xf32> to vector<1x32xf32>
    %cst_121 = arith.constant 6.250000e-02 : f32
    %130 = vector.broadcast %cst_121 : f32 to vector<1x32xf32>
    %131 = arith.mulf %129, %130 : vector<1x32xf32>
    %cst_122 = arith.constant 9.99999974E-6 : f32
    %132 = vector.broadcast %cst_122 : f32 to vector<1x32xf32>
    %133 = arith.addf %131, %132 : vector<1x32xf32>
    %134 = math.rsqrt %133 : vector<1x32xf32>
    %135 = vector.broadcast %134 : vector<1x32xf32> to vector<20x32xf32>
    %136 = arith.mulf %124, %135 : vector<20x32xf32>
    %cst_123 = arith.constant 0.000000e+00 : f32
    %137 = vector.broadcast %cst_123 : f32 to vector<20x32xf32>
    %138 = arith.cmpf oge, %136, %137 : vector<20x32xf32>
    %cst_124 = arith.constant 2.000000e-01 : f32
    %139 = vector.broadcast %cst_124 : f32 to vector<20x32xf32>
    %140 = arith.mulf %139, %136 : vector<20x32xf32>
    %141 = arith.select %138, %136, %140 : vector<20x32xi1>, vector<20x32xf32>
    %c0_125 = arith.constant 0 : index
    %c0_126 = arith.constant 0 : index
    %c0_127 = arith.constant 0 : index
    %142 = vector.load %arg4[%c0_125, %c0_126, %c0_127] : memref<1x20x32xf32, #tpu.memory_space<vmem>>, vector<1x20x32xf32>
    %143 = vector.shape_cast %142 : vector<1x20x32xf32> to vector<20x32xf32>
    %144 = vector.shape_cast %141 : vector<20x32xf32> to vector<1x20x32xf32>
    tpu.vector_store %arg4[%c0_125, %c0_126, %c0_127], %144 {strides = array<i32>} : memref<1x20x32xf32, #tpu.memory_space<vmem>>, vector<1x20x32xf32>,
    return
  }
  func.func @transform_0(%arg0: i32) -> (i32, i32, i32, i32) {
    %c0_i32 = arith.constant 0 : i32
    %c0_i32_0 = arith.constant 0 : i32
    %c0_i32_1 = arith.constant 0 : i32
    %c0_i32_2 = arith.constant 0 : i32
    return %arg0, %c0_i32, %c0_i32_0, %c0_i32_1 : i32, i32, i32, i32
  }
  func.func @transform_1(%arg0: i32) -> (i32, i32, i32) {
    %c0_i32 = arith.constant 0 : i32
    %c0_i32_0 = arith.constant 0 : i32
    %c0_i32_1 = arith.constant 0 : i32
    %c0_i32_2 = arith.constant 0 : i32
    return %c0_i32, %c0_i32_0, %c0_i32_1 : i32, i32, i32
  }
  func.func @transform_2(%arg0: i32) -> (i32, i32) {
    %c0_i32 = arith.constant 0 : i32
    %c0_i32_0 = arith.constant 0 : i32
    %c0_i32_1 = arith.constant 0 : i32
    return %c0_i32, %c0_i32_0 : i32, i32
  }
  func.func @transform_3(%arg0: i32) -> (i32, i32, i32) {
    %c0_i32 = arith.constant 0 : i32
    %c0_i32_0 = arith.constant 0 : i32
    %c0_i32_1 = arith.constant 0 : i32
    return %arg0, %c0_i32, %c0_i32_0 : i32, i32, i32
  }
}

module attributes {stable_mosaic.version = 11 : i64} {
  func.func @_conv_fused_kernel(%arg0: i32, %arg1: memref<1x1x42x32xf32, #tpu.memory_space<vmem>>, %arg2: memref<16x32x64xf32, #tpu.memory_space<vmem>>, %arg3: memref<1x64xf32, #tpu.memory_space<vmem>>, %arg4: memref<1x18x64xf32, #tpu.memory_space<vmem>>) attributes {dimension_semantics = [#tpu.dimension_semantics<parallel>], iteration_bounds = array<i64: 2>, scalar_prefetch = 0 : i64, scratch_operands = 0 : i64, tpu.core_type = #tpu.core_type<tc>, window_params = [{transform_indices = @transform_0, window_bounds = array<i64: 1, 1, 42, 32>}, {pipeline_mode = #tpu.pipeline_mode<synchronous>, transform_indices = @transform_1, window_bounds = array<i64: 16, 32, 64>}, {pipeline_mode = #tpu.pipeline_mode<synchronous>, transform_indices = @transform_2, window_bounds = array<i64: 1, 64>}, {transform_indices = @transform_3, window_bounds = array<i64: 1, 18, 64>}]} {
    %c0 = arith.constant 0 : index
    %c0_0 = arith.constant 0 : index
    %c0_1 = arith.constant 0 : index
    %c0_2 = arith.constant 0 : index
    %0 = vector.load %arg1[%c0, %c0_0, %c0_1, %c0_2] : memref<1x1x42x32xf32, #tpu.memory_space<vmem>>, vector<1x1x18x32xf32>
    %1 = vector.shape_cast %0 : vector<1x1x18x32xf32> to vector<18x32xf32>
    %c0_3 = arith.constant 0 : index
    %c0_4 = arith.constant 0 : index
    %c0_5 = arith.constant 0 : index
    %2 = vector.load %arg2[%c0_3, %c0_4, %c0_5] : memref<16x32x64xf32, #tpu.memory_space<vmem>>, vector<1x32x64xf32>
    %3 = vector.shape_cast %2 : vector<1x32x64xf32> to vector<32x64xf32>
    %cst = arith.constant dense<0.000000e+00> : vector<18x64xf32>
    %4 = tpu.matmul %1, %3, %cst {dimension_numbers = #tpu.dot_dimension_numbers<[1], [0], [0], [1], [0, 0, 1, 1], [], []>} : vector<18x32xf32>, vector<32x64xf32>, vector<18x64xf32> -> vector<18x64xf32>
    %c0_6 = arith.constant 0 : index
    %c0_7 = arith.constant 0 : index
    %c1 = arith.constant 1 : index
    %c0_8 = arith.constant 0 : index
    %5 = vector.load %arg1[%c0_6, %c0_7, %c1, %c0_8] : memref<1x1x42x32xf32, #tpu.memory_space<vmem>>, vector<1x1x18x32xf32>
    %6 = vector.shape_cast %5 : vector<1x1x18x32xf32> to vector<18x32xf32>
    %c1_9 = arith.constant 1 : index
    %c0_10 = arith.constant 0 : index
    %c0_11 = arith.constant 0 : index
    %7 = vector.load %arg2[%c1_9, %c0_10, %c0_11] : memref<16x32x64xf32, #tpu.memory_space<vmem>>, vector<1x32x64xf32>
    %8 = vector.shape_cast %7 : vector<1x32x64xf32> to vector<32x64xf32>
    %cst_12 = arith.constant dense<0.000000e+00> : vector<18x64xf32>
    %9 = tpu.matmul %6, %8, %cst_12 {dimension_numbers = #tpu.dot_dimension_numbers<[1], [0], [0], [1], [0, 0, 1, 1], [], []>} : vector<18x32xf32>, vector<32x64xf32>, vector<18x64xf32> -> vector<18x64xf32>
    %10 = arith.addf %4, %9 : vector<18x64xf32>
    %c0_13 = arith.constant 0 : index
    %c0_14 = arith.constant 0 : index
    %c2 = arith.constant 2 : index
    %c0_15 = arith.constant 0 : index
    %11 = vector.load %arg1[%c0_13, %c0_14, %c2, %c0_15] : memref<1x1x42x32xf32, #tpu.memory_space<vmem>>, vector<1x1x18x32xf32>
    %12 = vector.shape_cast %11 : vector<1x1x18x32xf32> to vector<18x32xf32>
    %c2_16 = arith.constant 2 : index
    %c0_17 = arith.constant 0 : index
    %c0_18 = arith.constant 0 : index
    %13 = vector.load %arg2[%c2_16, %c0_17, %c0_18] : memref<16x32x64xf32, #tpu.memory_space<vmem>>, vector<1x32x64xf32>
    %14 = vector.shape_cast %13 : vector<1x32x64xf32> to vector<32x64xf32>
    %cst_19 = arith.constant dense<0.000000e+00> : vector<18x64xf32>
    %15 = tpu.matmul %12, %14, %cst_19 {dimension_numbers = #tpu.dot_dimension_numbers<[1], [0], [0], [1], [0, 0, 1, 1], [], []>} : vector<18x32xf32>, vector<32x64xf32>, vector<18x64xf32> -> vector<18x64xf32>
    %16 = arith.addf %10, %15 : vector<18x64xf32>
    %c0_20 = arith.constant 0 : index
    %c0_21 = arith.constant 0 : index
    %c3 = arith.constant 3 : index
    %c0_22 = arith.constant 0 : index
    %17 = vector.load %arg1[%c0_20, %c0_21, %c3, %c0_22] : memref<1x1x42x32xf32, #tpu.memory_space<vmem>>, vector<1x1x18x32xf32>
    %18 = vector.shape_cast %17 : vector<1x1x18x32xf32> to vector<18x32xf32>
    %c3_23 = arith.constant 3 : index
    %c0_24 = arith.constant 0 : index
    %c0_25 = arith.constant 0 : index
    %19 = vector.load %arg2[%c3_23, %c0_24, %c0_25] : memref<16x32x64xf32, #tpu.memory_space<vmem>>, vector<1x32x64xf32>
    %20 = vector.shape_cast %19 : vector<1x32x64xf32> to vector<32x64xf32>
    %cst_26 = arith.constant dense<0.000000e+00> : vector<18x64xf32>
    %21 = tpu.matmul %18, %20, %cst_26 {dimension_numbers = #tpu.dot_dimension_numbers<[1], [0], [0], [1], [0, 0, 1, 1], [], []>} : vector<18x32xf32>, vector<32x64xf32>, vector<18x64xf32> -> vector<18x64xf32>
    %22 = arith.addf %16, %21 : vector<18x64xf32>
    %c0_27 = arith.constant 0 : index
    %c0_28 = arith.constant 0 : index
    %c6 = arith.constant 6 : index
    %c0_29 = arith.constant 0 : index
    %23 = vector.load %arg1[%c0_27, %c0_28, %c6, %c0_29] : memref<1x1x42x32xf32, #tpu.memory_space<vmem>>, vector<1x1x18x32xf32>
    %24 = vector.shape_cast %23 : vector<1x1x18x32xf32> to vector<18x32xf32>
    %c4 = arith.constant 4 : index
    %c0_30 = arith.constant 0 : index
    %c0_31 = arith.constant 0 : index
    %25 = vector.load %arg2[%c4, %c0_30, %c0_31] : memref<16x32x64xf32, #tpu.memory_space<vmem>>, vector<1x32x64xf32>
    %26 = vector.shape_cast %25 : vector<1x32x64xf32> to vector<32x64xf32>
    %cst_32 = arith.constant dense<0.000000e+00> : vector<18x64xf32>
    %27 = tpu.matmul %24, %26, %cst_32 {dimension_numbers = #tpu.dot_dimension_numbers<[1], [0], [0], [1], [0, 0, 1, 1], [], []>} : vector<18x32xf32>, vector<32x64xf32>, vector<18x64xf32> -> vector<18x64xf32>
    %28 = arith.addf %22, %27 : vector<18x64xf32>
    %c0_33 = arith.constant 0 : index
    %c0_34 = arith.constant 0 : index
    %c7 = arith.constant 7 : index
    %c0_35 = arith.constant 0 : index
    %29 = vector.load %arg1[%c0_33, %c0_34, %c7, %c0_35] : memref<1x1x42x32xf32, #tpu.memory_space<vmem>>, vector<1x1x18x32xf32>
    %30 = vector.shape_cast %29 : vector<1x1x18x32xf32> to vector<18x32xf32>
    %c5 = arith.constant 5 : index
    %c0_36 = arith.constant 0 : index
    %c0_37 = arith.constant 0 : index
    %31 = vector.load %arg2[%c5, %c0_36, %c0_37] : memref<16x32x64xf32, #tpu.memory_space<vmem>>, vector<1x32x64xf32>
    %32 = vector.shape_cast %31 : vector<1x32x64xf32> to vector<32x64xf32>
    %cst_38 = arith.constant dense<0.000000e+00> : vector<18x64xf32>
    %33 = tpu.matmul %30, %32, %cst_38 {dimension_numbers = #tpu.dot_dimension_numbers<[1], [0], [0], [1], [0, 0, 1, 1], [], []>} : vector<18x32xf32>, vector<32x64xf32>, vector<18x64xf32> -> vector<18x64xf32>
    %34 = arith.addf %28, %33 : vector<18x64xf32>
    %c0_39 = arith.constant 0 : index
    %c0_40 = arith.constant 0 : index
    %c8 = arith.constant 8 : index
    %c0_41 = arith.constant 0 : index
    %35 = vector.load %arg1[%c0_39, %c0_40, %c8, %c0_41] : memref<1x1x42x32xf32, #tpu.memory_space<vmem>>, vector<1x1x18x32xf32>
    %36 = vector.shape_cast %35 : vector<1x1x18x32xf32> to vector<18x32xf32>
    %c6_42 = arith.constant 6 : index
    %c0_43 = arith.constant 0 : index
    %c0_44 = arith.constant 0 : index
    %37 = vector.load %arg2[%c6_42, %c0_43, %c0_44] : memref<16x32x64xf32, #tpu.memory_space<vmem>>, vector<1x32x64xf32>
    %38 = vector.shape_cast %37 : vector<1x32x64xf32> to vector<32x64xf32>
    %cst_45 = arith.constant dense<0.000000e+00> : vector<18x64xf32>
    %39 = tpu.matmul %36, %38, %cst_45 {dimension_numbers = #tpu.dot_dimension_numbers<[1], [0], [0], [1], [0, 0, 1, 1], [], []>} : vector<18x32xf32>, vector<32x64xf32>, vector<18x64xf32> -> vector<18x64xf32>
    %40 = arith.addf %34, %39 : vector<18x64xf32>
    %c0_46 = arith.constant 0 : index
    %c0_47 = arith.constant 0 : index
    %c9 = arith.constant 9 : index
    %c0_48 = arith.constant 0 : index
    %41 = vector.load %arg1[%c0_46, %c0_47, %c9, %c0_48] : memref<1x1x42x32xf32, #tpu.memory_space<vmem>>, vector<1x1x18x32xf32>
    %42 = vector.shape_cast %41 : vector<1x1x18x32xf32> to vector<18x32xf32>
    %c7_49 = arith.constant 7 : index
    %c0_50 = arith.constant 0 : index
    %c0_51 = arith.constant 0 : index
    %43 = vector.load %arg2[%c7_49, %c0_50, %c0_51] : memref<16x32x64xf32, #tpu.memory_space<vmem>>, vector<1x32x64xf32>
    %44 = vector.shape_cast %43 : vector<1x32x64xf32> to vector<32x64xf32>
    %cst_52 = arith.constant dense<0.000000e+00> : vector<18x64xf32>
    %45 = tpu.matmul %42, %44, %cst_52 {dimension_numbers = #tpu.dot_dimension_numbers<[1], [0], [0], [1], [0, 0, 1, 1], [], []>} : vector<18x32xf32>, vector<32x64xf32>, vector<18x64xf32> -> vector<18x64xf32>
    %46 = arith.addf %40, %45 : vector<18x64xf32>
    %c0_53 = arith.constant 0 : index
    %c0_54 = arith.constant 0 : index
    %c12 = arith.constant 12 : index
    %c0_55 = arith.constant 0 : index
    %47 = vector.load %arg1[%c0_53, %c0_54, %c12, %c0_55] : memref<1x1x42x32xf32, #tpu.memory_space<vmem>>, vector<1x1x18x32xf32>
    %48 = vector.shape_cast %47 : vector<1x1x18x32xf32> to vector<18x32xf32>
    %c8_56 = arith.constant 8 : index
    %c0_57 = arith.constant 0 : index
    %c0_58 = arith.constant 0 : index
    %49 = vector.load %arg2[%c8_56, %c0_57, %c0_58] : memref<16x32x64xf32, #tpu.memory_space<vmem>>, vector<1x32x64xf32>
    %50 = vector.shape_cast %49 : vector<1x32x64xf32> to vector<32x64xf32>
    %cst_59 = arith.constant dense<0.000000e+00> : vector<18x64xf32>
    %51 = tpu.matmul %48, %50, %cst_59 {dimension_numbers = #tpu.dot_dimension_numbers<[1], [0], [0], [1], [0, 0, 1, 1], [], []>} : vector<18x32xf32>, vector<32x64xf32>, vector<18x64xf32> -> vector<18x64xf32>
    %52 = arith.addf %46, %51 : vector<18x64xf32>
    %c0_60 = arith.constant 0 : index
    %c0_61 = arith.constant 0 : index
    %c13 = arith.constant 13 : index
    %c0_62 = arith.constant 0 : index
    %53 = vector.load %arg1[%c0_60, %c0_61, %c13, %c0_62] : memref<1x1x42x32xf32, #tpu.memory_space<vmem>>, vector<1x1x18x32xf32>
    %54 = vector.shape_cast %53 : vector<1x1x18x32xf32> to vector<18x32xf32>
    %c9_63 = arith.constant 9 : index
    %c0_64 = arith.constant 0 : index
    %c0_65 = arith.constant 0 : index
    %55 = vector.load %arg2[%c9_63, %c0_64, %c0_65] : memref<16x32x64xf32, #tpu.memory_space<vmem>>, vector<1x32x64xf32>
    %56 = vector.shape_cast %55 : vector<1x32x64xf32> to vector<32x64xf32>
    %cst_66 = arith.constant dense<0.000000e+00> : vector<18x64xf32>
    %57 = tpu.matmul %54, %56, %cst_66 {dimension_numbers = #tpu.dot_dimension_numbers<[1], [0], [0], [1], [0, 0, 1, 1], [], []>} : vector<18x32xf32>, vector<32x64xf32>, vector<18x64xf32> -> vector<18x64xf32>
    %58 = arith.addf %52, %57 : vector<18x64xf32>
    %c0_67 = arith.constant 0 : index
    %c0_68 = arith.constant 0 : index
    %c14 = arith.constant 14 : index
    %c0_69 = arith.constant 0 : index
    %59 = vector.load %arg1[%c0_67, %c0_68, %c14, %c0_69] : memref<1x1x42x32xf32, #tpu.memory_space<vmem>>, vector<1x1x18x32xf32>
    %60 = vector.shape_cast %59 : vector<1x1x18x32xf32> to vector<18x32xf32>
    %c10 = arith.constant 10 : index
    %c0_70 = arith.constant 0 : index
    %c0_71 = arith.constant 0 : index
    %61 = vector.load %arg2[%c10, %c0_70, %c0_71] : memref<16x32x64xf32, #tpu.memory_space<vmem>>, vector<1x32x64xf32>
    %62 = vector.shape_cast %61 : vector<1x32x64xf32> to vector<32x64xf32>
    %cst_72 = arith.constant dense<0.000000e+00> : vector<18x64xf32>
    %63 = tpu.matmul %60, %62, %cst_72 {dimension_numbers = #tpu.dot_dimension_numbers<[1], [0], [0], [1], [0, 0, 1, 1], [], []>} : vector<18x32xf32>, vector<32x64xf32>, vector<18x64xf32> -> vector<18x64xf32>
    %64 = arith.addf %58, %63 : vector<18x64xf32>
    %c0_73 = arith.constant 0 : index
    %c0_74 = arith.constant 0 : index
    %c15 = arith.constant 15 : index
    %c0_75 = arith.constant 0 : index
    %65 = vector.load %arg1[%c0_73, %c0_74, %c15, %c0_75] : memref<1x1x42x32xf32, #tpu.memory_space<vmem>>, vector<1x1x18x32xf32>
    %66 = vector.shape_cast %65 : vector<1x1x18x32xf32> to vector<18x32xf32>
    %c11 = arith.constant 11 : index
    %c0_76 = arith.constant 0 : index
    %c0_77 = arith.constant 0 : index
    %67 = vector.load %arg2[%c11, %c0_76, %c0_77] : memref<16x32x64xf32, #tpu.memory_space<vmem>>, vector<1x32x64xf32>
    %68 = vector.shape_cast %67 : vector<1x32x64xf32> to vector<32x64xf32>
    %cst_78 = arith.constant dense<0.000000e+00> : vector<18x64xf32>
    %69 = tpu.matmul %66, %68, %cst_78 {dimension_numbers = #tpu.dot_dimension_numbers<[1], [0], [0], [1], [0, 0, 1, 1], [], []>} : vector<18x32xf32>, vector<32x64xf32>, vector<18x64xf32> -> vector<18x64xf32>
    %70 = arith.addf %64, %69 : vector<18x64xf32>
    %c0_79 = arith.constant 0 : index
    %c0_80 = arith.constant 0 : index
    %c18 = arith.constant 18 : index
    %c0_81 = arith.constant 0 : index
    %71 = vector.load %arg1[%c0_79, %c0_80, %c18, %c0_81] : memref<1x1x42x32xf32, #tpu.memory_space<vmem>>, vector<1x1x18x32xf32>
    %72 = vector.shape_cast %71 : vector<1x1x18x32xf32> to vector<18x32xf32>
    %c12_82 = arith.constant 12 : index
    %c0_83 = arith.constant 0 : index
    %c0_84 = arith.constant 0 : index
    %73 = vector.load %arg2[%c12_82, %c0_83, %c0_84] : memref<16x32x64xf32, #tpu.memory_space<vmem>>, vector<1x32x64xf32>
    %74 = vector.shape_cast %73 : vector<1x32x64xf32> to vector<32x64xf32>
    %cst_85 = arith.constant dense<0.000000e+00> : vector<18x64xf32>
    %75 = tpu.matmul %72, %74, %cst_85 {dimension_numbers = #tpu.dot_dimension_numbers<[1], [0], [0], [1], [0, 0, 1, 1], [], []>} : vector<18x32xf32>, vector<32x64xf32>, vector<18x64xf32> -> vector<18x64xf32>
    %76 = arith.addf %70, %75 : vector<18x64xf32>
    %c0_86 = arith.constant 0 : index
    %c0_87 = arith.constant 0 : index
    %c19 = arith.constant 19 : index
    %c0_88 = arith.constant 0 : index
    %77 = vector.load %arg1[%c0_86, %c0_87, %c19, %c0_88] : memref<1x1x42x32xf32, #tpu.memory_space<vmem>>, vector<1x1x18x32xf32>
    %78 = vector.shape_cast %77 : vector<1x1x18x32xf32> to vector<18x32xf32>
    %c13_89 = arith.constant 13 : index
    %c0_90 = arith.constant 0 : index
    %c0_91 = arith.constant 0 : index
    %79 = vector.load %arg2[%c13_89, %c0_90, %c0_91] : memref<16x32x64xf32, #tpu.memory_space<vmem>>, vector<1x32x64xf32>
    %80 = vector.shape_cast %79 : vector<1x32x64xf32> to vector<32x64xf32>
    %cst_92 = arith.constant dense<0.000000e+00> : vector<18x64xf32>
    %81 = tpu.matmul %78, %80, %cst_92 {dimension_numbers = #tpu.dot_dimension_numbers<[1], [0], [0], [1], [0, 0, 1, 1], [], []>} : vector<18x32xf32>, vector<32x64xf32>, vector<18x64xf32> -> vector<18x64xf32>
    %82 = arith.addf %76, %81 : vector<18x64xf32>
    %c0_93 = arith.constant 0 : index
    %c0_94 = arith.constant 0 : index
    %c20 = arith.constant 20 : index
    %c0_95 = arith.constant 0 : index
    %83 = vector.load %arg1[%c0_93, %c0_94, %c20, %c0_95] : memref<1x1x42x32xf32, #tpu.memory_space<vmem>>, vector<1x1x18x32xf32>
    %84 = vector.shape_cast %83 : vector<1x1x18x32xf32> to vector<18x32xf32>
    %c14_96 = arith.constant 14 : index
    %c0_97 = arith.constant 0 : index
    %c0_98 = arith.constant 0 : index
    %85 = vector.load %arg2[%c14_96, %c0_97, %c0_98] : memref<16x32x64xf32, #tpu.memory_space<vmem>>, vector<1x32x64xf32>
    %86 = vector.shape_cast %85 : vector<1x32x64xf32> to vector<32x64xf32>
    %cst_99 = arith.constant dense<0.000000e+00> : vector<18x64xf32>
    %87 = tpu.matmul %84, %86, %cst_99 {dimension_numbers = #tpu.dot_dimension_numbers<[1], [0], [0], [1], [0, 0, 1, 1], [], []>} : vector<18x32xf32>, vector<32x64xf32>, vector<18x64xf32> -> vector<18x64xf32>
    %88 = arith.addf %82, %87 : vector<18x64xf32>
    %c0_100 = arith.constant 0 : index
    %c0_101 = arith.constant 0 : index
    %c21 = arith.constant 21 : index
    %c0_102 = arith.constant 0 : index
    %89 = vector.load %arg1[%c0_100, %c0_101, %c21, %c0_102] : memref<1x1x42x32xf32, #tpu.memory_space<vmem>>, vector<1x1x18x32xf32>
    %90 = vector.shape_cast %89 : vector<1x1x18x32xf32> to vector<18x32xf32>
    %c15_103 = arith.constant 15 : index
    %c0_104 = arith.constant 0 : index
    %c0_105 = arith.constant 0 : index
    %91 = vector.load %arg2[%c15_103, %c0_104, %c0_105] : memref<16x32x64xf32, #tpu.memory_space<vmem>>, vector<1x32x64xf32>
    %92 = vector.shape_cast %91 : vector<1x32x64xf32> to vector<32x64xf32>
    %cst_106 = arith.constant dense<0.000000e+00> : vector<18x64xf32>
    %93 = tpu.matmul %90, %92, %cst_106 {dimension_numbers = #tpu.dot_dimension_numbers<[1], [0], [0], [1], [0, 0, 1, 1], [], []>} : vector<18x32xf32>, vector<32x64xf32>, vector<18x64xf32> -> vector<18x64xf32>
    %94 = arith.addf %88, %93 : vector<18x64xf32>
    %c0_107 = arith.constant 0 : index
    %c0_108 = arith.constant 0 : index
    %95 = vector.load %arg3[%c0_107, %c0_108] : memref<1x64xf32, #tpu.memory_space<vmem>>, vector<1x64xf32>
    %96 = vector.broadcast %95 : vector<1x64xf32> to vector<18x64xf32>
    %97 = arith.addf %94, %96 : vector<18x64xf32>
    %98 = tpu.iota {dimensions = array<i32: 0>} : vector<18x64xi32>
    %c6_i32 = arith.constant 6 : i32
    %c0_i32 = arith.constant 0 : i32
    %99 = arith.cmpi eq, %c6_i32, %c0_i32 : i32
    %c1_i32 = arith.constant 1 : i32
    %100 = arith.select %99, %c1_i32, %c6_i32 : i32
    %101 = vector.broadcast %100 : i32 to vector<18x64xi32>
    %102 = arith.remsi %98, %101 : vector<18x64xi32>
    %c0_i32_109 = arith.constant 0 : i32
    %103 = vector.broadcast %c0_i32_109 : i32 to vector<18x64xi32>
    %104 = arith.cmpi ne, %102, %103 : vector<18x64xi32>
    %c0_i32_110 = arith.constant 0 : i32
    %105 = vector.broadcast %c0_i32_110 : i32 to vector<18x64xi32>
    %106 = arith.cmpi slt, %102, %105 : vector<18x64xi32>
    %c0_i32_111 = arith.constant 0 : i32
    %107 = arith.cmpi slt, %100, %c0_i32_111 : i32
    %108 = vector.broadcast %107 : i1 to vector<18x64xi1>
    %109 = vector.broadcast %108 : vector<18x64xi1> to vector<18x64xi1>
    %110 = arith.xori %106, %109 : vector<18x64xi1>
    %111 = arith.andi %110, %104 : vector<18x64xi1>
    %112 = vector.broadcast %100 : i32 to vector<18x64xi32>
    %113 = arith.addi %102, %112 : vector<18x64xi32>
    %114 = arith.select %111, %113, %102 : vector<18x64xi1>, vector<18x64xi32>
    %c3_i32 = arith.constant 3 : i32
    %115 = vector.broadcast %c3_i32 : i32 to vector<18x64xi32>
    %116 = arith.cmpi slt, %114, %115 : vector<18x64xi32>
    %cst_112 = arith.constant 0.000000e+00 : f32
    %117 = vector.broadcast %cst_112 : f32 to vector<18x64xf32>
    %118 = arith.select %116, %97, %117 : vector<18x64xi1>, vector<18x64xf32>
    %cst_113 = arith.constant dense<0.000000e+00> : vector<64xf32>
    %119 = vector.multi_reduction <add>, %118, %cst_113 [0] : vector<18x64xf32> to vector<64xf32>
    %120 = vector.shape_cast %119 : vector<64xf32> to vector<1x64xf32>
    %cst_114 = arith.constant 0.111111112 : f32
    %121 = vector.broadcast %cst_114 : f32 to vector<1x64xf32>
    %122 = arith.mulf %120, %121 : vector<1x64xf32>
    %123 = vector.broadcast %122 : vector<1x64xf32> to vector<18x64xf32>
    %124 = arith.subf %97, %123 : vector<18x64xf32>
    %125 = arith.mulf %124, %124 : vector<18x64xf32>
    %cst_115 = arith.constant 0.000000e+00 : f32
    %126 = vector.broadcast %cst_115 : f32 to vector<18x64xf32>
    %127 = arith.select %116, %125, %126 : vector<18x64xi1>, vector<18x64xf32>
    %cst_116 = arith.constant dense<0.000000e+00> : vector<64xf32>
    %128 = vector.multi_reduction <add>, %127, %cst_116 [0] : vector<18x64xf32> to vector<64xf32>
    %129 = vector.shape_cast %128 : vector<64xf32> to vector<1x64xf32>
    %cst_117 = arith.constant 0.111111112 : f32
    %130 = vector.broadcast %cst_117 : f32 to vector<1x64xf32>
    %131 = arith.mulf %129, %130 : vector<1x64xf32>
    %cst_118 = arith.constant 9.99999974E-6 : f32
    %132 = vector.broadcast %cst_118 : f32 to vector<1x64xf32>
    %133 = arith.addf %131, %132 : vector<1x64xf32>
    %134 = math.rsqrt %133 : vector<1x64xf32>
    %135 = vector.broadcast %134 : vector<1x64xf32> to vector<18x64xf32>
    %136 = arith.mulf %124, %135 : vector<18x64xf32>
    %cst_119 = arith.constant 0.000000e+00 : f32
    %137 = vector.broadcast %cst_119 : f32 to vector<18x64xf32>
    %138 = arith.cmpf oge, %136, %137 : vector<18x64xf32>
    %cst_120 = arith.constant 2.000000e-01 : f32
    %139 = vector.broadcast %cst_120 : f32 to vector<18x64xf32>
    %140 = arith.mulf %139, %136 : vector<18x64xf32>
    %141 = arith.select %138, %136, %140 : vector<18x64xi1>, vector<18x64xf32>
    %c0_121 = arith.constant 0 : index
    %c0_122 = arith.constant 0 : index
    %c0_123 = arith.constant 0 : index
    %142 = vector.load %arg4[%c0_121, %c0_122, %c0_123] : memref<1x18x64xf32, #tpu.memory_space<vmem>>, vector<1x18x64xf32>
    %143 = vector.shape_cast %142 : vector<1x18x64xf32> to vector<18x64xf32>
    %144 = vector.shape_cast %141 : vector<18x64xf32> to vector<1x18x64xf32>
    tpu.vector_store %arg4[%c0_121, %c0_122, %c0_123], %144 {strides = array<i32>} : memref<1x18x64xf32, #tpu.memory_space<vmem>>, vector<1x18x64xf32>,
    return
  }
  func.func @transform_0(%arg0: i32) -> (i32, i32, i32, i32) {
    %c0_i32 = arith.constant 0 : i32
    %c0_i32_0 = arith.constant 0 : i32
    %c0_i32_1 = arith.constant 0 : i32
    %c0_i32_2 = arith.constant 0 : i32
    return %arg0, %c0_i32, %c0_i32_0, %c0_i32_1 : i32, i32, i32, i32
  }
  func.func @transform_1(%arg0: i32) -> (i32, i32, i32) {
    %c0_i32 = arith.constant 0 : i32
    %c0_i32_0 = arith.constant 0 : i32
    %c0_i32_1 = arith.constant 0 : i32
    %c0_i32_2 = arith.constant 0 : i32
    return %c0_i32, %c0_i32_0, %c0_i32_1 : i32, i32, i32
  }
  func.func @transform_2(%arg0: i32) -> (i32, i32) {
    %c0_i32 = arith.constant 0 : i32
    %c0_i32_0 = arith.constant 0 : i32
    %c0_i32_1 = arith.constant 0 : i32
    return %c0_i32, %c0_i32_0 : i32, i32
  }
  func.func @transform_3(%arg0: i32) -> (i32, i32, i32) {
    %c0_i32 = arith.constant 0 : i32
    %c0_i32_0 = arith.constant 0 : i32
    %c0_i32_1 = arith.constant 0 : i32
    return %arg0, %c0_i32, %c0_i32_0 : i32, i32, i32
  }
}

module attributes {stable_mosaic.version = 11 : i64} {
  func.func @_conv_fused_kernel(%arg0: i32, %arg1: memref<1x1x30x64xf32, #tpu.memory_space<vmem>>, %arg2: memref<16x64x8xf32, #tpu.memory_space<vmem>>, %arg3: memref<1x8xf32, #tpu.memory_space<vmem>>, %arg4: memref<1x1x8xf32, #tpu.memory_space<vmem>>) attributes {dimension_semantics = [#tpu.dimension_semantics<parallel>], iteration_bounds = array<i64: 2>, scalar_prefetch = 0 : i64, scratch_operands = 0 : i64, tpu.core_type = #tpu.core_type<tc>, window_params = [{transform_indices = @transform_0, window_bounds = array<i64: 1, 1, 30, 64>}, {pipeline_mode = #tpu.pipeline_mode<synchronous>, transform_indices = @transform_1, window_bounds = array<i64: 16, 64, 8>}, {pipeline_mode = #tpu.pipeline_mode<synchronous>, transform_indices = @transform_2, window_bounds = array<i64: 1, 8>}, {transform_indices = @transform_3, window_bounds = array<i64: 1, 1, 8>}]} {
    %c0 = arith.constant 0 : index
    %c0_0 = arith.constant 0 : index
    %c0_1 = arith.constant 0 : index
    %c0_2 = arith.constant 0 : index
    %0 = vector.load %arg1[%c0, %c0_0, %c0_1, %c0_2] : memref<1x1x30x64xf32, #tpu.memory_space<vmem>>, vector<1x1x10x64xf32>
    %1 = vector.shape_cast %0 : vector<1x1x10x64xf32> to vector<10x64xf32>
    %c0_3 = arith.constant 0 : index
    %c0_4 = arith.constant 0 : index
    %c0_5 = arith.constant 0 : index
    %2 = vector.load %arg2[%c0_3, %c0_4, %c0_5] : memref<16x64x8xf32, #tpu.memory_space<vmem>>, vector<1x64x8xf32>
    %3 = vector.shape_cast %2 : vector<1x64x8xf32> to vector<64x8xf32>
    %cst = arith.constant dense<0.000000e+00> : vector<10x8xf32>
    %4 = tpu.matmul %1, %3, %cst {dimension_numbers = #tpu.dot_dimension_numbers<[1], [0], [0], [1], [0, 0, 1, 1], [], []>} : vector<10x64xf32>, vector<64x8xf32>, vector<10x8xf32> -> vector<10x8xf32>
    %c0_6 = arith.constant 0 : index
    %c0_7 = arith.constant 0 : index
    %c1 = arith.constant 1 : index
    %c0_8 = arith.constant 0 : index
    %5 = vector.load %arg1[%c0_6, %c0_7, %c1, %c0_8] : memref<1x1x30x64xf32, #tpu.memory_space<vmem>>, vector<1x1x10x64xf32>
    %6 = vector.shape_cast %5 : vector<1x1x10x64xf32> to vector<10x64xf32>
    %c1_9 = arith.constant 1 : index
    %c0_10 = arith.constant 0 : index
    %c0_11 = arith.constant 0 : index
    %7 = vector.load %arg2[%c1_9, %c0_10, %c0_11] : memref<16x64x8xf32, #tpu.memory_space<vmem>>, vector<1x64x8xf32>
    %8 = vector.shape_cast %7 : vector<1x64x8xf32> to vector<64x8xf32>
    %cst_12 = arith.constant dense<0.000000e+00> : vector<10x8xf32>
    %9 = tpu.matmul %6, %8, %cst_12 {dimension_numbers = #tpu.dot_dimension_numbers<[1], [0], [0], [1], [0, 0, 1, 1], [], []>} : vector<10x64xf32>, vector<64x8xf32>, vector<10x8xf32> -> vector<10x8xf32>
    %10 = arith.addf %4, %9 : vector<10x8xf32>
    %c0_13 = arith.constant 0 : index
    %c0_14 = arith.constant 0 : index
    %c2 = arith.constant 2 : index
    %c0_15 = arith.constant 0 : index
    %11 = vector.load %arg1[%c0_13, %c0_14, %c2, %c0_15] : memref<1x1x30x64xf32, #tpu.memory_space<vmem>>, vector<1x1x10x64xf32>
    %12 = vector.shape_cast %11 : vector<1x1x10x64xf32> to vector<10x64xf32>
    %c2_16 = arith.constant 2 : index
    %c0_17 = arith.constant 0 : index
    %c0_18 = arith.constant 0 : index
    %13 = vector.load %arg2[%c2_16, %c0_17, %c0_18] : memref<16x64x8xf32, #tpu.memory_space<vmem>>, vector<1x64x8xf32>
    %14 = vector.shape_cast %13 : vector<1x64x8xf32> to vector<64x8xf32>
    %cst_19 = arith.constant dense<0.000000e+00> : vector<10x8xf32>
    %15 = tpu.matmul %12, %14, %cst_19 {dimension_numbers = #tpu.dot_dimension_numbers<[1], [0], [0], [1], [0, 0, 1, 1], [], []>} : vector<10x64xf32>, vector<64x8xf32>, vector<10x8xf32> -> vector<10x8xf32>
    %16 = arith.addf %10, %15 : vector<10x8xf32>
    %c0_20 = arith.constant 0 : index
    %c0_21 = arith.constant 0 : index
    %c3 = arith.constant 3 : index
    %c0_22 = arith.constant 0 : index
    %17 = vector.load %arg1[%c0_20, %c0_21, %c3, %c0_22] : memref<1x1x30x64xf32, #tpu.memory_space<vmem>>, vector<1x1x10x64xf32>
    %18 = vector.shape_cast %17 : vector<1x1x10x64xf32> to vector<10x64xf32>
    %c3_23 = arith.constant 3 : index
    %c0_24 = arith.constant 0 : index
    %c0_25 = arith.constant 0 : index
    %19 = vector.load %arg2[%c3_23, %c0_24, %c0_25] : memref<16x64x8xf32, #tpu.memory_space<vmem>>, vector<1x64x8xf32>
    %20 = vector.shape_cast %19 : vector<1x64x8xf32> to vector<64x8xf32>
    %cst_26 = arith.constant dense<0.000000e+00> : vector<10x8xf32>
    %21 = tpu.matmul %18, %20, %cst_26 {dimension_numbers = #tpu.dot_dimension_numbers<[1], [0], [0], [1], [0, 0, 1, 1], [], []>} : vector<10x64xf32>, vector<64x8xf32>, vector<10x8xf32> -> vector<10x8xf32>
    %22 = arith.addf %16, %21 : vector<10x8xf32>
    %c0_27 = arith.constant 0 : index
    %c0_28 = arith.constant 0 : index
    %c5 = arith.constant 5 : index
    %c0_29 = arith.constant 0 : index
    %23 = vector.load %arg1[%c0_27, %c0_28, %c5, %c0_29] : memref<1x1x30x64xf32, #tpu.memory_space<vmem>>, vector<1x1x10x64xf32>
    %24 = vector.shape_cast %23 : vector<1x1x10x64xf32> to vector<10x64xf32>
    %c4 = arith.constant 4 : index
    %c0_30 = arith.constant 0 : index
    %c0_31 = arith.constant 0 : index
    %25 = vector.load %arg2[%c4, %c0_30, %c0_31] : memref<16x64x8xf32, #tpu.memory_space<vmem>>, vector<1x64x8xf32>
    %26 = vector.shape_cast %25 : vector<1x64x8xf32> to vector<64x8xf32>
    %cst_32 = arith.constant dense<0.000000e+00> : vector<10x8xf32>
    %27 = tpu.matmul %24, %26, %cst_32 {dimension_numbers = #tpu.dot_dimension_numbers<[1], [0], [0], [1], [0, 0, 1, 1], [], []>} : vector<10x64xf32>, vector<64x8xf32>, vector<10x8xf32> -> vector<10x8xf32>
    %28 = arith.addf %22, %27 : vector<10x8xf32>
    %c0_33 = arith.constant 0 : index
    %c0_34 = arith.constant 0 : index
    %c6 = arith.constant 6 : index
    %c0_35 = arith.constant 0 : index
    %29 = vector.load %arg1[%c0_33, %c0_34, %c6, %c0_35] : memref<1x1x30x64xf32, #tpu.memory_space<vmem>>, vector<1x1x10x64xf32>
    %30 = vector.shape_cast %29 : vector<1x1x10x64xf32> to vector<10x64xf32>
    %c5_36 = arith.constant 5 : index
    %c0_37 = arith.constant 0 : index
    %c0_38 = arith.constant 0 : index
    %31 = vector.load %arg2[%c5_36, %c0_37, %c0_38] : memref<16x64x8xf32, #tpu.memory_space<vmem>>, vector<1x64x8xf32>
    %32 = vector.shape_cast %31 : vector<1x64x8xf32> to vector<64x8xf32>
    %cst_39 = arith.constant dense<0.000000e+00> : vector<10x8xf32>
    %33 = tpu.matmul %30, %32, %cst_39 {dimension_numbers = #tpu.dot_dimension_numbers<[1], [0], [0], [1], [0, 0, 1, 1], [], []>} : vector<10x64xf32>, vector<64x8xf32>, vector<10x8xf32> -> vector<10x8xf32>
    %34 = arith.addf %28, %33 : vector<10x8xf32>
    %c0_40 = arith.constant 0 : index
    %c0_41 = arith.constant 0 : index
    %c7 = arith.constant 7 : index
    %c0_42 = arith.constant 0 : index
    %35 = vector.load %arg1[%c0_40, %c0_41, %c7, %c0_42] : memref<1x1x30x64xf32, #tpu.memory_space<vmem>>, vector<1x1x10x64xf32>
    %36 = vector.shape_cast %35 : vector<1x1x10x64xf32> to vector<10x64xf32>
    %c6_43 = arith.constant 6 : index
    %c0_44 = arith.constant 0 : index
    %c0_45 = arith.constant 0 : index
    %37 = vector.load %arg2[%c6_43, %c0_44, %c0_45] : memref<16x64x8xf32, #tpu.memory_space<vmem>>, vector<1x64x8xf32>
    %38 = vector.shape_cast %37 : vector<1x64x8xf32> to vector<64x8xf32>
    %cst_46 = arith.constant dense<0.000000e+00> : vector<10x8xf32>
    %39 = tpu.matmul %36, %38, %cst_46 {dimension_numbers = #tpu.dot_dimension_numbers<[1], [0], [0], [1], [0, 0, 1, 1], [], []>} : vector<10x64xf32>, vector<64x8xf32>, vector<10x8xf32> -> vector<10x8xf32>
    %40 = arith.addf %34, %39 : vector<10x8xf32>
    %c0_47 = arith.constant 0 : index
    %c0_48 = arith.constant 0 : index
    %c8 = arith.constant 8 : index
    %c0_49 = arith.constant 0 : index
    %41 = vector.load %arg1[%c0_47, %c0_48, %c8, %c0_49] : memref<1x1x30x64xf32, #tpu.memory_space<vmem>>, vector<1x1x10x64xf32>
    %42 = vector.shape_cast %41 : vector<1x1x10x64xf32> to vector<10x64xf32>
    %c7_50 = arith.constant 7 : index
    %c0_51 = arith.constant 0 : index
    %c0_52 = arith.constant 0 : index
    %43 = vector.load %arg2[%c7_50, %c0_51, %c0_52] : memref<16x64x8xf32, #tpu.memory_space<vmem>>, vector<1x64x8xf32>
    %44 = vector.shape_cast %43 : vector<1x64x8xf32> to vector<64x8xf32>
    %cst_53 = arith.constant dense<0.000000e+00> : vector<10x8xf32>
    %45 = tpu.matmul %42, %44, %cst_53 {dimension_numbers = #tpu.dot_dimension_numbers<[1], [0], [0], [1], [0, 0, 1, 1], [], []>} : vector<10x64xf32>, vector<64x8xf32>, vector<10x8xf32> -> vector<10x8xf32>
    %46 = arith.addf %40, %45 : vector<10x8xf32>
    %c0_54 = arith.constant 0 : index
    %c0_55 = arith.constant 0 : index
    %c10 = arith.constant 10 : index
    %c0_56 = arith.constant 0 : index
    %47 = vector.load %arg1[%c0_54, %c0_55, %c10, %c0_56] : memref<1x1x30x64xf32, #tpu.memory_space<vmem>>, vector<1x1x10x64xf32>
    %48 = vector.shape_cast %47 : vector<1x1x10x64xf32> to vector<10x64xf32>
    %c8_57 = arith.constant 8 : index
    %c0_58 = arith.constant 0 : index
    %c0_59 = arith.constant 0 : index
    %49 = vector.load %arg2[%c8_57, %c0_58, %c0_59] : memref<16x64x8xf32, #tpu.memory_space<vmem>>, vector<1x64x8xf32>
    %50 = vector.shape_cast %49 : vector<1x64x8xf32> to vector<64x8xf32>
    %cst_60 = arith.constant dense<0.000000e+00> : vector<10x8xf32>
    %51 = tpu.matmul %48, %50, %cst_60 {dimension_numbers = #tpu.dot_dimension_numbers<[1], [0], [0], [1], [0, 0, 1, 1], [], []>} : vector<10x64xf32>, vector<64x8xf32>, vector<10x8xf32> -> vector<10x8xf32>
    %52 = arith.addf %46, %51 : vector<10x8xf32>
    %c0_61 = arith.constant 0 : index
    %c0_62 = arith.constant 0 : index
    %c11 = arith.constant 11 : index
    %c0_63 = arith.constant 0 : index
    %53 = vector.load %arg1[%c0_61, %c0_62, %c11, %c0_63] : memref<1x1x30x64xf32, #tpu.memory_space<vmem>>, vector<1x1x10x64xf32>
    %54 = vector.shape_cast %53 : vector<1x1x10x64xf32> to vector<10x64xf32>
    %c9 = arith.constant 9 : index
    %c0_64 = arith.constant 0 : index
    %c0_65 = arith.constant 0 : index
    %55 = vector.load %arg2[%c9, %c0_64, %c0_65] : memref<16x64x8xf32, #tpu.memory_space<vmem>>, vector<1x64x8xf32>
    %56 = vector.shape_cast %55 : vector<1x64x8xf32> to vector<64x8xf32>
    %cst_66 = arith.constant dense<0.000000e+00> : vector<10x8xf32>
    %57 = tpu.matmul %54, %56, %cst_66 {dimension_numbers = #tpu.dot_dimension_numbers<[1], [0], [0], [1], [0, 0, 1, 1], [], []>} : vector<10x64xf32>, vector<64x8xf32>, vector<10x8xf32> -> vector<10x8xf32>
    %58 = arith.addf %52, %57 : vector<10x8xf32>
    %c0_67 = arith.constant 0 : index
    %c0_68 = arith.constant 0 : index
    %c12 = arith.constant 12 : index
    %c0_69 = arith.constant 0 : index
    %59 = vector.load %arg1[%c0_67, %c0_68, %c12, %c0_69] : memref<1x1x30x64xf32, #tpu.memory_space<vmem>>, vector<1x1x10x64xf32>
    %60 = vector.shape_cast %59 : vector<1x1x10x64xf32> to vector<10x64xf32>
    %c10_70 = arith.constant 10 : index
    %c0_71 = arith.constant 0 : index
    %c0_72 = arith.constant 0 : index
    %61 = vector.load %arg2[%c10_70, %c0_71, %c0_72] : memref<16x64x8xf32, #tpu.memory_space<vmem>>, vector<1x64x8xf32>
    %62 = vector.shape_cast %61 : vector<1x64x8xf32> to vector<64x8xf32>
    %cst_73 = arith.constant dense<0.000000e+00> : vector<10x8xf32>
    %63 = tpu.matmul %60, %62, %cst_73 {dimension_numbers = #tpu.dot_dimension_numbers<[1], [0], [0], [1], [0, 0, 1, 1], [], []>} : vector<10x64xf32>, vector<64x8xf32>, vector<10x8xf32> -> vector<10x8xf32>
    %64 = arith.addf %58, %63 : vector<10x8xf32>
    %c0_74 = arith.constant 0 : index
    %c0_75 = arith.constant 0 : index
    %c13 = arith.constant 13 : index
    %c0_76 = arith.constant 0 : index
    %65 = vector.load %arg1[%c0_74, %c0_75, %c13, %c0_76] : memref<1x1x30x64xf32, #tpu.memory_space<vmem>>, vector<1x1x10x64xf32>
    %66 = vector.shape_cast %65 : vector<1x1x10x64xf32> to vector<10x64xf32>
    %c11_77 = arith.constant 11 : index
    %c0_78 = arith.constant 0 : index
    %c0_79 = arith.constant 0 : index
    %67 = vector.load %arg2[%c11_77, %c0_78, %c0_79] : memref<16x64x8xf32, #tpu.memory_space<vmem>>, vector<1x64x8xf32>
    %68 = vector.shape_cast %67 : vector<1x64x8xf32> to vector<64x8xf32>
    %cst_80 = arith.constant dense<0.000000e+00> : vector<10x8xf32>
    %69 = tpu.matmul %66, %68, %cst_80 {dimension_numbers = #tpu.dot_dimension_numbers<[1], [0], [0], [1], [0, 0, 1, 1], [], []>} : vector<10x64xf32>, vector<64x8xf32>, vector<10x8xf32> -> vector<10x8xf32>
    %70 = arith.addf %64, %69 : vector<10x8xf32>
    %c0_81 = arith.constant 0 : index
    %c0_82 = arith.constant 0 : index
    %c15 = arith.constant 15 : index
    %c0_83 = arith.constant 0 : index
    %71 = vector.load %arg1[%c0_81, %c0_82, %c15, %c0_83] : memref<1x1x30x64xf32, #tpu.memory_space<vmem>>, vector<1x1x10x64xf32>
    %72 = vector.shape_cast %71 : vector<1x1x10x64xf32> to vector<10x64xf32>
    %c12_84 = arith.constant 12 : index
    %c0_85 = arith.constant 0 : index
    %c0_86 = arith.constant 0 : index
    %73 = vector.load %arg2[%c12_84, %c0_85, %c0_86] : memref<16x64x8xf32, #tpu.memory_space<vmem>>, vector<1x64x8xf32>
    %74 = vector.shape_cast %73 : vector<1x64x8xf32> to vector<64x8xf32>
    %cst_87 = arith.constant dense<0.000000e+00> : vector<10x8xf32>
    %75 = tpu.matmul %72, %74, %cst_87 {dimension_numbers = #tpu.dot_dimension_numbers<[1], [0], [0], [1], [0, 0, 1, 1], [], []>} : vector<10x64xf32>, vector<64x8xf32>, vector<10x8xf32> -> vector<10x8xf32>
    %76 = arith.addf %70, %75 : vector<10x8xf32>
    %c0_88 = arith.constant 0 : index
    %c0_89 = arith.constant 0 : index
    %c16 = arith.constant 16 : index
    %c0_90 = arith.constant 0 : index
    %77 = vector.load %arg1[%c0_88, %c0_89, %c16, %c0_90] : memref<1x1x30x64xf32, #tpu.memory_space<vmem>>, vector<1x1x10x64xf32>
    %78 = vector.shape_cast %77 : vector<1x1x10x64xf32> to vector<10x64xf32>
    %c13_91 = arith.constant 13 : index
    %c0_92 = arith.constant 0 : index
    %c0_93 = arith.constant 0 : index
    %79 = vector.load %arg2[%c13_91, %c0_92, %c0_93] : memref<16x64x8xf32, #tpu.memory_space<vmem>>, vector<1x64x8xf32>
    %80 = vector.shape_cast %79 : vector<1x64x8xf32> to vector<64x8xf32>
    %cst_94 = arith.constant dense<0.000000e+00> : vector<10x8xf32>
    %81 = tpu.matmul %78, %80, %cst_94 {dimension_numbers = #tpu.dot_dimension_numbers<[1], [0], [0], [1], [0, 0, 1, 1], [], []>} : vector<10x64xf32>, vector<64x8xf32>, vector<10x8xf32> -> vector<10x8xf32>
    %82 = arith.addf %76, %81 : vector<10x8xf32>
    %c0_95 = arith.constant 0 : index
    %c0_96 = arith.constant 0 : index
    %c17 = arith.constant 17 : index
    %c0_97 = arith.constant 0 : index
    %83 = vector.load %arg1[%c0_95, %c0_96, %c17, %c0_97] : memref<1x1x30x64xf32, #tpu.memory_space<vmem>>, vector<1x1x10x64xf32>
    %84 = vector.shape_cast %83 : vector<1x1x10x64xf32> to vector<10x64xf32>
    %c14 = arith.constant 14 : index
    %c0_98 = arith.constant 0 : index
    %c0_99 = arith.constant 0 : index
    %85 = vector.load %arg2[%c14, %c0_98, %c0_99] : memref<16x64x8xf32, #tpu.memory_space<vmem>>, vector<1x64x8xf32>
    %86 = vector.shape_cast %85 : vector<1x64x8xf32> to vector<64x8xf32>
    %cst_100 = arith.constant dense<0.000000e+00> : vector<10x8xf32>
    %87 = tpu.matmul %84, %86, %cst_100 {dimension_numbers = #tpu.dot_dimension_numbers<[1], [0], [0], [1], [0, 0, 1, 1], [], []>} : vector<10x64xf32>, vector<64x8xf32>, vector<10x8xf32> -> vector<10x8xf32>
    %88 = arith.addf %82, %87 : vector<10x8xf32>
    %c0_101 = arith.constant 0 : index
    %c0_102 = arith.constant 0 : index
    %c18 = arith.constant 18 : index
    %c0_103 = arith.constant 0 : index
    %89 = vector.load %arg1[%c0_101, %c0_102, %c18, %c0_103] : memref<1x1x30x64xf32, #tpu.memory_space<vmem>>, vector<1x1x10x64xf32>
    %90 = vector.shape_cast %89 : vector<1x1x10x64xf32> to vector<10x64xf32>
    %c15_104 = arith.constant 15 : index
    %c0_105 = arith.constant 0 : index
    %c0_106 = arith.constant 0 : index
    %91 = vector.load %arg2[%c15_104, %c0_105, %c0_106] : memref<16x64x8xf32, #tpu.memory_space<vmem>>, vector<1x64x8xf32>
    %92 = vector.shape_cast %91 : vector<1x64x8xf32> to vector<64x8xf32>
    %cst_107 = arith.constant dense<0.000000e+00> : vector<10x8xf32>
    %93 = tpu.matmul %90, %92, %cst_107 {dimension_numbers = #tpu.dot_dimension_numbers<[1], [0], [0], [1], [0, 0, 1, 1], [], []>} : vector<10x64xf32>, vector<64x8xf32>, vector<10x8xf32> -> vector<10x8xf32>
    %94 = arith.addf %88, %93 : vector<10x8xf32>
    %c0_108 = arith.constant 0 : index
    %c0_109 = arith.constant 0 : index
    %95 = vector.load %arg3[%c0_108, %c0_109] : memref<1x8xf32, #tpu.memory_space<vmem>>, vector<1x8xf32>
    %96 = vector.broadcast %95 : vector<1x8xf32> to vector<10x8xf32>
    %97 = arith.addf %94, %96 : vector<10x8xf32>
    %98 = tpu.iota {dimensions = array<i32: 0>} : vector<10x8xi32>
    %c5_i32 = arith.constant 5 : i32
    %c0_i32 = arith.constant 0 : i32
    %99 = arith.cmpi eq, %c5_i32, %c0_i32 : i32
    %c1_i32 = arith.constant 1 : i32
    %100 = arith.select %99, %c1_i32, %c5_i32 : i32
    %101 = vector.broadcast %100 : i32 to vector<10x8xi32>
    %102 = arith.remsi %98, %101 : vector<10x8xi32>
    %c0_i32_110 = arith.constant 0 : i32
    %103 = vector.broadcast %c0_i32_110 : i32 to vector<10x8xi32>
    %104 = arith.cmpi ne, %102, %103 : vector<10x8xi32>
    %c0_i32_111 = arith.constant 0 : i32
    %105 = vector.broadcast %c0_i32_111 : i32 to vector<10x8xi32>
    %106 = arith.cmpi slt, %102, %105 : vector<10x8xi32>
    %c0_i32_112 = arith.constant 0 : i32
    %107 = arith.cmpi slt, %100, %c0_i32_112 : i32
    %108 = vector.broadcast %107 : i1 to vector<10x8xi1>
    %109 = vector.broadcast %108 : vector<10x8xi1> to vector<10x8xi1>
    %110 = arith.xori %106, %109 : vector<10x8xi1>
    %111 = arith.andi %110, %104 : vector<10x8xi1>
    %112 = vector.broadcast %100 : i32 to vector<10x8xi32>
    %113 = arith.addi %102, %112 : vector<10x8xi32>
    %114 = arith.select %111, %113, %102 : vector<10x8xi1>, vector<10x8xi32>
    %c2_i32 = arith.constant 2 : i32
    %115 = vector.broadcast %c2_i32 : i32 to vector<10x8xi32>
    %116 = arith.cmpi slt, %114, %115 : vector<10x8xi32>
    %cst_113 = arith.constant 0.000000e+00 : f32
    %117 = vector.broadcast %cst_113 : f32 to vector<10x8xf32>
    %118 = arith.select %116, %97, %117 : vector<10x8xi1>, vector<10x8xf32>
    %cst_114 = arith.constant dense<0.000000e+00> : vector<8xf32>
    %119 = vector.multi_reduction <add>, %118, %cst_114 [0] : vector<10x8xf32> to vector<8xf32>
    %120 = vector.shape_cast %119 : vector<8xf32> to vector<1x8xf32>
    %cst_115 = arith.constant 2.500000e-01 : f32
    %121 = vector.broadcast %cst_115 : f32 to vector<1x8xf32>
    %122 = arith.mulf %120, %121 : vector<1x8xf32>
    %c0_116 = arith.constant 0 : index
    %c0_117 = arith.constant 0 : index
    %c0_118 = arith.constant 0 : index
    %123 = vector.load %arg4[%c0_116, %c0_117, %c0_118] : memref<1x1x8xf32, #tpu.memory_space<vmem>>, vector<1x1x8xf32>
    %124 = vector.shape_cast %123 : vector<1x1x8xf32> to vector<1x8xf32>
    %125 = vector.shape_cast %122 : vector<1x8xf32> to vector<1x1x8xf32>
    tpu.vector_store %arg4[%c0_116, %c0_117, %c0_118], %125 {strides = array<i32>} : memref<1x1x8xf32, #tpu.memory_space<vmem>>, vector<1x1x8xf32>,
    return
  }
  func.func @transform_0(%arg0: i32) -> (i32, i32, i32, i32) {
    %c0_i32 = arith.constant 0 : i32
    %c0_i32_0 = arith.constant 0 : i32
    %c0_i32_1 = arith.constant 0 : i32
    %c0_i32_2 = arith.constant 0 : i32
    return %arg0, %c0_i32, %c0_i32_0, %c0_i32_1 : i32, i32, i32, i32
  }
  func.func @transform_1(%arg0: i32) -> (i32, i32, i32) {
    %c0_i32 = arith.constant 0 : i32
    %c0_i32_0 = arith.constant 0 : i32
    %c0_i32_1 = arith.constant 0 : i32
    %c0_i32_2 = arith.constant 0 : i32
    return %c0_i32, %c0_i32_0, %c0_i32_1 : i32, i32, i32
  }
  func.func @transform_2(%arg0: i32) -> (i32, i32) {
    %c0_i32 = arith.constant 0 : i32
    %c0_i32_0 = arith.constant 0 : i32
    %c0_i32_1 = arith.constant 0 : i32
    return %c0_i32, %c0_i32_0 : i32, i32
  }
  func.func @transform_3(%arg0: i32) -> (i32, i32, i32) {
    %c0_i32 = arith.constant 0 : i32
    %c0_i32_0 = arith.constant 0 : i32
    %c0_i32_1 = arith.constant 0 : i32
    return %arg0, %c0_i32, %c0_i32_0 : i32, i32, i32
  }
}

</mosaic_0001>

<bundles_post_ra>
// kernel: discriminator_forward.5
= control target key start
LH: loop header
LB: loop body
LE: loop exit
PB: predicated region body
PF: predicated region fallthrough
CT: control target
= control target key end

     0   :  { %s9273_s12 = smov 0   ;;  %s11303_s0 = inlined_call_operand.vmem [shape: f32[2,4,306,8], index: 0, kind: input, shape index: {}]   ;;  %s11304_s1 = inlined_call_operand.vmem [shape: f32[16,8,8], index: 1, kind: input, shape index: {}]   ;;  %s11305_s2 = inlined_call_operand.vmem [shape: f32[1,8], index: 2, kind: input, shape index: {}]   ;;  %s11306_s3 = inlined_call_operand.vmem [shape: f32[2,272,8], index: 3, kind: output, shape index: {}]  }
   0x1 LB: > { %s6850_s13 = sadd.s32 4294967295, %s9251_s12   ;;  %p6854_p0 = scmp.ge.s32.totalorder %s9251_s12, 1  ;;  %s9251_s12 = sphi %s9273_s12, %s13_s12  }
   0x2   : > { %p137_p1 = scmp.lt.s32.totalorder %s9251_s12, 3 }
   0x4   : > { %p138_p2 = pnand %p6854_p0, %p137_p1 }
   0x5   : > { %p161_p3 = scmp.lt.s32.totalorder (!%p138_p2), %s6850_s13, 1 }
   0x6   : > { %141 = sbr.rel (%p138_p2) target bundleno = 763 (0x2fb), region = 32 }
   0xb   : > { %v6891_v0 = vld [vmem:[%s11304_s1 + $0x8] sm:$0xff]  ;;  %v205_v1 = vld [vmem:[%s11304_s1] sm:$0xff]  ;;  %v6960_v2 = vld [vmem:[%s11304_s1 + $0x10] sm:$0xff]  ;;  %s11308_s13 = smov (!%p161_p3, %s6850_s13), 1  ;;  %vm243_vm0 = vcmask 64512  }
   0xc   : > { %8387 = vmatprep.subr.mxu0 %v6891_v0  ;;  %8440 = vmatprep.subr.mxu1 %v205_v1  ;;  %v7029_v3 = vld [vmem:[%s11304_s1 + $0x18] sm:$0xff]  ;;  %s9235_s22 = smul.u32 1248, %s11308_s13  ;;  %v9314_v10 = vld [vmem:[%s11304_s1 + $0x20] sm:$0xff]  ;;  %v9319_v11 = vld [vmem:[%s11304_s1 + $0x28] sm:$0xff] }
   0xd   : > { %8388 = vmatpush3.msra.mxu0 %v6891_v0  ;;  %8441 = vmatpush3.msra.mxu1 %v205_v1  ;;  %s9236_s27 = smul.u32 272, %s11308_s13 }
   0xe   : > { %8493 = vmatprep.subr.mxu0 %v6960_v2  ;;  %8546 = vmatprep.subr.mxu1 %v7029_v3  ;;  %s9299_s25 = scalar_lea.vmem %s11303_s0, %s9235_s22 }
   0xf   : > { %v6857_v4 = vld [vmem:[%s9299_s25 + $0x138] sm:$0xff]  ;;  %v171_v5 = vld [vmem:[%s9299_s25] sm:$0xff]  ;;  %v172_v7 = vld [vmem:[%s9299_s25 + $0x8] sm:$0xff]  ;;  %s11166_s30 = scalar_lea.vmem %s11306_s3, %s9236_s27 }
  0x10   : > { %v6858_v6 = vld [vmem:[%s9299_s25 + $0x140] sm:$0xff]  ;;  %8389 = vmatprep.mubr.msk.f32.mxu0 %vm243_vm0, %v6857_v4  ;;  %8442 = vmatprep.mubr.msk.f32.mxu1 %vm243_vm0, %v171_v5  ;;  %v6859_v8 = vld [vmem:[%s9299_s25 + $0x148] sm:$0xff]  ;;  %v173_v9 = vld [vmem:[%s9299_s25 + $0x10] sm:$0xff] }
  0x11   : > { %8390 = vmatmul.mubr.msk.f32.vlgmr.msra.gmra.mxu0 %vm243_vm0, %v6858_v6  ;;  %8443 = vmatmul.mubr.msk.f32.vlgmr.msra.gmra.mxu1 %vm243_vm0, %v172_v7  ;;  %v6860_v12 = vld [vmem:[%s9299_s25 + $0x150] sm:$0xff]  ;;  %v174_v13 = vld [vmem:[%s9299_s25 + $0x18] sm:$0xff]  ;;  %v175_v15 = vld [vmem:[%s9299_s25 + $0x20] sm:$0xff] }
  0x12   : > { %8494 = vmatpush3.msra.mxu0 %v6960_v2  ;;  %8547 = vmatpush3.msra.mxu1 %v7029_v3  ;;  %v6861_v14 = vld [vmem:[%s9299_s25 + $0x158] sm:$0xff]  ;;  %v6862_v16 = vld [vmem:[%s9299_s25 + $0x160] sm:$0xff]  ;;  %v176_v17 = vld [vmem:[%s9299_s25 + $0x28] sm:$0xff] }
  0x13   : > { %8392 = vmatprep.mubr.msk.f32.mxu0 %vm243_vm0, %v6859_v8  ;;  %8445 = vmatprep.mubr.msk.f32.mxu1 %vm243_vm0, %v173_v9  ;;  %v6863_v18 = vld [vmem:[%s9299_s25 + $0x168] sm:$0xff]  ;;  %v177_v19 = vld [vmem:[%s9299_s25 + $0x30] sm:$0xff]  ;;  %v178_v21 = vld [vmem:[%s9299_s25 + $0x38] sm:$0xff] }
  0x14   : > { %8599 = vmatprep.subr.mxu0 %v9314_v10  ;;  %8652 = vmatprep.subr.mxu1 %v9319_v11  ;;  %v6864_v20 = vld [vmem:[%s9299_s25 + $0x170] sm:$0xff]  ;;  %v6865_v22 = vld [vmem:[%s9299_s25 + $0x178] sm:$0xff]  ;;  %v179_v23 = vld [vmem:[%s9299_s25 + $0x40] sm:$0xff] }
  0x15   : > { %8393 = vmatmul.mubr.msk.f32.gmra.mxu0 %vm243_vm0, %v6860_v12  ;;  %8446 = vmatmul.mubr.msk.f32.gmra.mxu1 %vm243_vm0, %v174_v13  ;;  %v6866_v24 = vld [vmem:[%s9299_s25 + $0x180] sm:$0xff]  ;;  %v180_v25 = vld [vmem:[%s9299_s25 + $0x48] sm:$0xff]  ;;  %v181_v27 = vld [vmem:[%s9299_s25 + $0x50] sm:$0xff] }
  0x16   : > { %8395 = vmatprep.mubr.msk.f32.mxu0 %vm243_vm0, %v6861_v14  ;;  %8448 = vmatprep.mubr.msk.f32.mxu1 %vm243_vm0, %v175_v15  ;;  %v6867_v26 = vld [vmem:[%s9299_s25 + $0x188] sm:$0xff]  ;;  %v6868_v28 = vld [vmem:[%s9299_s25 + $0x190] sm:$0xff]  ;;  %v182_v29 = vld [vmem:[%s9299_s25 + $0x58] sm:$0xff] }
  0x17   : > { %v6869_v30 = vld [vmem:[%s9299_s25 + $0x198] sm:$0xff]  ;;  %v183_v31 = vld [vmem:[%s9299_s25 + $0x60] sm:$0xff]  ;;  %v184_v33 = vld [vmem:[%s9299_s25 + $0x68] sm:$0xff] }
  0x18   : > { %v6870_v32 = vld [vmem:[%s9299_s25 + $0x1a0] sm:$0xff]  ;;  %v6871_v34 = vld [vmem:[%s9299_s25 + $0x1a8] sm:$0xff]  ;;  %v185_v35 = vld [vmem:[%s9299_s25 + $0x70] sm:$0xff] }
  0x19   : > { %8396 = vmatmul.mubr.msk.f32.gmra.mxu0 %vm243_vm0, %v6862_v16  ;;  %8449 = vmatmul.mubr.msk.f32.gmra.mxu1 %vm243_vm0, %v176_v17  ;;  %v6872_v36 = vld [vmem:[%s9299_s25 + $0x1b0] sm:$0xff]  ;;  %v186_v37 = vld [vmem:[%s9299_s25 + $0x78] sm:$0xff]  ;;  %v187_v39 = vld [vmem:[%s9299_s25 + $0x80] sm:$0xff] }
  0x1a   : > { %8398 = vmatprep.mubr.msk.f32.mxu0 %vm243_vm0, %v6863_v18  ;;  %8451 = vmatprep.mubr.msk.f32.mxu1 %vm243_vm0, %v177_v19  ;;  %v6873_v38 = vld [vmem:[%s9299_s25 + $0x1b8] sm:$0xff]  ;;  %v6874_v40 = vld [vmem:[%s9299_s25 + $0x1c0] sm:$0xff]  ;;  %v188_v41 = vld [vmem:[%s9299_s25 + $0x88] sm:$0xff] }
  0x1b   : > { %v6875_v42 = vld [vmem:[%s9299_s25 + $0x1c8] sm:$0xff]  ;;  %v189_v43 = vld [vmem:[%s9299_s25 + $0x90] sm:$0xff]  ;;  %v190_v45 = vld [vmem:[%s9299_s25 + $0x98] sm:$0xff] }
  0x1c   : > { %v6876_v44 = vld [vmem:[%s9299_s25 + $0x1d0] sm:$0xff]  ;;  %v6877_v46 = vld [vmem:[%s9299_s25 + $0x1d8] sm:$0xff]  ;;  %v191_v47 = vld [vmem:[%s9299_s25 + $0xa0] sm:$0xff] }
  0x1d   : > { %8399 = vmatmul.mubr.msk.f32.gmra.mxu0 %vm243_vm0, %v6864_v20  ;;  %8452 = vmatmul.mubr.msk.f32.gmra.mxu1 %vm243_vm0, %v178_v21  ;;  %v6878_v48 = vld [vmem:[%s9299_s25 + $0x1e0] sm:$0xff]  ;;  %v192_v49 = vld [vmem:[%s9299_s25 + $0xa8] sm:$0xff]  ;;  %v193_v51 = vld [vmem:[%s9299_s25 + $0xb0] sm:$0xff] }
  0x1e   : > { %8401 = vmatprep.mubr.msk.f32.mxu0 %vm243_vm0, %v6865_v22  ;;  %8454 = vmatprep.mubr.msk.f32.mxu1 %vm243_vm0, %v179_v23  ;;  %v6879_v50 = vld [vmem:[%s9299_s25 + $0x1e8] sm:$0xff]  ;;  %v6880_v52 = vld [vmem:[%s9299_s25 + $0x1f0] sm:$0xff]  ;;  %v194_v53 = vld [vmem:[%s9299_s25 + $0xb8] sm:$0xff] }
  0x1f   : > { %v6881_v54 = vld [vmem:[%s9299_s25 + $0x1f8] sm:$0xff]  ;;  %v195_v55 = vld [vmem:[%s9299_s25 + $0xc0] sm:$0xff]  ;;  %v196_v57 = vld [vmem:[%s9299_s25 + $0xc8] sm:$0xff] }
  0x20   : > { %v6882_v56 = vld [vmem:[%s9299_s25 + $0x200] sm:$0xff]  ;;  %v6883_v58 = vld [vmem:[%s9299_s25 + $0x208] sm:$0xff]  ;;  %v197_v59 = vld [vmem:[%s9299_s25 + $0xd0] sm:$0xff] }
  0x21   : > { %8402 = vmatmul.mubr.msk.f32.gmra.mxu0 %vm243_vm0, %v6866_v24  ;;  %8455 = vmatmul.mubr.msk.f32.gmra.mxu1 %vm243_vm0, %v180_v25  ;;  %v6884_v60 = vld [vmem:[%s9299_s25 + $0x210] sm:$0xff]  ;;  %v198_v61 = vld [vmem:[%s9299_s25 + $0xd8] sm:$0xff]  ;;  %v199_v63 = vld [vmem:[%s9299_s25 + $0xe0] sm:$0xff] }
  0x22   : > { %8404 = vmatprep.mubr.msk.f32.mxu0 %vm243_vm0, %v6867_v26  ;;  %8457 = vmatprep.mubr.msk.f32.mxu1 %vm243_vm0, %v181_v27  ;;  %v6885_v62 = vld [vmem:[%s9299_s25 + $0x218] sm:$0xff]  ;;  %v6886_v0 = vld [vmem:[%s9299_s25 + $0x220] sm:$0xff]  ;;  %v200_v1 = vld [vmem:[%s9299_s25 + $0xe8] sm:$0xff] }
  0x23   : > { %v6887_v2 = vld [vmem:[%s9299_s25 + $0x228] sm:$0xff]  ;;  %v201_v3 = vld [vmem:[%s9299_s25 + $0xf0] sm:$0xff]  ;;  %v202_v5 = vld [vmem:[%s9299_s25 + $0xf8] sm:$0xff] }
  0x24   : > { %v6888_v4 = vld [vmem:[%s9299_s25 + $0x230] sm:$0xff]  ;;  %v6889_v6 = vld [vmem:[%s9299_s25 + $0x238] sm:$0xff]  ;;  %v203_v7 = vld [vmem:[%s9299_s25 + $0x100] sm:$0xff] }
  0x25   : > { %8405 = vmatmul.mubr.msk.f32.gmra.mxu0 %vm243_vm0, %v6868_v28  ;;  %8458 = vmatmul.mubr.msk.f32.gmra.mxu1 %vm243_vm0, %v182_v29  ;;  %v6890_v8 = vld [vmem:[%s9299_s25 + $0x240] sm:$0xff]  ;;  %v204_v9 = vld [vmem:[%s9299_s25 + $0x108] sm:$0xff]  ;;  %v920_v16 = vld [vmem:[%s9299_s25 + $0x11] sm:$0xff] }
  0x26   : > { %8407 = vmatprep.mubr.msk.f32.mxu0 %vm243_vm0, %v6869_v30  ;;  %8460 = vmatprep.mubr.msk.f32.mxu1 %vm243_vm0, %v183_v31  ;;  %v918_v12 = vld [vmem:[%s9299_s25 + $0x1] sm:$0xff]  ;;  %v6995_v13 = vld [vmem:[%s9299_s25 + $0x139] sm:$0xff]  ;;  %v919_v14 = vld [vmem:[%s9299_s25 + $0x9] sm:$0xff] }
  0x27   : > { %v6996_v15 = vld [vmem:[%s9299_s25 + $0x141] sm:$0xff]  ;;  %v6997_v17 = vld [vmem:[%s9299_s25 + $0x149] sm:$0xff]  ;;  %v9467_v19 = vld [vmem:[%s11304_s1 + $0x38] sm:$0xff] }
  0x28   : > { %v9462_v18 = vld [vmem:[%s11304_s1 + $0x30] sm:$0xff]  ;;  %v921_v20 = vld [vmem:[%s9299_s25 + $0x19] sm:$0xff]  ;;  %v922_v22 = vld [vmem:[%s9299_s25 + $0x21] sm:$0xff] }
  0x29   : > { %8408 = vmatmul.mubr.msk.f32.gmra.mxu0 %vm243_vm0, %v6870_v32  ;;  %8461 = vmatmul.mubr.msk.f32.gmra.mxu1 %vm243_vm0, %v184_v33  ;;  %v6998_v21 = vld [vmem:[%s9299_s25 + $0x151] sm:$0xff]  ;;  %v6999_v23 = vld [vmem:[%s9299_s25 + $0x159] sm:$0xff]  ;;  %v7001_v25 = vld [vmem:[%s9299_s25 + $0x169] sm:$0xff] }
  0x2a   : > { %8410 = vmatprep.mubr.msk.f32.mxu0 %vm243_vm0, %v6871_v34  ;;  %8463 = vmatprep.mubr.msk.f32.mxu1 %vm243_vm0, %v185_v35  ;;  %v924_v24 = vld [vmem:[%s9299_s25 + $0x31] sm:$0xff]  ;;  %v925_v26 = vld [vmem:[%s9299_s25 + $0x39] sm:$0xff]  ;;  %v926_v28 = vld [vmem:[%s9299_s25 + $0x41] sm:$0xff] }
  0x2b   : > { %v7002_v27 = vld [vmem:[%s9299_s25 + $0x171] sm:$0xff]  ;;  %v7003_v29 = vld [vmem:[%s9299_s25 + $0x179] sm:$0xff]  ;;  %v927_v30 = vld [vmem:[%s9299_s25 + $0x49] sm:$0xff] }
  0x2c   : > { %v7004_v31 = vld [vmem:[%s9299_s25 + $0x181] sm:$0xff]  ;;  %v928_v32 = vld [vmem:[%s9299_s25 + $0x51] sm:$0xff]  ;;  %v7005_v33 = vld [vmem:[%s9299_s25 + $0x189] sm:$0xff] }
  0x2d   : > { %8411 = vmatmul.mubr.msk.f32.gmra.mxu0 %vm243_vm0, %v6872_v36  ;;  %8464 = vmatmul.mubr.msk.f32.gmra.mxu1 %vm243_vm0, %v186_v37  ;;  %v929_v34 = vld [vmem:[%s9299_s25 + $0x59] sm:$0xff]  ;;  %v7006_v35 = vld [vmem:[%s9299_s25 + $0x191] sm:$0xff]  ;;  %v930_v36 = vld [vmem:[%s9299_s25 + $0x61] sm:$0xff] }
  0x2e   : > { %8413 = vmatprep.mubr.msk.f32.mxu0 %vm243_vm0, %v6873_v38  ;;  %8466 = vmatprep.mubr.msk.f32.mxu1 %vm243_vm0, %v187_v39  ;;  %v7007_v37 = vld [vmem:[%s9299_s25 + $0x199] sm:$0xff]  ;;  %v931_v38 = vld [vmem:[%s9299_s25 + $0x69] sm:$0xff]  ;;  %v7008_v39 = vld [vmem:[%s9299_s25 + $0x1a1] sm:$0xff] }
  0x31   : > { %8414 = vmatmul.mubr.msk.f32.gmra.mxu0 %vm243_vm0, %v6874_v40  ;;  %8467 = vmatmul.mubr.msk.f32.gmra.mxu1 %vm243_vm0, %v188_v41  ;;  %v932_v40 = vld [vmem:[%s9299_s25 + $0x71] sm:$0xff]  ;;  %v7009_v41 = vld [vmem:[%s9299_s25 + $0x1a9] sm:$0xff] }
  0x32   : > { %8416 = vmatprep.mubr.msk.f32.mxu0 %vm243_vm0, %v6875_v42  ;;  %8469 = vmatprep.mubr.msk.f32.mxu1 %vm243_vm0, %v189_v43  ;;  %v933_v42 = vld [vmem:[%s9299_s25 + $0x79] sm:$0xff]  ;;  %v7010_v43 = vld [vmem:[%s9299_s25 + $0x1b1] sm:$0xff] }
  0x35   : > { %8417 = vmatmul.mubr.msk.f32.gmra.mxu0 %vm243_vm0, %v6876_v44  ;;  %8470 = vmatmul.mubr.msk.f32.gmra.mxu1 %vm243_vm0, %v190_v45  ;;  %v934_v44 = vld [vmem:[%s9299_s25 + $0x81] sm:$0xff]  ;;  %v7011_v45 = vld [vmem:[%s9299_s25 + $0x1b9] sm:$0xff] }
  0x36   : > { %8419 = vmatprep.mubr.msk.f32.mxu0 %vm243_vm0, %v6877_v46  ;;  %8472 = vmatprep.mubr.msk.f32.mxu1 %vm243_vm0, %v191_v47  ;;  %v935_v46 = vld [vmem:[%s9299_s25 + $0x89] sm:$0xff]  ;;  %v7012_v47 = vld [vmem:[%s9299_s25 + $0x1c1] sm:$0xff] }
  0x39   : > { %8420 = vmatmul.mubr.msk.f32.gmra.mxu0 %vm243_vm0, %v6878_v48  ;;  %8473 = vmatmul.mubr.msk.f32.gmra.mxu1 %vm243_vm0, %v192_v49  ;;  %v936_v48 = vld [vmem:[%s9299_s25 + $0x91] sm:$0xff]  ;;  %v7013_v49 = vld [vmem:[%s9299_s25 + $0x1c9] sm:$0xff] }
  0x3a   : > { %8422 = vmatprep.mubr.msk.f32.mxu0 %vm243_vm0, %v6879_v50  ;;  %8475 = vmatprep.mubr.msk.f32.mxu1 %vm243_vm0, %v193_v51  ;;  %v937_v50 = vld [vmem:[%s9299_s25 + $0x99] sm:$0xff]  ;;  %v7014_v51 = vld [vmem:[%s9299_s25 + $0x1d1] sm:$0xff] }
  0x3d   : > { %8423 = vmatmul.mubr.msk.f32.gmra.mxu0 %vm243_vm0, %v6880_v52  ;;  %8476 = vmatmul.mubr.msk.f32.gmra.mxu1 %vm243_vm0, %v194_v53  ;;  %v938_v52 = vld [vmem:[%s9299_s25 + $0xa1] sm:$0xff]  ;;  %v7015_v53 = vld [vmem:[%s9299_s25 + $0x1d9] sm:$0xff] }
  0x3e   : > { %8425 = vmatprep.mubr.msk.f32.mxu0 %vm243_vm0, %v6881_v54  ;;  %8478 = vmatprep.mubr.msk.f32.mxu1 %vm243_vm0, %v195_v55  ;;  %v939_v54 = vld [vmem:[%s9299_s25 + $0xa9] sm:$0xff]  ;;  %v7016_v55 = vld [vmem:[%s9299_s25 + $0x1e1] sm:$0xff] }
  0x41   : > { %8426 = vmatmul.mubr.msk.f32.gmra.mxu0 %vm243_vm0, %v6882_v56  ;;  %8479 = vmatmul.mubr.msk.f32.gmra.mxu1 %vm243_vm0, %v196_v57  ;;  %v940_v56 = vld [vmem:[%s9299_s25 + $0xb1] sm:$0xff]  ;;  %v7017_v57 = vld [vmem:[%s9299_s25 + $0x1e9] sm:$0xff] }
  0x42   : > { %8428 = vmatprep.mubr.msk.f32.mxu0 %vm243_vm0, %v6883_v58  ;;  %8481 = vmatprep.mubr.msk.f32.mxu1 %vm243_vm0, %v197_v59  ;;  %v941_v58 = vld [vmem:[%s9299_s25 + $0xb9] sm:$0xff]  ;;  %v7018_v59 = vld [vmem:[%s9299_s25 + $0x1f1] sm:$0xff] }
  0x45   : > { %8429 = vmatmul.mubr.msk.f32.gmra.mxu0 %vm243_vm0, %v6884_v60  ;;  %8482 = vmatmul.mubr.msk.f32.gmra.mxu1 %vm243_vm0, %v198_v61  ;;  %v942_v60 = vld [vmem:[%s9299_s25 + $0xc1] sm:$0xff]  ;;  %v7019_v61 = vld [vmem:[%s9299_s25 + $0x1f9] sm:$0xff] }
  0x46   : > { %8431 = vmatprep.mubr.msk.f32.mxu0 %vm243_vm0, %v6885_v62  ;;  %8484 = vmatprep.mubr.msk.f32.mxu1 %vm243_vm0, %v199_v63  ;;  %v943_v62 = vld [vmem:[%s9299_s25 + $0xc9] sm:$0xff]  ;;  %v7020_v63 = vld [vmem:[%s9299_s25 + $0x201] sm:$0xff] }
  0x49   : > { %8432 = vmatmul.mubr.msk.f32.gmra.mxu0 %vm243_vm0, %v6886_v0  ;;  %8485 = vmatmul.mubr.msk.f32.gmra.mxu1 %vm243_vm0, %v200_v1  ;;  %v944_v0 = vld [vmem:[%s9299_s25 + $0xd1] sm:$0xff]  ;;  %v7021_v1 = vld [vmem:[%s9299_s25 + $0x209] sm:$0xff] }
  0x4a   : > { %8434 = vmatprep.mubr.msk.f32.mxu0 %vm243_vm0, %v6887_v2  ;;  %8487 = vmatprep.mubr.msk.f32.mxu1 %vm243_vm0, %v201_v3  ;;  %v945_v2 = vld [vmem:[%s9299_s25 + $0xd9] sm:$0xff]  ;;  %v7022_v3 = vld [vmem:[%s9299_s25 + $0x211] sm:$0xff] }
  0x4d   : > { %8435 = vmatmul.mubr.msk.f32.gmra.mxu0 %vm243_vm0, %v6888_v4  ;;  %8488 = vmatmul.mubr.msk.f32.gmra.mxu1 %vm243_vm0, %v202_v5  ;;  %v946_v4 = vld [vmem:[%s9299_s25 + $0xe1] sm:$0xff]  ;;  %v7023_v5 = vld [vmem:[%s9299_s25 + $0x219] sm:$0xff] }
  0x4e   : > { %8437 = vmatprep.mubr.msk.f32.mxu0 %vm243_vm0, %v6889_v6  ;;  %8490 = vmatprep.mubr.msk.f32.mxu1 %vm243_vm0, %v203_v7  ;;  %v947_v6 = vld [vmem:[%s9299_s25 + $0xe9] sm:$0xff]  ;;  %v7024_v7 = vld [vmem:[%s9299_s25 + $0x221] sm:$0xff] }
  0x51   : > { %8438 = vmatmul.mubr.msk.f32.gmra.mxu0 %vm243_vm0, %v6890_v8  ;;  %8491 = vmatmul.mubr.msk.f32.gmra.mxu1 %vm243_vm0, %v204_v9  ;;  %v948_v8 = vld [vmem:[%s9299_s25 + $0xf1] sm:$0xff]  ;;  %v7025_v9 = vld [vmem:[%s9299_s25 + $0x229] sm:$0xff] }
  0x52   : > { %8495 = vmatprep.mubr.msk.f32.mxu0 %vm243_vm0, %v918_v12  ;;  %8548 = vmatprep.mubr.msk.f32.mxu1 %vm243_vm0, %v6995_v13  ;;  %v949_v12 = vld [vmem:[%s9299_s25 + $0xf9] sm:$0xff]  ;;  %v7026_v13 = vld [vmem:[%s9299_s25 + $0x231] sm:$0xff] }
  0x55   : > { %8496 = vmatmul.mubr.msk.f32.vlgmr.msra.gmra.mxu0 %vm243_vm0, %v919_v14  ;;  %8549 = vmatmul.mubr.msk.f32.vlgmr.msra.gmra.mxu1 %vm243_vm0, %v6996_v15  ;;  %v950_v14 = vld [vmem:[%s9299_s25 + $0x101] sm:$0xff]  ;;  %v7027_v15 = vld [vmem:[%s9299_s25 + $0x239] sm:$0xff] }
  0x56   : > { %8600 = vmatpush3.msra.mxu0 %v9314_v10  ;;  %8653 = vmatpush3.msra.mxu1 %v9319_v11  ;;  %v923_v10 = vld [vmem:[%s9299_s25 + $0x29] sm:$0xff]  ;;  %v7000_v11 = vld [vmem:[%s9299_s25 + $0x161] sm:$0xff] }
  0x57   : > { %8498 = vmatprep.mubr.msk.f32.mxu0 %vm243_vm0, %v920_v16  ;;  %8551 = vmatprep.mubr.msk.f32.mxu1 %vm243_vm0, %v6997_v17  ;;  %v951_v16 = vld [vmem:[%s9299_s25 + $0x109] sm:$0xff]  ;;  %v7028_v17 = vld [vmem:[%s9299_s25 + $0x241] sm:$0xff] }
  0x58   : > { %8705 = vmatprep.subr.mxu0 %v9462_v18  ;;  %8758 = vmatprep.subr.mxu1 %v9467_v19 }
  0x59   : > { %8499 = vmatmul.mubr.msk.f32.gmra.mxu0 %vm243_vm0, %v921_v20  ;;  %8552 = vmatmul.mubr.msk.f32.gmra.mxu1 %vm243_vm0, %v6998_v21  ;;  %v7064_v20 = vld [vmem:[%s9299_s25 + $0x270] sm:$0xff]  ;;  %v7133_v21 = vld [vmem:[%s9299_s25 + $0x3a8] sm:$0xff] }
  0x5a   : > { %8501 = vmatprep.mubr.msk.f32.mxu0 %vm243_vm0, %v922_v22  ;;  %8554 = vmatprep.mubr.msk.f32.mxu1 %vm243_vm0, %v6999_v23  ;;  %v7065_v22 = vld [vmem:[%s9299_s25 + $0x278] sm:$0xff]  ;;  %v7134_v23 = vld [vmem:[%s9299_s25 + $0x3b0] sm:$0xff] }
  0x5d   : > { %8502 = vmatmul.mubr.msk.f32.gmra.mxu0 %vm243_vm0, %v923_v10  ;;  %8555 = vmatmul.mubr.msk.f32.gmra.mxu1 %vm243_vm0, %v7000_v11  ;;  %v7066_v10 = vld [vmem:[%s9299_s25 + $0x280] sm:$0xff]  ;;  %v7135_v11 = vld [vmem:[%s9299_s25 + $0x3b8] sm:$0xff] }
  0x5e   : > { %8504 = vmatprep.mubr.msk.f32.mxu0 %vm243_vm0, %v924_v24  ;;  %8557 = vmatprep.mubr.msk.f32.mxu1 %vm243_vm0, %v7001_v25  ;;  %v9612_v24 = vld [vmem:[%s11304_s1 + $0x40] sm:$0xff]  ;;  %v9617_v25 = vld [vmem:[%s11304_s1 + $0x48] sm:$0xff] }
  0x61   : > { %8505 = vmatmul.mubr.msk.f32.gmra.mxu0 %vm243_vm0, %v925_v26  ;;  %8558 = vmatmul.mubr.msk.f32.gmra.mxu1 %vm243_vm0, %v7002_v27  ;;  %v7067_v26 = vld [vmem:[%s9299_s25 + $0x288] sm:$0xff]  ;;  %v7136_v27 = vld [vmem:[%s9299_s25 + $0x3c0] sm:$0xff] }
  0x62   : > { %8507 = vmatprep.mubr.msk.f32.mxu0 %vm243_vm0, %v926_v28  ;;  %8560 = vmatprep.mubr.msk.f32.mxu1 %vm243_vm0, %v7003_v29  ;;  %v7068_v28 = vld [vmem:[%s9299_s25 + $0x290] sm:$0xff]  ;;  %v7137_v29 = vld [vmem:[%s9299_s25 + $0x3c8] sm:$0xff] }
  0x65   : > { %8508 = vmatmul.mubr.msk.f32.gmra.mxu0 %vm243_vm0, %v927_v30  ;;  %8561 = vmatmul.mubr.msk.f32.gmra.mxu1 %vm243_vm0, %v7004_v31  ;;  %v7070_v30 = vld [vmem:[%s9299_s25 + $0x2a0] sm:$0xff]  ;;  %v7139_v31 = vld [vmem:[%s9299_s25 + $0x3d8] sm:$0xff] }
  0x66   : > { %8510 = vmatprep.mubr.msk.f32.mxu0 %vm243_vm0, %v928_v32  ;;  %8563 = vmatprep.mubr.msk.f32.mxu1 %vm243_vm0, %v7005_v33  ;;  %v7071_v32 = vld [vmem:[%s9299_s25 + $0x2a8] sm:$0xff]  ;;  %v7140_v33 = vld [vmem:[%s9299_s25 + $0x3e0] sm:$0xff] }
  0x69   : > { %8511 = vmatmul.mubr.msk.f32.gmra.mxu0 %vm243_vm0, %v929_v34  ;;  %8564 = vmatmul.mubr.msk.f32.gmra.mxu1 %vm243_vm0, %v7006_v35  ;;  %v7072_v34 = vld [vmem:[%s9299_s25 + $0x2b0] sm:$0xff]  ;;  %v7141_v35 = vld [vmem:[%s9299_s25 + $0x3e8] sm:$0xff] }
  0x6a   : > { %8513 = vmatprep.mubr.msk.f32.mxu0 %vm243_vm0, %v930_v36  ;;  %8566 = vmatprep.mubr.msk.f32.mxu1 %vm243_vm0, %v7007_v37  ;;  %v7073_v36 = vld [vmem:[%s9299_s25 + $0x2b8] sm:$0xff]  ;;  %v7142_v37 = vld [vmem:[%s9299_s25 + $0x3f0] sm:$0xff] }
  0x6d   : > { %8514 = vmatmul.mubr.msk.f32.gmra.mxu0 %vm243_vm0, %v931_v38  ;;  %8567 = vmatmul.mubr.msk.f32.gmra.mxu1 %vm243_vm0, %v7008_v39  ;;  %v7074_v38 = vld [vmem:[%s9299_s25 + $0x2c0] sm:$0xff]  ;;  %v7143_v39 = vld [vmem:[%s9299_s25 + $0x3f8] sm:$0xff] }
  0x6e   : > { %8516 = vmatprep.mubr.msk.f32.mxu0 %vm243_vm0, %v932_v40  ;;  %8569 = vmatprep.mubr.msk.f32.mxu1 %vm243_vm0, %v7009_v41  ;;  %v7075_v40 = vld [vmem:[%s9299_s25 + $0x2c8] sm:$0xff]  ;;  %v7144_v41 = vld [vmem:[%s9299_s25 + $0x400] sm:$0xff] }
  0x71   : > { %8517 = vmatmul.mubr.msk.f32.gmra.mxu0 %vm243_vm0, %v933_v42  ;;  %8570 = vmatmul.mubr.msk.f32.gmra.mxu1 %vm243_vm0, %v7010_v43  ;;  %v7076_v42 = vld [vmem:[%s9299_s25 + $0x2d0] sm:$0xff]  ;;  %v7145_v43 = vld [vmem:[%s9299_s25 + $0x408] sm:$0xff] }
  0x72   : > { %8519 = vmatprep.mubr.msk.f32.mxu0 %vm243_vm0, %v934_v44  ;;  %8572 = vmatprep.mubr.msk.f32.mxu1 %vm243_vm0, %v7011_v45  ;;  %v7077_v44 = vld [vmem:[%s9299_s25 + $0x2d8] sm:$0xff]  ;;  %v7146_v45 = vld [vmem:[%s9299_s25 + $0x410] sm:$0xff] }
  0x75   : > { %8520 = vmatmul.mubr.msk.f32.gmra.mxu0 %vm243_vm0, %v935_v46  ;;  %8573 = vmatmul.mubr.msk.f32.gmra.mxu1 %vm243_vm0, %v7012_v47  ;;  %v7078_v46 = vld [vmem:[%s9299_s25 + $0x2e0] sm:$0xff]  ;;  %v7147_v47 = vld [vmem:[%s9299_s25 + $0x418] sm:$0xff] }
  0x76   : > { %8522 = vmatprep.mubr.msk.f32.mxu0 %vm243_vm0, %v936_v48  ;;  %8575 = vmatprep.mubr.msk.f32.mxu1 %vm243_vm0, %v7013_v49  ;;  %v7079_v48 = vld [vmem:[%s9299_s25 + $0x2e8] sm:$0xff]  ;;  %v7148_v49 = vld [vmem:[%s9299_s25 + $0x420] sm:$0xff] }
  0x79   : > { %8523 = vmatmul.mubr.msk.f32.gmra.mxu0 %vm243_vm0, %v937_v50  ;;  %8576 = vmatmul.mubr.msk.f32.gmra.mxu1 %vm243_vm0, %v7014_v51  ;;  %v7080_v50 = vld [vmem:[%s9299_s25 + $0x2f0] sm:$0xff]  ;;  %v7149_v51 = vld [vmem:[%s9299_s25 + $0x428] sm:$0xff] }
  0x7a   : > { %8525 = vmatprep.mubr.msk.f32.mxu0 %vm243_vm0, %v938_v52  ;;  %8578 = vmatprep.mubr.msk.f32.mxu1 %vm243_vm0, %v7015_v53  ;;  %v7081_v52 = vld [vmem:[%s9299_s25 + $0x2f8] sm:$0xff]  ;;  %v7150_v53 = vld [vmem:[%s9299_s25 + $0x430] sm:$0xff] }
  0x7d   : > { %8526 = vmatmul.mubr.msk.f32.gmra.mxu0 %vm243_vm0, %v939_v54  ;;  %8579 = vmatmul.mubr.msk.f32.gmra.mxu1 %vm243_vm0, %v7016_v55  ;;  %v7082_v54 = vld [vmem:[%s9299_s25 + $0x300] sm:$0xff]  ;;  %v7151_v55 = vld [vmem:[%s9299_s25 + $0x438] sm:$0xff] }
  0x7e   : > { %8528 = vmatprep.mubr.msk.f32.mxu0 %vm243_vm0, %v940_v56  ;;  %8581 = vmatprep.mubr.msk.f32.mxu1 %vm243_vm0, %v7017_v57  ;;  %v7083_v56 = vld [vmem:[%s9299_s25 + $0x308] sm:$0xff]  ;;  %v7152_v57 = vld [vmem:[%s9299_s25 + $0x440] sm:$0xff] }
  0x81   : > { %8529 = vmatmul.mubr.msk.f32.gmra.mxu0 %vm243_vm0, %v941_v58  ;;  %8582 = vmatmul.mubr.msk.f32.gmra.mxu1 %vm243_vm0, %v7018_v59  ;;  %v7084_v58 = vld [vmem:[%s9299_s25 + $0x310] sm:$0xff]  ;;  %v7153_v59 = vld [vmem:[%s9299_s25 + $0x448] sm:$0xff] }
  0x82   : > { %8531 = vmatprep.mubr.msk.f32.mxu0 %vm243_vm0, %v942_v60  ;;  %8584 = vmatprep.mubr.msk.f32.mxu1 %vm243_vm0, %v7019_v61  ;;  %v7085_v60 = vld [vmem:[%s9299_s25 + $0x318] sm:$0xff]  ;;  %v7154_v61 = vld [vmem:[%s9299_s25 + $0x450] sm:$0xff] }
  0x85   : > { %8532 = vmatmul.mubr.msk.f32.gmra.mxu0 %vm243_vm0, %v943_v62  ;;  %8585 = vmatmul.mubr.msk.f32.gmra.mxu1 %vm243_vm0, %v7020_v63  ;;  %v7086_v62 = vld [vmem:[%s9299_s25 + $0x320] sm:$0xff]  ;;  %v7155_v63 = vld [vmem:[%s9299_s25 + $0x458] sm:$0xff] }
  0x86   : > { %8534 = vmatprep.mubr.msk.f32.mxu0 %vm243_vm0, %v944_v0  ;;  %8587 = vmatprep.mubr.msk.f32.mxu1 %vm243_vm0, %v7021_v1  ;;  %v7087_v0 = vld [vmem:[%s9299_s25 + $0x328] sm:$0xff]  ;;  %v7156_v1 = vld [vmem:[%s9299_s25 + $0x460] sm:$0xff] }
  0x89   : > { %8535 = vmatmul.mubr.msk.f32.gmra.mxu0 %vm243_vm0, %v945_v2  ;;  %8588 = vmatmul.mubr.msk.f32.gmra.mxu1 %vm243_vm0, %v7022_v3  ;;  %v7088_v2 = vld [vmem:[%s9299_s25 + $0x330] sm:$0xff]  ;;  %v7157_v3 = vld [vmem:[%s9299_s25 + $0x468] sm:$0xff] }
  0x8a   : > { %8537 = vmatprep.mubr.msk.f32.mxu0 %vm243_vm0, %v946_v4  ;;  %8590 = vmatprep.mubr.msk.f32.mxu1 %vm243_vm0, %v7023_v5  ;;  %v7089_v4 = vld [vmem:[%s9299_s25 + $0x338] sm:$0xff]  ;;  %v7158_v5 = vld [vmem:[%s9299_s25 + $0x470] sm:$0xff] }
  0x8d   : > { %8538 = vmatmul.mubr.msk.f32.gmra.mxu0 %vm243_vm0, %v947_v6  ;;  %8591 = vmatmul.mubr.msk.f32.gmra.mxu1 %vm243_vm0, %v7024_v7  ;;  %v7090_v6 = vld [vmem:[%s9299_s25 + $0x340] sm:$0xff]  ;;  %v7159_v7 = vld [vmem:[%s9299_s25 + $0x478] sm:$0xff] }
  0x8e   : > { %8540 = vmatprep.mubr.msk.f32.mxu0 %vm243_vm0, %v948_v8  ;;  %8593 = vmatprep.mubr.msk.f32.mxu1 %vm243_vm0, %v7025_v9  ;;  %v7091_v8 = vld [vmem:[%s9299_s25 + $0x348] sm:$0xff]  ;;  %v7160_v9 = vld [vmem:[%s9299_s25 + $0x480] sm:$0xff] }
  0x91   : > { %8541 = vmatmul.mubr.msk.f32.gmra.mxu0 %vm243_vm0, %v949_v12  ;;  %8594 = vmatmul.mubr.msk.f32.gmra.mxu1 %vm243_vm0, %v7026_v13  ;;  %v7092_v12 = vld [vmem:[%s9299_s25 + $0x350] sm:$0xff]  ;;  %v7161_v13 = vld [vmem:[%s9299_s25 + $0x488] sm:$0xff] }
  0x92   : > { %8543 = vmatprep.mubr.msk.f32.mxu0 %vm243_vm0, %v950_v14  ;;  %8596 = vmatprep.mubr.msk.f32.mxu1 %vm243_vm0, %v7027_v15  ;;  %v7093_v14 = vld [vmem:[%s9299_s25 + $0x358] sm:$0xff]  ;;  %v7162_v15 = vld [vmem:[%s9299_s25 + $0x490] sm:$0xff] }
  0x95   : > { %8544 = vmatmul.mubr.msk.f32.gmra.mxu0 %vm243_vm0, %v951_v16  ;;  %8597 = vmatmul.mubr.msk.f32.gmra.mxu1 %vm243_vm0, %v7028_v17  ;;  %v7094_v16 = vld [vmem:[%s9299_s25 + $0x360] sm:$0xff]  ;;  %v7163_v17 = vld [vmem:[%s9299_s25 + $0x498] sm:$0xff] }
  0x96   : > { %8601 = vmatprep.mubr.msk.f32.mxu0 %vm243_vm0, %v7064_v20  ;;  %8654 = vmatprep.mubr.msk.f32.mxu1 %vm243_vm0, %v7133_v21 }
  0x99   : > { %8602 = vmatmul.mubr.msk.f32.vlgmr.msra.gmra.mxu0 %vm243_vm0, %v7065_v22  ;;  %8655 = vmatmul.mubr.msk.f32.vlgmr.msra.gmra.mxu1 %vm243_vm0, %v7134_v23  ;;  %v7095_v23 = vld [vmem:[%s9299_s25 + $0x368] sm:$0xff] }
  0x9a   : > { %8706 = vmatpush3.msra.mxu0 %v9462_v18  ;;  %8759 = vmatpush3.msra.mxu1 %v9467_v19  ;;  %v7069_v18 = vld [vmem:[%s9299_s25 + $0x298] sm:$0xff]  ;;  %v7138_v19 = vld [vmem:[%s9299_s25 + $0x3d0] sm:$0xff] }
  0x9b   : > { %8604 = vmatprep.mubr.msk.f32.mxu0 %vm243_vm0, %v7066_v10  ;;  %8657 = vmatprep.mubr.msk.f32.mxu1 %vm243_vm0, %v7135_v11  ;;  %v7164_v10 = vld [vmem:[%s9299_s25 + $0x4a0] sm:$0xff] }
  0x9c   : > { %8811 = vmatprep.subr.mxu0 %v9612_v24  ;;  %8864 = vmatprep.subr.mxu1 %v9617_v25 }
  0x9d   : > { %8605 = vmatmul.mubr.msk.f32.gmra.mxu0 %vm243_vm0, %v7067_v26  ;;  %8658 = vmatmul.mubr.msk.f32.gmra.mxu1 %vm243_vm0, %v7136_v27  ;;  %v7096_v27 = vld [vmem:[%s9299_s25 + $0x370] sm:$0xff] }
  0x9e   : > { %8607 = vmatprep.mubr.msk.f32.mxu0 %vm243_vm0, %v7068_v28  ;;  %8660 = vmatprep.mubr.msk.f32.mxu1 %vm243_vm0, %v7137_v29  ;;  %v7165_v28 = vld [vmem:[%s9299_s25 + $0x4a8] sm:$0xff] }
  0xa1   : > { %8608 = vmatmul.mubr.msk.f32.gmra.mxu0 %vm243_vm0, %v7069_v18  ;;  %8661 = vmatmul.mubr.msk.f32.gmra.mxu1 %vm243_vm0, %v7138_v19 }
  0xa2   : > { %8610 = vmatprep.mubr.msk.f32.mxu0 %vm243_vm0, %v7070_v30  ;;  %8663 = vmatprep.mubr.msk.f32.mxu1 %vm243_vm0, %v7139_v31  ;;  %v7097_v31 = vld [vmem:[%s9299_s25 + $0x378] sm:$0xff] }
  0xa5   : > { %8611 = vmatmul.mubr.msk.f32.gmra.mxu0 %vm243_vm0, %v7071_v32  ;;  %8664 = vmatmul.mubr.msk.f32.gmra.mxu1 %vm243_vm0, %v7140_v33  ;;  %v7166_v32 = vld [vmem:[%s9299_s25 + $0x4b0] sm:$0xff] }
  0xa6   : > { %8613 = vmatprep.mubr.msk.f32.mxu0 %vm243_vm0, %v7072_v34  ;;  %8666 = vmatprep.mubr.msk.f32.mxu1 %vm243_vm0, %v7141_v35  ;;  %v7202_v35 = vld [vmem:[%s9299_s25 + $0x271] sm:$0xff] }
  0xa9   : > { %8614 = vmatmul.mubr.msk.f32.gmra.mxu0 %vm243_vm0, %v7073_v36  ;;  %8667 = vmatmul.mubr.msk.f32.gmra.mxu1 %vm243_vm0, %v7142_v37  ;;  %v7271_v36 = vld [vmem:[%s9299_s25 + $0x3a9] sm:$0xff] }
  0xaa   : > { %8616 = vmatprep.mubr.msk.f32.mxu0 %vm243_vm0, %v7074_v38  ;;  %8669 = vmatprep.mubr.msk.f32.mxu1 %vm243_vm0, %v7143_v39 }
  0xad   : > { %8617 = vmatmul.mubr.msk.f32.gmra.mxu0 %vm243_vm0, %v7075_v40  ;;  %8670 = vmatmul.mubr.msk.f32.gmra.mxu1 %vm243_vm0, %v7144_v41  ;;  %v7203_v41 = vld [vmem:[%s9299_s25 + $0x279] sm:$0xff] }
  0xae   : > { %8619 = vmatprep.mubr.msk.f32.mxu0 %vm243_vm0, %v7076_v42  ;;  %8672 = vmatprep.mubr.msk.f32.mxu1 %vm243_vm0, %v7145_v43  ;;  %v7272_v42 = vld [vmem:[%s9299_s25 + $0x3b1] sm:$0xff] }
  0xb1   : > { %8620 = vmatmul.mubr.msk.f32.gmra.mxu0 %vm243_vm0, %v7077_v44  ;;  %8673 = vmatmul.mubr.msk.f32.gmra.mxu1 %vm243_vm0, %v7146_v45 }
  0xb2   : > { %8622 = vmatprep.mubr.msk.f32.mxu0 %vm243_vm0, %v7078_v46  ;;  %8675 = vmatprep.mubr.msk.f32.mxu1 %vm243_vm0, %v7147_v47  ;;  %v7204_v46 = vld [vmem:[%s9299_s25 + $0x281] sm:$0xff]  ;;  %v7273_v47 = vld [vmem:[%s9299_s25 + $0x3b9] sm:$0xff] }
  0xb5   : > { %8623 = vmatmul.mubr.msk.f32.gmra.mxu0 %vm243_vm0, %v7079_v48  ;;  %8676 = vmatmul.mubr.msk.f32.gmra.mxu1 %vm243_vm0, %v7148_v49 }
  0xb6   : > { %8625 = vmatprep.mubr.msk.f32.mxu0 %vm243_vm0, %v7080_v50  ;;  %8678 = vmatprep.mubr.msk.f32.mxu1 %vm243_vm0, %v7149_v51  ;;  %v9774_v50 = vld [vmem:[%s11304_s1 + $0x50] sm:$0xff]  ;;  %v9779_v51 = vld [vmem:[%s11304_s1 + $0x58] sm:$0xff] }
  0xb9   : > { %8626 = vmatmul.mubr.msk.f32.gmra.mxu0 %vm243_vm0, %v7081_v52  ;;  %8679 = vmatmul.mubr.msk.f32.gmra.mxu1 %vm243_vm0, %v7150_v53  ;;  %v7205_v53 = vld [vmem:[%s9299_s25 + $0x289] sm:$0xff] }
  0xba   : > { %8628 = vmatprep.mubr.msk.f32.mxu0 %vm243_vm0, %v7082_v54  ;;  %8681 = vmatprep.mubr.msk.f32.mxu1 %vm243_vm0, %v7151_v55  ;;  %v7274_v54 = vld [vmem:[%s9299_s25 + $0x3c1] sm:$0xff] }
  0xbd   : > { %8629 = vmatmul.mubr.msk.f32.gmra.mxu0 %vm243_vm0, %v7083_v56  ;;  %8682 = vmatmul.mubr.msk.f32.gmra.mxu1 %vm243_vm0, %v7152_v57  ;;  %v7206_v57 = vld [vmem:[%s9299_s25 + $0x291] sm:$0xff] }
  0xbe   : > { %8631 = vmatprep.mubr.msk.f32.mxu0 %vm243_vm0, %v7084_v58  ;;  %8684 = vmatprep.mubr.msk.f32.mxu1 %vm243_vm0, %v7153_v59  ;;  %v7275_v58 = vld [vmem:[%s9299_s25 + $0x3c9] sm:$0xff] }
  0xc1   : > { %8632 = vmatmul.mubr.msk.f32.gmra.mxu0 %vm243_vm0, %v7085_v60  ;;  %8685 = vmatmul.mubr.msk.f32.gmra.mxu1 %vm243_vm0, %v7154_v61  ;;  %v7207_v61 = vld [vmem:[%s9299_s25 + $0x299] sm:$0xff] }
  0xc2   : > { %8634 = vmatprep.mubr.msk.f32.mxu0 %vm243_vm0, %v7086_v62  ;;  %8687 = vmatprep.mubr.msk.f32.mxu1 %vm243_vm0, %v7155_v63  ;;  %v7276_v62 = vld [vmem:[%s9299_s25 + $0x3d1] sm:$0xff] }
  0xc5   : > { %8635 = vmatmul.mubr.msk.f32.gmra.mxu0 %vm243_vm0, %v7087_v0  ;;  %8688 = vmatmul.mubr.msk.f32.gmra.mxu1 %vm243_vm0, %v7156_v1  ;;  %v7208_v1 = vld [vmem:[%s9299_s25 + $0x2a1] sm:$0xff] }
  0xc6   : > { %8637 = vmatprep.mubr.msk.f32.mxu0 %vm243_vm0, %v7088_v2  ;;  %8690 = vmatprep.mubr.msk.f32.mxu1 %vm243_vm0, %v7157_v3  ;;  %v7277_v2 = vld [vmem:[%s9299_s25 + $0x3d9] sm:$0xff] }
  0xc9   : > { %8638 = vmatmul.mubr.msk.f32.gmra.mxu0 %vm243_vm0, %v7089_v4  ;;  %8691 = vmatmul.mubr.msk.f32.gmra.mxu1 %vm243_vm0, %v7158_v5 }
  0xca   : > { %8640 = vmatprep.mubr.msk.f32.mxu0 %vm243_vm0, %v7090_v6  ;;  %8693 = vmatprep.mubr.msk.f32.mxu1 %vm243_vm0, %v7159_v7  ;;  %v7209_v7 = vld [vmem:[%s9299_s25 + $0x2a9] sm:$0xff] }
  0xcd   : > { %8641 = vmatmul.mubr.msk.f32.gmra.mxu0 %vm243_vm0, %v7091_v8  ;;  %8694 = vmatmul.mubr.msk.f32.gmra.mxu1 %vm243_vm0, %v7160_v9  ;;  %v7278_v8 = vld [vmem:[%s9299_s25 + $0x3e1] sm:$0xff] }
  0xce   : > { %8643 = vmatprep.mubr.msk.f32.mxu0 %vm243_vm0, %v7092_v12  ;;  %8696 = vmatprep.mubr.msk.f32.mxu1 %vm243_vm0, %v7161_v13  ;;  %v7210_v13 = vld [vmem:[%s9299_s25 + $0x2b1] sm:$0xff] }
  0xd1   : > { %v8391_v20 = vpop.f32.mrf.mxu0  ;;  %v8444_v21 = vpop.f32.mrf.mxu1  ;;  %8644 = vmatmul.mubr.msk.f32.gmra.mxu0 %vm243_vm0, %v7093_v14  ;;  %8697 = vmatmul.mubr.msk.f32.gmra.mxu1 %vm243_vm0, %v7162_v15  ;;  %v7279_v14 = vld [vmem:[%s9299_s25 + $0x3e9] sm:$0xff] }
  0xd2   : > { %v9735_v22 = vadd.f32 %v8444_v21, %v8391_v20  ;;  %8646 = vmatprep.mubr.msk.f32.mxu0 %vm243_vm0, %v7094_v16  ;;  %8699 = vmatprep.mubr.msk.f32.mxu1 %vm243_vm0, %v7163_v17  ;;  %v7211_v21 = vld [vmem:[%s9299_s25 + $0x2b9] sm:$0xff] }
  0xd3   : > { %v412_v11 = vpop.f32.mrf.mxu0  ;;  %v749_v26 = vpop.f32.mrf.mxu1 }
  0xd4   : > { %v9743_v29 = vadd.f32 %v749_v26, %v412_v11  ;;  %v7212_v26 = vld [vmem:[%s9299_s25 + $0x2c1] sm:$0xff] }
  0xd5   : > { %v8394_v18 = vpop.f32.mrf.mxu0  ;;  %v8447_v19 = vpop.f32.mrf.mxu1  ;;  %8647 = vmatmul.mubr.msk.f32.gmra.mxu0 %vm243_vm0, %v7095_v23  ;;  %8700 = vmatmul.mubr.msk.f32.gmra.mxu1 %vm243_vm0, %v7164_v10  ;;  %v7280_v23 = vld [vmem:[%s9299_s25 + $0x3f1] sm:$0xff] }
  0xd6   : > { %v9747_v30 = vadd.f32 %v8447_v19, %v8394_v18  ;;  %8649 = vmatprep.mubr.msk.f32.mxu0 %vm243_vm0, %v7096_v27  ;;  %8702 = vmatprep.mubr.msk.f32.mxu1 %vm243_vm0, %v7165_v28  ;;  %v7281_v27 = vld [vmem:[%s9299_s25 + $0x3f9] sm:$0xff] }
  0xd7   : > { %v422_v33 = vpop.f32.mrf.mxu0  ;;  %v759_v34 = vpop.f32.mrf.mxu1 }
  0xd8   : > { %v9755_v37 = vadd.f32 %v759_v34, %v422_v33  ;;  %v7282_v33 = vld [vmem:[%s9299_s25 + $0x401] sm:$0xff] }
  0xd9   : > { %v8397_v38 = vpop.f32.mrf.mxu0  ;;  %v8450_v39 = vpop.f32.mrf.mxu1  ;;  %8650 = vmatmul.mubr.msk.f32.gmra.mxu0 %vm243_vm0, %v7097_v31  ;;  %8703 = vmatmul.mubr.msk.f32.gmra.mxu1 %vm243_vm0, %v7166_v32  ;;  %v7213_v32 = vld [vmem:[%s9299_s25 + $0x2c9] sm:$0xff] }
  0xda   : > { %v9759_v40 = vadd.f32 %v8450_v39, %v8397_v38  ;;  %8707 = vmatprep.mubr.msk.f32.mxu0 %vm243_vm0, %v7202_v35  ;;  %8760 = vmatprep.mubr.msk.f32.mxu1 %vm243_vm0, %v7271_v36  ;;  %v7214_v36 = vld [vmem:[%s9299_s25 + $0x2d1] sm:$0xff]  ;;  %v7283_v38 = vld [vmem:[%s9299_s25 + $0x409] sm:$0xff] }
  0xdb   : > { %v432_v43 = vpop.f32.mrf.mxu0  ;;  %v769_v44 = vpop.f32.mrf.mxu1 }
  0xdc   : > { %v9765_v45 = vadd.f32 %v769_v44, %v432_v43  ;;  %v7215_v44 = vld [vmem:[%s9299_s25 + $0x2d9] sm:$0xff] }
  0xdd   : > { %v8400_v48 = vpop.f32.mrf.mxu0  ;;  %v8453_v49 = vpop.f32.mrf.mxu1  ;;  %8708 = vmatmul.mubr.msk.f32.vlgmr.msra.gmra.mxu0 %vm243_vm0, %v7203_v41  ;;  %8761 = vmatmul.mubr.msk.f32.vlgmr.msra.gmra.mxu1 %vm243_vm0, %v7272_v42 }
  0xde   : > { %v9781_v52 = vadd.f32 %v8453_v49, %v8400_v48  ;;  %8812 = vmatpush3.msra.mxu0 %v9612_v24  ;;  %8865 = vmatpush3.msra.mxu1 %v9617_v25  ;;  %v7216_v49 = vld [vmem:[%s9299_s25 + $0x2e1] sm:$0xff] }
  0xdf   : > { %v442_v55 = vpop.f32.mrf.mxu0  ;;  %v779_v56 = vpop.f32.mrf.mxu1  ;;  %8710 = vmatprep.mubr.msk.f32.mxu0 %vm243_vm0, %v7204_v46  ;;  %8763 = vmatprep.mubr.msk.f32.mxu1 %vm243_vm0, %v7273_v47  ;;  %v7284_v46 = vld [vmem:[%s9299_s25 + $0x411] sm:$0xff] }
  0xe0   : > { %v9791_v59 = vadd.f32 %v779_v56, %v442_v55  ;;  %8917 = vmatprep.subr.mxu0 %v9774_v50  ;;  %8970 = vmatprep.subr.mxu1 %v9779_v51 }
  0xe1   : > { %v8403_v24 = vpop.f32.mrf.mxu0  ;;  %v8456_v25 = vpop.f32.mrf.mxu1  ;;  %8711 = vmatmul.mubr.msk.f32.gmra.mxu0 %vm243_vm0, %v7205_v53  ;;  %8764 = vmatmul.mubr.msk.f32.gmra.mxu1 %vm243_vm0, %v7274_v54  ;;  %v7285_v53 = vld [vmem:[%s9299_s25 + $0x419] sm:$0xff] }
  0xe2   : > { %v9797_v60 = vadd.f32 %v8456_v25, %v8403_v24  ;;  %8713 = vmatprep.mubr.msk.f32.mxu0 %vm243_vm0, %v7206_v57  ;;  %8766 = vmatprep.mubr.msk.f32.mxu1 %vm243_vm0, %v7275_v58  ;;  %v7217_v58 = vld [vmem:[%s9299_s25 + $0x2e9] sm:$0xff]  ;;  %v7286_v24 = vld [vmem:[%s9299_s25 + $0x421] sm:$0xff] }
  0xe3   : > { %v452_v63 = vpop.f32.mrf.mxu0  ;;  %v789_v0 = vpop.f32.mrf.mxu1 }
  0xe4   : > { %v9805_v3 = vadd.f32 %v789_v0, %v452_v63  ;;  %v7287_v63 = vld [vmem:[%s9299_s25 + $0x429] sm:$0xff] }
  0xe5   : > { %v8406_v4 = vpop.f32.mrf.mxu0  ;;  %v8459_v5 = vpop.f32.mrf.mxu1  ;;  %8714 = vmatmul.mubr.msk.f32.gmra.mxu0 %vm243_vm0, %v7207_v61  ;;  %8767 = vmatmul.mubr.msk.f32.gmra.mxu1 %vm243_vm0, %v7276_v62  ;;  %v7218_v62 = vld [vmem:[%s9299_s25 + $0x2f1] sm:$0xff] }
  0xe6   : > { %v9809_v6 = vadd.f32 %v8459_v5, %v8406_v4  ;;  %8716 = vmatprep.mubr.msk.f32.mxu0 %vm243_vm0, %v7208_v1  ;;  %8769 = vmatprep.mubr.msk.f32.mxu1 %vm243_vm0, %v7277_v2  ;;  %v7219_v5 = vld [vmem:[%s9299_s25 + $0x2f9] sm:$0xff] }
  0xe7   : > { %v462_v9 = vpop.f32.mrf.mxu0  ;;  %v799_v12 = vpop.f32.mrf.mxu1 }
  0xe8   : > { %v9817_v15 = vadd.f32 %v799_v12, %v462_v9  ;;  %v7220_v12 = vld [vmem:[%s9299_s25 + $0x301] sm:$0xff] }
  0xe9   : > { %v8409_v16 = vpop.f32.mrf.mxu0  ;;  %v8462_v17 = vpop.f32.mrf.mxu1  ;;  %8717 = vmatmul.mubr.msk.f32.gmra.mxu0 %vm243_vm0, %v7209_v7  ;;  %8770 = vmatmul.mubr.msk.f32.gmra.mxu1 %vm243_vm0, %v7278_v8  ;;  %v7288_v7 = vld [vmem:[%s9299_s25 + $0x431] sm:$0xff] }
  0xea   : > { %v9821_v20 = vadd.f32 %v8462_v17, %v8409_v16  ;;  %8719 = vmatprep.mubr.msk.f32.mxu0 %vm243_vm0, %v7210_v13  ;;  %8772 = vmatprep.mubr.msk.f32.mxu1 %vm243_vm0, %v7279_v14  ;;  %v7289_v13 = vld [vmem:[%s9299_s25 + $0x439] sm:$0xff] }
  0xeb   : > { %v472_v10 = vpop.f32.mrf.mxu0  ;;  %v809_v11 = vpop.f32.mrf.mxu1 }
  0xec   : > { %v9829_v28 = vadd.f32 %v809_v11, %v472_v10  ;;  %v7290_v10 = vld [vmem:[%s9299_s25 + $0x441] sm:$0xff] }
  0xed   : > { %v8412_v18 = vpop.f32.mrf.mxu0  ;;  %v8465_v19 = vpop.f32.mrf.mxu1  ;;  %8720 = vmatmul.mubr.msk.f32.gmra.mxu0 %vm243_vm0, %v7211_v21  ;;  %8773 = vmatmul.mubr.msk.f32.gmra.mxu1 %vm243_vm0, %v7280_v23  ;;  %v7221_v23 = vld [vmem:[%s9299_s25 + $0x309] sm:$0xff] }
  0xee   : > { %v9833_v31 = vadd.f32 %v8465_v19, %v8412_v18  ;;  %8722 = vmatprep.mubr.msk.f32.mxu0 %vm243_vm0, %v7212_v26  ;;  %8775 = vmatprep.mubr.msk.f32.mxu1 %vm243_vm0, %v7281_v27  ;;  %v7222_v27 = vld [vmem:[%s9299_s25 + $0x311] sm:$0xff]  ;;  %v7291_v18 = vld [vmem:[%s9299_s25 + $0x449] sm:$0xff] }
  0xef   : > { %v482_v34 = vpop.f32.mrf.mxu0  ;;  %v819_v35 = vpop.f32.mrf.mxu1 }
  0xf0   : > { %v9841_v39 = vadd.f32 %v819_v35, %v482_v34  ;;  %v7223_v35 = vld [vmem:[%s9299_s25 + $0x319] sm:$0xff] }
  0xf1   : > { %v8415_v41 = vpop.f32.mrf.mxu0  ;;  %v8468_v42 = vpop.f32.mrf.mxu1  ;;  %8723 = vmatmul.mubr.msk.f32.gmra.mxu0 %vm243_vm0, %v7213_v32  ;;  %8776 = vmatmul.mubr.msk.f32.gmra.mxu1 %vm243_vm0, %v7282_v33 }
  0xf2   : > { %v9845_v43 = vadd.f32 %v8468_v42, %v8415_v41  ;;  %8725 = vmatprep.mubr.msk.f32.mxu0 %vm243_vm0, %v7214_v36  ;;  %8778 = vmatprep.mubr.msk.f32.mxu1 %vm243_vm0, %v7283_v38  ;;  %v7292_v36 = vld [vmem:[%s9299_s25 + $0x451] sm:$0xff]  ;;  %v7224_v42 = vld [vmem:[%s9299_s25 + $0x321] sm:$0xff] }
  0xf3   : > { %v492_v47 = vpop.f32.mrf.mxu0  ;;  %v829_v48 = vpop.f32.mrf.mxu1 }
  0xf4   : > { %v9853_v54 = vadd.f32 %v829_v48, %v492_v47 }
  0xf5   : > { %v8418_v55 = vpop.f32.mrf.mxu0  ;;  %v8471_v56 = vpop.f32.mrf.mxu1  ;;  %8726 = vmatmul.mubr.msk.f32.gmra.mxu0 %vm243_vm0, %v7215_v44  ;;  %8779 = vmatmul.mubr.msk.f32.gmra.mxu1 %vm243_vm0, %v7284_v46  ;;  %v7293_v44 = vld [vmem:[%s9299_s25 + $0x459] sm:$0xff] }
  0xf6   : > { %v9857_v57 = vadd.f32 %v8471_v56, %v8418_v55  ;;  %8728 = vmatprep.mubr.msk.f32.mxu0 %vm243_vm0, %v7216_v49  ;;  %8781 = vmatprep.mubr.msk.f32.mxu1 %vm243_vm0, %v7285_v53  ;;  %v7225_v53 = vld [vmem:[%s9299_s25 + $0x329] sm:$0xff]  ;;  %v7294_v55 = vld [vmem:[%s9299_s25 + $0x461] sm:$0xff] }
  0xf7   : > { %v502_v25 = vpop.f32.mrf.mxu0  ;;  %v839_v61 = vpop.f32.mrf.mxu1 }
  0xf8   : > { %v9865_v0 = vadd.f32 %v839_v61, %v502_v25  ;;  %v7295_v25 = vld [vmem:[%s9299_s25 + $0x469] sm:$0xff] }
  0xf9   : > { %v8421_v1 = vpop.f32.mrf.mxu0  ;;  %v8474_v2 = vpop.f32.mrf.mxu1  ;;  %8729 = vmatmul.mubr.msk.f32.gmra.mxu0 %vm243_vm0, %v7217_v58  ;;  %8782 = vmatmul.mubr.msk.f32.gmra.mxu1 %vm243_vm0, %v7286_v24  ;;  %v7226_v24 = vld [vmem:[%s9299_s25 + $0x331] sm:$0xff] }
  0xfa   : > { %v9869_v4 = vadd.f32 %v8474_v2, %v8421_v1  ;;  %8731 = vmatprep.mubr.msk.f32.mxu0 %vm243_vm0, %v7218_v62  ;;  %8784 = vmatprep.mubr.msk.f32.mxu1 %vm243_vm0, %v7287_v63  ;;  %v7227_v2 = vld [vmem:[%s9299_s25 + $0x339] sm:$0xff] }
  0xfb   : > { %v512_v8 = vpop.f32.mrf.mxu0  ;;  %v849_v9 = vpop.f32.mrf.mxu1 }
  0xfc   : > { %v9877_v14 = vadd.f32 %v849_v9, %v512_v8  ;;  %v7228_v9 = vld [vmem:[%s9299_s25 + $0x341] sm:$0xff] }
  0xfd   : > { %v8424_v16 = vpop.f32.mrf.mxu0  ;;  %v8477_v17 = vpop.f32.mrf.mxu1  ;;  %8732 = vmatmul.mubr.msk.f32.gmra.mxu0 %vm243_vm0, %v7219_v5  ;;  %8785 = vmatmul.mubr.msk.f32.gmra.mxu1 %vm243_vm0, %v7288_v7  ;;  %v7296_v5 = vld [vmem:[%s9299_s25 + $0x471] sm:$0xff] }
  0xfe   : > { %v9881_v21 = vadd.f32 %v8477_v17, %v8424_v16  ;;  %8734 = vmatprep.mubr.msk.f32.mxu0 %vm243_vm0, %v7220_v12  ;;  %8787 = vmatprep.mubr.msk.f32.mxu1 %vm243_vm0, %v7289_v13  ;;  %v7297_v12 = vld [vmem:[%s9299_s25 + $0x479] sm:$0xff] }
  0xff   : > { %v522_v11 = vpop.f32.mrf.mxu0  ;;  %v859_v26 = vpop.f32.mrf.mxu1 }
 0x100   : > { %v9889_v19 = vadd.f32 %v859_v26, %v522_v11  ;;  %v7298_v11 = vld [vmem:[%s9299_s25 + $0x481] sm:$0xff] }
 0x101   : > { %v8427_v32 = vpop.f32.mrf.mxu0  ;;  %v8480_v33 = vpop.f32.mrf.mxu1  ;;  %8735 = vmatmul.mubr.msk.f32.gmra.mxu0 %vm243_vm0, %v7221_v23  ;;  %8788 = vmatmul.mubr.msk.f32.gmra.mxu1 %vm243_vm0, %v7290_v10  ;;  %v7229_v10 = vld [vmem:[%s9299_s25 + $0x349] sm:$0xff] }
 0x102   : > { %v9893_v34 = vadd.f32 %v8480_v33, %v8427_v32  ;;  %8737 = vmatprep.mubr.msk.f32.mxu0 %vm243_vm0, %v7222_v27  ;;  %8790 = vmatprep.mubr.msk.f32.mxu1 %vm243_vm0, %v7291_v18  ;;  %v7230_v18 = vld [vmem:[%s9299_s25 + $0x351] sm:$0xff]  ;;  %v7299_v32 = vld [vmem:[%s9299_s25 + $0x489] sm:$0xff] }
 0x103   : > { %v532_v38 = vpop.f32.mrf.mxu0  ;;  %v869_v41 = vpop.f32.mrf.mxu1 }
 0x104   : > { %v9901_v46 = vadd.f32 %v869_v41, %v532_v38  ;;  %v7231_v41 = vld [vmem:[%s9299_s25 + $0x359] sm:$0xff] }
 0x105   : > { %v8430_v47 = vpop.f32.mrf.mxu0  ;;  %v8483_v48 = vpop.f32.mrf.mxu1  ;;  %8738 = vmatmul.mubr.msk.f32.gmra.mxu0 %vm243_vm0, %v7223_v35  ;;  %8791 = vmatmul.mubr.msk.f32.gmra.mxu1 %vm243_vm0, %v7292_v36 }
 0x106   : > { %v9905_v49 = vadd.f32 %v8483_v48, %v8430_v47  ;;  %8740 = vmatprep.mubr.msk.f32.mxu0 %vm243_vm0, %v7224_v42  ;;  %8793 = vmatprep.mubr.msk.f32.mxu1 %vm243_vm0, %v7293_v44  ;;  %v7300_v42 = vld [vmem:[%s9299_s25 + $0x491] sm:$0xff]  ;;  %v7232_v48 = vld [vmem:[%s9299_s25 + $0x361] sm:$0xff] }
 0x107   : > { %v542_v56 = vpop.f32.mrf.mxu0  ;;  %v879_v58 = vpop.f32.mrf.mxu1 }
 0x108   : > { %v9913_v61 = vadd.f32 %v879_v58, %v542_v56 }
 0x109   : > { %v8433_v62 = vpop.f32.mrf.mxu0  ;;  %v8486_v63 = vpop.f32.mrf.mxu1  ;;  %8741 = vmatmul.mubr.msk.f32.gmra.mxu0 %vm243_vm0, %v7225_v53  ;;  %8794 = vmatmul.mubr.msk.f32.gmra.mxu1 %vm243_vm0, %v7294_v55  ;;  %v7301_v53 = vld [vmem:[%s9299_s25 + $0x499] sm:$0xff] }
 0x10a   : > { %v9917_v1 = vadd.f32 %v8486_v63, %v8433_v62  ;;  %8743 = vmatprep.mubr.msk.f32.mxu0 %vm243_vm0, %v7226_v24  ;;  %8796 = vmatprep.mubr.msk.f32.mxu1 %vm243_vm0, %v7295_v25  ;;  %v7233_v25 = vld [vmem:[%s9299_s25 + $0x369] sm:$0xff]  ;;  %v7302_v62 = vld [vmem:[%s9299_s25 + $0x4a1] sm:$0xff] }
 0x10b   : > { %v552_v7 = vpop.f32.mrf.mxu0  ;;  %v889_v8 = vpop.f32.mrf.mxu1 }
 0x10c   : > { %v9925_v13 = vadd.f32 %v889_v8, %v552_v7  ;;  %v7303_v7 = vld [vmem:[%s9299_s25 + $0x4a9] sm:$0xff] }
 0x10d   : > { %v8436_v16 = vpop.f32.mrf.mxu0  ;;  %v8489_v17 = vpop.f32.mrf.mxu1  ;;  %8744 = vmatmul.mubr.msk.f32.gmra.mxu0 %vm243_vm0, %v7227_v2  ;;  %8797 = vmatmul.mubr.msk.f32.gmra.mxu1 %vm243_vm0, %v7296_v5  ;;  %v7234_v5 = vld [vmem:[%s9299_s25 + $0x371] sm:$0xff] }
 0x10e   : > { %v9929_v23 = vadd.f32 %v8489_v17, %v8436_v16  ;;  %8746 = vmatprep.mubr.msk.f32.mxu0 %vm243_vm0, %v7228_v9  ;;  %8799 = vmatprep.mubr.msk.f32.mxu1 %vm243_vm0, %v7297_v12 }
 0x10f   : > { %v562_v26 = vpop.f32.mrf.mxu0  ;;  %v899_v27 = vpop.f32.mrf.mxu1 }
 0x110   : > { %v9937_v33 = vadd.f32 %v899_v27, %v562_v26  ;;  %v3362_v27 = vld [vmem:[%s9299_s25 + $0x11] sm:$0xff] }
 0x111   : > { %v8439_v35 = vpop.f32.mrf.mxu0  ;;  %v8492_v36 = vpop.f32.mrf.mxu1  ;;  %8747 = vmatmul.mubr.msk.f32.gmra.mxu0 %vm243_vm0, %v7229_v10  ;;  %8800 = vmatmul.mubr.msk.f32.gmra.mxu1 %vm243_vm0, %v7298_v11  ;;  %v7235_v10 = vld [vmem:[%s9299_s25 + $0x379] sm:$0xff]  ;;  %v7304_v11 = vld [vmem:[%s9299_s25 + $0x4b1] sm:$0xff] }
 0x112   : > { %v9941_v38 = vadd.f32 %v8492_v36, %v8439_v35  ;;  %8749 = vmatprep.mubr.msk.f32.mxu0 %vm243_vm0, %v7230_v18  ;;  %8802 = vmatprep.mubr.msk.f32.mxu1 %vm243_vm0, %v7299_v32  ;;  %v7375_v18 = vld [vmem:[%s9299_s25 + $0x149] sm:$0xff] }
 0x113   : > { %v572_v44 = vpop.f32.mrf.mxu0  ;;  %v909_v47 = vpop.f32.mrf.mxu1 }
 0x114   : > { %v9949_v55 = vadd.f32 %v909_v47, %v572_v44  ;;  %v3363_v44 = vld [vmem:[%s9299_s25 + $0x19] sm:$0xff]  ;;  %v7376_v47 = vld [vmem:[%s9299_s25 + $0x151] sm:$0xff] }
 0x115   : > { %v8497_v56 = vpop.f32.mrf.mxu0  ;;  %v8550_v58 = vpop.f32.mrf.mxu1  ;;  %8750 = vmatmul.mubr.msk.f32.gmra.mxu0 %vm243_vm0, %v7231_v41  ;;  %8803 = vmatmul.mubr.msk.f32.gmra.mxu1 %vm243_vm0, %v7300_v42 }
 0x116   : > { %v1292_v24 = vadd.f32 %v8497_v56, %v9735_v22  ;;  %8752 = vmatprep.mubr.msk.f32.mxu0 %vm243_vm0, %v7232_v48  ;;  %8805 = vmatprep.mubr.msk.f32.mxu1 %vm243_vm0, %v7301_v53 }
 0x117   : > { %v1122_v63 = vpop.f32.mrf.mxu0  ;;  %v1529_v2 = vpop.f32.mrf.mxu1 }
 0x118   : > { %v9960_v8 = vadd.f32 %v8550_v58, %v1292_v24  ;;  %v1291_v9 = vadd.f32 %v1122_v63, %v9743_v29  ;;  %v3364_v58 = vld [vmem:[%s9299_s25 + $0x21] sm:$0xff]  ;;  %v7377_v24 = vld [vmem:[%s9299_s25 + $0x159] sm:$0xff] }
 0x119   : > { %v8500_v12 = vpop.f32.mrf.mxu0  ;;  %v8553_v22 = vpop.f32.mrf.mxu1  ;;  %8753 = vmatmul.mubr.msk.f32.gmra.mxu0 %vm243_vm0, %v7233_v25  ;;  %8806 = vmatmul.mubr.msk.f32.gmra.mxu1 %vm243_vm0, %v7302_v62  ;;  %v10001_v63 = vld [vmem:[%s11304_s1 + $0x68] sm:$0xff] }
 0x11a   : > { %v9965_v16 = vadd.f32 %v1529_v2, %v1291_v9  ;;  %v1294_v17 = vadd.f32 %v8500_v12, %v9747_v30  ;;  %8755 = vmatprep.mubr.msk.f32.mxu0 %vm243_vm0, %v7234_v5  ;;  %8808 = vmatprep.mubr.msk.f32.mxu1 %vm243_vm0, %v7303_v7  ;;  %v3365_v5 = vld [vmem:[%s9299_s25 + $0x29] sm:$0xff]  ;;  %v7378_v7 = vld [vmem:[%s9299_s25 + $0x161] sm:$0xff] }
 0x11b   : > { %v1132_v26 = vpop.f32.mrf.mxu0  ;;  %v1539_v29 = vpop.f32.mrf.mxu1 }
 0x11c   : > { %v9974_v32 = vadd.f32 %v8553_v22, %v1294_v17  ;;  %v1293_v35 = vadd.f32 %v1132_v26, %v9755_v37  ;;  %v3366_v22 = vld [vmem:[%s9299_s25 + $0x31] sm:$0xff]  ;;  %v7379_v17 = vld [vmem:[%s9299_s25 + $0x169] sm:$0xff] }
 0x11d   : > { %v8503_v36 = vpop.f32.mrf.mxu0  ;;  %v8556_v30 = vpop.f32.mrf.mxu1  ;;  %8756 = vmatmul.mubr.msk.f32.gmra.mxu0 %vm243_vm0, %v7235_v10  ;;  %8809 = vmatmul.mubr.msk.f32.gmra.mxu1 %vm243_vm0, %v7304_v11 }
 0x11e   : > { %v9979_v41 = vadd.f32 %v1539_v29, %v1293_v35  ;;  %v1296_v42 = vadd.f32 %v8503_v36, %v9759_v40  ;;  %8813 = vmatprep.mubr.msk.f32.mxu0 %vm243_vm0, %v3362_v27  ;;  %8866 = vmatprep.mubr.msk.f32.mxu1 %vm243_vm0, %v7375_v18  ;;  %v9996_v40 = vld [vmem:[%s11304_s1 + $0x60] sm:$0xff]  ;;  %v7380_v29 = vld [vmem:[%s9299_s25 + $0x171] sm:$0xff] }
 0x11f   : > { %v1142_v48 = vpop.f32.mrf.mxu0  ;;  %v1549_v37 = vpop.f32.mrf.mxu1  ;;  %v3368_v35 = vld [vmem:[%s9299_s25 + $0x41] sm:$0xff]  ;;  %v7381_v36 = vld [vmem:[%s9299_s25 + $0x179] sm:$0xff] }
 0x120   : > { %v9986_v53 = vadd.f32 %v8556_v30, %v1296_v42  ;;  %v1295_v56 = vadd.f32 %v1142_v48, %v9765_v45 }
 0x121   : > { %v8506_v25 = vpop.f32.mrf.mxu0  ;;  %v8559_v62 = vpop.f32.mrf.mxu1  ;;  %8814 = vmatmul.mubr.msk.f32.vlgmr.msra.gmra.mxu0 %vm243_vm0, %v3363_v44  ;;  %8867 = vmatmul.mubr.msk.f32.vlgmr.msra.gmra.mxu1 %vm243_vm0, %v7376_v47 }
 0x122   : > { %v10003_v45 = vadd.f32 %v1549_v37, %v1295_v56  ;;  %v1298_v2 = vadd.f32 %v8506_v25, %v9781_v52  ;;  %8918 = vmatpush3.msra.mxu0 %v9774_v50  ;;  %8971 = vmatpush3.msra.mxu1 %v9779_v51  ;;  %v3369_v37 = vld [vmem:[%s9299_s25 + $0x49] sm:$0xff]  ;;  %v7382_v56 = vld [vmem:[%s9299_s25 + $0x181] sm:$0xff] }
 0x123   : > { %v1152_v9 = vpop.f32.mrf.mxu0  ;;  %v1559_v12 = vpop.f32.mrf.mxu1  ;;  %8816 = vmatprep.mubr.msk.f32.mxu0 %vm243_vm0, %v3364_v58  ;;  %8869 = vmatprep.mubr.msk.f32.mxu1 %vm243_vm0, %v7377_v24  ;;  %v3370_v24 = vld [vmem:[%s9299_s25 + $0x51] sm:$0xff]  ;;  %v7383_v25 = vld [vmem:[%s9299_s25 + $0x189] sm:$0xff] }
 0x124   : > { %v10014_v10 = vadd.f32 %v8559_v62, %v1298_v2  ;;  %v1297_v52 = vadd.f32 %v1152_v9, %v9791_v59  ;;  %9023 = vmatprep.subr.mxu0 %v9996_v40  ;;  %9076 = vmatprep.subr.mxu1 %v10001_v63  ;;  %v3367_v59 = vld [vmem:[%s9299_s25 + $0x39] sm:$0xff] }
 0x125   : > { %v8509_v50 = vpop.f32.mrf.mxu0  ;;  %v8562_v51 = vpop.f32.mrf.mxu1  ;;  %8817 = vmatmul.mubr.msk.f32.gmra.mxu0 %vm243_vm0, %v3365_v5  ;;  %8870 = vmatmul.mubr.msk.f32.gmra.mxu1 %vm243_vm0, %v7378_v7 }
 0x126   : > { %v10021_v11 = vadd.f32 %v1559_v12, %v1297_v52  ;;  %v1300_v26 = vadd.f32 %v8509_v50, %v9797_v60  ;;  %8819 = vmatprep.mubr.msk.f32.mxu0 %vm243_vm0, %v3366_v22  ;;  %8872 = vmatprep.mubr.msk.f32.mxu1 %vm243_vm0, %v7379_v17  ;;  %v3371_v12 = vld [vmem:[%s9299_s25 + $0x59] sm:$0xff]  ;;  %v7384_v22 = vld [vmem:[%s9299_s25 + $0x191] sm:$0xff]  ;;  %v3372_v52 = vld [vmem:[%s9299_s25 + $0x61] sm:$0xff] }
 0x127   : > { %v1162_v27 = vpop.f32.mrf.mxu0  ;;  %v1569_v18 = vpop.f32.mrf.mxu1  ;;  %v7385_v50 = vld [vmem:[%s9299_s25 + $0x199] sm:$0xff] }
 0x128   : > { %v10030_v30 = vadd.f32 %v8562_v51, %v1300_v26  ;;  %v1299_v42 = vadd.f32 %v1162_v27, %v9805_v3 }
 0x129   : > { %v8512_v44 = vpop.f32.mrf.mxu0  ;;  %v8565_v60 = vpop.f32.mrf.mxu1  ;;  %8820 = vmatmul.mubr.msk.f32.gmra.mxu0 %vm243_vm0, %v3367_v59  ;;  %8873 = vmatmul.mubr.msk.f32.gmra.mxu1 %vm243_vm0, %v7380_v29 }
 0x12a   : > { %v10035_v47 = vadd.f32 %v1569_v18, %v1299_v42  ;;  %v1302_v48 = vadd.f32 %v8512_v44, %v9809_v6  ;;  %8822 = vmatprep.mubr.msk.f32.mxu0 %vm243_vm0, %v3368_v35  ;;  %8875 = vmatprep.mubr.msk.f32.mxu1 %vm243_vm0, %v7381_v36  ;;  %v3373_v18 = vld [vmem:[%s9299_s25 + $0x69] sm:$0xff]  ;;  %v7386_v35 = vld [vmem:[%s9299_s25 + $0x1a1] sm:$0xff]  ;;  %v3374_v42 = vld [vmem:[%s9299_s25 + $0x71] sm:$0xff] }
 0x12b   : > { %v1172_v58 = vpop.f32.mrf.mxu0  ;;  %v1579_v3 = vpop.f32.mrf.mxu1  ;;  %v7387_v44 = vld [vmem:[%s9299_s25 + $0x1a9] sm:$0xff] }
 0x12c   : > { %v10044_v62 = vadd.f32 %v8565_v60, %v1302_v48  ;;  %v1301_v2 = vadd.f32 %v1172_v58, %v9817_v15 }
 0x12d   : > { %v8515_v5 = vpop.f32.mrf.mxu0  ;;  %v8568_v6 = vpop.f32.mrf.mxu1  ;;  %8823 = vmatmul.mubr.msk.f32.gmra.mxu0 %vm243_vm0, %v3369_v37  ;;  %8876 = vmatmul.mubr.msk.f32.gmra.mxu1 %vm243_vm0, %v7382_v56 }
 0x12e   : > { %v10049_v7 = vadd.f32 %v1579_v3, %v1301_v2  ;;  %v1304_v9 = vadd.f32 %v8515_v5, %v9821_v20  ;;  %8825 = vmatprep.mubr.msk.f32.mxu0 %vm243_vm0, %v3370_v24  ;;  %8878 = vmatprep.mubr.msk.f32.mxu1 %vm243_vm0, %v7383_v25  ;;  %v3375_v3 = vld [vmem:[%s9299_s25 + $0x79] sm:$0xff]  ;;  %v7388_v24 = vld [vmem:[%s9299_s25 + $0x1b1] sm:$0xff]  ;;  %v3376_v2 = vld [vmem:[%s9299_s25 + $0x81] sm:$0xff] }
 0x12f   : > { %v1182_v17 = vpop.f32.mrf.mxu0  ;;  %v1589_v15 = vpop.f32.mrf.mxu1  ;;  %v7389_v5 = vld [vmem:[%s9299_s25 + $0x1b9] sm:$0xff] }
 0x130   : > { %v10058_v51 = vadd.f32 %v8568_v6, %v1304_v9  ;;  %v1303_v26 = vadd.f32 %v1182_v17, %v9829_v28 }
 0x131   : > { %v8518_v59 = vpop.f32.mrf.mxu0  ;;  %v8571_v20 = vpop.f32.mrf.mxu1  ;;  %8826 = vmatmul.mubr.msk.f32.gmra.mxu0 %vm243_vm0, %v3371_v12  ;;  %8879 = vmatmul.mubr.msk.f32.gmra.mxu1 %vm243_vm0, %v7384_v22 }
 0x132   : > { %v10063_v29 = vadd.f32 %v1589_v15, %v1303_v26  ;;  %v1306_v27 = vadd.f32 %v8518_v59, %v9833_v31  ;;  %8828 = vmatprep.mubr.msk.f32.mxu0 %vm243_vm0, %v3372_v52  ;;  %8881 = vmatprep.mubr.msk.f32.mxu1 %vm243_vm0, %v7385_v50  ;;  %v3377_v15 = vld [vmem:[%s9299_s25 + $0x89] sm:$0xff]  ;;  %v7390_v52 = vld [vmem:[%s9299_s25 + $0x1c1] sm:$0xff]  ;;  %v3378_v26 = vld [vmem:[%s9299_s25 + $0x91] sm:$0xff] }
 0x133   : > { %v1192_v36 = vpop.f32.mrf.mxu0  ;;  %v1599_v28 = vpop.f32.mrf.mxu1  ;;  %v7391_v59 = vld [vmem:[%s9299_s25 + $0x1c9] sm:$0xff] }
 0x134   : > { %v10072_v60 = vadd.f32 %v8571_v20, %v1306_v27  ;;  %v1305_v48 = vadd.f32 %v1192_v36, %v9841_v39 }
 0x135   : > { %v8521_v37 = vpop.f32.mrf.mxu0  ;;  %v8574_v31 = vpop.f32.mrf.mxu1  ;;  %8829 = vmatmul.mubr.msk.f32.gmra.mxu0 %vm243_vm0, %v3373_v18  ;;  %8882 = vmatmul.mubr.msk.f32.gmra.mxu1 %vm243_vm0, %v7386_v35 }
 0x136   : > { %v10077_v56 = vadd.f32 %v1599_v28, %v1305_v48  ;;  %v1308_v58 = vadd.f32 %v8521_v37, %v9845_v43  ;;  %8831 = vmatprep.mubr.msk.f32.mxu0 %vm243_vm0, %v3374_v42  ;;  %8884 = vmatprep.mubr.msk.f32.mxu1 %vm243_vm0, %v7387_v44  ;;  %v3379_v28 = vld [vmem:[%s9299_s25 + $0x99] sm:$0xff]  ;;  %v7392_v42 = vld [vmem:[%s9299_s25 + $0x1d1] sm:$0xff]  ;;  %v3380_v48 = vld [vmem:[%s9299_s25 + $0xa1] sm:$0xff] }
 0x137   : > { %v1202_v25 = vpop.f32.mrf.mxu0  ;;  %v1609_v39 = vpop.f32.mrf.mxu1  ;;  %v7393_v37 = vld [vmem:[%s9299_s25 + $0x1d9] sm:$0xff] }
 0x138   : > { %v10086_v6 = vadd.f32 %v8574_v31, %v1308_v58  ;;  %v1307_v9 = vadd.f32 %v1202_v25, %v9853_v54 }
 0x139   : > { %v8524_v12 = vpop.f32.mrf.mxu0  ;;  %v8577_v43 = vpop.f32.mrf.mxu1  ;;  %8832 = vmatmul.mubr.msk.f32.gmra.mxu0 %vm243_vm0, %v3375_v3  ;;  %8885 = vmatmul.mubr.msk.f32.gmra.mxu1 %vm243_vm0, %v7388_v24 }
 0x13a   : > { %v10091_v22 = vadd.f32 %v1609_v39, %v1307_v9  ;;  %v1310_v17 = vadd.f32 %v8524_v12, %v9857_v57  ;;  %8834 = vmatprep.mubr.msk.f32.mxu0 %vm243_vm0, %v3376_v2  ;;  %8887 = vmatprep.mubr.msk.f32.mxu1 %vm243_vm0, %v7389_v5  ;;  %v3381_v39 = vld [vmem:[%s9299_s25 + $0xa9] sm:$0xff]  ;;  %v7394_v2 = vld [vmem:[%s9299_s25 + $0x1e1] sm:$0xff]  ;;  %v3382_v9 = vld [vmem:[%s9299_s25 + $0xb1] sm:$0xff] }
 0x13b   : > { %v1212_v50 = vpop.f32.mrf.mxu0  ;;  %v1619_v54 = vpop.f32.mrf.mxu1  ;;  %v7395_v12 = vld [vmem:[%s9299_s25 + $0x1e9] sm:$0xff] }
 0x13c   : > { %v10100_v20 = vadd.f32 %v8577_v43, %v1310_v17  ;;  %v1309_v27 = vadd.f32 %v1212_v50, %v9865_v0 }
 0x13d   : > { %v8527_v18 = vpop.f32.mrf.mxu0  ;;  %v8580_v57 = vpop.f32.mrf.mxu1  ;;  %8835 = vmatmul.mubr.msk.f32.gmra.mxu0 %vm243_vm0, %v3377_v15  ;;  %8888 = vmatmul.mubr.msk.f32.gmra.mxu1 %vm243_vm0, %v7390_v52 }
 0x13e   : > { %v10105_v35 = vadd.f32 %v1619_v54, %v1309_v27  ;;  %v1312_v36 = vadd.f32 %v8527_v18, %v9869_v4  ;;  %8837 = vmatprep.mubr.msk.f32.mxu0 %vm243_vm0, %v3378_v26  ;;  %8890 = vmatprep.mubr.msk.f32.mxu1 %vm243_vm0, %v7391_v59  ;;  %v3383_v54 = vld [vmem:[%s9299_s25 + $0xb9] sm:$0xff]  ;;  %v7396_v26 = vld [vmem:[%s9299_s25 + $0x1f1] sm:$0xff]  ;;  %v3384_v27 = vld [vmem:[%s9299_s25 + $0xc1] sm:$0xff] }
 0x13f   : > { %v1222_v44 = vpop.f32.mrf.mxu0  ;;  %v1629_v0 = vpop.f32.mrf.mxu1  ;;  %v7397_v18 = vld [vmem:[%s9299_s25 + $0x1f9] sm:$0xff] }
 0x140   : > { %v10114_v31 = vadd.f32 %v8580_v57, %v1312_v36  ;;  %v1311_v58 = vadd.f32 %v1222_v44, %v9877_v14 }
 0x141   : > { %v8530_v3 = vpop.f32.mrf.mxu0  ;;  %v8583_v4 = vpop.f32.mrf.mxu1  ;;  %8838 = vmatmul.mubr.msk.f32.gmra.mxu0 %vm243_vm0, %v3379_v28  ;;  %8891 = vmatmul.mubr.msk.f32.gmra.mxu1 %vm243_vm0, %v7392_v42 }
 0x142   : > { %v10119_v24 = vadd.f32 %v1629_v0, %v1311_v58  ;;  %v1314_v25 = vadd.f32 %v8530_v3, %v9881_v21  ;;  %8840 = vmatprep.mubr.msk.f32.mxu0 %vm243_vm0, %v3380_v48  ;;  %8893 = vmatprep.mubr.msk.f32.mxu1 %vm243_vm0, %v7393_v37  ;;  %v3385_v0 = vld [vmem:[%s9299_s25 + $0xc9] sm:$0xff]  ;;  %v7398_v48 = vld [vmem:[%s9299_s25 + $0x201] sm:$0xff]  ;;  %v3386_v58 = vld [vmem:[%s9299_s25 + $0xd1] sm:$0xff] }
 0x143   : > { %v1232_v5 = vpop.f32.mrf.mxu0  ;;  %v1639_v14 = vpop.f32.mrf.mxu1  ;;  %v7399_v3 = vld [vmem:[%s9299_s25 + $0x209] sm:$0xff] }
 0x144   : > { %v10128_v43 = vadd.f32 %v8583_v4, %v1314_v25  ;;  %v1313_v17 = vadd.f32 %v1232_v5, %v9889_v19 }
 0x145   : > { %v8533_v15 = vpop.f32.mrf.mxu0  ;;  %v8586_v21 = vpop.f32.mrf.mxu1  ;;  %8841 = vmatmul.mubr.msk.f32.gmra.mxu0 %vm243_vm0, %v3381_v39  ;;  %8894 = vmatmul.mubr.msk.f32.gmra.mxu1 %vm243_vm0, %v7394_v2 }
 0x146   : > { %v10133_v52 = vadd.f32 %v1639_v14, %v1313_v17  ;;  %v1316_v50 = vadd.f32 %v8533_v15, %v9893_v34  ;;  %8843 = vmatprep.mubr.msk.f32.mxu0 %vm243_vm0, %v3382_v9  ;;  %8896 = vmatprep.mubr.msk.f32.mxu1 %vm243_vm0, %v7395_v12  ;;  %v3387_v14 = vld [vmem:[%s9299_s25 + $0xd9] sm:$0xff]  ;;  %v7400_v9 = vld [vmem:[%s9299_s25 + $0x211] sm:$0xff]  ;;  %v3388_v17 = vld [vmem:[%s9299_s25 + $0xe1] sm:$0xff] }
 0x147   : > { %v1242_v59 = vpop.f32.mrf.mxu0  ;;  %v1649_v19 = vpop.f32.mrf.mxu1  ;;  %v7401_v15 = vld [vmem:[%s9299_s25 + $0x219] sm:$0xff] }
 0x148   : > { %v10142_v57 = vadd.f32 %v8586_v21, %v1316_v50  ;;  %v1315_v36 = vadd.f32 %v1242_v59, %v9901_v46 }
 0x149   : > { %v8536_v28 = vpop.f32.mrf.mxu0  ;;  %v8589_v34 = vpop.f32.mrf.mxu1  ;;  %8844 = vmatmul.mubr.msk.f32.gmra.mxu0 %vm243_vm0, %v3383_v54  ;;  %8897 = vmatmul.mubr.msk.f32.gmra.mxu1 %vm243_vm0, %v7396_v26 }
 0x14a   : > { %v10147_v42 = vadd.f32 %v1649_v19, %v1315_v36  ;;  %v1318_v44 = vadd.f32 %v8536_v28, %v9905_v49  ;;  %8846 = vmatprep.mubr.msk.f32.mxu0 %vm243_vm0, %v3384_v27  ;;  %8899 = vmatprep.mubr.msk.f32.mxu1 %vm243_vm0, %v7397_v18  ;;  %v3389_v19 = vld [vmem:[%s9299_s25 + $0xe9] sm:$0xff]  ;;  %v7402_v27 = vld [vmem:[%s9299_s25 + $0x221] sm:$0xff]  ;;  %v3390_v36 = vld [vmem:[%s9299_s25 + $0xf1] sm:$0xff] }
 0x14b   : > { %v1252_v37 = vpop.f32.mrf.mxu0  ;;  %v1659_v46 = vpop.f32.mrf.mxu1  ;;  %v7403_v28 = vld [vmem:[%s9299_s25 + $0x229] sm:$0xff] }
 0x14c   : > { %v10156_v4 = vadd.f32 %v8589_v34, %v1318_v44  ;;  %v1317_v25 = vadd.f32 %v1252_v37, %v9913_v61 }
 0x14d   : > { %v8539_v39 = vpop.f32.mrf.mxu0  ;;  %v8592_v49 = vpop.f32.mrf.mxu1  ;;  %8847 = vmatmul.mubr.msk.f32.gmra.mxu0 %vm243_vm0, %v3385_v0  ;;  %8900 = vmatmul.mubr.msk.f32.gmra.mxu1 %vm243_vm0, %v7398_v48 }
 0x14e   : > { %v10161_v2 = vadd.f32 %v1659_v46, %v1317_v25  ;;  %v1320_v5 = vadd.f32 %v8539_v39, %v9917_v1  ;;  %8849 = vmatprep.mubr.msk.f32.mxu0 %vm243_vm0, %v3386_v58  ;;  %8902 = vmatprep.mubr.msk.f32.mxu1 %vm243_vm0, %v7399_v3  ;;  %v3391_v46 = vld [vmem:[%s9299_s25 + $0xf9] sm:$0xff]  ;;  %v7404_v58 = vld [vmem:[%s9299_s25 + $0x231] sm:$0xff]  ;;  %v3392_v25 = vld [vmem:[%s9299_s25 + $0x101] sm:$0xff] }
 0x14f   : > { %v1262_v12 = vpop.f32.mrf.mxu0  ;;  %v1669_v61 = vpop.f32.mrf.mxu1  ;;  %v7405_v39 = vld [vmem:[%s9299_s25 + $0x239] sm:$0xff] }
 0x150   : > { %v10170_v21 = vadd.f32 %v8592_v49, %v1320_v5  ;;  %v1319_v50 = vadd.f32 %v1262_v12, %v9925_v13 }
 0x151   : > { %v8542_v54 = vpop.f32.mrf.mxu0  ;;  %v8595_v1 = vpop.f32.mrf.mxu1  ;;  %8850 = vmatmul.mubr.msk.f32.gmra.mxu0 %vm243_vm0, %v3387_v14  ;;  %8903 = vmatmul.mubr.msk.f32.gmra.mxu1 %vm243_vm0, %v7400_v9 }
 0x152   : > { %v10175_v26 = vadd.f32 %v1669_v61, %v1319_v50  ;;  %v1322_v59 = vadd.f32 %v8542_v54, %v9929_v23  ;;  %8852 = vmatprep.mubr.msk.f32.mxu0 %vm243_vm0, %v3388_v17  ;;  %8905 = vmatprep.mubr.msk.f32.mxu1 %vm243_vm0, %v7401_v15  ;;  %v3393_v61 = vld [vmem:[%s9299_s25 + $0x109] sm:$0xff]  ;;  %v7406_v17 = vld [vmem:[%s9299_s25 + $0x241] sm:$0xff]  ;;  %v3394_v50 = vld [vmem:[%s9299_s25 + $0x111] sm:$0xff] }
 0x153   : > { %v1272_v18 = vpop.f32.mrf.mxu0  ;;  %v1679_v13 = vpop.f32.mrf.mxu1  ;;  %v7407_v54 = vld [vmem:[%s9299_s25 + $0x249] sm:$0xff] }
 0x154   : > { %v10184_v34 = vadd.f32 %v8595_v1, %v1322_v59  ;;  %v1321_v44 = vadd.f32 %v1272_v18, %v9937_v33 }
 0x155   : > { %v8545_v0 = vpop.f32.mrf.mxu0  ;;  %v8598_v23 = vpop.f32.mrf.mxu1  ;;  %8853 = vmatmul.mubr.msk.f32.gmra.mxu0 %vm243_vm0, %v3389_v19  ;;  %8906 = vmatmul.mubr.msk.f32.gmra.mxu1 %vm243_vm0, %v7402_v27 }
 0x156   : > { %v10189_v48 = vadd.f32 %v1679_v13, %v1321_v44  ;;  %v1324_v37 = vadd.f32 %v8545_v0, %v9941_v38  ;;  %8855 = vmatprep.mubr.msk.f32.mxu0 %vm243_vm0, %v3390_v36  ;;  %8908 = vmatprep.mubr.msk.f32.mxu1 %vm243_vm0, %v7403_v28  ;;  %v3395_v13 = vld [vmem:[%s9299_s25 + $0x119] sm:$0xff]  ;;  %v7408_v36 = vld [vmem:[%s9299_s25 + $0x251] sm:$0xff] }
 0x157   : > { %v1282_v3 = vpop.f32.mrf.mxu0  ;;  %v1689_v33 = vpop.f32.mrf.mxu1  ;;  %v4176_v44 = vld [vmem:[%s9299_s25 + $0x12] sm:$0xff]  ;;  %v7479_v0 = vld [vmem:[%s9299_s25 + $0x14a] sm:$0xff] }
 0x158   : > { %v10198_v49 = vadd.f32 %v8598_v23, %v1324_v37  ;;  %v1323_v5 = vadd.f32 %v1282_v3, %v9949_v55 }
 0x159   : > { %v8603_v14 = vpop.f32.mrf.mxu0  ;;  %v8656_v38 = vpop.f32.mrf.mxu1  ;;  %8856 = vmatmul.mubr.msk.f32.gmra.mxu0 %vm243_vm0, %v3391_v46  ;;  %8909 = vmatmul.mubr.msk.f32.gmra.mxu1 %vm243_vm0, %v7404_v58 }
 0x15a   : > { %v10203_v9 = vadd.f32 %v1689_v33, %v1323_v5  ;;  %v2107_v12 = vadd.f32 %v8603_v14, %v9960_v8  ;;  %8858 = vmatprep.mubr.msk.f32.mxu0 %vm243_vm0, %v3392_v25  ;;  %8911 = vmatprep.mubr.msk.f32.mxu1 %vm243_vm0, %v7405_v39  ;;  %v4177_v33 = vld [vmem:[%s9299_s25 + $0x1a] sm:$0xff]  ;;  %v7480_v25 = vld [vmem:[%s9299_s25 + $0x152] sm:$0xff] }
 0x15b   : > { %v1937_v15 = vpop.f32.mrf.mxu0  ;;  %v2345_v55 = vpop.f32.mrf.mxu1 }
 0x15c   : > { %v10212_v1 = vadd.f32 %v8656_v38, %v2107_v12  ;;  %v2106_v59 = vadd.f32 %v1937_v15, %v9965_v16  ;;  %v4178_v38 = vld [vmem:[%s9299_s25 + $0x22] sm:$0xff]  ;;  %v7481_v12 = vld [vmem:[%s9299_s25 + $0x15a] sm:$0xff] }
 0x15d   : > { %v8606_v19 = vpop.f32.mrf.mxu0  ;;  %v8659_v8 = vpop.f32.mrf.mxu1  ;;  %8859 = vmatmul.mubr.msk.f32.gmra.mxu0 %vm243_vm0, %v3393_v61  ;;  %8912 = vmatmul.mubr.msk.f32.gmra.mxu1 %vm243_vm0, %v7406_v17  ;;  %v10253_v15 = vld [vmem:[%s11304_s1 + $0x78] sm:$0xff] }
 0x15e   : > { %v10217_v27 = vadd.f32 %v2345_v55, %v2106_v59  ;;  %v2109_v18 = vadd.f32 %v8606_v19, %v9974_v32  ;;  %8861 = vmatprep.mubr.msk.f32.mxu0 %vm243_vm0, %v3394_v50  ;;  %8914 = vmatprep.mubr.msk.f32.mxu1 %vm243_vm0, %v7407_v54  ;;  %v4179_v50 = vld [vmem:[%s9299_s25 + $0x2a] sm:$0xff]  ;;  %v7482_v54 = vld [vmem:[%s9299_s25 + $0x162] sm:$0xff] }
 0x15f   : > { %v1947_v28 = vpop.f32.mrf.mxu0  ;;  %v2355_v16 = vpop.f32.mrf.mxu1 }
 0x160   : > { %v10226_v23 = vadd.f32 %v8659_v8, %v2109_v18  ;;  %v2108_v37 = vadd.f32 %v1947_v28, %v9979_v41  ;;  %v4180_v8 = vld [vmem:[%s9299_s25 + $0x32] sm:$0xff]  ;;  %v7483_v18 = vld [vmem:[%s9299_s25 + $0x16a] sm:$0xff] }
 0x161   : > { %v8609_v46 = vpop.f32.mrf.mxu0  ;;  %v8662_v32 = vpop.f32.mrf.mxu1  ;;  %8862 = vmatmul.mubr.msk.f32.gmra.mxu0 %vm243_vm0, %v3395_v13  ;;  %8915 = vmatmul.mubr.msk.f32.gmra.mxu1 %vm243_vm0, %v7408_v36 }
 0x162   : > { %v10231_v58 = vadd.f32 %v2355_v16, %v2108_v37  ;;  %v2111_v3 = vadd.f32 %v8609_v46, %v9986_v53  ;;  %8919 = vmatprep.mubr.msk.f32.mxu0 %vm243_vm0, %v4176_v44  ;;  %8972 = vmatprep.mubr.msk.f32.mxu1 %vm243_vm0, %v7479_v0  ;;  %v10248_v53 = vld [vmem:[%s11304_s1 + $0x70] sm:$0xff]  ;;  %v4182_v37 = vld [vmem:[%s9299_s25 + $0x42] sm:$0xff]  ;;  %v7485_v46 = vld [vmem:[%s9299_s25 + $0x17a] sm:$0xff] }
 0x163   : > { %v1957_v39 = vpop.f32.mrf.mxu0  ;;  %v2365_v41 = vpop.f32.mrf.mxu1  ;;  %v7484_v16 = vld [vmem:[%s9299_s25 + $0x172] sm:$0xff] }
 0x164   : > { %v10238_v5 = vadd.f32 %v8662_v32, %v2111_v3  ;;  %v2110_v14 = vadd.f32 %v1957_v39, %v10003_v45 }
 0x165   : > { %v8612_v61 = vpop.f32.mrf.mxu0  ;;  %v8665_v17 = vpop.f32.mrf.mxu1  ;;  %8920 = vmatmul.mubr.msk.f32.vlgmr.msra.gmra.mxu0 %vm243_vm0, %v4177_v33  ;;  %8973 = vmatmul.mubr.msk.f32.vlgmr.msra.gmra.mxu1 %vm243_vm0, %v7480_v25 }
 0x166   : > { %v10255_v45 = vadd.f32 %v2365_v41, %v2110_v14  ;;  %v2113_v55 = vadd.f32 %v8612_v61, %v10014_v10  ;;  %9024 = vmatpush3.msra.mxu0 %v9996_v40  ;;  %9077 = vmatpush3.msra.mxu1 %v10001_v63  ;;  %v4183_v41 = vld [vmem:[%s9299_s25 + $0x4a] sm:$0xff]  ;;  %v7486_v14 = vld [vmem:[%s9299_s25 + $0x182] sm:$0xff] }
 0x167   : > { %v1967_v59 = vpop.f32.mrf.mxu0  ;;  %v2375_v19 = vpop.f32.mrf.mxu1  ;;  %8922 = vmatprep.mubr.msk.f32.mxu0 %vm243_vm0, %v4178_v38  ;;  %8975 = vmatprep.mubr.msk.f32.mxu1 %vm243_vm0, %v7481_v12  ;;  %v4184_v12 = vld [vmem:[%s9299_s25 + $0x52] sm:$0xff]  ;;  %v7487_v61 = vld [vmem:[%s9299_s25 + $0x18a] sm:$0xff] }
 0x168   : > { %v10266_v13 = vadd.f32 %v8665_v17, %v2113_v55  ;;  %v2112_v10 = vadd.f32 %v1967_v59, %v10021_v11  ;;  %9129 = vmatprep.subr.mxu0 %v10248_v53  ;;  %9182 = vmatprep.subr.mxu1 %v10253_v15  ;;  %v4181_v11 = vld [vmem:[%s9299_s25 + $0x3a] sm:$0xff] }
 0x169   : > { %v8615_v40 = vpop.f32.mrf.mxu0  ;;  %v8668_v63 = vpop.f32.mrf.mxu1  ;;  %8923 = vmatmul.mubr.msk.f32.gmra.mxu0 %vm243_vm0, %v4179_v50  ;;  %8976 = vmatmul.mubr.msk.f32.gmra.mxu1 %vm243_vm0, %v7482_v54 }
 0x16a   : > { %v10273_v36 = vadd.f32 %v2375_v19, %v2112_v10  ;;  %v2115_v28 = vadd.f32 %v8615_v40, %v10030_v30  ;;  %8925 = vmatprep.mubr.msk.f32.mxu0 %vm243_vm0, %v4180_v8  ;;  %8978 = vmatprep.mubr.msk.f32.mxu1 %vm243_vm0, %v7483_v18  ;;  %v4185_v19 = vld [vmem:[%s9299_s25 + $0x5a] sm:$0xff]  ;;  %v7488_v8 = vld [vmem:[%s9299_s25 + $0x192] sm:$0xff]  ;;  %v4186_v10 = vld [vmem:[%s9299_s25 + $0x62] sm:$0xff] }
 0x16b   : > { %v1977_v44 = vpop.f32.mrf.mxu0  ;;  %v2385_v0 = vpop.f32.mrf.mxu1  ;;  %v7489_v40 = vld [vmem:[%s9299_s25 + $0x19a] sm:$0xff] }
 0x16c   : > { %v10282_v32 = vadd.f32 %v8668_v63, %v2115_v28  ;;  %v2114_v3 = vadd.f32 %v1977_v44, %v10035_v47 }
 0x16d   : > { %v8618_v33 = vpop.f32.mrf.mxu0  ;;  %v8671_v30 = vpop.f32.mrf.mxu1  ;;  %8926 = vmatmul.mubr.msk.f32.gmra.mxu0 %vm243_vm0, %v4181_v11  ;;  %8979 = vmatmul.mubr.msk.f32.gmra.mxu1 %vm243_vm0, %v7484_v16 }
 0x16e   : > { %v10287_v25 = vadd.f32 %v2385_v0, %v2114_v3  ;;  %v2117_v39 = vadd.f32 %v8618_v33, %v10044_v62  ;;  %8928 = vmatprep.mubr.msk.f32.mxu0 %vm243_vm0, %v4182_v37  ;;  %8981 = vmatprep.mubr.msk.f32.mxu1 %vm243_vm0, %v7485_v46  ;;  %v4187_v0 = vld [vmem:[%s9299_s25 + $0x6a] sm:$0xff]  ;;  %v7490_v37 = vld [vmem:[%s9299_s25 + $0x1a2] sm:$0xff]  ;;  %v4188_v3 = vld [vmem:[%s9299_s25 + $0x72] sm:$0xff] }
 0x16f   : > { %v1987_v38 = vpop.f32.mrf.mxu0  ;;  %v2395_v47 = vpop.f32.mrf.mxu1  ;;  %v7491_v33 = vld [vmem:[%s9299_s25 + $0x1aa] sm:$0xff] }
 0x170   : > { %v10296_v17 = vadd.f32 %v8671_v30, %v2117_v39  ;;  %v2116_v55 = vadd.f32 %v1987_v38, %v10049_v7 }
 0x171   : > { %v8621_v50 = vpop.f32.mrf.mxu0  ;;  %v8674_v62 = vpop.f32.mrf.mxu1  ;;  %8929 = vmatmul.mubr.msk.f32.gmra.mxu0 %vm243_vm0, %v4183_v41  ;;  %8982 = vmatmul.mubr.msk.f32.gmra.mxu1 %vm243_vm0, %v7486_v14 }
 0x172   : > { %v10301_v54 = vadd.f32 %v2395_v47, %v2116_v55  ;;  %v2119_v59 = vadd.f32 %v8621_v50, %v10058_v51  ;;  %8931 = vmatprep.mubr.msk.f32.mxu0 %vm243_vm0, %v4184_v12  ;;  %8984 = vmatprep.mubr.msk.f32.mxu1 %vm243_vm0, %v7487_v61  ;;  %v4189_v47 = vld [vmem:[%s9299_s25 + $0x7a] sm:$0xff]  ;;  %v7492_v12 = vld [vmem:[%s9299_s25 + $0x1b2] sm:$0xff]  ;;  %v4190_v55 = vld [vmem:[%s9299_s25 + $0x82] sm:$0xff] }
 0x173   : > { %v1997_v18 = vpop.f32.mrf.mxu0  ;;  %v2405_v7 = vpop.f32.mrf.mxu1  ;;  %v7493_v50 = vld [vmem:[%s9299_s25 + $0x1ba] sm:$0xff] }
 0x174   : > { %v10310_v63 = vadd.f32 %v8674_v62, %v2119_v59  ;;  %v2118_v28 = vadd.f32 %v1997_v18, %v10063_v29 }
 0x175   : > { %v8624_v11 = vpop.f32.mrf.mxu0  ;;  %v8677_v51 = vpop.f32.mrf.mxu1  ;;  %8932 = vmatmul.mubr.msk.f32.gmra.mxu0 %vm243_vm0, %v4185_v19  ;;  %8985 = vmatmul.mubr.msk.f32.gmra.mxu1 %vm243_vm0, %v7488_v8 }
 0x176   : > { %v10315_v16 = vadd.f32 %v2405_v7, %v2118_v28  ;;  %v2121_v44 = vadd.f32 %v8624_v11, %v10072_v60  ;;  %8934 = vmatprep.mubr.msk.f32.mxu0 %vm243_vm0, %v4186_v10  ;;  %8987 = vmatprep.mubr.msk.f32.mxu1 %vm243_vm0, %v7489_v40  ;;  %v4191_v7 = vld [vmem:[%s9299_s25 + $0x8a] sm:$0xff]  ;;  %v7494_v10 = vld [vmem:[%s9299_s25 + $0x1c2] sm:$0xff]  ;;  %v4192_v28 = vld [vmem:[%s9299_s25 + $0x92] sm:$0xff] }
 0x177   : > { %v2007_v46 = vpop.f32.mrf.mxu0  ;;  %v2415_v29 = vpop.f32.mrf.mxu1  ;;  %v7495_v11 = vld [vmem:[%s9299_s25 + $0x1ca] sm:$0xff] }
 0x178   : > { %v10324_v30 = vadd.f32 %v8677_v51, %v2121_v44  ;;  %v2120_v39 = vadd.f32 %v2007_v46, %v10077_v56 }
 0x179   : > { %v8627_v41 = vpop.f32.mrf.mxu0  ;;  %v8680_v60 = vpop.f32.mrf.mxu1  ;;  %8935 = vmatmul.mubr.msk.f32.gmra.mxu0 %vm243_vm0, %v4187_v0  ;;  %8988 = vmatmul.mubr.msk.f32.gmra.mxu1 %vm243_vm0, %v7490_v37 }
 0x17a   : > { %v10329_v14 = vadd.f32 %v2415_v29, %v2120_v39  ;;  %v2123_v38 = vadd.f32 %v8627_v41, %v10086_v6  ;;  %8937 = vmatprep.mubr.msk.f32.mxu0 %vm243_vm0, %v4188_v3  ;;  %8990 = vmatprep.mubr.msk.f32.mxu1 %vm243_vm0, %v7491_v33  ;;  %v4193_v29 = vld [vmem:[%s9299_s25 + $0x9a] sm:$0xff]  ;;  %v7496_v3 = vld [vmem:[%s9299_s25 + $0x1d2] sm:$0xff]  ;;  %v4194_v39 = vld [vmem:[%s9299_s25 + $0xa2] sm:$0xff] }
 0x17b   : > { %v2017_v61 = vpop.f32.mrf.mxu0  ;;  %v2425_v56 = vpop.f32.mrf.mxu1  ;;  %v7497_v41 = vld [vmem:[%s9299_s25 + $0x1da] sm:$0xff] }
 0x17c   : > { %v10338_v62 = vadd.f32 %v8680_v60, %v2123_v38  ;;  %v2122_v59 = vadd.f32 %v2017_v61, %v10091_v22 }
 0x17d   : > { %v8630_v19 = vpop.f32.mrf.mxu0  ;;  %v8683_v6 = vpop.f32.mrf.mxu1  ;;  %8938 = vmatmul.mubr.msk.f32.gmra.mxu0 %vm243_vm0, %v4189_v47  ;;  %8991 = vmatmul.mubr.msk.f32.gmra.mxu1 %vm243_vm0, %v7492_v12 }
 0x17e   : > { %v10343_v8 = vadd.f32 %v2425_v56, %v2122_v59  ;;  %v2125_v18 = vadd.f32 %v8630_v19, %v10100_v20  ;;  %8940 = vmatprep.mubr.msk.f32.mxu0 %vm243_vm0, %v4190_v55  ;;  %8993 = vmatprep.mubr.msk.f32.mxu1 %vm243_vm0, %v7493_v50  ;;  %v4195_v56 = vld [vmem:[%s9299_s25 + $0xaa] sm:$0xff]  ;;  %v7498_v55 = vld [vmem:[%s9299_s25 + $0x1e2] sm:$0xff]  ;;  %v4196_v59 = vld [vmem:[%s9299_s25 + $0xb2] sm:$0xff] }
 0x17f   : > { %v2027_v40 = vpop.f32.mrf.mxu0  ;;  %v2435_v22 = vpop.f32.mrf.mxu1  ;;  %v7499_v19 = vld [vmem:[%s9299_s25 + $0x1ea] sm:$0xff] }
 0x180   : > { %v10352_v51 = vadd.f32 %v8683_v6, %v2125_v18  ;;  %v2124_v44 = vadd.f32 %v2027_v40, %v10105_v35 }
 0x181   : > { %v8633_v0 = vpop.f32.mrf.mxu0  ;;  %v8686_v20 = vpop.f32.mrf.mxu1  ;;  %8941 = vmatmul.mubr.msk.f32.gmra.mxu0 %vm243_vm0, %v4191_v7  ;;  %8994 = vmatmul.mubr.msk.f32.gmra.mxu1 %vm243_vm0, %v7494_v10 }
 0x182   : > { %v10357_v37 = vadd.f32 %v2435_v22, %v2124_v44  ;;  %v2127_v46 = vadd.f32 %v8633_v0, %v10114_v31  ;;  %8943 = vmatprep.mubr.msk.f32.mxu0 %vm243_vm0, %v4192_v28  ;;  %8996 = vmatprep.mubr.msk.f32.mxu1 %vm243_vm0, %v7495_v11  ;;  %v4197_v22 = vld [vmem:[%s9299_s25 + $0xba] sm:$0xff]  ;;  %v7500_v28 = vld [vmem:[%s9299_s25 + $0x1f2] sm:$0xff]  ;;  %v4198_v44 = vld [vmem:[%s9299_s25 + $0xc2] sm:$0xff] }
 0x183   : > { %v2037_v33 = vpop.f32.mrf.mxu0  ;;  %v2445_v35 = vpop.f32.mrf.mxu1  ;;  %v7501_v0 = vld [vmem:[%s9299_s25 + $0x1fa] sm:$0xff] }
 0x184   : > { %v10366_v60 = vadd.f32 %v8686_v20, %v2127_v46  ;;  %v2126_v38 = vadd.f32 %v2037_v33, %v10119_v24 }
 0x185   : > { %v8636_v47 = vpop.f32.mrf.mxu0  ;;  %v8689_v31 = vpop.f32.mrf.mxu1  ;;  %8944 = vmatmul.mubr.msk.f32.gmra.mxu0 %vm243_vm0, %v4193_v29  ;;  %8997 = vmatmul.mubr.msk.f32.gmra.mxu1 %vm243_vm0, %v7496_v3 }
 0x186   : > { %v10371_v12 = vadd.f32 %v2445_v35, %v2126_v38  ;;  %v2129_v61 = vadd.f32 %v8636_v47, %v10128_v43  ;;  %8946 = vmatprep.mubr.msk.f32.mxu0 %vm243_vm0, %v4194_v39  ;;  %8999 = vmatprep.mubr.msk.f32.mxu1 %vm243_vm0, %v7497_v41  ;;  %v4199_v35 = vld [vmem:[%s9299_s25 + $0xca] sm:$0xff]  ;;  %v7502_v39 = vld [vmem:[%s9299_s25 + $0x202] sm:$0xff]  ;;  %v4200_v38 = vld [vmem:[%s9299_s25 + $0xd2] sm:$0xff] }
 0x187   : > { %v2047_v50 = vpop.f32.mrf.mxu0  ;;  %v2455_v24 = vpop.f32.mrf.mxu1  ;;  %v7503_v47 = vld [vmem:[%s9299_s25 + $0x20a] sm:$0xff] }
 0x188   : > { %v10380_v6 = vadd.f32 %v8689_v31, %v2129_v61  ;;  %v2128_v18 = vadd.f32 %v2047_v50, %v10133_v52 }
 0x189   : > { %v8639_v7 = vpop.f32.mrf.mxu0  ;;  %v8692_v43 = vpop.f32.mrf.mxu1  ;;  %8947 = vmatmul.mubr.msk.f32.gmra.mxu0 %vm243_vm0, %v4195_v56  ;;  %9000 = vmatmul.mubr.msk.f32.gmra.mxu1 %vm243_vm0, %v7498_v55 }
 0x18a   : > { %v10385_v10 = vadd.f32 %v2455_v24, %v2128_v18  ;;  %v2131_v40 = vadd.f32 %v8639_v7, %v10142_v57  ;;  %8949 = vmatprep.mubr.msk.f32.mxu0 %vm243_vm0, %v4196_v59  ;;  %9002 = vmatprep.mubr.msk.f32.mxu1 %vm243_vm0, %v7499_v19  ;;  %v4201_v24 = vld [vmem:[%s9299_s25 + $0xda] sm:$0xff]  ;;  %v7504_v59 = vld [vmem:[%s9299_s25 + $0x212] sm:$0xff]  ;;  %v4202_v18 = vld [vmem:[%s9299_s25 + $0xe2] sm:$0xff] }
 0x18b   : > { %v2057_v11 = vpop.f32.mrf.mxu0  ;;  %v2465_v52 = vpop.f32.mrf.mxu1  ;;  %v7505_v7 = vld [vmem:[%s9299_s25 + $0x21a] sm:$0xff] }
 0x18c   : > { %v10394_v20 = vadd.f32 %v8692_v43, %v2131_v40  ;;  %v2130_v46 = vadd.f32 %v2057_v11, %v10147_v42 }
 0x18d   : > { %v8642_v29 = vpop.f32.mrf.mxu0  ;;  %v8695_v57 = vpop.f32.mrf.mxu1  ;;  %8950 = vmatmul.mubr.msk.f32.gmra.mxu0 %vm243_vm0, %v4197_v22  ;;  %9003 = vmatmul.mubr.msk.f32.gmra.mxu1 %vm243_vm0, %v7500_v28 }
 0x18e   : > { %v10399_v3 = vadd.f32 %v2465_v52, %v2130_v46  ;;  %v2133_v33 = vadd.f32 %v8642_v29, %v10156_v4  ;;  %8952 = vmatprep.mubr.msk.f32.mxu0 %vm243_vm0, %v4198_v44  ;;  %9005 = vmatprep.mubr.msk.f32.mxu1 %vm243_vm0, %v7501_v0  ;;  %v4203_v52 = vld [vmem:[%s9299_s25 + $0xea] sm:$0xff]  ;;  %v7506_v44 = vld [vmem:[%s9299_s25 + $0x222] sm:$0xff]  ;;  %v4204_v46 = vld [vmem:[%s9299_s25 + $0xf2] sm:$0xff] }
 0x18f   : > { %v2067_v41 = vpop.f32.mrf.mxu0  ;;  %v2475_v42 = vpop.f32.mrf.mxu1  ;;  %v7507_v29 = vld [vmem:[%s9299_s25 + $0x22a] sm:$0xff] }
 0x190   : > { %v10408_v31 = vadd.f32 %v8695_v57, %v2133_v33  ;;  %v2132_v61 = vadd.f32 %v2067_v41, %v10161_v2 }
 0x191   : > { %v8645_v56 = vpop.f32.mrf.mxu0  ;;  %v8698_v4 = vpop.f32.mrf.mxu1  ;;  %8953 = vmatmul.mubr.msk.f32.gmra.mxu0 %vm243_vm0, %v4199_v35  ;;  %9006 = vmatmul.mubr.msk.f32.gmra.mxu1 %vm243_vm0, %v7502_v39 }
 0x192   : > { %v10413_v55 = vadd.f32 %v2475_v42, %v2132_v61  ;;  %v2135_v50 = vadd.f32 %v8645_v56, %v10170_v21  ;;  %8955 = vmatprep.mubr.msk.f32.mxu0 %vm243_vm0, %v4200_v38  ;;  %9008 = vmatprep.mubr.msk.f32.mxu1 %vm243_vm0, %v7503_v47  ;;  %v4205_v42 = vld [vmem:[%s9299_s25 + $0xfa] sm:$0xff]  ;;  %v7508_v38 = vld [vmem:[%s9299_s25 + $0x232] sm:$0xff]  ;;  %v4206_v61 = vld [vmem:[%s9299_s25 + $0x102] sm:$0xff] }
 0x193   : > { %v2077_v19 = vpop.f32.mrf.mxu0  ;;  %v2485_v2 = vpop.f32.mrf.mxu1  ;;  %v7509_v56 = vld [vmem:[%s9299_s25 + $0x23a] sm:$0xff] }
 0x194   : > { %v10422_v43 = vadd.f32 %v8698_v4, %v2135_v50  ;;  %v2134_v40 = vadd.f32 %v2077_v19, %v10175_v26 }
 0x195   : > { %v8648_v22 = vpop.f32.mrf.mxu0  ;;  %v8701_v21 = vpop.f32.mrf.mxu1  ;;  %8956 = vmatmul.mubr.msk.f32.gmra.mxu0 %vm243_vm0, %v4201_v24  ;;  %9009 = vmatmul.mubr.msk.f32.gmra.mxu1 %vm243_vm0, %v7504_v59 }
 0x196   : > { %v10427_v28 = vadd.f32 %v2485_v2, %v2134_v40  ;;  %v2137_v11 = vadd.f32 %v8648_v22, %v10184_v34  ;;  %8958 = vmatprep.mubr.msk.f32.mxu0 %vm243_vm0, %v4202_v18  ;;  %9011 = vmatprep.mubr.msk.f32.mxu1 %vm243_vm0, %v7505_v7  ;;  %v4207_v2 = vld [vmem:[%s9299_s25 + $0x10a] sm:$0xff]  ;;  %v7510_v18 = vld [vmem:[%s9299_s25 + $0x242] sm:$0xff]  ;;  %v4208_v40 = vld [vmem:[%s9299_s25 + $0x112] sm:$0xff] }
 0x197   : > { %v2087_v0 = vpop.f32.mrf.mxu0  ;;  %v2495_v26 = vpop.f32.mrf.mxu1  ;;  %v7511_v22 = vld [vmem:[%s9299_s25 + $0x24a] sm:$0xff] }
 0x198   : > { %v10436_v57 = vadd.f32 %v8701_v21, %v2137_v11  ;;  %v2136_v33 = vadd.f32 %v2087_v0, %v10189_v48 }
 0x199   : > { %v8651_v35 = vpop.f32.mrf.mxu0  ;;  %v8704_v34 = vpop.f32.mrf.mxu1  ;;  %8959 = vmatmul.mubr.msk.f32.gmra.mxu0 %vm243_vm0, %v4203_v52  ;;  %9012 = vmatmul.mubr.msk.f32.gmra.mxu1 %vm243_vm0, %v7506_v44 }
 0x19a   : > { %v10441_v39 = vadd.f32 %v2495_v26, %v2136_v33  ;;  %v2139_v41 = vadd.f32 %v8651_v35, %v10198_v49  ;;  %8961 = vmatprep.mubr.msk.f32.mxu0 %vm243_vm0, %v4204_v46  ;;  %9014 = vmatprep.mubr.msk.f32.mxu1 %vm243_vm0, %v7507_v29  ;;  %v4209_v26 = vld [vmem:[%s9299_s25 + $0x11a] sm:$0xff]  ;;  %v7512_v46 = vld [vmem:[%s9299_s25 + $0x252] sm:$0xff] }
 0x19b   : > { %v2097_v47 = vpop.f32.mrf.mxu0  ;;  %v2505_v48 = vpop.f32.mrf.mxu1  ;;  %v7548_v33 = vld [vmem:[%s9299_s25 + $0x281] sm:$0xff]  ;;  %v7617_v35 = vld [vmem:[%s9299_s25 + $0x3b9] sm:$0xff] }
 0x19c   : > { %v10450_v4 = vadd.f32 %v8704_v34, %v2139_v41  ;;  %v2138_v50 = vadd.f32 %v2097_v47, %v10203_v9 }
 0x19d   : > { %v8709_v24 = vpop.f32.mrf.mxu0  ;;  %v8762_v49 = vpop.f32.mrf.mxu1  ;;  %8962 = vmatmul.mubr.msk.f32.gmra.mxu0 %vm243_vm0, %v4205_v42  ;;  %9015 = vmatmul.mubr.msk.f32.gmra.mxu1 %vm243_vm0, %v7508_v38 }
 0x19e   : > { %v10455_v59 = vadd.f32 %v2505_v48, %v2138_v50  ;;  %v2922_v19 = vadd.f32 %v8709_v24, %v10212_v1  ;;  %8964 = vmatprep.mubr.msk.f32.mxu0 %vm243_vm0, %v4206_v61  ;;  %9017 = vmatprep.mubr.msk.f32.mxu1 %vm243_vm0, %v7509_v56  ;;  %v7549_v48 = vld [vmem:[%s9299_s25 + $0x289] sm:$0xff]  ;;  %v7618_v61 = vld [vmem:[%s9299_s25 + $0x3c1] sm:$0xff] }
 0x19f   : > { %v2752_v7 = vpop.f32.mrf.mxu0  ;;  %v3159_v9 = vpop.f32.mrf.mxu1 }
 0x1a0   : > { %v10464_v21 = vadd.f32 %v8762_v49, %v2922_v19  ;;  %v2921_v11 = vadd.f32 %v2752_v7, %v10217_v27  ;;  %v7550_v49 = vld [vmem:[%s9299_s25 + $0x291] sm:$0xff]  ;;  %v7619_v19 = vld [vmem:[%s9299_s25 + $0x3c9] sm:$0xff] }
 0x1a1   : > { %v8712_v52 = vpop.f32.mrf.mxu0  ;;  %v8765_v1 = vpop.f32.mrf.mxu1  ;;  %8965 = vmatmul.mubr.msk.f32.gmra.mxu0 %vm243_vm0, %v4207_v2  ;;  %9018 = vmatmul.mubr.msk.f32.gmra.mxu1 %vm243_vm0, %v7510_v18 }
 0x1a2   : > { %v10469_v44 = vadd.f32 %v3159_v9, %v2921_v11  ;;  %v2924_v0 = vadd.f32 %v8712_v52, %v10226_v23  ;;  %8967 = vmatprep.mubr.msk.f32.mxu0 %vm243_vm0, %v4208_v40  ;;  %9020 = vmatprep.mubr.msk.f32.mxu1 %vm243_vm0, %v7511_v22  ;;  %v7551_v9 = vld [vmem:[%s9299_s25 + $0x299] sm:$0xff]  ;;  %v7552_v11 = vld [vmem:[%s9299_s25 + $0x2a1] sm:$0xff] }
 0x1a3   : > { %v2762_v29 = vpop.f32.mrf.mxu0  ;;  %v3169_v27 = vpop.f32.mrf.mxu1  ;;  %v7621_v52 = vld [vmem:[%s9299_s25 + $0x3d9] sm:$0xff] }
 0x1a4   : > { %v10478_v34 = vadd.f32 %v8765_v1, %v2924_v0  ;;  %v2923_v41 = vadd.f32 %v2762_v29, %v10231_v58  ;;  %v7622_v29 = vld [vmem:[%s9299_s25 + $0x3e1] sm:$0xff] }
 0x1a5   : > { %v8715_v42 = vpop.f32.mrf.mxu0  ;;  %v8768_v23 = vpop.f32.mrf.mxu1  ;;  %8968 = vmatmul.mubr.msk.f32.gmra.mxu0 %vm243_vm0, %v4209_v26  ;;  %9021 = vmatmul.mubr.msk.f32.gmra.mxu1 %vm243_vm0, %v7512_v46  ;;  %v7553_v46 = vld [vmem:[%s9299_s25 + $0x2a9] sm:$0xff] }
 0x1a6   : > { %v10483_v38 = vadd.f32 %v3169_v27, %v2923_v41  ;;  %v2926_v47 = vadd.f32 %v8715_v42, %v10238_v5  ;;  %9025 = vmatprep.mubr.msk.f32.mxu0 %vm243_vm0, %v7548_v33  ;;  %9078 = vmatprep.mubr.msk.f32.mxu1 %vm243_vm0, %v7617_v35  ;;  %v7554_v33 = vld [vmem:[%s9299_s25 + $0x2b1] sm:$0xff]  ;;  %v7623_v35 = vld [vmem:[%s9299_s25 + $0x3e9] sm:$0xff] }
 0x1a7   : > { %v2772_v58 = vpop.f32.mrf.mxu0  ;;  %v3179_v56 = vpop.f32.mrf.mxu1 }
 0x1a8   : > { %v10490_v50 = vadd.f32 %v8768_v23, %v2926_v47  ;;  %v2925_v24 = vadd.f32 %v2772_v58, %v10255_v45  ;;  %v7620_v45 = vld [vmem:[%s9299_s25 + $0x3d1] sm:$0xff] }
 0x1a9   : > { %v8718_v2 = vpop.f32.mrf.mxu0  ;;  %v8771_v5 = vpop.f32.mrf.mxu1  ;;  %9026 = vmatmul.mubr.msk.f32.vlgmr.msra.gmra.mxu0 %vm243_vm0, %v7549_v48  ;;  %9079 = vmatmul.mubr.msk.f32.vlgmr.msra.gmra.mxu1 %vm243_vm0, %v7618_v61  ;;  %v7555_v61 = vld [vmem:[%s9299_s25 + $0x2b9] sm:$0xff]  ;;  %v7624_v58 = vld [vmem:[%s9299_s25 + $0x3f1] sm:$0xff] }
 0x1aa   : > { %v10497_v18 = vadd.f32 %v3179_v56, %v2925_v24  ;;  %v2928_v7 = vadd.f32 %v8718_v2, %v10266_v13  ;;  %9130 = vmatpush3.msra.mxu0 %v10248_v53  ;;  %9183 = vmatpush3.msra.mxu1 %v10253_v15  ;;  %v7556_v24 = vld [vmem:[%s9299_s25 + $0x2c1] sm:$0xff] }
 0x1ab   : > { %v2782_v40 = vpop.f32.mrf.mxu0  ;;  %v3189_v22 = vpop.f32.mrf.mxu1  ;;  %9028 = vmatprep.mubr.msk.f32.mxu0 %vm243_vm0, %v7550_v49  ;;  %9081 = vmatprep.mubr.msk.f32.mxu1 %vm243_vm0, %v7619_v19  ;;  %v7625_v49 = vld [vmem:[%s9299_s25 + $0x3f9] sm:$0xff] }
 0x1ac   : > { %v10508_v1 = vadd.f32 %v8771_v5, %v2928_v7  ;;  %v2927_v53 = vadd.f32 %v2782_v40, %v10273_v36  ;;  %v7626_v40 = vld [vmem:[%s9299_s25 + $0x401] sm:$0xff] }
 0x1ad   : > { %v8721_v13 = vpop.f32.mrf.mxu0  ;;  %v8774_v15 = vpop.f32.mrf.mxu1  ;;  %9029 = vmatmul.mubr.msk.f32.gmra.mxu0 %vm243_vm0, %v7551_v9  ;;  %9082 = vmatmul.mubr.msk.f32.gmra.mxu1 %vm243_vm0, %v7620_v45  ;;  %v7557_v45 = vld [vmem:[%s9299_s25 + $0x2c9] sm:$0xff] }
 0x1ae   : > { %v10513_v0 = vadd.f32 %v3189_v22, %v2927_v53  ;;  %v2930_v26 = vadd.f32 %v8721_v13, %v10282_v32  ;;  %9031 = vmatprep.mubr.msk.f32.mxu0 %vm243_vm0, %v7552_v11  ;;  %9084 = vmatprep.mubr.msk.f32.mxu1 %vm243_vm0, %v7621_v52  ;;  %v7558_v11 = vld [vmem:[%s9299_s25 + $0x2d1] sm:$0xff]  ;;  %v7627_v52 = vld [vmem:[%s9299_s25 + $0x409] sm:$0xff] }
 0x1af   : > { %v2792_v27 = vpop.f32.mrf.mxu0  ;;  %v3199_v36 = vpop.f32.mrf.mxu1 }
 0x1b0   : > { %v10522_v41 = vadd.f32 %v8774_v15, %v2930_v26  ;;  %v2929_v42 = vadd.f32 %v2792_v27, %v10287_v25  ;;  %v7628_v27 = vld [vmem:[%s9299_s25 + $0x411] sm:$0xff] }
 0x1b1   : > { %v8724_v23 = vpop.f32.mrf.mxu0  ;;  %v8777_v32 = vpop.f32.mrf.mxu1  ;;  %9032 = vmatmul.mubr.msk.f32.gmra.mxu0 %vm243_vm0, %v7553_v46  ;;  %9085 = vmatmul.mubr.msk.f32.gmra.mxu1 %vm243_vm0, %v7622_v29  ;;  %v7559_v29 = vld [vmem:[%s9299_s25 + $0x2d9] sm:$0xff] }
 0x1b2   : > { %v10527_v47 = vadd.f32 %v3199_v36, %v2929_v42  ;;  %v2932_v48 = vadd.f32 %v8724_v23, %v10296_v17  ;;  %9034 = vmatprep.mubr.msk.f32.mxu0 %vm243_vm0, %v7554_v33  ;;  %9087 = vmatprep.mubr.msk.f32.mxu1 %vm243_vm0, %v7623_v35  ;;  %v7560_v33 = vld [vmem:[%s9299_s25 + $0x2e1] sm:$0xff]  ;;  %v7629_v35 = vld [vmem:[%s9299_s25 + $0x419] sm:$0xff] }
 0x1b3   : > { %v2802_v56 = vpop.f32.mrf.mxu0  ;;  %v3209_v25 = vpop.f32.mrf.mxu1 }
 0x1b4   : > { %v10536_v19 = vadd.f32 %v8777_v32, %v2932_v48  ;;  %v2931_v2 = vadd.f32 %v2802_v56, %v10301_v54  ;;  %v7630_v56 = vld [vmem:[%s9299_s25 + $0x421] sm:$0xff] }
 0x1b5   : > { %v8727_v5 = vpop.f32.mrf.mxu0  ;;  %v8780_v17 = vpop.f32.mrf.mxu1  ;;  %9035 = vmatmul.mubr.msk.f32.gmra.mxu0 %vm243_vm0, %v7555_v61  ;;  %9088 = vmatmul.mubr.msk.f32.gmra.mxu1 %vm243_vm0, %v7624_v58  ;;  %v7561_v58 = vld [vmem:[%s9299_s25 + $0x2e9] sm:$0xff] }
 0x1b6   : > { %v10541_v7 = vadd.f32 %v3209_v25, %v2931_v2  ;;  %v2934_v9 = vadd.f32 %v8727_v5, %v10310_v63  ;;  %9037 = vmatprep.mubr.msk.f32.mxu0 %vm243_vm0, %v7556_v24  ;;  %9090 = vmatprep.mubr.msk.f32.mxu1 %vm243_vm0, %v7625_v49  ;;  %v7562_v24 = vld [vmem:[%s9299_s25 + $0x2f1] sm:$0xff]  ;;  %v7631_v49 = vld [vmem:[%s9299_s25 + $0x429] sm:$0xff] }
 0x1b7   : > { %v2812_v22 = vpop.f32.mrf.mxu0  ;;  %v3219_v54 = vpop.f32.mrf.mxu1 }
 0x1b8   : > { %v10550_v53 = vadd.f32 %v8780_v17, %v2934_v9  ;;  %v2933_v13 = vadd.f32 %v2812_v22, %v10315_v16  ;;  %v7632_v22 = vld [vmem:[%s9299_s25 + $0x431] sm:$0xff] }
 0x1b9   : > { %v8730_v15 = vpop.f32.mrf.mxu0  ;;  %v8783_v63 = vpop.f32.mrf.mxu1  ;;  %9038 = vmatmul.mubr.msk.f32.gmra.mxu0 %vm243_vm0, %v7557_v45  ;;  %9091 = vmatmul.mubr.msk.f32.gmra.mxu1 %vm243_vm0, %v7626_v40  ;;  %v7563_v40 = vld [vmem:[%s9299_s25 + $0x2f9] sm:$0xff] }
 0x1ba   : > { %v10555_v26 = vadd.f32 %v3219_v54, %v2933_v13  ;;  %v2936_v46 = vadd.f32 %v8730_v15, %v10324_v30  ;;  %9040 = vmatprep.mubr.msk.f32.mxu0 %vm243_vm0, %v7558_v11  ;;  %9093 = vmatprep.mubr.msk.f32.mxu1 %vm243_vm0, %v7627_v52  ;;  %v7564_v11 = vld [vmem:[%s9299_s25 + $0x301] sm:$0xff]  ;;  %v7633_v52 = vld [vmem:[%s9299_s25 + $0x439] sm:$0xff] }
 0x1bb   : > { %v2822_v36 = vpop.f32.mrf.mxu0  ;;  %v3229_v16 = vpop.f32.mrf.mxu1 }
 0x1bc   : > { %v10564_v42 = vadd.f32 %v8783_v63, %v2936_v46  ;;  %v2935_v23 = vadd.f32 %v2822_v36, %v10329_v14  ;;  %v7634_v36 = vld [vmem:[%s9299_s25 + $0x441] sm:$0xff] }
 0x1bd   : > { %v8733_v32 = vpop.f32.mrf.mxu0  ;;  %v8786_v30 = vpop.f32.mrf.mxu1  ;;  %9041 = vmatmul.mubr.msk.f32.gmra.mxu0 %vm243_vm0, %v7559_v29  ;;  %9094 = vmatmul.mubr.msk.f32.gmra.mxu1 %vm243_vm0, %v7628_v27  ;;  %v7565_v27 = vld [vmem:[%s9299_s25 + $0x309] sm:$0xff] }
 0x1be   : > { %v10569_v48 = vadd.f32 %v3229_v16, %v2935_v23  ;;  %v2938_v61 = vadd.f32 %v8733_v32, %v10338_v62  ;;  %9043 = vmatprep.mubr.msk.f32.mxu0 %vm243_vm0, %v7560_v33  ;;  %9096 = vmatprep.mubr.msk.f32.mxu1 %vm243_vm0, %v7629_v35  ;;  %v7566_v33 = vld [vmem:[%s9299_s25 + $0x311] sm:$0xff]  ;;  %v7635_v35 = vld [vmem:[%s9299_s25 + $0x449] sm:$0xff] }
 0x1bf   : > { %v2832_v25 = vpop.f32.mrf.mxu0  ;;  %v3239_v14 = vpop.f32.mrf.mxu1 }
 0x1c0   : > { %v10578_v2 = vadd.f32 %v8786_v30, %v2938_v61  ;;  %v2937_v5 = vadd.f32 %v2832_v25, %v10343_v8  ;;  %v7636_v25 = vld [vmem:[%s9299_s25 + $0x451] sm:$0xff] }
 0x1c1   : > { %v8736_v17 = vpop.f32.mrf.mxu0  ;;  %v8789_v62 = vpop.f32.mrf.mxu1  ;;  %9044 = vmatmul.mubr.msk.f32.gmra.mxu0 %vm243_vm0, %v7561_v58  ;;  %9097 = vmatmul.mubr.msk.f32.gmra.mxu1 %vm243_vm0, %v7630_v56  ;;  %v7567_v56 = vld [vmem:[%s9299_s25 + $0x319] sm:$0xff] }
 0x1c2   : > { %v10583_v9 = vadd.f32 %v3239_v14, %v2937_v5  ;;  %v2940_v45 = vadd.f32 %v8736_v17, %v10352_v51  ;;  %9046 = vmatprep.mubr.msk.f32.mxu0 %vm243_vm0, %v7562_v24  ;;  %9099 = vmatprep.mubr.msk.f32.mxu1 %vm243_vm0, %v7631_v49  ;;  %v7568_v24 = vld [vmem:[%s9299_s25 + $0x321] sm:$0xff]  ;;  %v7637_v49 = vld [vmem:[%s9299_s25 + $0x459] sm:$0xff] }
 0x1c3   : > { %v2842_v54 = vpop.f32.mrf.mxu0  ;;  %v3249_v8 = vpop.f32.mrf.mxu1 }
 0x1c4   : > { %v10592_v13 = vadd.f32 %v8789_v62, %v2940_v45  ;;  %v2939_v15 = vadd.f32 %v2842_v54, %v10357_v37  ;;  %v7638_v54 = vld [vmem:[%s9299_s25 + $0x461] sm:$0xff] }
 0x1c5   : > { %v8739_v63 = vpop.f32.mrf.mxu0  ;;  %v8792_v51 = vpop.f32.mrf.mxu1  ;;  %9047 = vmatmul.mubr.msk.f32.gmra.mxu0 %vm243_vm0, %v7563_v40  ;;  %9100 = vmatmul.mubr.msk.f32.gmra.mxu1 %vm243_vm0, %v7632_v22  ;;  %v7569_v22 = vld [vmem:[%s9299_s25 + $0x329] sm:$0xff] }
 0x1c6   : > { %v10597_v46 = vadd.f32 %v3249_v8, %v2939_v15  ;;  %v2942_v29 = vadd.f32 %v8739_v63, %v10366_v60  ;;  %9049 = vmatprep.mubr.msk.f32.mxu0 %vm243_vm0, %v7564_v11  ;;  %9102 = vmatprep.mubr.msk.f32.mxu1 %vm243_vm0, %v7633_v52  ;;  %v7570_v11 = vld [vmem:[%s9299_s25 + $0x331] sm:$0xff]  ;;  %v7639_v52 = vld [vmem:[%s9299_s25 + $0x469] sm:$0xff] }
 0x1c7   : > { %v2852_v16 = vpop.f32.mrf.mxu0  ;;  %v3259_v37 = vpop.f32.mrf.mxu1 }
 0x1c8   : > { %v10606_v23 = vadd.f32 %v8792_v51, %v2942_v29  ;;  %v2941_v32 = vadd.f32 %v2852_v16, %v10371_v12  ;;  %v7640_v16 = vld [vmem:[%s9299_s25 + $0x471] sm:$0xff] }
 0x1c9   : > { %v8742_v30 = vpop.f32.mrf.mxu0  ;;  %v8795_v60 = vpop.f32.mrf.mxu1  ;;  %9050 = vmatmul.mubr.msk.f32.gmra.mxu0 %vm243_vm0, %v7565_v27  ;;  %9103 = vmatmul.mubr.msk.f32.gmra.mxu1 %vm243_vm0, %v7634_v36  ;;  %v7571_v36 = vld [vmem:[%s9299_s25 + $0x339] sm:$0xff] }
 0x1ca   : > { %v10611_v61 = vadd.f32 %v3259_v37, %v2941_v32  ;;  %v2944_v58 = vadd.f32 %v8742_v30, %v10380_v6  ;;  %9052 = vmatprep.mubr.msk.f32.mxu0 %vm243_vm0, %v7566_v33  ;;  %9105 = vmatprep.mubr.msk.f32.mxu1 %vm243_vm0, %v7635_v35  ;;  %v7572_v33 = vld [vmem:[%s9299_s25 + $0x341] sm:$0xff]  ;;  %v7641_v35 = vld [vmem:[%s9299_s25 + $0x479] sm:$0xff] }
 0x1cb   : > { %v2862_v14 = vpop.f32.mrf.mxu0  ;;  %v3269_v12 = vpop.f32.mrf.mxu1 }
 0x1cc   : > { %v10620_v5 = vadd.f32 %v8795_v60, %v2944_v58  ;;  %v2943_v17 = vadd.f32 %v2862_v14, %v10385_v10  ;;  %v7642_v14 = vld [vmem:[%s9299_s25 + $0x481] sm:$0xff] }
 0x1cd   : > { %v8745_v62 = vpop.f32.mrf.mxu0  ;;  %v8798_v6 = vpop.f32.mrf.mxu1  ;;  %9053 = vmatmul.mubr.msk.f32.gmra.mxu0 %vm243_vm0, %v7567_v56  ;;  %9106 = vmatmul.mubr.msk.f32.gmra.mxu1 %vm243_vm0, %v7636_v25  ;;  %v7573_v25 = vld [vmem:[%s9299_s25 + $0x349] sm:$0xff] }
 0x1ce   : > { %v10625_v45 = vadd.f32 %v3269_v12, %v2943_v17  ;;  %v2946_v40 = vadd.f32 %v8745_v62, %v10394_v20  ;;  %9055 = vmatprep.mubr.msk.f32.mxu0 %vm243_vm0, %v7568_v24  ;;  %9108 = vmatprep.mubr.msk.f32.mxu1 %vm243_vm0, %v7637_v49  ;;  %v7574_v24 = vld [vmem:[%s9299_s25 + $0x351] sm:$0xff]  ;;  %v7643_v49 = vld [vmem:[%s9299_s25 + $0x489] sm:$0xff] }
 0x1cf   : > { %v2872_v8 = vpop.f32.mrf.mxu0  ;;  %v3279_v10 = vpop.f32.mrf.mxu1 }
 0x1d0   : > { %v10634_v15 = vadd.f32 %v8798_v6, %v2946_v40  ;;  %v2945_v63 = vadd.f32 %v2872_v8, %v10399_v3  ;;  %v7644_v8 = vld [vmem:[%s9299_s25 + $0x491] sm:$0xff] }
 0x1d1   : > { %v8748_v51 = vpop.f32.mrf.mxu0  ;;  %v8801_v20 = vpop.f32.mrf.mxu1  ;;  %9056 = vmatmul.mubr.msk.f32.gmra.mxu0 %vm243_vm0, %v7569_v22  ;;  %9109 = vmatmul.mubr.msk.f32.gmra.mxu1 %vm243_vm0, %v7638_v54  ;;  %v7575_v54 = vld [vmem:[%s9299_s25 + $0x359] sm:$0xff] }
 0x1d2   : > { %v10639_v29 = vadd.f32 %v3279_v10, %v2945_v63  ;;  %v2948_v27 = vadd.f32 %v8748_v51, %v10408_v31  ;;  %9058 = vmatprep.mubr.msk.f32.mxu0 %vm243_vm0, %v7570_v11  ;;  %9111 = vmatprep.mubr.msk.f32.mxu1 %vm243_vm0, %v7639_v52  ;;  %v7576_v11 = vld [vmem:[%s9299_s25 + $0x361] sm:$0xff]  ;;  %v7645_v52 = vld [vmem:[%s9299_s25 + $0x499] sm:$0xff] }
 0x1d3   : > { %v2882_v37 = vpop.f32.mrf.mxu0  ;;  %v3289_v3 = vpop.f32.mrf.mxu1 }
 0x1d4   : > { %v10648_v32 = vadd.f32 %v8801_v20, %v2948_v27  ;;  %v2947_v30 = vadd.f32 %v2882_v37, %v10413_v55  ;;  %v7646_v37 = vld [vmem:[%s9299_s25 + $0x4a1] sm:$0xff] }
 0x1d5   : > { %v8751_v60 = vpop.f32.mrf.mxu0  ;;  %v8804_v31 = vpop.f32.mrf.mxu1  ;;  %9059 = vmatmul.mubr.msk.f32.gmra.mxu0 %vm243_vm0, %v7571_v36  ;;  %9112 = vmatmul.mubr.msk.f32.gmra.mxu1 %vm243_vm0, %v7640_v16  ;;  %v7577_v16 = vld [vmem:[%s9299_s25 + $0x369] sm:$0xff] }
 0x1d6   : > { %v10653_v58 = vadd.f32 %v3289_v3, %v2947_v30  ;;  %v2950_v56 = vadd.f32 %v8751_v60, %v10422_v43  ;;  %9061 = vmatprep.mubr.msk.f32.mxu0 %vm243_vm0, %v7572_v33  ;;  %9114 = vmatprep.mubr.msk.f32.mxu1 %vm243_vm0, %v7641_v35  ;;  %v7578_v33 = vld [vmem:[%s9299_s25 + $0x371] sm:$0xff]  ;;  %v7647_v35 = vld [vmem:[%s9299_s25 + $0x4a9] sm:$0xff] }
 0x1d7   : > { %v2892_v12 = vpop.f32.mrf.mxu0  ;;  %v3299_v55 = vpop.f32.mrf.mxu1 }
 0x1d8   : > { %v10662_v17 = vadd.f32 %v8804_v31, %v2950_v56  ;;  %v2949_v62 = vadd.f32 %v2892_v12, %v10427_v28  ;;  %v7648_v12 = vld [vmem:[%s9299_s25 + $0x4b1] sm:$0xff] }
 0x1d9   : > { %v8754_v6 = vpop.f32.mrf.mxu0  ;;  %v8807_v43 = vpop.f32.mrf.mxu1  ;;  %9062 = vmatmul.mubr.msk.f32.gmra.mxu0 %vm243_vm0, %v7573_v25  ;;  %9115 = vmatmul.mubr.msk.f32.gmra.mxu1 %vm243_vm0, %v7642_v14  ;;  %v7579_v14 = vld [vmem:[%s9299_s25 + $0x379] sm:$0xff] }
 0x1da   : > { %v10667_v40 = vadd.f32 %v3299_v55, %v2949_v62  ;;  %v2952_v22 = vadd.f32 %v8754_v6, %v10436_v57  ;;  %9064 = vmatprep.mubr.msk.f32.mxu0 %vm243_vm0, %v7574_v24  ;;  %9117 = vmatprep.mubr.msk.f32.mxu1 %vm243_vm0, %v7643_v49  ;;  %v7580_v24 = vld [vmem:[%s9299_s25 + $0x381] sm:$0xff]  ;;  %v7649_v49 = vld [vmem:[%s9299_s25 + $0x4b9] sm:$0xff] }
 0x1db   : > { %v2902_v10 = vpop.f32.mrf.mxu0  ;;  %v3309_v28 = vpop.f32.mrf.mxu1 }
 0x1dc   : > { %v10676_v63 = vadd.f32 %v8807_v43, %v2952_v22  ;;  %v2951_v51 = vadd.f32 %v2902_v10, %v10441_v39  ;;  %v7650_v10 = vld [vmem:[%s9299_s25 + $0x4c1] sm:$0xff] }
 0x1dd   : > { %v8757_v20 = vpop.f32.mrf.mxu0  ;;  %v8810_v57 = vpop.f32.mrf.mxu1  ;;  %9065 = vmatmul.mubr.msk.f32.gmra.mxu0 %vm243_vm0, %v7575_v54  ;;  %9118 = vmatmul.mubr.msk.f32.gmra.mxu1 %vm243_vm0, %v7644_v8  ;;  %v7581_v8 = vld [vmem:[%s9299_s25 + $0x389] sm:$0xff] }
 0x1de   : > { %v10681_v27 = vadd.f32 %v3309_v28, %v2951_v51  ;;  %v2954_v36 = vadd.f32 %v8757_v20, %v10450_v4  ;;  %9067 = vmatprep.mubr.msk.f32.mxu0 %vm243_vm0, %v7576_v11  ;;  %9120 = vmatprep.mubr.msk.f32.mxu1 %vm243_vm0, %v7645_v52  ;;  %v7686_v11 = vld [vmem:[%s9299_s25 + $0x282] sm:$0xff]  ;;  %v7755_v52 = vld [vmem:[%s9299_s25 + $0x3ba] sm:$0xff] }
 0x1df   : > { %v2912_v3 = vpop.f32.mrf.mxu0  ;;  %v3319_v39 = vpop.f32.mrf.mxu1 }
 0x1e0   : > { %v10690_v30 = vadd.f32 %v8810_v57, %v2954_v36  ;;  %v2953_v60 = vadd.f32 %v2912_v3, %v10455_v59  ;;  %v7756_v3 = vld [vmem:[%s9299_s25 + $0x3c2] sm:$0xff] }
 0x1e1   : > { %v8815_v31 = vpop.f32.mrf.mxu0  ;;  %v8868_v4 = vpop.f32.mrf.mxu1  ;;  %9068 = vmatmul.mubr.msk.f32.gmra.mxu0 %vm243_vm0, %v7577_v16  ;;  %9121 = vmatmul.mubr.msk.f32.gmra.mxu1 %vm243_vm0, %v7646_v37  ;;  %v7687_v37 = vld [vmem:[%s9299_s25 + $0x28a] sm:$0xff] }
 0x1e2   : > { %v10695_v56 = vadd.f32 %v3319_v39, %v2953_v60  ;;  %v3736_v25 = vadd.f32 %v8815_v31, %v10464_v21  ;;  %9070 = vmatprep.mubr.msk.f32.mxu0 %vm243_vm0, %v7578_v33  ;;  %9123 = vmatprep.mubr.msk.f32.mxu1 %vm243_vm0, %v7647_v35  ;;  %v7688_v33 = vld [vmem:[%s9299_s25 + $0x292] sm:$0xff]  ;;  %v7757_v35 = vld [vmem:[%s9299_s25 + $0x3ca] sm:$0xff] }
 0x1e3   : > { %v3566_v55 = vpop.f32.mrf.mxu0  ;;  %v3973_v59 = vpop.f32.mrf.mxu1 }
 0x1e4   : > { %v10704_v62 = vadd.f32 %v8868_v4, %v3736_v25  ;;  %v3735_v6 = vadd.f32 %v3566_v55, %v10469_v44  ;;  %v7758_v55 = vld [vmem:[%s9299_s25 + $0x3d2] sm:$0xff] }
 0x1e5   : > { %v8818_v43 = vpop.f32.mrf.mxu0  ;;  %v8871_v21 = vpop.f32.mrf.mxu1  ;;  %9071 = vmatmul.mubr.msk.f32.gmra.mxu0 %vm243_vm0, %v7579_v14  ;;  %9124 = vmatmul.mubr.msk.f32.gmra.mxu1 %vm243_vm0, %v7648_v12  ;;  %v7689_v12 = vld [vmem:[%s9299_s25 + $0x29a] sm:$0xff] }
 0x1e6   : > { %v10709_v22 = vadd.f32 %v3973_v59, %v3735_v6  ;;  %v3738_v54 = vadd.f32 %v8818_v43, %v10478_v34  ;;  %9073 = vmatprep.mubr.msk.f32.mxu0 %vm243_vm0, %v7580_v24  ;;  %9126 = vmatprep.mubr.msk.f32.mxu1 %vm243_vm0, %v7649_v49  ;;  %v7690_v24 = vld [vmem:[%s9299_s25 + $0x2a2] sm:$0xff]  ;;  %v7759_v49 = vld [vmem:[%s9299_s25 + $0x3da] sm:$0xff] }
 0x1e7   : > { %v3576_v28 = vpop.f32.mrf.mxu0  ;;  %v3983_v44 = vpop.f32.mrf.mxu1 }
 0x1e8   : > { %v10718_v51 = vadd.f32 %v8871_v21, %v3738_v54  ;;  %v3737_v20 = vadd.f32 %v3576_v28, %v10483_v38  ;;  %v7760_v28 = vld [vmem:[%s9299_s25 + $0x3e2] sm:$0xff] }
 0x1e9   : > { %v8821_v57 = vpop.f32.mrf.mxu0  ;;  %v8874_v34 = vpop.f32.mrf.mxu1  ;;  %9074 = vmatmul.mubr.msk.f32.gmra.mxu0 %vm243_vm0, %v7581_v8  ;;  %9127 = vmatmul.mubr.msk.f32.gmra.mxu1 %vm243_vm0, %v7650_v10  ;;  %v7691_v10 = vld [vmem:[%s9299_s25 + $0x2aa] sm:$0xff] }
 0x1ea   : > { %v10723_v36 = vadd.f32 %v3983_v44, %v3737_v20  ;;  %v3740_v16 = vadd.f32 %v8821_v57, %v10490_v50  ;;  %9131 = vmatprep.mubr.msk.f32.mxu0 %vm243_vm0, %v7686_v11  ;;  %9184 = vmatprep.mubr.msk.f32.mxu1 %vm243_vm0, %v7755_v52  ;;  %v7692_v11 = vld [vmem:[%s9299_s25 + $0x2b2] sm:$0xff]  ;;  %v7761_v52 = vld [vmem:[%s9299_s25 + $0x3ea] sm:$0xff] }
 0x1eb   : > { %v3586_v39 = vpop.f32.mrf.mxu0  ;;  %v3993_v38 = vpop.f32.mrf.mxu1 }
 0x1ec   : > { %v10732_v60 = vadd.f32 %v8874_v34, %v3740_v16  ;;  %v3739_v31 = vadd.f32 %v3586_v39, %v10497_v18  ;;  %v7762_v39 = vld [vmem:[%s9299_s25 + $0x3f2] sm:$0xff] }
 0x1ed   : > { %v8824_v4 = vpop.f32.mrf.mxu0  ;;  %v8877_v50 = vpop.f32.mrf.mxu1  ;;  %9132 = vmatmul.mubr.msk.f32.vlgmr.msra.gmra.mxu0 %vm243_vm0, %v7687_v37  ;;  %9185 = vmatmul.mubr.msk.f32.vlgmr.msra.gmra.mxu1 %vm243_vm0, %v7756_v3  ;;  %v7693_v3 = vld [vmem:[%s9299_s25 + $0x2ba] sm:$0xff] }
 0x1ee   : > { %v10737_v25 = vadd.f32 %v3993_v38, %v3739_v31  ;;  %v3742_v14 = vadd.f32 %v8824_v4, %v10508_v1  ;;  %9134 = vmatprep.mubr.msk.f32.mxu0 %vm243_vm0, %v7688_v33  ;;  %9187 = vmatprep.mubr.msk.f32.mxu1 %vm243_vm0, %v7757_v35  ;;  %v7694_v33 = vld [vmem:[%s9299_s25 + $0x2c2] sm:$0xff]  ;;  %v7763_v35 = vld [vmem:[%s9299_s25 + $0x3fa] sm:$0xff] }
 0x1ef   : > { %v3596_v59 = vpop.f32.mrf.mxu0  ;;  %v4003_v18 = vpop.f32.mrf.mxu1 }
 0x1f0   : > { %v10746_v6 = vadd.f32 %v8877_v50, %v3742_v14  ;;  %v3741_v43 = vadd.f32 %v3596_v59, %v10513_v0  ;;  %v7764_v59 = vld [vmem:[%s9299_s25 + $0x402] sm:$0xff] }
 0x1f1   : > { %v8827_v21 = vpop.f32.mrf.mxu0  ;;  %v8880_v1 = vpop.f32.mrf.mxu1  ;;  %9135 = vmatmul.mubr.msk.f32.gmra.mxu0 %vm243_vm0, %v7689_v12  ;;  %9188 = vmatmul.mubr.msk.f32.gmra.mxu1 %vm243_vm0, %v7758_v55  ;;  %v7695_v55 = vld [vmem:[%s9299_s25 + $0x2ca] sm:$0xff] }
 0x1f2   : > { %v10751_v54 = vadd.f32 %v4003_v18, %v3741_v43  ;;  %v3744_v8 = vadd.f32 %v8827_v21, %v10522_v41  ;;  %9137 = vmatprep.mubr.msk.f32.mxu0 %vm243_vm0, %v7690_v24  ;;  %9190 = vmatprep.mubr.msk.f32.mxu1 %vm243_vm0, %v7759_v49  ;;  %v7696_v24 = vld [vmem:[%s9299_s25 + $0x2d2] sm:$0xff]  ;;  %v7765_v49 = vld [vmem:[%s9299_s25 + $0x40a] sm:$0xff] }
 0x1f3   : > { %v3606_v44 = vpop.f32.mrf.mxu0  ;;  %v4013_v0 = vpop.f32.mrf.mxu1 }
 0x1f4   : > { %v10760_v20 = vadd.f32 %v8880_v1, %v3744_v8  ;;  %v3743_v57 = vadd.f32 %v3606_v44, %v10527_v47  ;;  %v7766_v44 = vld [vmem:[%s9299_s25 + $0x412] sm:$0xff] }
 0x1f5   : > { %v8830_v34 = vpop.f32.mrf.mxu0  ;;  %v8883_v41 = vpop.f32.mrf.mxu1  ;;  %9138 = vmatmul.mubr.msk.f32.gmra.mxu0 %vm243_vm0, %v7691_v10  ;;  %9191 = vmatmul.mubr.msk.f32.gmra.mxu1 %vm243_vm0, %v7760_v28  ;;  %v7697_v28 = vld [vmem:[%s9299_s25 + $0x2da] sm:$0xff] }
 0x1f6   : > { %v10765_v16 = vadd.f32 %v4013_v0, %v3743_v57  ;;  %v3746_v37 = vadd.f32 %v8830_v34, %v10536_v19  ;;  %9140 = vmatprep.mubr.msk.f32.mxu0 %vm243_vm0, %v7692_v11  ;;  %9193 = vmatprep.mubr.msk.f32.mxu1 %vm243_vm0, %v7761_v52  ;;  %v7698_v11 = vld [vmem:[%s9299_s25 + $0x2e2] sm:$0xff]  ;;  %v7767_v52 = vld [vmem:[%s9299_s25 + $0x41a] sm:$0xff] }
 0x1f7   : > { %v3616_v38 = vpop.f32.mrf.mxu0  ;;  %v4023_v47 = vpop.f32.mrf.mxu1 }
 0x1f8   : > { %v10774_v31 = vadd.f32 %v8883_v41, %v3746_v37  ;;  %v3745_v4 = vadd.f32 %v3616_v38, %v10541_v7  ;;  %v7768_v38 = vld [vmem:[%s9299_s25 + $0x422] sm:$0xff] }
 0x1f9   : > { %v8833_v50 = vpop.f32.mrf.mxu0  ;;  %v8886_v19 = vpop.f32.mrf.mxu1  ;;  %9141 = vmatmul.mubr.msk.f32.gmra.mxu0 %vm243_vm0, %v7693_v3  ;;  %9194 = vmatmul.mubr.msk.f32.gmra.mxu1 %vm243_vm0, %v7762_v39  ;;  %v7699_v39 = vld [vmem:[%s9299_s25 + $0x2ea] sm:$0xff] }
 0x1fa   : > { %v10779_v14 = vadd.f32 %v4023_v47, %v3745_v4  ;;  %v3748_v12 = vadd.f32 %v8833_v50, %v10550_v53  ;;  %9143 = vmatprep.mubr.msk.f32.mxu0 %vm243_vm0, %v7694_v33  ;;  %9196 = vmatprep.mubr.msk.f32.mxu1 %vm243_vm0, %v7763_v35  ;;  %v7700_v33 = vld [vmem:[%s9299_s25 + $0x2f2] sm:$0xff]  ;;  %v7769_v35 = vld [vmem:[%s9299_s25 + $0x42a] sm:$0xff] }
 0x1fb   : > { %v3626_v18 = vpop.f32.mrf.mxu0  ;;  %v4033_v7 = vpop.f32.mrf.mxu1 }
 0x1fc   : > { %v10788_v43 = vadd.f32 %v8886_v19, %v3748_v12  ;;  %v3747_v21 = vadd.f32 %v3626_v18, %v10555_v26  ;;  %v7770_v18 = vld [vmem:[%s9299_s25 + $0x432] sm:$0xff] }
 0x1fd   : > { %v8836_v1 = vpop.f32.mrf.mxu0  ;;  %v8889_v53 = vpop.f32.mrf.mxu1  ;;  %9144 = vmatmul.mubr.msk.f32.gmra.mxu0 %vm243_vm0, %v7695_v55  ;;  %9197 = vmatmul.mubr.msk.f32.gmra.mxu1 %vm243_vm0, %v7764_v59  ;;  %v7701_v59 = vld [vmem:[%s9299_s25 + $0x2fa] sm:$0xff] }
 0x1fe   : > { %v10793_v8 = vadd.f32 %v4033_v7, %v3747_v21  ;;  %v3750_v10 = vadd.f32 %v8836_v1, %v10564_v42  ;;  %9146 = vmatprep.mubr.msk.f32.mxu0 %vm243_vm0, %v7696_v24  ;;  %9199 = vmatprep.mubr.msk.f32.mxu1 %vm243_vm0, %v7765_v49  ;;  %v7702_v24 = vld [vmem:[%s9299_s25 + $0x302] sm:$0xff]  ;;  %v7771_v49 = vld [vmem:[%s9299_s25 + $0x43a] sm:$0xff] }
 0x1ff   : > { %v3636_v0 = vpop.f32.mrf.mxu0  ;;  %v4043_v26 = vpop.f32.mrf.mxu1 }
 0x200   : > { %v10802_v57 = vadd.f32 %v8889_v53, %v3750_v10  ;;  %v3749_v34 = vadd.f32 %v3636_v0, %v10569_v48  ;;  %v7772_v0 = vld [vmem:[%s9299_s25 + $0x442] sm:$0xff] }
 0x201   : > { %v8839_v41 = vpop.f32.mrf.mxu0  ;;  %v8892_v42 = vpop.f32.mrf.mxu1  ;;  %9147 = vmatmul.mubr.msk.f32.gmra.mxu0 %vm243_vm0, %v7697_v28  ;;  %9200 = vmatmul.mubr.msk.f32.gmra.mxu1 %vm243_vm0, %v7766_v44  ;;  %v7703_v44 = vld [vmem:[%s9299_s25 + $0x30a] sm:$0xff] }
 0x202   : > { %v10807_v37 = vadd.f32 %v4043_v26, %v3749_v34  ;;  %v3752_v3 = vadd.f32 %v8839_v41, %v10578_v2  ;;  %9149 = vmatprep.mubr.msk.f32.mxu0 %vm243_vm0, %v7698_v11  ;;  %9202 = vmatprep.mubr.msk.f32.mxu1 %vm243_vm0, %v7767_v52  ;;  %v7704_v11 = vld [vmem:[%s9299_s25 + $0x312] sm:$0xff]  ;;  %v7773_v52 = vld [vmem:[%s9299_s25 + $0x44a] sm:$0xff] }
 0x203   : > { %v3646_v47 = vpop.f32.mrf.mxu0  ;;  %v4053_v48 = vpop.f32.mrf.mxu1 }
 0x204   : > { %v10816_v4 = vadd.f32 %v8892_v42, %v3752_v3  ;;  %v3751_v50 = vadd.f32 %v3646_v47, %v10583_v9  ;;  %v7774_v47 = vld [vmem:[%s9299_s25 + $0x452] sm:$0xff] }
 0x205   : > { %v8842_v19 = vpop.f32.mrf.mxu0  ;;  %v8895_v2 = vpop.f32.mrf.mxu1  ;;  %9150 = vmatmul.mubr.msk.f32.gmra.mxu0 %vm243_vm0, %v7699_v39  ;;  %9203 = vmatmul.mubr.msk.f32.gmra.mxu1 %vm243_vm0, %v7768_v38  ;;  %v7705_v38 = vld [vmem:[%s9299_s25 + $0x31a] sm:$0xff] }
 0x206   : > { %v10821_v12 = vadd.f32 %v4053_v48, %v3751_v50  ;;  %v3754_v55 = vadd.f32 %v8842_v19, %v10592_v13  ;;  %9152 = vmatprep.mubr.msk.f32.mxu0 %vm243_vm0, %v7700_v33  ;;  %9205 = vmatprep.mubr.msk.f32.mxu1 %vm243_vm0, %v7769_v35  ;;  %v7706_v33 = vld [vmem:[%s9299_s25 + $0x322] sm:$0xff]  ;;  %v7775_v35 = vld [vmem:[%s9299_s25 + $0x45a] sm:$0xff] }
 0x207   : > { %v3656_v7 = vpop.f32.mrf.mxu0  ;;  %v4063_v9 = vpop.f32.mrf.mxu1 }
 0x208   : > { %v10830_v21 = vadd.f32 %v8895_v2, %v3754_v55  ;;  %v3753_v1 = vadd.f32 %v3656_v7, %v10597_v46  ;;  %v7776_v7 = vld [vmem:[%s9299_s25 + $0x462] sm:$0xff] }
 0x209   : > { %v8845_v53 = vpop.f32.mrf.mxu0  ;;  %v8898_v13 = vpop.f32.mrf.mxu1  ;;  %9153 = vmatmul.mubr.msk.f32.gmra.mxu0 %vm243_vm0, %v7701_v59  ;;  %9206 = vmatmul.mubr.msk.f32.gmra.mxu1 %vm243_vm0, %v7770_v18  ;;  %v7707_v18 = vld [vmem:[%s9299_s25 + $0x32a] sm:$0xff] }
 0x20a   : > { %v10835_v10 = vadd.f32 %v4063_v9, %v3753_v1  ;;  %v3756_v28 = vadd.f32 %v8845_v53, %v10606_v23  ;;  %9155 = vmatprep.mubr.msk.f32.mxu0 %vm243_vm0, %v7702_v24  ;;  %9208 = vmatprep.mubr.msk.f32.mxu1 %vm243_vm0, %v7771_v49  ;;  %v7708_v24 = vld [vmem:[%s9299_s25 + $0x332] sm:$0xff]  ;;  %v7777_v49 = vld [vmem:[%s9299_s25 + $0x46a] sm:$0xff] }
 0x20b   : > { %v3666_v26 = vpop.f32.mrf.mxu0  ;;  %v4073_v46 = vpop.f32.mrf.mxu1 }
 0x20c   : > { %v10844_v34 = vadd.f32 %v8898_v13, %v3756_v28  ;;  %v3755_v41 = vadd.f32 %v3666_v26, %v10611_v61  ;;  %v7778_v26 = vld [vmem:[%s9299_s25 + $0x472] sm:$0xff] }
 0x20d   : > { %v8848_v42 = vpop.f32.mrf.mxu0  ;;  %v8901_v23 = vpop.f32.mrf.mxu1  ;;  %9156 = vmatmul.mubr.msk.f32.gmra.mxu0 %vm243_vm0, %v7703_v44  ;;  %9209 = vmatmul.mubr.msk.f32.gmra.mxu1 %vm243_vm0, %v7772_v0  ;;  %v7709_v0 = vld [vmem:[%s9299_s25 + $0x33a] sm:$0xff] }
 0x20e   : > { %v10849_v3 = vadd.f32 %v4073_v46, %v3755_v41  ;;  %v3758_v39 = vadd.f32 %v8848_v42, %v10620_v5  ;;  %9158 = vmatprep.mubr.msk.f32.mxu0 %vm243_vm0, %v7704_v11  ;;  %9211 = vmatprep.mubr.msk.f32.mxu1 %vm243_vm0, %v7773_v52  ;;  %v7710_v11 = vld [vmem:[%s9299_s25 + $0x342] sm:$0xff]  ;;  %v7779_v52 = vld [vmem:[%s9299_s25 + $0x47a] sm:$0xff] }
 0x20f   : > { %v3676_v48 = vpop.f32.mrf.mxu0  ;;  %v4083_v61 = vpop.f32.mrf.mxu1 }
 0x210   : > { %v10858_v50 = vadd.f32 %v8901_v23, %v3758_v39  ;;  %v3757_v19 = vadd.f32 %v3676_v48, %v10625_v45  ;;  %v7780_v48 = vld [vmem:[%s9299_s25 + $0x482] sm:$0xff] }
 0x211   : > { %v8851_v2 = vpop.f32.mrf.mxu0  ;;  %v8904_v5 = vpop.f32.mrf.mxu1  ;;  %9159 = vmatmul.mubr.msk.f32.gmra.mxu0 %vm243_vm0, %v7705_v38  ;;  %9212 = vmatmul.mubr.msk.f32.gmra.mxu1 %vm243_vm0, %v7774_v47  ;;  %v7711_v47 = vld [vmem:[%s9299_s25 + $0x34a] sm:$0xff] }
 0x212   : > { %v10863_v55 = vadd.f32 %v4083_v61, %v3757_v19  ;;  %v3760_v59 = vadd.f32 %v8851_v2, %v10634_v15  ;;  %9161 = vmatprep.mubr.msk.f32.mxu0 %vm243_vm0, %v7706_v33  ;;  %9214 = vmatprep.mubr.msk.f32.mxu1 %vm243_vm0, %v7775_v35  ;;  %v7712_v33 = vld [vmem:[%s9299_s25 + $0x352] sm:$0xff]  ;;  %v7781_v35 = vld [vmem:[%s9299_s25 + $0x48a] sm:$0xff] }
 0x213   : > { %v3686_v9 = vpop.f32.mrf.mxu0  ;;  %v4093_v45 = vpop.f32.mrf.mxu1 }
 0x214   : > { %v10872_v1 = vadd.f32 %v8904_v5, %v3760_v59  ;;  %v3759_v53 = vadd.f32 %v3686_v9, %v10639_v29  ;;  %v7782_v9 = vld [vmem:[%s9299_s25 + $0x492] sm:$0xff] }
 0x215   : > { %v8854_v13 = vpop.f32.mrf.mxu0  ;;  %v8907_v15 = vpop.f32.mrf.mxu1  ;;  %9162 = vmatmul.mubr.msk.f32.gmra.mxu0 %vm243_vm0, %v7707_v18  ;;  %9215 = vmatmul.mubr.msk.f32.gmra.mxu1 %vm243_vm0, %v7776_v7  ;;  %v7713_v7 = vld [vmem:[%s9299_s25 + $0x35a] sm:$0xff] }
 0x216   : > { %v10877_v28 = vadd.f32 %v4093_v45, %v3759_v53  ;;  %v3762_v44 = vadd.f32 %v8854_v13, %v10648_v32  ;;  %9164 = vmatprep.mubr.msk.f32.mxu0 %vm243_vm0, %v7708_v24  ;;  %9217 = vmatprep.mubr.msk.f32.mxu1 %vm243_vm0, %v7777_v49  ;;  %v7714_v24 = vld [vmem:[%s9299_s25 + $0x362] sm:$0xff]  ;;  %v7783_v49 = vld [vmem:[%s9299_s25 + $0x49a] sm:$0xff] }
 0x217   : > { %v3696_v46 = vpop.f32.mrf.mxu0  ;;  %v4103_v29 = vpop.f32.mrf.mxu1 }
 0x218   : > { %v10886_v41 = vadd.f32 %v8907_v15, %v3762_v44  ;;  %v3761_v42 = vadd.f32 %v3696_v46, %v10653_v58  ;;  %v7784_v46 = vld [vmem:[%s9299_s25 + $0x4a2] sm:$0xff] }
 0x219   : > { %v8857_v23 = vpop.f32.mrf.mxu0  ;;  %v8910_v32 = vpop.f32.mrf.mxu1  ;;  %9165 = vmatmul.mubr.msk.f32.gmra.mxu0 %vm243_vm0, %v7709_v0  ;;  %9218 = vmatmul.mubr.msk.f32.gmra.mxu1 %vm243_vm0, %v7778_v26  ;;  %v7715_v26 = vld [vmem:[%s9299_s25 + $0x36a] sm:$0xff] }
 0x21a   : > { %v10891_v39 = vadd.f32 %v4103_v29, %v3761_v42  ;;  %v3764_v38 = vadd.f32 %v8857_v23, %v10662_v17  ;;  %9167 = vmatprep.mubr.msk.f32.mxu0 %vm243_vm0, %v7710_v11  ;;  %9220 = vmatprep.mubr.msk.f32.mxu1 %vm243_vm0, %v7779_v52  ;;  %v7716_v11 = vld [vmem:[%s9299_s25 + $0x372] sm:$0xff]  ;;  %v7785_v52 = vld [vmem:[%s9299_s25 + $0x4aa] sm:$0xff] }
 0x21b   : > { %v3706_v61 = vpop.f32.mrf.mxu0  ;;  %v4113_v58 = vpop.f32.mrf.mxu1 }
 0x21c   : > { %v10900_v19 = vadd.f32 %v8910_v32, %v3764_v38  ;;  %v3763_v2 = vadd.f32 %v3706_v61, %v10667_v40  ;;  %v7786_v61 = vld [vmem:[%s9299_s25 + $0x4b2] sm:$0xff] }
 0x21d   : > { %v8860_v5 = vpop.f32.mrf.mxu0  ;;  %v8913_v17 = vpop.f32.mrf.mxu1  ;;  %9168 = vmatmul.mubr.msk.f32.gmra.mxu0 %vm243_vm0, %v7711_v47  ;;  %9221 = vmatmul.mubr.msk.f32.gmra.mxu1 %vm243_vm0, %v7780_v48  ;;  %v7717_v48 = vld [vmem:[%s9299_s25 + $0x37a] sm:$0xff] }
 0x21e   : > { %v10905_v59 = vadd.f32 %v4113_v58, %v3763_v2  ;;  %v3766_v18 = vadd.f32 %v8860_v5, %v10676_v63  ;;  %9170 = vmatprep.mubr.msk.f32.mxu0 %vm243_vm0, %v7712_v33  ;;  %9223 = vmatprep.mubr.msk.f32.mxu1 %vm243_vm0, %v7781_v35  ;;  %v7718_v33 = vld [vmem:[%s9299_s25 + $0x382] sm:$0xff]  ;;  %v7787_v35 = vld [vmem:[%s9299_s25 + $0x4ba] sm:$0xff] }
 0x21f   : > { %v3716_v45 = vpop.f32.mrf.mxu0  ;;  %v4123_v40 = vpop.f32.mrf.mxu1 }
 0x220   : > { %v10914_v53 = vadd.f32 %v8913_v17, %v3766_v18  ;;  %v3765_v13 = vadd.f32 %v3716_v45, %v10681_v27  ;;  %v7788_v45 = vld [vmem:[%s9299_s25 + $0x4c2] sm:$0xff] }
 0x221   : > { %v8863_v15 = vpop.f32.mrf.mxu0  ;;  %v8916_v63 = vpop.f32.mrf.mxu1  ;;  %9171 = vmatmul.mubr.msk.f32.gmra.mxu0 %vm243_vm0, %v7713_v7  ;;  %9224 = vmatmul.mubr.msk.f32.gmra.mxu1 %vm243_vm0, %v7782_v9  ;;  %v7719_v9 = vld [vmem:[%s9299_s25 + $0x38a] sm:$0xff] }
 0x222   : > { %v10919_v44 = vadd.f32 %v4123_v40, %v3765_v13  ;;  %v3768_v0 = vadd.f32 %v8863_v15, %v10690_v30  ;;  %9173 = vmatprep.mubr.msk.f32.mxu0 %vm243_vm0, %v7714_v24  ;;  %9226 = vmatprep.mubr.msk.f32.mxu1 %vm243_vm0, %v7783_v49 }
 0x223   : > { %v3726_v29 = vpop.f32.mrf.mxu0  ;;  %v4133_v27 = vpop.f32.mrf.mxu1 }
 0x224   : > { %v10928_v42 = vadd.f32 %v8916_v63, %v3768_v0  ;;  %v3767_v23 = vadd.f32 %v3726_v29, %v10695_v56 }
 0x225   : > { %v8921_v32 = vpop.f32.mrf.mxu0  ;;  %v8974_v30 = vpop.f32.mrf.mxu1  ;;  %9174 = vmatmul.mubr.msk.f32.gmra.mxu0 %vm243_vm0, %v7715_v26  ;;  %9227 = vmatmul.mubr.msk.f32.gmra.mxu1 %vm243_vm0, %v7784_v46 }
 0x226   : > { %v10933_v38 = vadd.f32 %v4133_v27, %v3767_v23  ;;  %v4550_v47 = vadd.f32 %v8921_v32, %v10704_v62  ;;  %9176 = vmatprep.mubr.msk.f32.mxu0 %vm243_vm0, %v7716_v11  ;;  %9229 = vmatprep.mubr.msk.f32.mxu1 %vm243_vm0, %v7785_v52 }
 0x227   : > { %v4380_v58 = vpop.f32.mrf.mxu0  ;;  %v4787_v56 = vpop.f32.mrf.mxu1 }
 0x228   : > { %v10942_v2 = vadd.f32 %v8974_v30, %v4550_v47  ;;  %v4549_v5 = vadd.f32 %v4380_v58, %v10709_v22 }
 0x229   : > { %v8924_v17 = vpop.f32.mrf.mxu0  ;;  %v8977_v18 = vpop.f32.mrf.mxu1  ;;  %9177 = vmatmul.mubr.msk.f32.gmra.mxu0 %vm243_vm0, %v7717_v48  ;;  %9230 = vmatmul.mubr.msk.f32.gmra.mxu1 %vm243_vm0, %v7786_v61 }
 0x22a   : > { %v10947_v62 = vadd.f32 %v4787_v56, %v4549_v5  ;;  %v4552_v7 = vadd.f32 %v8924_v17, %v10718_v51  ;;  %9179 = vmatprep.mubr.msk.f32.mxu0 %vm243_vm0, %v7718_v33  ;;  %9232 = vmatprep.mubr.msk.f32.mxu1 %vm243_vm0, %v7787_v35 }
 0x22b   : > { %v4390_v40 = vpop.f32.mrf.mxu0  ;;  %v4797_v24 = vpop.f32.mrf.mxu1 }
 0x22c   : > { %v10954_v49 = vadd.f32 %v8977_v18, %v4552_v7  ;;  %v4551_v22 = vadd.f32 %v4390_v40, %v10723_v36 }
 0x22d   : > { %v8927_v13 = vpop.f32.mrf.mxu0  ;;  %v8980_v15 = vpop.f32.mrf.mxu1  ;;  %9180 = vmatmul.mubr.msk.f32.gmra.mxu0 %vm243_vm0, %v7719_v9  ;;  %9233 = vmatmul.mubr.msk.f32.gmra.mxu1 %vm243_vm0, %v7788_v45 }
 0x22e   : > { %v10959_v63 = vadd.f32 %v4797_v24, %v4551_v22  ;;  %v4554_v51 = vadd.f32 %v8927_v13, %v10732_v60 }
 0x22f   : > { %v4400_v0 = vpop.f32.mrf.mxu0  ;;  %v4807_v26 = vpop.f32.mrf.mxu1 }
 0x230   : > { %v10962_v46 = vadd.f32 %v8980_v15, %v4554_v51  ;;  %v4553_v29 = vadd.f32 %v4400_v0, %v10737_v25 }
 0x231   : > { %v8930_v27 = vpop.f32.mrf.mxu0  ;;  %v8983_v11 = vpop.f32.mrf.mxu1 }
 0x232   : > { %v10965_v52 = vadd.f32 %v4807_v26, %v4553_v29  ;;  %v4556_v36 = vadd.f32 %v8930_v27, %v10746_v6 }
 0x233   : > { %v4410_v23 = vpop.f32.mrf.mxu0  ;;  %v4817_v32 = vpop.f32.mrf.mxu1 }
 0x234   : > { %v10968_v30 = vadd.f32 %v8983_v11, %v4556_v36  ;;  %v4555_v47 = vadd.f32 %v4410_v23, %v10751_v54 }
 0x235   : > { %v8933_v48 = vpop.f32.mrf.mxu0  ;;  %v8986_v60 = vpop.f32.mrf.mxu1 }
 0x236   : > { %v10971_v61 = vadd.f32 %v4817_v32, %v4555_v47  ;;  %v4558_v58 = vadd.f32 %v8933_v48, %v10760_v20 }
 0x237   : > { %v4420_v56 = vpop.f32.mrf.mxu0  ;;  %v4827_v25 = vpop.f32.mrf.mxu1 }
 0x238   : > { %v10974_v33 = vadd.f32 %v8986_v60, %v4558_v58  ;;  %v4557_v35 = vadd.f32 %v4420_v56, %v10765_v16 }
 0x239   : > { %v8936_v5 = vpop.f32.mrf.mxu0  ;;  %v8989_v6 = vpop.f32.mrf.mxu1 }
 0x23a   : > { %v10977_v17 = vadd.f32 %v4827_v25, %v4557_v35  ;;  %v4560_v18 = vadd.f32 %v8936_v5, %v10774_v31 }
 0x23b   : > { %v4430_v7 = vpop.f32.mrf.mxu0  ;;  %v4837_v54 = vpop.f32.mrf.mxu1 }
 0x23c   : > { %v10980_v9 = vadd.f32 %v8989_v6, %v4560_v18  ;;  %v4559_v45 = vadd.f32 %v4430_v7, %v10779_v14 }
 0x23d   : > { %v8939_v40 = vpop.f32.mrf.mxu0  ;;  %v8992_v20 = vpop.f32.mrf.mxu1 }
 0x23e   : > { %v10983_v24 = vadd.f32 %v4837_v54, %v4559_v45  ;;  %v4562_v22 = vadd.f32 %v8939_v40, %v10788_v43 }
 0x23f   : > { %v4440_v13 = vpop.f32.mrf.mxu0  ;;  %v4847_v16 = vpop.f32.mrf.mxu1 }
 0x240   : > { %v10986_v15 = vadd.f32 %v8992_v20, %v4562_v22  ;;  %v4561_v51 = vadd.f32 %v4440_v13, %v10793_v8 }
 0x241   : > { %v8942_v0 = vpop.f32.mrf.mxu0  ;;  %v8995_v31 = vpop.f32.mrf.mxu1 }
 0x242   : > { %v10989_v26 = vadd.f32 %v4847_v16, %v4561_v51  ;;  %v4564_v29 = vadd.f32 %v8942_v0, %v10802_v57 }
 0x243   : > { %v4450_v27 = vpop.f32.mrf.mxu0  ;;  %v4857_v14 = vpop.f32.mrf.mxu1 }
 0x244   : > { %v10992_v11 = vadd.f32 %v8995_v31, %v4564_v29  ;;  %v4563_v36 = vadd.f32 %v4450_v27, %v10807_v37 }
 0x245   : > { %v8945_v23 = vpop.f32.mrf.mxu0  ;;  %v8998_v43 = vpop.f32.mrf.mxu1 }
 0x246   : > { %v10995_v32 = vadd.f32 %v4857_v14, %v4563_v36  ;;  %v4566_v47 = vadd.f32 %v8945_v23, %v10816_v4 }
 0x247   : > { %v4460_v48 = vpop.f32.mrf.mxu0  ;;  %v4867_v8 = vpop.f32.mrf.mxu1 }
 0x248   : > { %v10998_v60 = vadd.f32 %v8998_v43, %v4566_v47  ;;  %v4565_v58 = vadd.f32 %v4460_v48, %v10821_v12 }
 0x249   : > { %v8948_v56 = vpop.f32.mrf.mxu0  ;;  %v9001_v57 = vpop.f32.mrf.mxu1 }
 0x24a   : > { %v11001_v25 = vadd.f32 %v4867_v8, %v4565_v58  ;;  %v4568_v35 = vadd.f32 %v8948_v56, %v10830_v21 }
 0x24b   : > { %v4470_v5 = vpop.f32.mrf.mxu0  ;;  %v4877_v37 = vpop.f32.mrf.mxu1 }
 0x24c   : > { %v11004_v6 = vadd.f32 %v9001_v57, %v4568_v35  ;;  %v4567_v18 = vadd.f32 %v4470_v5, %v10835_v10 }
 0x24d   : > { %v8951_v7 = vpop.f32.mrf.mxu0  ;;  %v9004_v4 = vpop.f32.mrf.mxu1 }
 0x24e   : > { %v11007_v54 = vadd.f32 %v4877_v37, %v4567_v18  ;;  %v4570_v45 = vadd.f32 %v8951_v7, %v10844_v34 }
 0x24f   : > { %v4480_v40 = vpop.f32.mrf.mxu0  ;;  %v4887_v12 = vpop.f32.mrf.mxu1 }
 0x250   : > { %v11010_v20 = vadd.f32 %v9004_v4, %v4570_v45  ;;  %v4569_v22 = vadd.f32 %v4480_v40, %v10849_v3 }
 0x251   : > { %v8954_v13 = vpop.f32.mrf.mxu0  ;;  %v9007_v21 = vpop.f32.mrf.mxu1 }
 0x252   : > { %v11013_v16 = vadd.f32 %v4887_v12, %v4569_v22  ;;  %v4572_v51 = vadd.f32 %v8954_v13, %v10858_v50 }
 0x253   : > { %v4490_v0 = vpop.f32.mrf.mxu0  ;;  %v4897_v10 = vpop.f32.mrf.mxu1 }
 0x254   : > { %v11016_v31 = vadd.f32 %v9007_v21, %v4572_v51  ;;  %v4571_v29 = vadd.f32 %v4490_v0, %v10863_v55 }
 0x255   : > { %v8957_v27 = vpop.f32.mrf.mxu0  ;;  %v9010_v34 = vpop.f32.mrf.mxu1 }
 0x256   : > { %v11019_v14 = vadd.f32 %v4897_v10, %v4571_v29  ;;  %v4574_v36 = vadd.f32 %v8957_v27, %v10872_v1 }
 0x257   : > { %v4500_v23 = vpop.f32.mrf.mxu0  ;;  %v4907_v3 = vpop.f32.mrf.mxu1 }
 0x258   : > { %v11022_v43 = vadd.f32 %v9010_v34, %v4574_v36  ;;  %v4573_v47 = vadd.f32 %v4500_v23, %v10877_v28 }
 0x259   : > { %v8960_v48 = vpop.f32.mrf.mxu0  ;;  %v9013_v50 = vpop.f32.mrf.mxu1 }
 0x25a   : > { %v11025_v8 = vadd.f32 %v4907_v3, %v4573_v47  ;;  %v4576_v58 = vadd.f32 %v8960_v48, %v10886_v41 }
 0x25b   : > { %v4510_v56 = vpop.f32.mrf.mxu0  ;;  %v4917_v55 = vpop.f32.mrf.mxu1 }
 0x25c   : > { %v11028_v57 = vadd.f32 %v9013_v50, %v4576_v58  ;;  %v4575_v35 = vadd.f32 %v4510_v56, %v10891_v39 }
 0x25d   : > { %v8963_v5 = vpop.f32.mrf.mxu0  ;;  %v9016_v1 = vpop.f32.mrf.mxu1 }
 0x25e   : > { %v11031_v37 = vadd.f32 %v4917_v55, %v4575_v35  ;;  %v4578_v18 = vadd.f32 %v8963_v5, %v10900_v19 }
 0x25f   : > { %v4520_v7 = vpop.f32.mrf.mxu0  ;;  %v4927_v28 = vpop.f32.mrf.mxu1 }
 0x260   : > { %v11034_v4 = vadd.f32 %v9016_v1, %v4578_v18  ;;  %v4577_v45 = vadd.f32 %v4520_v7, %v10905_v59 }
 0x261   : > { %v8966_v40 = vpop.f32.mrf.mxu0  ;;  %v9019_v41 = vpop.f32.mrf.mxu1 }
 0x262   : > { %v11037_v12 = vadd.f32 %v4927_v28, %v4577_v45  ;;  %v4580_v22 = vadd.f32 %v8966_v40, %v10914_v53 }
 0x263   : > { %v4530_v13 = vpop.f32.mrf.mxu0  ;;  %v4937_v39 = vpop.f32.mrf.mxu1 }
 0x264   : > { %v11040_v21 = vadd.f32 %v9019_v41, %v4580_v22  ;;  %v4579_v51 = vadd.f32 %v4530_v13, %v10919_v44 }
 0x265   : > { %v8969_v0 = vpop.f32.mrf.mxu0  ;;  %v9022_v19 = vpop.f32.mrf.mxu1 }
 0x266   : > { %v11043_v10 = vadd.f32 %v4937_v39, %v4579_v51  ;;  %v4582_v29 = vadd.f32 %v8969_v0, %v10928_v42 }
 0x267   : > { %v4540_v27 = vpop.f32.mrf.mxu0  ;;  %v4947_v59 = vpop.f32.mrf.mxu1 }
 0x268   : > { %v11046_v34 = vadd.f32 %v9022_v19, %v4582_v29  ;;  %v4581_v36 = vadd.f32 %v4540_v27, %v10933_v38 }
 0x269   : > { %v9027_v23 = vpop.f32.mrf.mxu0  ;;  %v9080_v53 = vpop.f32.mrf.mxu1 }
 0x26a   : > { %v11049_v3 = vadd.f32 %v4947_v59, %v4581_v36  ;;  %v5364_v47 = vadd.f32 %v9027_v23, %v10942_v2 }
 0x26b   : > { %v5194_v48 = vpop.f32.mrf.mxu0  ;;  %v5601_v44 = vpop.f32.mrf.mxu1 }
 0x26c   : > { %v11052_v50 = vadd.f32 %v9080_v53, %v5364_v47  ;;  %v5363_v58 = vadd.f32 %v5194_v48, %v10947_v62 }
 0x26d   : > { %v9030_v56 = vpop.f32.mrf.mxu0  ;;  %v9083_v42 = vpop.f32.mrf.mxu1 }
 0x26e   : > { %v11055_v55 = vadd.f32 %v5601_v44, %v5363_v58  ;;  %v5366_v35 = vadd.f32 %v9030_v56, %v10954_v49 }
 0x26f   : > { %v5204_v5 = vpop.f32.mrf.mxu0  ;;  %v5611_v38 = vpop.f32.mrf.mxu1 }
 0x270   : > { %v11058_v1 = vadd.f32 %v9083_v42, %v5366_v35  ;;  %v5365_v18 = vadd.f32 %v5204_v5, %v10959_v63 }
 0x271   : > { %v9033_v7 = vpop.f32.mrf.mxu0  ;;  %v9086_v2 = vpop.f32.mrf.mxu1 }
 0x272   : > { %v11061_v28 = vadd.f32 %v5611_v38, %v5365_v18  ;;  %v5368_v45 = vadd.f32 %v9033_v7, %v10962_v46 }
 0x273   : > { %v5214_v40 = vpop.f32.mrf.mxu0  ;;  %v5621_v62 = vpop.f32.mrf.mxu1 }
 0x274   : > { %v11064_v41 = vadd.f32 %v9086_v2, %v5368_v45  ;;  %v5367_v22 = vadd.f32 %v5214_v40, %v10965_v52 }
 0x275   : > { %v9036_v13 = vpop.f32.mrf.mxu0  ;;  %v9089_v49 = vpop.f32.mrf.mxu1 }
 0x276   : > { %v11067_v39 = vadd.f32 %v5621_v62, %v5367_v22  ;;  %v5370_v51 = vadd.f32 %v9036_v13, %v10968_v30 }
 0x277   : > { %v5224_v0 = vpop.f32.mrf.mxu0  ;;  %v5631_v63 = vpop.f32.mrf.mxu1 }
 0x278   : > { %v11070_v19 = vadd.f32 %v9089_v49, %v5370_v51  ;;  %v5369_v29 = vadd.f32 %v5224_v0, %v10971_v61 }
 0x279   : > { %v9039_v27 = vpop.f32.mrf.mxu0  ;;  %v9092_v46 = vpop.f32.mrf.mxu1 }
 0x27a   : > { %v11073_v59 = vadd.f32 %v5631_v63, %v5369_v29  ;;  %v5372_v36 = vadd.f32 %v9039_v27, %v10974_v33 }
 0x27b   : > { %v5234_v23 = vpop.f32.mrf.mxu0  ;;  %v5641_v52 = vpop.f32.mrf.mxu1 }
 0x27c   : > { %v11076_v53 = vadd.f32 %v9092_v46, %v5372_v36  ;;  %v5371_v47 = vadd.f32 %v5234_v23, %v10977_v17 }
 0x27d   : > { %v9042_v48 = vpop.f32.mrf.mxu0  ;;  %v9095_v30 = vpop.f32.mrf.mxu1 }
 0x27e   : > { %v11079_v44 = vadd.f32 %v5641_v52, %v5371_v47  ;;  %v5374_v58 = vadd.f32 %v9042_v48, %v10980_v9 }
 0x27f   : > { %v5244_v56 = vpop.f32.mrf.mxu0  ;;  %v5651_v61 = vpop.f32.mrf.mxu1 }
 0x280   : > { %v11082_v42 = vadd.f32 %v9095_v30, %v5374_v58  ;;  %v5373_v35 = vadd.f32 %v5244_v56, %v10983_v24 }
 0x281   : > { %v9045_v5 = vpop.f32.mrf.mxu0  ;;  %v9098_v33 = vpop.f32.mrf.mxu1 }
 0x282   : > { %v11085_v38 = vadd.f32 %v5651_v61, %v5373_v35  ;;  %v5376_v18 = vadd.f32 %v9045_v5, %v10986_v15 }
 0x283   : > { %v5254_v7 = vpop.f32.mrf.mxu0  ;;  %v5661_v17 = vpop.f32.mrf.mxu1 }
 0x284   : > { %v11088_v2 = vadd.f32 %v9098_v33, %v5376_v18  ;;  %v5375_v45 = vadd.f32 %v5254_v7, %v10989_v26 }
 0x285   : > { %v9048_v40 = vpop.f32.mrf.mxu0  ;;  %v9101_v9 = vpop.f32.mrf.mxu1 }
 0x286   : > { %v11091_v62 = vadd.f32 %v5661_v17, %v5375_v45  ;;  %v5378_v22 = vadd.f32 %v9048_v40, %v10992_v11 }
 0x287   : > { %v5264_v13 = vpop.f32.mrf.mxu0  ;;  %v5671_v24 = vpop.f32.mrf.mxu1 }
 0x288   : > { %v11094_v49 = vadd.f32 %v9101_v9, %v5378_v22  ;;  %v5377_v51 = vadd.f32 %v5264_v13, %v10995_v32 }
 0x289   : > { %v9051_v0 = vpop.f32.mrf.mxu0  ;;  %v9104_v15 = vpop.f32.mrf.mxu1 }
 0x28a   : > { %v11097_v63 = vadd.f32 %v5671_v24, %v5377_v51  ;;  %v5380_v29 = vadd.f32 %v9051_v0, %v10998_v60 }
 0x28b   : > { %v5274_v27 = vpop.f32.mrf.mxu0  ;;  %v5681_v26 = vpop.f32.mrf.mxu1 }
 0x28c   : > { %v11100_v46 = vadd.f32 %v9104_v15, %v5380_v29  ;;  %v5379_v36 = vadd.f32 %v5274_v27, %v11001_v25 }
 0x28d   : > { %v9054_v23 = vpop.f32.mrf.mxu0  ;;  %v9107_v11 = vpop.f32.mrf.mxu1 }
 0x28e   : > { %v11103_v52 = vadd.f32 %v5681_v26, %v5379_v36  ;;  %v5382_v47 = vadd.f32 %v9054_v23, %v11004_v6 }
 0x28f   : > { %v5284_v48 = vpop.f32.mrf.mxu0  ;;  %v5691_v32 = vpop.f32.mrf.mxu1 }
 0x290   : > { %v11106_v30 = vadd.f32 %v9107_v11, %v5382_v47  ;;  %v5381_v58 = vadd.f32 %v5284_v48, %v11007_v54 }
 0x291   : > { %v9057_v56 = vpop.f32.mrf.mxu0  ;;  %v9110_v60 = vpop.f32.mrf.mxu1 }
 0x292   : > { %v11109_v61 = vadd.f32 %v5691_v32, %v5381_v58  ;;  %v5384_v35 = vadd.f32 %v9057_v56, %v11010_v20 }
 0x293   : > { %v5294_v5 = vpop.f32.mrf.mxu0  ;;  %v5701_v25 = vpop.f32.mrf.mxu1 }
 0x294   : > { %v11112_v33 = vadd.f32 %v9110_v60, %v5384_v35  ;;  %v5383_v18 = vadd.f32 %v5294_v5, %v11013_v16 }
 0x295   : > { %v9060_v7 = vpop.f32.mrf.mxu0  ;;  %v9113_v6 = vpop.f32.mrf.mxu1 }
 0x296   : > { %v11115_v17 = vadd.f32 %v5701_v25, %v5383_v18  ;;  %v5386_v45 = vadd.f32 %v9060_v7, %v11016_v31 }
 0x297   : > { %v5304_v40 = vpop.f32.mrf.mxu0  ;;  %v5711_v54 = vpop.f32.mrf.mxu1 }
 0x298   : > { %v11118_v9 = vadd.f32 %v9113_v6, %v5386_v45  ;;  %v5385_v22 = vadd.f32 %v5304_v40, %v11019_v14 }
 0x299   : > { %v9063_v13 = vpop.f32.mrf.mxu0  ;;  %v9116_v20 = vpop.f32.mrf.mxu1 }
 0x29a   : > { %v11121_v24 = vadd.f32 %v5711_v54, %v5385_v22  ;;  %v5388_v51 = vadd.f32 %v9063_v13, %v11022_v43 }
 0x29b   : > { %v5314_v0 = vpop.f32.mrf.mxu0  ;;  %v5721_v16 = vpop.f32.mrf.mxu1 }
 0x29c   : > { %v11124_v15 = vadd.f32 %v9116_v20, %v5388_v51  ;;  %v5387_v29 = vadd.f32 %v5314_v0, %v11025_v8 }
 0x29d   : > { %v9066_v27 = vpop.f32.mrf.mxu0  ;;  %v9119_v31 = vpop.f32.mrf.mxu1 }
 0x29e   : > { %v11127_v26 = vadd.f32 %v5721_v16, %v5387_v29  ;;  %v5390_v36 = vadd.f32 %v9066_v27, %v11028_v57 }
 0x29f   : > { %v5324_v23 = vpop.f32.mrf.mxu0  ;;  %v5731_v14 = vpop.f32.mrf.mxu1 }
 0x2a0   : > { %v11130_v11 = vadd.f32 %v9119_v31, %v5390_v36  ;;  %v5389_v47 = vadd.f32 %v5324_v23, %v11031_v37 }
 0x2a1   : > { %v9069_v48 = vpop.f32.mrf.mxu0  ;;  %v9122_v43 = vpop.f32.mrf.mxu1 }
 0x2a2   : > { %v11133_v32 = vadd.f32 %v5731_v14, %v5389_v47  ;;  %v5392_v58 = vadd.f32 %v9069_v48, %v11034_v4 }
 0x2a3   : > { %v5334_v56 = vpop.f32.mrf.mxu0  ;;  %v5741_v8 = vpop.f32.mrf.mxu1 }
 0x2a4   : > { %v11136_v60 = vadd.f32 %v9122_v43, %v5392_v58  ;;  %v5391_v35 = vadd.f32 %v5334_v56, %v11037_v12 }
 0x2a5   : > { %v9072_v5 = vpop.f32.mrf.mxu0  ;;  %v9125_v57 = vpop.f32.mrf.mxu1 }
 0x2a6   : > { %v11139_v25 = vadd.f32 %v5741_v8, %v5391_v35  ;;  %v5394_v18 = vadd.f32 %v9072_v5, %v11040_v21 }
 0x2a7   : > { %v5344_v7 = vpop.f32.mrf.mxu0  ;;  %v5751_v37 = vpop.f32.mrf.mxu1 }
 0x2a8   : > { %v11142_v6 = vadd.f32 %v9125_v57, %v5394_v18  ;;  %v5393_v45 = vadd.f32 %v5344_v7, %v11043_v10  ;;  %v11157_v10 = vld [vmem:[%s11305_s2] ss:$0 sm:$0xff] }
 0x2a9   : > { %v9075_v4 = vpop.f32.mrf.mxu0  ;;  %v9128_v40 = vpop.f32.mrf.mxu1 }
 0x2aa   : > { %v11145_v54 = vadd.f32 %v5751_v37, %v5393_v45  ;;  %v5396_v22 = vadd.f32 %v9075_v4, %v11046_v34 }
 0x2ab   : > { %v5354_v12 = vpop.f32.mrf.mxu0  ;;  %v5761_v13 = vpop.f32.mrf.mxu1 }
 0x2ac   : > { %v11148_v20 = vadd.f32 %v9128_v40, %v5396_v22  ;;  %v5395_v51 = vadd.f32 %v5354_v12, %v11049_v3 }
 0x2ad   : > { %v9133_v21 = vpop.f32.mrf.mxu0  ;;  %v9186_v0 = vpop.f32.mrf.mxu1 }
 0x2ae   : > { %v11151_v16 = vadd.f32 %v5761_v13, %v5395_v51  ;;  %v6178_v29 = vadd.f32 %v9133_v21, %v11052_v50 }
 0x2af   : > { %v6008_v27 = vpop.f32.mrf.mxu0  ;;  %v6415_v31 = vpop.f32.mrf.mxu1 }
 0x2b0   : > { %v6585_v34 = vadd.f32 %v9186_v0, %v6178_v29  ;;  %v6177_v36 = vadd.f32 %v6008_v27, %v11055_v55 }
 0x2b1   : > { %v9136_v23 = vpop.f32.mrf.mxu0  ;;  %v9189_v14 = vpop.f32.mrf.mxu1 }
 0x2b2   : > { %v6626_v3 = vadd.f32 %v11157_v10, %v6585_v34  ;;  %v6584_v47 = vadd.f32 %v6415_v31, %v6177_v36  ;;  %v6180_v48 = vadd.f32 %v9136_v23, %v11058_v1 }
 0x2b3   : > { %v6018_v43 = vpop.f32.mrf.mxu0  ;;  %v6425_v50 = vpop.f32.mrf.mxu1 }
 0x2b4   : > { %vm6660_vm1 = vcmp.ge.f32.partialorder %v6626_v3, 0.0  ;;  %v6694_v58 = vmul.f32 0.2, %v6626_v3  ;;  %v6625_v56 = vadd.f32 %v11157_v10, %v6584_v47  ;;  %v6587_v55 = vadd.f32 %v9189_v14, %v6180_v48 }
 0x2b5   : > { %v6179_v8 = vadd.f32 %v6018_v43, %v11061_v28  ;;  %v9139_v35 = vpop.f32.mrf.mxu0  ;;  %v9192_v5 = vpop.f32.mrf.mxu1 }
 0x2b6   : > { %v6728_v57 = vsel %vm6660_vm1, %v6626_v3, %v6694_v58  ;;  %vm6659_vm2 = vcmp.ge.f32.partialorder %v6625_v56, 0.0  ;;  %v6693_v1 = vmul.f32 0.2, %v6625_v56  ;;  %v6628_v18 = vadd.f32 %v11157_v10, %v6587_v55 }
 0x2b7   : > { %6762 = vst.msk [vmem:[%s11166_s30 + $0x8] sm:$0xff] %vm243_vm0, %v6728_v57  ;;  %v6586_v7 = vadd.f32 %v6425_v50, %v6179_v8  ;;  %v6182_v37 = vadd.f32 %v9139_v35, %v11064_v41  ;;  %v6028_v45 = vpop.f32.mrf.mxu0  ;;  %v6435_v4 = vpop.f32.mrf.mxu1 }
 0x2b8   : > { %v6727_v40 = vsel %vm6659_vm2, %v6625_v56, %v6693_v1  ;;  %vm6662_vm3 = vcmp.ge.f32.partialorder %v6628_v18, 0.0  ;;  %v6696_v22 = vmul.f32 0.2, %v6628_v18  ;;  %v6181_v28 = vadd.f32 %v6028_v45, %v11067_v39 }
 0x2b9   : > { %6761 = vst.msk [vmem:[%s11166_s30] sm:$0xff] %vm243_vm0, %v6727_v40  ;;  %v6627_v12 = vadd.f32 %v11157_v10, %v6586_v7  ;;  %v6589_v13 = vadd.f32 %v9192_v5, %v6182_v37  ;;  %v9142_v51 = vpop.f32.mrf.mxu0  ;;  %v9195_v21 = vpop.f32.mrf.mxu1 }
 0x2ba   : > { %v6730_v0 = vsel %vm6662_vm3, %v6628_v18, %v6696_v22  ;;  %v6588_v29 = vadd.f32 %v6435_v4, %v6181_v28  ;;  %v6184_v27 = vadd.f32 %v9142_v51, %v11070_v19 }
 0x2bb   : > { %6764 = vst.msk [vmem:[%s11166_s30 + $0x18] sm:$0xff] %vm243_vm0, %v6730_v0  ;;  %vm6661_vm4 = vcmp.ge.f32.partialorder %v6627_v12, 0.0  ;;  %v6695_v41 = vmul.f32 0.2, %v6627_v12  ;;  %v6630_v31 = vadd.f32 %v11157_v10, %v6589_v13  ;;  %v6038_v34 = vpop.f32.mrf.mxu0  ;;  %v6445_v39 = vpop.f32.mrf.mxu1 }
 0x2bc   : > { %v6629_v36 = vadd.f32 %v11157_v10, %v6588_v29  ;;  %v6591_v23 = vadd.f32 %v9195_v21, %v6184_v27  ;;  %v6183_v14 = vadd.f32 %v6038_v34, %v11073_v59 }
 0x2bd   : > { %v6729_v3 = vsel %vm6661_vm4, %v6627_v12, %v6695_v41  ;;  %vm6664_vm5 = vcmp.ge.f32.partialorder %v6630_v31, 0.0  ;;  %v6698_v47 = vmul.f32 0.2, %v6630_v31  ;;  %v9145_v48 = vpop.f32.mrf.mxu0  ;;  %v9198_v19 = vpop.f32.mrf.mxu1 }
 0x2be   : > { %6763 = vst.msk [vmem:[%s11166_s30 + $0x10] sm:$0xff] %vm243_vm0, %v6729_v3  ;;  %vm6663_vm6 = vcmp.ge.f32.partialorder %v6629_v36, 0.0  ;;  %v6697_v43 = vmul.f32 0.2, %v6629_v36  ;;  %v6632_v50 = vadd.f32 %v11157_v10, %v6591_v23  ;;  %v6590_v58 = vadd.f32 %v6445_v39, %v6183_v14 }
 0x2bf   : > { %v6732_v56 = vsel %vm6664_vm5, %v6630_v31, %v6698_v47  ;;  %v6186_v55 = vadd.f32 %v9145_v48, %v11076_v53  ;;  %v6048_v8 = vpop.f32.mrf.mxu0  ;;  %v6455_v35 = vpop.f32.mrf.mxu1 }
 0x2c0   : > { %6766 = vst.msk [vmem:[%s11166_s30 + $0x28] sm:$0xff] %vm243_vm0, %v6732_v56  ;;  %v6731_v59 = vsel %vm6663_vm6, %v6629_v36, %v6697_v43  ;;  %vm6666_vm7 = vcmp.ge.f32.partialorder %v6632_v50, 0.0  ;;  %v6700_v5 = vmul.f32 0.2, %v6632_v50  ;;  %v6631_v57 = vadd.f32 %v11157_v10, %v6590_v58 }
 0x2c1   : > { %6765 = vst.msk [vmem:[%s11166_s30 + $0x20] sm:$0xff] %vm243_vm0, %v6731_v59  ;;  %v6593_v1 = vadd.f32 %v9198_v19, %v6186_v55  ;;  %v6185_v18 = vadd.f32 %v6048_v8, %v11079_v44  ;;  %v9148_v7 = vpop.f32.mrf.mxu0  ;;  %v9201_v37 = vpop.f32.mrf.mxu1 }
 0x2c2   : > { %v6734_v45 = vsel %vm6666_vm7, %v6632_v50, %v6700_v5  ;;  %vm6665_vm8 = vcmp.ge.f32.partialorder %v6631_v57, 0.0  ;;  %v6699_v53 = vmul.f32 0.2, %v6631_v57  ;;  %v6188_v4 = vadd.f32 %v9148_v7, %v11082_v42 }
 0x2c3   : > { %6768 = vst.msk [vmem:[%s11166_s30 + $0x38] sm:$0xff] %vm243_vm0, %v6734_v45  ;;  %v6634_v40 = vadd.f32 %v11157_v10, %v6593_v1  ;;  %v6592_v22 = vadd.f32 %v6455_v35, %v6185_v18  ;;  %v6058_v28 = vpop.f32.mrf.mxu0  ;;  %v6465_v12 = vpop.f32.mrf.mxu1 }
 0x2c4   : > { %v6733_v13 = vsel %vm6665_vm8, %v6631_v57, %v6699_v53  ;;  %v6595_v51 = vadd.f32 %v9201_v37, %v6188_v4  ;;  %v6187_v21 = vadd.f32 %v6058_v28, %v11085_v38 }
 0x2c5   : > { %6767 = vst.msk [vmem:[%s11166_s30 + $0x30] sm:$0xff] %vm243_vm0, %v6733_v13  ;;  %vm6668_vm9 = vcmp.ge.f32.partialorder %v6634_v40, 0.0  ;;  %v6702_v44 = vmul.f32 0.2, %v6634_v40  ;;  %v6633_v0 = vadd.f32 %v11157_v10, %v6592_v22  ;;  %v9151_v29 = vpop.f32.mrf.mxu0  ;;  %v9204_v42 = vpop.f32.mrf.mxu1 }
 0x2c6   : > { %v6636_v27 = vadd.f32 %v11157_v10, %v6595_v51  ;;  %v6594_v41 = vadd.f32 %v6465_v12, %v6187_v21  ;;  %v6190_v31 = vadd.f32 %v9151_v29, %v11088_v2 }
 0x2c7   : > { %v6736_v34 = vsel %vm6668_vm9, %v6634_v40, %v6702_v44  ;;  %vm6667_vm10 = vcmp.ge.f32.partialorder %v6633_v0, 0.0  ;;  %v6701_v39 = vmul.f32 0.2, %v6633_v0  ;;  %v6068_v36 = vpop.f32.mrf.mxu0  ;;  %v6475_v38 = vpop.f32.mrf.mxu1 }
 0x2c8   : > { %6770 = vst.msk [vmem:[%s11166_s30 + $0x48] sm:$0xff] %vm243_vm0, %v6736_v34  ;;  %vm6670_vm11 = vcmp.ge.f32.partialorder %v6636_v27, 0.0  ;;  %v6704_v23 = vmul.f32 0.2, %v6636_v27  ;;  %v6635_v14 = vadd.f32 %v11157_v10, %v6594_v41  ;;  %v6597_v3 = vadd.f32 %v9204_v42, %v6190_v31 }
 0x2c9   : > { %v6735_v47 = vsel %vm6667_vm10, %v6633_v0, %v6701_v39  ;;  %v6189_v48 = vadd.f32 %v6068_v36, %v11091_v62  ;;  %v9154_v19 = vpop.f32.mrf.mxu0  ;;  %v9207_v43 = vpop.f32.mrf.mxu1 }
 0x2ca   : > { %6769 = vst.msk [vmem:[%s11166_s30 + $0x40] sm:$0xff] %vm243_vm0, %v6735_v47  ;;  %v6738_v2 = vsel %vm6670_vm11, %v6636_v27, %v6704_v23  ;;  %vm6669_vm12 = vcmp.ge.f32.partialorder %v6635_v14, 0.0  ;;  %v6703_v50 = vmul.f32 0.2, %v6635_v14  ;;  %v6638_v58 = vadd.f32 %v11157_v10, %v6597_v3 }
 0x2cb   : > { %6772 = vst.msk [vmem:[%s11166_s30 + $0x58] sm:$0xff] %vm243_vm0, %v6738_v2  ;;  %v6596_v56 = vadd.f32 %v6475_v38, %v6189_v48  ;;  %v6192_v55 = vadd.f32 %v9154_v19, %v11094_v49  ;;  %v6078_v8 = vpop.f32.mrf.mxu0  ;;  %v6485_v35 = vpop.f32.mrf.mxu1 }
 0x2cc   : > { %v6737_v59 = vsel %vm6669_vm12, %v6635_v14, %v6703_v50  ;;  %vm6672_vm13 = vcmp.ge.f32.partialorder %v6638_v58, 0.0  ;;  %v6706_v62 = vmul.f32 0.2, %v6638_v58  ;;  %v6191_v5 = vadd.f32 %v6078_v8, %v11097_v63 }
 0x2cd   : > { %6771 = vst.msk [vmem:[%s11166_s30 + $0x50] sm:$0xff] %vm243_vm0, %v6737_v59  ;;  %v6637_v57 = vadd.f32 %v11157_v10, %v6596_v56  ;;  %v6599_v1 = vadd.f32 %v9207_v43, %v6192_v55  ;;  %v9157_v18 = vpop.f32.mrf.mxu0  ;;  %v9210_v7 = vpop.f32.mrf.mxu1 }
 0x2ce   : > { %v6740_v37 = vsel %vm6672_vm13, %v6638_v58, %v6706_v62  ;;  %v6598_v45 = vadd.f32 %v6485_v35, %v6191_v5  ;;  %v6194_v53 = vadd.f32 %v9157_v18, %v11100_v46 }
 0x2cf   : > { %6774 = vst.msk [vmem:[%s11166_s30 + $0x68] sm:$0xff] %vm243_vm0, %v6740_v37  ;;  %vm6671_vm14 = vcmp.ge.f32.partialorder %v6637_v57, 0.0  ;;  %v6705_v49 = vmul.f32 0.2, %v6637_v57  ;;  %v6640_v4 = vadd.f32 %v11157_v10, %v6599_v1  ;;  %v6088_v40 = vpop.f32.mrf.mxu0  ;;  %v6495_v63 = vpop.f32.mrf.mxu1 }
 0x2d0   : > { %v6639_v22 = vadd.f32 %v11157_v10, %v6598_v45  ;;  %v6601_v28 = vadd.f32 %v9210_v7, %v6194_v53  ;;  %v6193_v12 = vadd.f32 %v6088_v40, %v11103_v52 }
 0x2d1   : > { %v6739_v13 = vsel %vm6671_vm14, %v6637_v57, %v6705_v49  ;;  %vm6674_vm15 = vcmp.ge.f32.partialorder %v6640_v4, 0.0  ;;  %v6708_v51 = vmul.f32 0.2, %v6640_v4  ;;  %v9160_v21 = vpop.f32.mrf.mxu0  ;;  %v9213_v46 = vpop.f32.mrf.mxu1 }
 0x2d2   : > { %6773 = vst.msk [vmem:[%s11166_s30 + $0x60] sm:$0xff] %vm243_vm0, %v6739_v13  ;;  %vm6673_vm1 = vcmp.ge.f32.partialorder %v6639_v22, 0.0  ;;  %v6707_v44 = vmul.f32 0.2, %v6639_v22  ;;  %v6642_v0 = vadd.f32 %v11157_v10, %v6601_v28  ;;  %v6600_v29 = vadd.f32 %v6495_v63, %v6193_v12 }
 0x2d3   : > { %v6742_v42 = vsel %vm6674_vm15, %v6640_v4, %v6708_v51  ;;  %v6196_v27 = vadd.f32 %v9160_v21, %v11106_v30  ;;  %v6098_v41 = vpop.f32.mrf.mxu0  ;;  %v6505_v31 = vpop.f32.mrf.mxu1 }
 0x2d4   : > { %6776 = vst.msk [vmem:[%s11166_s30 + $0x78] sm:$0xff] %vm243_vm0, %v6742_v42  ;;  %v6741_v52 = vsel %vm6673_vm1, %v6639_v22, %v6707_v44  ;;  %vm6676_vm2 = vcmp.ge.f32.partialorder %v6642_v0, 0.0  ;;  %v6710_v34 = vmul.f32 0.2, %v6642_v0  ;;  %v6641_v39 = vadd.f32 %v11157_v10, %v6600_v29 }
 0x2d5   : > { %6775 = vst.msk [vmem:[%s11166_s30 + $0x70] sm:$0xff] %vm243_vm0, %v6741_v52  ;;  %v6603_v36 = vadd.f32 %v9213_v46, %v6196_v27  ;;  %v6195_v38 = vadd.f32 %v6098_v41, %v11109_v61  ;;  %v9163_v23 = vpop.f32.mrf.mxu0  ;;  %v9216_v14 = vpop.f32.mrf.mxu1 }
 0x2d6   : > { %v6744_v3 = vsel %vm6676_vm2, %v6642_v0, %v6710_v34  ;;  %vm6675_vm3 = vcmp.ge.f32.partialorder %v6641_v39, 0.0  ;;  %v6709_v30 = vmul.f32 0.2, %v6641_v39  ;;  %v6198_v47 = vadd.f32 %v9163_v23, %v11112_v33 }
 0x2d7   : > { %6778 = vst.msk [vmem:[%s11166_s30 + $0x88] sm:$0xff] %vm243_vm0, %v6744_v3  ;;  %v6644_v48 = vadd.f32 %v11157_v10, %v6603_v36  ;;  %v6602_v19 = vadd.f32 %v6505_v31, %v6195_v38  ;;  %v6108_v43 = vpop.f32.mrf.mxu0  ;;  %v6515_v2 = vpop.f32.mrf.mxu1 }
 0x2d8   : > { %v6743_v50 = vsel %vm6675_vm3, %v6641_v39, %v6709_v30  ;;  %v6605_v58 = vadd.f32 %v9216_v14, %v6198_v47  ;;  %v6197_v56 = vadd.f32 %v6108_v43, %v11115_v17 }
 0x2d9   : > { %6777 = vst.msk [vmem:[%s11166_s30 + $0x80] sm:$0xff] %vm243_vm0, %v6743_v50  ;;  %vm6678_vm4 = vcmp.ge.f32.partialorder %v6644_v48, 0.0  ;;  %v6712_v61 = vmul.f32 0.2, %v6644_v48  ;;  %v6643_v55 = vadd.f32 %v11157_v10, %v6602_v19  ;;  %v9166_v8 = vpop.f32.mrf.mxu0  ;;  %v9219_v33 = vpop.f32.mrf.mxu1 }
 0x2da   : > { %v6646_v35 = vadd.f32 %v11157_v10, %v6605_v58  ;;  %v6604_v59 = vadd.f32 %v6515_v2, %v6197_v56  ;;  %v6200_v62 = vadd.f32 %v9166_v8, %v11118_v9 }
 0x2db   : > { %v6746_v5 = vsel %vm6678_vm4, %v6644_v48, %v6712_v61  ;;  %vm6677_vm5 = vcmp.ge.f32.partialorder %v6643_v55, 0.0  ;;  %v6711_v57 = vmul.f32 0.2, %v6643_v55  ;;  %v6118_v1 = vpop.f32.mrf.mxu0  ;;  %v6525_v17 = vpop.f32.mrf.mxu1 }
 0x2dc   : > { %6780 = vst.msk [vmem:[%s11166_s30 + $0x98] sm:$0xff] %vm243_vm0, %v6746_v5  ;;  %vm6680_vm6 = vcmp.ge.f32.partialorder %v6646_v35, 0.0  ;;  %v6714_v18 = vmul.f32 0.2, %v6646_v35  ;;  %v6645_v7 = vadd.f32 %v11157_v10, %v6604_v59  ;;  %v6607_v37 = vadd.f32 %v9219_v33, %v6200_v62 }
 0x2dd   : > { %v6745_v45 = vsel %vm6677_vm5, %v6643_v55, %v6711_v57  ;;  %v6199_v53 = vadd.f32 %v6118_v1, %v11121_v24  ;;  %v9169_v49 = vpop.f32.mrf.mxu0  ;;  %v9222_v4 = vpop.f32.mrf.mxu1 }
 0x2de   : > { %6779 = vst.msk [vmem:[%s11166_s30 + $0x90] sm:$0xff] %vm243_vm0, %v6745_v45  ;;  %v6748_v9 = vsel %vm6680_vm6, %v6646_v35, %v6714_v18  ;;  %vm6679_vm7 = vcmp.ge.f32.partialorder %v6645_v7, 0.0  ;;  %v6713_v40 = vmul.f32 0.2, %v6645_v7  ;;  %v6648_v63 = vadd.f32 %v11157_v10, %v6607_v37 }
 0x2df   : > { %6782 = vst.msk [vmem:[%s11166_s30 + $0xa8] sm:$0xff] %vm243_vm0, %v6748_v9  ;;  %v6606_v22 = vadd.f32 %v6525_v17, %v6199_v53  ;;  %v6202_v28 = vadd.f32 %v9169_v49, %v11124_v15  ;;  %v6128_v12 = vpop.f32.mrf.mxu0  ;;  %v6535_v13 = vpop.f32.mrf.mxu1 }
 0x2e0   : > { %v6747_v51 = vsel %vm6679_vm7, %v6645_v7, %v6713_v40  ;;  %vm6682_vm8 = vcmp.ge.f32.partialorder %v6648_v63, 0.0  ;;  %v6716_v24 = vmul.f32 0.2, %v6648_v63  ;;  %v6201_v21 = vadd.f32 %v6128_v12, %v11127_v26 }
 0x2e1   : > { %6781 = vst.msk [vmem:[%s11166_s30 + $0xa0] sm:$0xff] %vm243_vm0, %v6747_v51  ;;  %v6647_v46 = vadd.f32 %v11157_v10, %v6606_v22  ;;  %v6609_v44 = vadd.f32 %v9222_v4, %v6202_v28  ;;  %v9172_v0 = vpop.f32.mrf.mxu0  ;;  %v9225_v29 = vpop.f32.mrf.mxu1 }
 0x2e2   : > { %v6750_v42 = vsel %vm6682_vm8, %v6648_v63, %v6716_v24  ;;  %v6608_v27 = vadd.f32 %v6535_v13, %v6201_v21  ;;  %v6204_v41 = vadd.f32 %v9172_v0, %v11130_v11 }
 0x2e3   : > { %6784 = vst.msk [vmem:[%s11166_s30 + $0xb8] sm:$0xff] %vm243_vm0, %v6750_v42  ;;  %vm6681_vm9 = vcmp.ge.f32.partialorder %v6647_v46, 0.0  ;;  %v6715_v15 = vmul.f32 0.2, %v6647_v46  ;;  %v6650_v31 = vadd.f32 %v11157_v10, %v6609_v44  ;;  %v6138_v52 = vpop.f32.mrf.mxu0  ;;  %v6545_v26 = vpop.f32.mrf.mxu1 }
 0x2e4   : > { %v6649_v34 = vadd.f32 %v11157_v10, %v6608_v27  ;;  %v6611_v39 = vadd.f32 %v9225_v29, %v6204_v41  ;;  %v6203_v36 = vadd.f32 %v6138_v52, %v11133_v32 }
 0x2e5   : > { %v6749_v38 = vsel %vm6681_vm9, %v6647_v46, %v6715_v15  ;;  %vm6684_vm10 = vcmp.ge.f32.partialorder %v6650_v31, 0.0  ;;  %v6718_v23 = vmul.f32 0.2, %v6650_v31  ;;  %v9175_v14 = vpop.f32.mrf.mxu0  ;;  %v9228_v11 = vpop.f32.mrf.mxu1 }
 0x2e6   : > { %6783 = vst.msk [vmem:[%s11166_s30 + $0xb0] sm:$0xff] %vm243_vm0, %v6749_v38  ;;  %vm6683_vm11 = vcmp.ge.f32.partialorder %v6649_v34, 0.0  ;;  %v6717_v3 = vmul.f32 0.2, %v6649_v34  ;;  %v6652_v30 = vadd.f32 %v11157_v10, %v6611_v39  ;;  %v6610_v47 = vadd.f32 %v6545_v26, %v6203_v36 }
 0x2e7   : > { %v6752_v48 = vsel %vm6684_vm10, %v6650_v31, %v6718_v23  ;;  %v6206_v19 = vadd.f32 %v9175_v14, %v11136_v60  ;;  %v6148_v43 = vpop.f32.mrf.mxu0  ;;  %v6555_v2 = vpop.f32.mrf.mxu1 }
 0x2e8   : > { %6786 = vst.msk [vmem:[%s11166_s30 + $0xc8] sm:$0xff] %vm243_vm0, %v6752_v48  ;;  %v6751_v32 = vsel %vm6683_vm11, %v6649_v34, %v6717_v3  ;;  %vm6686_vm12 = vcmp.ge.f32.partialorder %v6652_v30, 0.0  ;;  %v6720_v50 = vmul.f32 0.2, %v6652_v30  ;;  %v6651_v58 = vadd.f32 %v11157_v10, %v6610_v47 }
 0x2e9   : > { %6785 = vst.msk [vmem:[%s11166_s30 + $0xc0] sm:$0xff] %vm243_vm0, %v6751_v32  ;;  %v6613_v56 = vadd.f32 %v9228_v11, %v6206_v19  ;;  %v6205_v61 = vadd.f32 %v6148_v43, %v11139_v25  ;;  %v9178_v55 = vpop.f32.mrf.mxu0  ;;  %v9231_v8 = vpop.f32.mrf.mxu1 }
 0x2ea   : > { %v6754_v33 = vsel %vm6686_vm12, %v6652_v30, %v6720_v50  ;;  %vm6685_vm13 = vcmp.ge.f32.partialorder %v6651_v58, 0.0  ;;  %v6719_v60 = vmul.f32 0.2, %v6651_v58  ;;  %v6208_v35 = vadd.f32 %v9178_v55, %v11142_v6 }
 0x2eb   : > { %6788 = vst.msk [vmem:[%s11166_s30 + $0xd8] sm:$0xff] %vm243_vm0, %v6754_v33  ;;  %v6654_v59 = vadd.f32 %v11157_v10, %v6613_v56  ;;  %v6612_v62 = vadd.f32 %v6555_v2, %v6205_v61  ;;  %v6158_v5 = vpop.f32.mrf.mxu0  ;;  %v6565_v57 = vpop.f32.mrf.mxu1 }
 0x2ec   : > { %v6753_v1 = vsel %vm6685_vm13, %v6651_v58, %v6719_v60  ;;  %v6615_v17 = vadd.f32 %v9231_v8, %v6208_v35  ;;  %v6207_v18 = vadd.f32 %v6158_v5, %v11145_v54 }
 0x2ed   : > { %6787 = vst.msk [vmem:[%s11166_s30 + $0xd0] sm:$0xff] %vm243_vm0, %v6753_v1  ;;  %vm6688_vm14 = vcmp.ge.f32.partialorder %v6654_v59, 0.0  ;;  %v6722_v25 = vmul.f32 0.2, %v6654_v59  ;;  %v6653_v7 = vadd.f32 %v11157_v10, %v6612_v62  ;;  %v9181_v37 = vpop.f32.mrf.mxu0  ;;  %v9234_v49 = vpop.f32.mrf.mxu1 }
 0x2ee   : > { %v6656_v6 = vadd.f32 %v11157_v10, %v6615_v17  ;;  %v6614_v45 = vadd.f32 %v6565_v57, %v6207_v18  ;;  %v6210_v53 = vadd.f32 %v9181_v37, %v11148_v20 }
 0x2ef   : > { %v6756_v4 = vsel %vm6688_vm14, %v6654_v59, %v6722_v25  ;;  %vm6687_vm15 = vcmp.ge.f32.partialorder %v6653_v7, 0.0  ;;  %v6721_v9 = vmul.f32 0.2, %v6653_v7  ;;  %v6168_v40 = vpop.f32.mrf.mxu0  ;;  %v6575_v24 = vpop.f32.mrf.mxu1 }
 0x2f0   : > { %6790 = vst.msk [vmem:[%s11166_s30 + $0xe8] sm:$0xff] %vm243_vm0, %v6756_v4  ;;  %vm6690_vm1 = vcmp.ge.f32.partialorder %v6656_v6, 0.0  ;;  %v6724_v54 = vmul.f32 0.2, %v6656_v6  ;;  %v6655_v63 = vadd.f32 %v11157_v10, %v6614_v45  ;;  %v6617_v22 = vadd.f32 %v9234_v49, %v6210_v53 }
 0x2f1   : > { %v6755_v28 = vsel %vm6687_vm15, %v6653_v7, %v6721_v9  ;;  %v6209_v12 = vadd.f32 %v6168_v40, %v11151_v16 }
 0x2f2   : > { %6789 = vst.msk [vmem:[%s11166_s30 + $0xe0] sm:$0xff] %vm243_vm0, %v6755_v28  ;;  %v6758_v20 = vsel %vm6690_vm1, %v6656_v6, %v6724_v54  ;;  %vm6689_vm2 = vcmp.ge.f32.partialorder %v6655_v63, 0.0  ;;  %v6723_v13 = vmul.f32 0.2, %v6655_v63  ;;  %v6658_v51 = vadd.f32 %v11157_v10, %v6617_v22 }
 0x2f3   : > { %6792 = vst.msk [vmem:[%s11166_s30 + $0xf8] sm:$0xff] %vm243_vm0, %v6758_v20  ;;  %v6616_v21 = vadd.f32 %v6575_v24, %v6209_v12 }
 0x2f4   : > { %v6757_v46 = vsel %vm6689_vm2, %v6655_v63, %v6723_v13  ;;  %vm6692_vm3 = vcmp.ge.f32.partialorder %v6658_v51, 0.0  ;;  %v6726_v44 = vmul.f32 0.2, %v6658_v51 }
 0x2f5   : > { %6791 = vst.msk [vmem:[%s11166_s30 + $0xf0] sm:$0xff] %vm243_vm0, %v6757_v46  ;;  %v6657_v0 = vadd.f32 %v11157_v10, %v6616_v21 }
 0x2f6   : > { %v6760_v16 = vsel %vm6692_vm3, %v6658_v51, %v6726_v44 }
 0x2f7   : > { %6794 = vst.msk [vmem:[%s11166_s30 + $0x108] sm:$0xff] %vm243_vm0, %v6760_v16  ;;  %vm6691_vm4 = vcmp.ge.f32.partialorder %v6657_v0, 0.0  ;;  %v6725_v29 = vmul.f32 0.2, %v6657_v0 }
 0x2f9   : > { %v6759_v42 = vsel %vm6691_vm4, %v6657_v0, %v6725_v29 }
 0x2fa   : > { %6793 = vst.msk [vmem:[%s11166_s30 + $0x100] sm:$0xff] %vm243_vm0, %v6759_v42 }
 0x2fb PF: > { %s13_s12 = sadd.s32 1, %s9251_s12  }
 0x2fc   : > { %p10_p4 = scmp.ge.s32.totalorder %s13_s12, 4  }
 0x2fe   :  { %12 = sbr.rel (!%p10_p4) target bundleno = 1 (0x1), region = 80 }

// kernel: discriminator_forward.6
= control target key start
LH: loop header
LB: loop body
LE: loop exit
PB: predicated region body
PF: predicated region fallthrough
CT: control target
= control target key end

     0   :  { %s3997_s12 = smov 0   ;;  %s5223_s0 = inlined_call_operand.vmem [shape: f32[2,4,90,8], index: 0, kind: input, shape index: {}]   ;;  %s5224_s1 = inlined_call_operand.vmem [shape: f32[16,8,16], index: 1, kind: input, shape index: {}]   ;;  %s5225_s2 = inlined_call_operand.vmem [shape: f32[1,16], index: 2, kind: input, shape index: {}]   ;;  %s5226_s3 = inlined_call_operand.vmem [shape: f32[2,72,16], index: 3, kind: output, shape index: {}]  }
   0x1 LB: > { %s3034_s13 = sadd.s32 4294967295, %s3973_s12   ;;  %p3038_p0 = scmp.ge.s32.totalorder %s3973_s12, 1  ;;  %s3973_s12 = sphi %s3997_s12, %s13_s12  }
   0x2   : > { %p137_p1 = scmp.lt.s32.totalorder %s3973_s12, 3 }
   0x4   : > { %p138_p2 = pnand %p3038_p0, %p137_p1 }
   0x5   : > { %p161_p3 = scmp.lt.s32.totalorder (!%p138_p2), %s3034_s13, 1 }
   0x6   : > { %141 = sbr.rel (%p138_p2) target bundleno = 582 (0x246), region = 32 }
   0xb   : > { %v3050_v0 = vld [vmem:[%s5224_s1 + $0x8] sm:$0xff]  ;;  %v180_v1 = vld [vmem:[%s5224_s1] sm:$0xff]  ;;  %v3975_v2 = vmov 0.0   ;;  %vm3976_vm0 = vmmov 0   ;;  %s5264_s13 = smov (!%p161_p3, %s3034_s13), 1  ;;  %vm193_vm1 = vcmask 64512  }
   0xc   : > { %3471 = vmatprep.subr.mxu0 %v3975_v2  ;;  %3500 = vmatprep.subr.mxu1 %v3975_v2  ;;  %s3935_s18 = smul.u32 384, %s5264_s13  ;;  %v3069_v3 = vld [vmem:[%s5224_s1 + $0x10] sm:$0xff]  ;;  %v3088_v4 = vld [vmem:[%s5224_s1 + $0x18] sm:$0xff]  ;;  %v3107_v25 = vld [vmem:[%s5224_s1 + $0x20] sm:$0xff]  ;;  %vm2856_vm14 = vcmask 130048  }
   0xd   : > { %3472 = vmatpush3.msra.mxu0 %v3050_v0  ;;  %3473 = vmatprep.mubr.msk.f32.mxu0 %vm3976_vm0, %v3975_v2  ;;  %v3126_v26 = vld [vmem:[%s5224_s1 + $0x28] sm:$0xff]  ;;  %v3145_v45 = vld [vmem:[%s5224_s1 + $0x30] sm:$0xff]  ;;  %v3164_v46 = vld [vmem:[%s5224_s1 + $0x38] sm:$0xff]  ;;  %s3936_s27 = smul.u32 72, %s5264_s13 }
   0xe   : > { %3501 = vmatpush3.msra.mxu1 %v180_v1  ;;  %3502 = vmatprep.mubr.msk.f32.mxu1 %vm3976_vm0, %v3975_v2  ;;  %s4025_s21 = scalar_lea.vmem %s5223_s0, %s3935_s18  ;;  %v3174_v1 = vld [vmem:[%s5224_s1 + $0x40] sm:$0xff] }
   0xf   : > { %3529 = vmatprep.subr.mxu0 %v3975_v2  ;;  %3558 = vmatprep.subr.mxu1 %v3975_v2  ;;  %v3041_v5 = vld [vmem:[%s4025_s21 + $0x60] sm:$0xff]  ;;  %v3042_v7 = vld [vmem:[%s4025_s21 + $0x68] sm:$0xff]  ;;  %v3043_v9 = vld [vmem:[%s4025_s21 + $0x70] sm:$0xff]  ;;  %s170_s13 = scalar_lea.vmem %s5226_s3, %s3936_s27 }
  0x10   : > { %v171_v6 = vld [vmem:[%s4025_s21] sm:$0xff]  ;;  %3474 = vmatmul.mubr.msk.f32.vlgmr.msra.gmra.mxu0 %vm193_vm1, %v3041_v5  ;;  %v172_v8 = vld [vmem:[%s4025_s21 + $0x8] sm:$0xff]  ;;  %v173_v10 = vld [vmem:[%s4025_s21 + $0x10] sm:$0xff] }
  0x11   : > { %3503 = vmatmul.mubr.msk.f32.vlgmr.msra.gmra.mxu1 %vm193_vm1, %v171_v6  ;;  %3530 = vmatpush3.msra.mxu0 %v3069_v3  ;;  %v3044_v11 = vld [vmem:[%s4025_s21 + $0x78] sm:$0xff]  ;;  %v3045_v13 = vld [vmem:[%s4025_s21 + $0x80] sm:$0xff]  ;;  %v3046_v15 = vld [vmem:[%s4025_s21 + $0x88] sm:$0xff] }
  0x12   : > { %3559 = vmatpush3.msra.mxu1 %v3088_v4  ;;  %3476 = vmatprep.mubr.msk.f32.mxu0 %vm3976_vm0, %v3975_v2  ;;  %v174_v12 = vld [vmem:[%s4025_s21 + $0x18] sm:$0xff]  ;;  %v175_v14 = vld [vmem:[%s4025_s21 + $0x20] sm:$0xff]  ;;  %v176_v16 = vld [vmem:[%s4025_s21 + $0x28] sm:$0xff] }
  0x13   : > { %3505 = vmatprep.mubr.msk.f32.mxu1 %vm3976_vm0, %v3975_v2  ;;  %3587 = vmatprep.subr.mxu0 %v3975_v2  ;;  %v3047_v17 = vld [vmem:[%s4025_s21 + $0x90] sm:$0xff]  ;;  %v3048_v19 = vld [vmem:[%s4025_s21 + $0x98] sm:$0xff]  ;;  %v3049_v21 = vld [vmem:[%s4025_s21 + $0xa0] sm:$0xff] }
  0x14   : > { %3616 = vmatprep.subr.mxu1 %v3975_v2  ;;  %3477 = vmatmul.mubr.msk.f32.gmra.mxu0 %vm193_vm1, %v3042_v7  ;;  %v177_v18 = vld [vmem:[%s4025_s21 + $0x30] sm:$0xff]  ;;  %v178_v20 = vld [vmem:[%s4025_s21 + $0x38] sm:$0xff]  ;;  %v179_v22 = vld [vmem:[%s4025_s21 + $0x40] sm:$0xff] }
  0x15   : > { %3506 = vmatmul.mubr.msk.f32.gmra.mxu1 %vm193_vm1, %v172_v8  ;;  %3479 = vmatprep.mubr.msk.f32.mxu0 %vm3976_vm0, %v3975_v2  ;;  %v468_v23 = vld [vmem:[%s4025_s21 + $0x1] sm:$0xff]  ;;  %v4118_v27 = vld [vmem:[%s4025_s21 + $0x9] sm:$0xff]  ;;  %v4138_v29 = vld [vmem:[%s4025_s21 + $0x11] sm:$0xff] }
  0x16   : > { %3508 = vmatprep.mubr.msk.f32.mxu1 %vm3976_vm0, %v3975_v2  ;;  %v3079_v24 = vld [vmem:[%s4025_s21 + $0x61] sm:$0xff]  ;;  %v4121_v28 = vld [vmem:[%s4025_s21 + $0x69] sm:$0xff]  ;;  %v4141_v30 = vld [vmem:[%s4025_s21 + $0x71] sm:$0xff] }
  0x17   : > { %v4152_v31 = vld [vmem:[%s4025_s21 + $0x19] sm:$0xff]  ;;  %v4166_v33 = vld [vmem:[%s4025_s21 + $0x21] sm:$0xff]  ;;  %v4180_v35 = vld [vmem:[%s4025_s21 + $0x29] sm:$0xff] }
  0x18   : > { %3480 = vmatmul.mubr.msk.f32.gmra.mxu0 %vm193_vm1, %v3043_v9  ;;  %v4155_v32 = vld [vmem:[%s4025_s21 + $0x79] sm:$0xff]  ;;  %v4169_v34 = vld [vmem:[%s4025_s21 + $0x81] sm:$0xff]  ;;  %v4183_v36 = vld [vmem:[%s4025_s21 + $0x89] sm:$0xff] }
  0x19   : > { %3509 = vmatmul.mubr.msk.f32.gmra.mxu1 %vm193_vm1, %v173_v10  ;;  %3482 = vmatprep.mubr.msk.f32.mxu0 %vm3976_vm0, %v3975_v2  ;;  %v4194_v37 = vld [vmem:[%s4025_s21 + $0x31] sm:$0xff]  ;;  %v4208_v39 = vld [vmem:[%s4025_s21 + $0x39] sm:$0xff]  ;;  %v4222_v41 = vld [vmem:[%s4025_s21 + $0x41] sm:$0xff] }
  0x1a   : > { %3511 = vmatprep.mubr.msk.f32.mxu1 %vm3976_vm0, %v3975_v2  ;;  %v4197_v38 = vld [vmem:[%s4025_s21 + $0x91] sm:$0xff]  ;;  %v4211_v40 = vld [vmem:[%s4025_s21 + $0x99] sm:$0xff]  ;;  %v4225_v42 = vld [vmem:[%s4025_s21 + $0xa1] sm:$0xff] }
  0x1b   : > { %v3098_v43 = vld [vmem:[%s4025_s21 + $0xc0] sm:$0xff]  ;;  %v3099_v47 = vld [vmem:[%s4025_s21 + $0xc8] sm:$0xff]  ;;  %v3100_v49 = vld [vmem:[%s4025_s21 + $0xd0] sm:$0xff] }
  0x1c   : > { %3483 = vmatmul.mubr.msk.f32.gmra.mxu0 %vm193_vm1, %v3044_v11  ;;  %v3117_v44 = vld [vmem:[%s4025_s21 + $0x120] sm:$0xff]  ;;  %v3118_v48 = vld [vmem:[%s4025_s21 + $0x128] sm:$0xff]  ;;  %v3119_v50 = vld [vmem:[%s4025_s21 + $0x130] sm:$0xff] }
  0x1d   : > { %3512 = vmatmul.mubr.msk.f32.gmra.mxu1 %vm193_vm1, %v174_v12  ;;  %3485 = vmatprep.mubr.msk.f32.mxu0 %vm3976_vm0, %v3975_v2  ;;  %v3101_v51 = vld [vmem:[%s4025_s21 + $0xd8] sm:$0xff]  ;;  %v3102_v53 = vld [vmem:[%s4025_s21 + $0xe0] sm:$0xff]  ;;  %v3103_v55 = vld [vmem:[%s4025_s21 + $0xe8] sm:$0xff] }
  0x1e   : > { %3514 = vmatprep.mubr.msk.f32.mxu1 %vm3976_vm0, %v3975_v2  ;;  %v3120_v52 = vld [vmem:[%s4025_s21 + $0x138] sm:$0xff]  ;;  %v3121_v54 = vld [vmem:[%s4025_s21 + $0x140] sm:$0xff]  ;;  %v3122_v56 = vld [vmem:[%s4025_s21 + $0x148] sm:$0xff] }
  0x1f   : > { %v3104_v57 = vld [vmem:[%s4025_s21 + $0xf0] sm:$0xff]  ;;  %v3105_v59 = vld [vmem:[%s4025_s21 + $0xf8] sm:$0xff]  ;;  %v3106_v61 = vld [vmem:[%s4025_s21 + $0x100] sm:$0xff] }
  0x20   : > { %3486 = vmatmul.mubr.msk.f32.gmra.mxu0 %vm193_vm1, %v3045_v13  ;;  %v3123_v58 = vld [vmem:[%s4025_s21 + $0x150] sm:$0xff]  ;;  %v3124_v60 = vld [vmem:[%s4025_s21 + $0x158] sm:$0xff]  ;;  %v3125_v62 = vld [vmem:[%s4025_s21 + $0x160] sm:$0xff] }
  0x21   : > { %3515 = vmatmul.mubr.msk.f32.gmra.mxu1 %vm193_vm1, %v175_v14  ;;  %3488 = vmatprep.mubr.msk.f32.mxu0 %vm3976_vm0, %v3975_v2  ;;  %v3136_v63 = vld [vmem:[%s4025_s21 + $0xc1] sm:$0xff]  ;;  %v4326_v4 = vld [vmem:[%s4025_s21 + $0xc9] sm:$0xff]  ;;  %v4346_v6 = vld [vmem:[%s4025_s21 + $0xd1] sm:$0xff] }
  0x22   : > { %3517 = vmatprep.mubr.msk.f32.mxu1 %vm3976_vm0, %v3975_v2  ;;  %v3155_v0 = vld [vmem:[%s4025_s21 + $0x121] sm:$0xff]  ;;  %v4329_v5 = vld [vmem:[%s4025_s21 + $0x129] sm:$0xff]  ;;  %v4349_v7 = vld [vmem:[%s4025_s21 + $0x131] sm:$0xff] }
  0x23   : > { %v3193_v3 = vld [vmem:[%s5224_s1 + $0x48] sm:$0xff]  ;;  %v4360_v8 = vld [vmem:[%s4025_s21 + $0xd9] sm:$0xff]  ;;  %v4402_v14 = vld [vmem:[%s4025_s21 + $0xf1] sm:$0xff] }
  0x24   : > { %3489 = vmatmul.mubr.msk.f32.gmra.mxu0 %vm193_vm1, %v3046_v15  ;;  %v4363_v9 = vld [vmem:[%s4025_s21 + $0x139] sm:$0xff]  ;;  %v4374_v10 = vld [vmem:[%s4025_s21 + $0xe1] sm:$0xff]  ;;  %v4388_v12 = vld [vmem:[%s4025_s21 + $0xe9] sm:$0xff] }
  0x25   : > { %3518 = vmatmul.mubr.msk.f32.gmra.mxu1 %vm193_vm1, %v176_v16  ;;  %3491 = vmatprep.mubr.msk.f32.mxu0 %vm3976_vm0, %v3975_v2  ;;  %v4377_v11 = vld [vmem:[%s4025_s21 + $0x141] sm:$0xff]  ;;  %v4391_v13 = vld [vmem:[%s4025_s21 + $0x149] sm:$0xff]  ;;  %v4405_v15 = vld [vmem:[%s4025_s21 + $0x151] sm:$0xff] }
  0x26   : > { %3520 = vmatprep.mubr.msk.f32.mxu1 %vm3976_vm0, %v3975_v2  ;;  %v4416_v16 = vld [vmem:[%s4025_s21 + $0xf9] sm:$0xff] }
  0x28   : > { %3492 = vmatmul.mubr.msk.f32.gmra.mxu0 %vm193_vm1, %v3047_v17  ;;  %v4419_v17 = vld [vmem:[%s4025_s21 + $0x159] sm:$0xff] }
  0x29   : > { %3521 = vmatmul.mubr.msk.f32.gmra.mxu1 %vm193_vm1, %v177_v18  ;;  %3494 = vmatprep.mubr.msk.f32.mxu0 %vm3976_vm0, %v3975_v2  ;;  %v4430_v18 = vld [vmem:[%s4025_s21 + $0x101] sm:$0xff] }
  0x2a   : > { %3523 = vmatprep.mubr.msk.f32.mxu1 %vm3976_vm0, %v3975_v2 }
  0x2c   : > { %3495 = vmatmul.mubr.msk.f32.gmra.mxu0 %vm193_vm1, %v3048_v19  ;;  %v4433_v19 = vld [vmem:[%s4025_s21 + $0x161] sm:$0xff] }
  0x2d   : > { %3524 = vmatmul.mubr.msk.f32.gmra.mxu1 %vm193_vm1, %v178_v20  ;;  %3497 = vmatprep.mubr.msk.f32.mxu0 %vm3976_vm0, %v3975_v2  ;;  %v3203_v20 = vld [vmem:[%s5224_s1 + $0x50] sm:$0xff] }
  0x2e   : > { %3526 = vmatprep.mubr.msk.f32.mxu1 %vm3976_vm0, %v3975_v2 }
  0x30   : > { %3498 = vmatmul.mubr.msk.f32.gmra.mxu0 %vm193_vm1, %v3049_v21  ;;  %v3222_v21 = vld [vmem:[%s5224_s1 + $0x58] sm:$0xff] }
  0x31   : > { %3527 = vmatmul.mubr.msk.f32.gmra.mxu1 %vm193_vm1, %v179_v22  ;;  %3531 = vmatprep.mubr.msk.f32.mxu0 %vm3976_vm0, %v3975_v2  ;;  %v1420_v22 = vld [vmem:[%s4025_s21 + $0x49] sm:$0xff] }
  0x32   : > { %3560 = vmatprep.mubr.msk.f32.mxu1 %vm3976_vm0, %v3975_v2 }
  0x34   : > { %3532 = vmatmul.mubr.msk.f32.vlgmr.msra.gmra.mxu0 %vm193_vm1, %v468_v23  ;;  %v3192_v23 = vld [vmem:[%s4025_s21 + $0xa9] sm:$0xff] }
  0x35   : > { %3561 = vmatmul.mubr.msk.f32.vlgmr.msra.gmra.mxu1 %vm193_vm1, %v3079_v24  ;;  %3588 = vmatpush3.msra.mxu0 %v3107_v25  ;;  %v1726_v24 = vld [vmem:[%s4025_s21 + $0xa] sm:$0xff] }
  0x36   : > { %3617 = vmatpush3.msra.mxu1 %v3126_v26  ;;  %3534 = vmatprep.mubr.msk.f32.mxu0 %vm3976_vm0, %v3975_v2  ;;  %v3213_v25 = vld [vmem:[%s4025_s21 + $0x6a] sm:$0xff]  ;;  %v3241_v26 = vld [vmem:[%s5224_s1 + $0x60] sm:$0xff] }
  0x37   : > { %3563 = vmatprep.mubr.msk.f32.mxu1 %vm3976_vm0, %v3975_v2  ;;  %3645 = vmatprep.subr.mxu0 %v3975_v2 }
  0x38   : > { %3674 = vmatprep.subr.mxu1 %v3975_v2  ;;  %3535 = vmatmul.mubr.msk.f32.gmra.mxu0 %vm193_vm1, %v4118_v27 }
  0x39   : > { %3564 = vmatmul.mubr.msk.f32.gmra.mxu1 %vm193_vm1, %v4121_v28  ;;  %3537 = vmatprep.mubr.msk.f32.mxu0 %vm3976_vm0, %v3975_v2 }
  0x3a   : > { %3566 = vmatprep.mubr.msk.f32.mxu1 %vm3976_vm0, %v3975_v2 }
  0x3c   : > { %3538 = vmatmul.mubr.msk.f32.gmra.mxu0 %vm193_vm1, %v4138_v29 }
  0x3d   : > { %3567 = vmatmul.mubr.msk.f32.gmra.mxu1 %vm193_vm1, %v4141_v30  ;;  %3540 = vmatprep.mubr.msk.f32.mxu0 %vm3976_vm0, %v3975_v2 }
  0x3e   : > { %3569 = vmatprep.mubr.msk.f32.mxu1 %vm3976_vm0, %v3975_v2 }
  0x40   : > { %3541 = vmatmul.mubr.msk.f32.gmra.mxu0 %vm193_vm1, %v4152_v31 }
  0x41   : > { %3570 = vmatmul.mubr.msk.f32.gmra.mxu1 %vm193_vm1, %v4155_v32  ;;  %3543 = vmatprep.mubr.msk.f32.mxu0 %vm3976_vm0, %v3975_v2 }
  0x42   : > { %3572 = vmatprep.mubr.msk.f32.mxu1 %vm3976_vm0, %v3975_v2 }
  0x44   : > { %3544 = vmatmul.mubr.msk.f32.gmra.mxu0 %vm193_vm1, %v4166_v33 }
  0x45   : > { %3573 = vmatmul.mubr.msk.f32.gmra.mxu1 %vm193_vm1, %v4169_v34  ;;  %3546 = vmatprep.mubr.msk.f32.mxu0 %vm3976_vm0, %v3975_v2 }
  0x46   : > { %3575 = vmatprep.mubr.msk.f32.mxu1 %vm3976_vm0, %v3975_v2 }
  0x48   : > { %3547 = vmatmul.mubr.msk.f32.gmra.mxu0 %vm193_vm1, %v4180_v35 }
  0x49   : > { %3576 = vmatmul.mubr.msk.f32.gmra.mxu1 %vm193_vm1, %v4183_v36  ;;  %3549 = vmatprep.mubr.msk.f32.mxu0 %vm3976_vm0, %v3975_v2 }
  0x4a   : > { %3578 = vmatprep.mubr.msk.f32.mxu1 %vm3976_vm0, %v3975_v2 }
  0x4c   : > { %3550 = vmatmul.mubr.msk.f32.gmra.mxu0 %vm193_vm1, %v4194_v37 }
  0x4d   : > { %3579 = vmatmul.mubr.msk.f32.gmra.mxu1 %vm193_vm1, %v4197_v38  ;;  %3552 = vmatprep.mubr.msk.f32.mxu0 %vm3976_vm0, %v3975_v2 }
  0x4e   : > { %3581 = vmatprep.mubr.msk.f32.mxu1 %vm3976_vm0, %v3975_v2 }
  0x50   : > { %3553 = vmatmul.mubr.msk.f32.gmra.mxu0 %vm193_vm1, %v4208_v39 }
  0x51   : > { %3582 = vmatmul.mubr.msk.f32.gmra.mxu1 %vm193_vm1, %v4211_v40  ;;  %3555 = vmatprep.mubr.msk.f32.mxu0 %vm3976_vm0, %v3975_v2 }
  0x52   : > { %3584 = vmatprep.mubr.msk.f32.mxu1 %vm3976_vm0, %v3975_v2 }
  0x54   : > { %3556 = vmatmul.mubr.msk.f32.gmra.mxu0 %vm193_vm1, %v4222_v41 }
  0x55   : > { %3585 = vmatmul.mubr.msk.f32.gmra.mxu1 %vm193_vm1, %v4225_v42  ;;  %3589 = vmatprep.mubr.msk.f32.mxu0 %vm3976_vm0, %v3975_v2 }
  0x56   : > { %3618 = vmatprep.mubr.msk.f32.mxu1 %vm3976_vm0, %v3975_v2 }
  0x58   : > { %3590 = vmatmul.mubr.msk.f32.vlgmr.msra.gmra.mxu0 %vm193_vm1, %v3098_v43 }
  0x59   : > { %3619 = vmatmul.mubr.msk.f32.vlgmr.msra.gmra.mxu1 %vm193_vm1, %v3117_v44  ;;  %3646 = vmatpush3.msra.mxu0 %v3145_v45  ;;  %v1731_v44 = vld [vmem:[%s4025_s21 + $0x32] sm:$0xff] }
  0x5a   : > { %3675 = vmatpush3.msra.mxu1 %v3164_v46  ;;  %3592 = vmatprep.mubr.msk.f32.mxu0 %vm3976_vm0, %v3975_v2  ;;  %v3218_v45 = vld [vmem:[%s4025_s21 + $0x92] sm:$0xff] }
  0x5b   : > { %3621 = vmatprep.mubr.msk.f32.mxu1 %vm3976_vm0, %v3975_v2  ;;  %3703 = vmatprep.subr.mxu0 %v3975_v2 }
  0x5c   : > { %3732 = vmatprep.subr.mxu1 %v3975_v2  ;;  %3593 = vmatmul.mubr.msk.f32.gmra.mxu0 %vm193_vm1, %v3099_v47 }
  0x5d   : > { %3622 = vmatmul.mubr.msk.f32.gmra.mxu1 %vm193_vm1, %v3118_v48  ;;  %3595 = vmatprep.mubr.msk.f32.mxu0 %vm3976_vm0, %v3975_v2 }
  0x5e   : > { %3624 = vmatprep.mubr.msk.f32.mxu1 %vm3976_vm0, %v3975_v2 }
  0x60   : > { %3596 = vmatmul.mubr.msk.f32.gmra.mxu0 %vm193_vm1, %v3100_v49 }
  0x61   : > { %3625 = vmatmul.mubr.msk.f32.gmra.mxu1 %vm193_vm1, %v3119_v50  ;;  %3598 = vmatprep.mubr.msk.f32.mxu0 %vm3976_vm0, %v3975_v2 }
  0x62   : > { %3627 = vmatprep.mubr.msk.f32.mxu1 %vm3976_vm0, %v3975_v2 }
  0x64   : > { %3599 = vmatmul.mubr.msk.f32.gmra.mxu0 %vm193_vm1, %v3101_v51  ;;  %v1732_v51 = vld [vmem:[%s4025_s21 + $0x3a] sm:$0xff] }
  0x65   : > { %3628 = vmatmul.mubr.msk.f32.gmra.mxu1 %vm193_vm1, %v3120_v52  ;;  %3601 = vmatprep.mubr.msk.f32.mxu0 %vm3976_vm0, %v3975_v2  ;;  %v3219_v52 = vld [vmem:[%s4025_s21 + $0x9a] sm:$0xff] }
  0x66   : > { %3630 = vmatprep.mubr.msk.f32.mxu1 %vm3976_vm0, %v3975_v2 }
  0x68   : > { %3602 = vmatmul.mubr.msk.f32.gmra.mxu0 %vm193_vm1, %v3102_v53 }
  0x69   : > { %3631 = vmatmul.mubr.msk.f32.gmra.mxu1 %vm193_vm1, %v3121_v54  ;;  %3604 = vmatprep.mubr.msk.f32.mxu0 %vm3976_vm0, %v3975_v2 }
  0x6a   : > { %3633 = vmatprep.mubr.msk.f32.mxu1 %vm3976_vm0, %v3975_v2 }
  0x6c   : > { %3605 = vmatmul.mubr.msk.f32.gmra.mxu0 %vm193_vm1, %v3103_v55 }
  0x6d   : > { %3634 = vmatmul.mubr.msk.f32.gmra.mxu1 %vm193_vm1, %v3122_v56  ;;  %3607 = vmatprep.mubr.msk.f32.mxu0 %vm3976_vm0, %v3975_v2 }
  0x6e   : > { %3636 = vmatprep.mubr.msk.f32.mxu1 %vm3976_vm0, %v3975_v2 }
  0x70   : > { %3608 = vmatmul.mubr.msk.f32.gmra.mxu0 %vm193_vm1, %v3104_v57 }
  0x71   : > { %3637 = vmatmul.mubr.msk.f32.gmra.mxu1 %vm193_vm1, %v3123_v58  ;;  %3610 = vmatprep.mubr.msk.f32.mxu0 %vm3976_vm0, %v3975_v2  ;;  %v1733_v58 = vld [vmem:[%s4025_s21 + $0x42] sm:$0xff] }
  0x72   : > { %3639 = vmatprep.mubr.msk.f32.mxu1 %vm3976_vm0, %v3975_v2 }
  0x74   : > { %3611 = vmatmul.mubr.msk.f32.gmra.mxu0 %vm193_vm1, %v3105_v59  ;;  %v3220_v59 = vld [vmem:[%s4025_s21 + $0xa2] sm:$0xff] }
  0x75   : > { %3640 = vmatmul.mubr.msk.f32.gmra.mxu1 %vm193_vm1, %v3124_v60  ;;  %3613 = vmatprep.mubr.msk.f32.mxu0 %vm3976_vm0, %v3975_v2 }
  0x76   : > { %3642 = vmatprep.mubr.msk.f32.mxu1 %vm3976_vm0, %v3975_v2 }
  0x78   : > { %3614 = vmatmul.mubr.msk.f32.gmra.mxu0 %vm193_vm1, %v3106_v61 }
  0x79   : > { %3643 = vmatmul.mubr.msk.f32.gmra.mxu1 %vm193_vm1, %v3125_v62  ;;  %3647 = vmatprep.mubr.msk.f32.mxu0 %vm3976_vm0, %v3975_v2 }
  0x7a   : > { %3676 = vmatprep.mubr.msk.f32.mxu1 %vm3976_vm0, %v3975_v2 }
  0x7c   : > { %3648 = vmatmul.mubr.msk.f32.vlgmr.msra.gmra.mxu0 %vm193_vm1, %v3136_v63 }
  0x7d   : > { %3677 = vmatmul.mubr.msk.f32.vlgmr.msra.gmra.mxu1 %vm193_vm1, %v3155_v0  ;;  %3704 = vmatpush3.msra.mxu0 %v3174_v1  ;;  %v1734_v1 = vld [vmem:[%s4025_s21 + $0x4a] sm:$0xff] }
  0x7e   : > { %3733 = vmatpush3.msra.mxu1 %v3193_v3  ;;  %3650 = vmatprep.mubr.msk.f32.mxu0 %vm3976_vm0, %v3975_v2  ;;  %v3221_v3 = vld [vmem:[%s4025_s21 + $0xaa] sm:$0xff] }
  0x7f   : > { %3679 = vmatprep.mubr.msk.f32.mxu1 %vm3976_vm0, %v3975_v2  ;;  %3761 = vmatprep.subr.mxu0 %v3975_v2 }
  0x80   : > { %3790 = vmatprep.subr.mxu1 %v3975_v2  ;;  %3651 = vmatmul.mubr.msk.f32.gmra.mxu0 %vm193_vm1, %v4326_v4 }
  0x81   : > { %3680 = vmatmul.mubr.msk.f32.gmra.mxu1 %vm193_vm1, %v4329_v5  ;;  %3653 = vmatprep.mubr.msk.f32.mxu0 %vm3976_vm0, %v3975_v2 }
  0x82   : > { %3682 = vmatprep.mubr.msk.f32.mxu1 %vm3976_vm0, %v3975_v2 }
  0x84   : > { %3654 = vmatmul.mubr.msk.f32.gmra.mxu0 %vm193_vm1, %v4346_v6 }
  0x85   : > { %3683 = vmatmul.mubr.msk.f32.gmra.mxu1 %vm193_vm1, %v4349_v7  ;;  %3656 = vmatprep.mubr.msk.f32.mxu0 %vm3976_vm0, %v3975_v2 }
  0x86   : > { %3685 = vmatprep.mubr.msk.f32.mxu1 %vm3976_vm0, %v3975_v2 }
  0x88   : > { %3657 = vmatmul.mubr.msk.f32.gmra.mxu0 %vm193_vm1, %v4360_v8 }
  0x89   : > { %3686 = vmatmul.mubr.msk.f32.gmra.mxu1 %vm193_vm1, %v4363_v9  ;;  %3659 = vmatprep.mubr.msk.f32.mxu0 %vm3976_vm0, %v3975_v2 }
  0x8a   : > { %3688 = vmatprep.mubr.msk.f32.mxu1 %vm3976_vm0, %v3975_v2 }
  0x8c   : > { %3660 = vmatmul.mubr.msk.f32.gmra.mxu0 %vm193_vm1, %v4374_v10 }
  0x8d   : > { %3689 = vmatmul.mubr.msk.f32.gmra.mxu1 %vm193_vm1, %v4377_v11  ;;  %3662 = vmatprep.mubr.msk.f32.mxu0 %vm3976_vm0, %v3975_v2 }
  0x8e   : > { %3691 = vmatprep.mubr.msk.f32.mxu1 %vm3976_vm0, %v3975_v2 }
  0x90   : > { %3663 = vmatmul.mubr.msk.f32.gmra.mxu0 %vm193_vm1, %v4388_v12 }
  0x91   : > { %3692 = vmatmul.mubr.msk.f32.gmra.mxu1 %vm193_vm1, %v4391_v13  ;;  %3665 = vmatprep.mubr.msk.f32.mxu0 %vm3976_vm0, %v3975_v2 }
  0x92   : > { %3694 = vmatprep.mubr.msk.f32.mxu1 %vm3976_vm0, %v3975_v2 }
  0x94   : > { %3666 = vmatmul.mubr.msk.f32.gmra.mxu0 %vm193_vm1, %v4402_v14 }
  0x95   : > { %3695 = vmatmul.mubr.msk.f32.gmra.mxu1 %vm193_vm1, %v4405_v15  ;;  %3668 = vmatprep.mubr.msk.f32.mxu0 %vm3976_vm0, %v3975_v2 }
  0x96   : > { %3697 = vmatprep.mubr.msk.f32.mxu1 %vm3976_vm0, %v3975_v2 }
  0x98   : > { %3669 = vmatmul.mubr.msk.f32.gmra.mxu0 %vm193_vm1, %v4416_v16 }
  0x99   : > { %3698 = vmatmul.mubr.msk.f32.gmra.mxu1 %vm193_vm1, %v4419_v17  ;;  %3671 = vmatprep.mubr.msk.f32.mxu0 %vm3976_vm0, %v3975_v2 }
  0x9a   : > { %3700 = vmatprep.mubr.msk.f32.mxu1 %vm3976_vm0, %v3975_v2 }
  0x9c   : > { %3672 = vmatmul.mubr.msk.f32.gmra.mxu0 %vm193_vm1, %v4430_v18 }
  0x9d   : > { %3701 = vmatmul.mubr.msk.f32.gmra.mxu1 %vm193_vm1, %v4433_v19  ;;  %3705 = vmatprep.mubr.msk.f32.mxu0 %vm3976_vm0, %v3975_v2 }
  0x9e   : > { %3734 = vmatprep.mubr.msk.f32.mxu1 %vm3976_vm0, %v3975_v2 }
  0xa0   : > { %3706 = vmatmul.mubr.msk.f32.vlgmr.msra.gmra.mxu0 %vm193_vm1, %v4118_v27  ;;  %v3260_v27 = vld [vmem:[%s5224_s1 + $0x68] sm:$0xff] }
  0xa1   : > { %3735 = vmatmul.mubr.msk.f32.vlgmr.msra.gmra.mxu1 %vm193_vm1, %v4121_v28  ;;  %3762 = vmatpush3.msra.mxu0 %v3203_v20  ;;  %v1727_v28 = vld [vmem:[%s4025_s21 + $0x12] sm:$0xff] }
  0xa2   : > { %3791 = vmatpush3.msra.mxu1 %v3222_v21  ;;  %3708 = vmatprep.mubr.msk.f32.mxu0 %vm3976_vm0, %v3975_v2 }
  0xa3   : > { %3737 = vmatprep.mubr.msk.f32.mxu1 %vm3976_vm0, %v3975_v2  ;;  %3819 = vmatprep.subr.mxu0 %v3975_v2 }
  0xa4   : > { %3848 = vmatprep.subr.mxu1 %v3975_v2  ;;  %3709 = vmatmul.mubr.msk.f32.gmra.mxu0 %vm193_vm1, %v4138_v29  ;;  %v3214_v29 = vld [vmem:[%s4025_s21 + $0x72] sm:$0xff] }
  0xa5   : > { %3738 = vmatmul.mubr.msk.f32.gmra.mxu1 %vm193_vm1, %v4141_v30  ;;  %3711 = vmatprep.mubr.msk.f32.mxu0 %vm3976_vm0, %v3975_v2  ;;  %v1728_v30 = vld [vmem:[%s4025_s21 + $0x1a] sm:$0xff] }
  0xa6   : > { %3740 = vmatprep.mubr.msk.f32.mxu1 %vm3976_vm0, %v3975_v2 }
  0xa8   : > { %3712 = vmatmul.mubr.msk.f32.gmra.mxu0 %vm193_vm1, %v4152_v31  ;;  %v3215_v31 = vld [vmem:[%s4025_s21 + $0x7a] sm:$0xff] }
  0xa9   : > { %3741 = vmatmul.mubr.msk.f32.gmra.mxu1 %vm193_vm1, %v4155_v32  ;;  %3714 = vmatprep.mubr.msk.f32.mxu0 %vm3976_vm0, %v3975_v2  ;;  %v1729_v32 = vld [vmem:[%s4025_s21 + $0x22] sm:$0xff] }
  0xaa   : > { %3743 = vmatprep.mubr.msk.f32.mxu1 %vm3976_vm0, %v3975_v2 }
  0xac   : > { %3715 = vmatmul.mubr.msk.f32.gmra.mxu0 %vm193_vm1, %v4166_v33  ;;  %v3216_v33 = vld [vmem:[%s4025_s21 + $0x82] sm:$0xff] }
  0xad   : > { %3744 = vmatmul.mubr.msk.f32.gmra.mxu1 %vm193_vm1, %v4169_v34  ;;  %3717 = vmatprep.mubr.msk.f32.mxu0 %vm3976_vm0, %v3975_v2 }
  0xae   : > { %3746 = vmatprep.mubr.msk.f32.mxu1 %vm3976_vm0, %v3975_v2 }
  0xb0   : > { %3718 = vmatmul.mubr.msk.f32.gmra.mxu0 %vm193_vm1, %v4180_v35 }
  0xb1   : > { %3747 = vmatmul.mubr.msk.f32.gmra.mxu1 %vm193_vm1, %v4183_v36  ;;  %3720 = vmatprep.mubr.msk.f32.mxu0 %vm3976_vm0, %v3975_v2 }
  0xb2   : > { %3749 = vmatprep.mubr.msk.f32.mxu1 %vm3976_vm0, %v3975_v2 }
  0xb4   : > { %3721 = vmatmul.mubr.msk.f32.gmra.mxu0 %vm193_vm1, %v4194_v37  ;;  %v1730_v37 = vld [vmem:[%s4025_s21 + $0x2a] sm:$0xff] }
  0xb5   : > { %3750 = vmatmul.mubr.msk.f32.gmra.mxu1 %vm193_vm1, %v4197_v38  ;;  %3723 = vmatprep.mubr.msk.f32.mxu0 %vm3976_vm0, %v3975_v2  ;;  %v3217_v38 = vld [vmem:[%s4025_s21 + $0x8a] sm:$0xff] }
  0xb6   : > { %3752 = vmatprep.mubr.msk.f32.mxu1 %vm3976_vm0, %v3975_v2 }
  0xb8   : > { %3724 = vmatmul.mubr.msk.f32.gmra.mxu0 %vm193_vm1, %v4208_v39 }
  0xb9   : > { %3753 = vmatmul.mubr.msk.f32.gmra.mxu1 %vm193_vm1, %v4211_v40  ;;  %3726 = vmatprep.mubr.msk.f32.mxu0 %vm3976_vm0, %v3975_v2 }
  0xba   : > { %3755 = vmatprep.mubr.msk.f32.mxu1 %vm3976_vm0, %v3975_v2 }
  0xbc   : > { %3727 = vmatmul.mubr.msk.f32.gmra.mxu0 %vm193_vm1, %v4222_v41 }
  0xbd   : > { %3756 = vmatmul.mubr.msk.f32.gmra.mxu1 %vm193_vm1, %v4225_v42  ;;  %3729 = vmatprep.mubr.msk.f32.mxu0 %vm3976_vm0, %v3975_v2 }
  0xbe   : > { %3758 = vmatprep.mubr.msk.f32.mxu1 %vm3976_vm0, %v3975_v2 }
  0xc0   : > { %3730 = vmatmul.mubr.msk.f32.gmra.mxu0 %vm193_vm1, %v1420_v22 }
  0xc1   : > { %3759 = vmatmul.mubr.msk.f32.gmra.mxu1 %vm193_vm1, %v3192_v23  ;;  %3763 = vmatprep.mubr.msk.f32.mxu0 %vm3976_vm0, %v3975_v2 }
  0xc2   : > { %3792 = vmatprep.mubr.msk.f32.mxu1 %vm3976_vm0, %v3975_v2 }
  0xc4   : > { %3764 = vmatmul.mubr.msk.f32.vlgmr.msra.gmra.mxu0 %vm193_vm1, %v1726_v24 }
  0xc5   : > { %3793 = vmatmul.mubr.msk.f32.vlgmr.msra.gmra.mxu1 %vm193_vm1, %v3213_v25  ;;  %3820 = vmatpush3.msra.mxu0 %v3241_v26 }
  0xc6   : > { %3849 = vmatpush3.msra.mxu1 %v3260_v27  ;;  %3766 = vmatprep.mubr.msk.f32.mxu0 %vm3976_vm0, %v3975_v2  ;;  %v3279_v27 = vld [vmem:[%s5224_s1 + $0x70] sm:$0xff] }
  0xc7   : > { %3795 = vmatprep.mubr.msk.f32.mxu1 %vm3976_vm0, %v3975_v2  ;;  %3877 = vmatprep.subr.mxu0 %v3975_v2 }
  0xc8   : > { %3906 = vmatprep.subr.mxu1 %v3975_v2  ;;  %3767 = vmatmul.mubr.msk.f32.gmra.mxu0 %vm193_vm1, %v1727_v28  ;;  %v3298_v28 = vld [vmem:[%s5224_s1 + $0x78] sm:$0xff] }
  0xc9   : > { %3796 = vmatmul.mubr.msk.f32.gmra.mxu1 %vm193_vm1, %v3214_v29  ;;  %3769 = vmatprep.mubr.msk.f32.mxu0 %vm3976_vm0, %v3975_v2 }
  0xca   : > { %3798 = vmatprep.mubr.msk.f32.mxu1 %vm3976_vm0, %v3975_v2 }
  0xcc   : > { %3770 = vmatmul.mubr.msk.f32.gmra.mxu0 %vm193_vm1, %v1728_v30 }
  0xcd   : > { %3799 = vmatmul.mubr.msk.f32.gmra.mxu1 %vm193_vm1, %v3215_v31  ;;  %3772 = vmatprep.mubr.msk.f32.mxu0 %vm3976_vm0, %v3975_v2 }
  0xce   : > { %3801 = vmatprep.mubr.msk.f32.mxu1 %vm3976_vm0, %v3975_v2 }
  0xd0   : > { %v287_v34 = vpop.f32.mrf.mxu0  ;;  %3773 = vmatmul.mubr.msk.f32.gmra.mxu0 %vm193_vm1, %v1729_v32 }
  0xd1   : > { %v424_v35 = vpop.f32.mrf.mxu1  ;;  %3802 = vmatmul.mubr.msk.f32.gmra.mxu1 %vm193_vm1, %v3216_v33  ;;  %3775 = vmatprep.mubr.msk.f32.mxu0 %vm3976_vm0, %v3975_v2 }
  0xd2   : > { %v4559_v36 = vadd.f32 %v424_v35, %v287_v34  ;;  %3804 = vmatprep.mubr.msk.f32.mxu1 %vm3976_vm0, %v3975_v2  ;;  %v3475_v39 = vpop.f32.mrf.mxu0 }
  0xd3   : > { %v3504_v40 = vpop.f32.mrf.mxu1 }
  0xd4   : > { %v292_v41 = vpop.f32.mrf.mxu0  ;;  %3776 = vmatmul.mubr.msk.f32.gmra.mxu0 %vm193_vm1, %v1730_v37 }
  0xd5   : > { %v429_v42 = vpop.f32.mrf.mxu1  ;;  %3805 = vmatmul.mubr.msk.f32.gmra.mxu1 %vm193_vm1, %v3217_v38  ;;  %3778 = vmatprep.mubr.msk.f32.mxu0 %vm3976_vm0, %v3975_v2 }
  0xd6   : > { %v4569_v43 = vadd.f32 %v429_v42, %v292_v41  ;;  %3807 = vmatprep.mubr.msk.f32.mxu1 %vm3976_vm0, %v3975_v2  ;;  %v3478_v46 = vpop.f32.mrf.mxu0 }
  0xd7   : > { %v3507_v47 = vpop.f32.mrf.mxu1 }
  0xd8   : > { %v297_v48 = vpop.f32.mrf.mxu0  ;;  %3779 = vmatmul.mubr.msk.f32.gmra.mxu0 %vm193_vm1, %v1731_v44 }
  0xd9   : > { %v434_v49 = vpop.f32.mrf.mxu1  ;;  %3808 = vmatmul.mubr.msk.f32.gmra.mxu1 %vm193_vm1, %v3218_v45  ;;  %3781 = vmatprep.mubr.msk.f32.mxu0 %vm3976_vm0, %v3975_v2 }
  0xda   : > { %v4579_v50 = vadd.f32 %v434_v49, %v297_v48  ;;  %3810 = vmatprep.mubr.msk.f32.mxu1 %vm3976_vm0, %v3975_v2  ;;  %v3481_v53 = vpop.f32.mrf.mxu0 }
  0xdb   : > { %v3510_v54 = vpop.f32.mrf.mxu1 }
  0xdc   : > { %v302_v55 = vpop.f32.mrf.mxu0  ;;  %3782 = vmatmul.mubr.msk.f32.gmra.mxu0 %vm193_vm1, %v1732_v51 }
  0xdd   : > { %v439_v56 = vpop.f32.mrf.mxu1  ;;  %3811 = vmatmul.mubr.msk.f32.gmra.mxu1 %vm193_vm1, %v3219_v52  ;;  %3784 = vmatprep.mubr.msk.f32.mxu0 %vm3976_vm0, %v3975_v2 }
  0xde   : > { %v4589_v57 = vadd.f32 %v439_v56, %v302_v55  ;;  %3813 = vmatprep.mubr.msk.f32.mxu1 %vm3976_vm0, %v3975_v2  ;;  %v3484_v60 = vpop.f32.mrf.mxu0 }
  0xdf   : > { %v3513_v61 = vpop.f32.mrf.mxu1 }
  0xe0   : > { %v307_v62 = vpop.f32.mrf.mxu0  ;;  %3785 = vmatmul.mubr.msk.f32.gmra.mxu0 %vm193_vm1, %v1733_v58 }
  0xe1   : > { %v444_v63 = vpop.f32.mrf.mxu1  ;;  %3814 = vmatmul.mubr.msk.f32.gmra.mxu1 %vm193_vm1, %v3220_v59  ;;  %3787 = vmatprep.mubr.msk.f32.mxu0 %vm3976_vm0, %v3975_v2 }
  0xe2   : > { %v4599_v0 = vadd.f32 %v444_v63, %v307_v62  ;;  %3816 = vmatprep.mubr.msk.f32.mxu1 %vm3976_vm0, %v3975_v2  ;;  %v3487_v20 = vpop.f32.mrf.mxu0  ;;  %v3270_v63 = vld [vmem:[%s4025_s21 + $0xca] sm:$0xff] }
  0xe3   : > { %v3516_v21 = vpop.f32.mrf.mxu1 }
  0xe4   : > { %v312_v22 = vpop.f32.mrf.mxu0  ;;  %3788 = vmatmul.mubr.msk.f32.gmra.mxu0 %vm193_vm1, %v1734_v1 }
  0xe5   : > { %v449_v23 = vpop.f32.mrf.mxu1  ;;  %3817 = vmatmul.mubr.msk.f32.gmra.mxu1 %vm193_vm1, %v3221_v3  ;;  %3821 = vmatprep.mubr.msk.f32.mxu0 %vm3976_vm0, %v3975_v2 }
  0xe6   : > { %v4609_v24 = vadd.f32 %v449_v23, %v312_v22  ;;  %3850 = vmatprep.mubr.msk.f32.mxu1 %vm3976_vm0, %v3975_v2  ;;  %v3490_v25 = vpop.f32.mrf.mxu0 }
  0xe7   : > { %v3519_v26 = vpop.f32.mrf.mxu1  ;;  %v3290_v25 = vld [vmem:[%s4025_s21 + $0x132] sm:$0xff] }
  0xe8   : > { %v317_v29 = vpop.f32.mrf.mxu0  ;;  %3822 = vmatmul.mubr.msk.f32.vlgmr.msra.gmra.mxu0 %vm193_vm1, %v4326_v4 }
  0xe9   : > { %v454_v30 = vpop.f32.mrf.mxu1  ;;  %3851 = vmatmul.mubr.msk.f32.vlgmr.msra.gmra.mxu1 %vm193_vm1, %v4329_v5  ;;  %3878 = vmatpush3.msra.mxu0 %v3279_v27 }
  0xea   : > { %v4625_v31 = vadd.f32 %v454_v30, %v317_v29  ;;  %3907 = vmatpush3.msra.mxu1 %v3298_v28  ;;  %v3493_v32 = vpop.f32.mrf.mxu0  ;;  %3824 = vmatprep.mubr.msk.f32.mxu0 %vm3976_vm0, %v3975_v2 }
  0xeb   : > { %v3522_v33 = vpop.f32.mrf.mxu1  ;;  %3853 = vmatprep.mubr.msk.f32.mxu1 %vm3976_vm0, %v3975_v2  ;;  %v3272_v32 = vld [vmem:[%s4025_s21 + $0xda] sm:$0xff] }
  0xec   : > { %v322_v34 = vpop.f32.mrf.mxu0  ;;  %3825 = vmatmul.mubr.msk.f32.gmra.mxu0 %vm193_vm1, %v4346_v6  ;;  %v3291_v33 = vld [vmem:[%s4025_s21 + $0x13a] sm:$0xff] }
  0xed   : > { %v459_v35 = vpop.f32.mrf.mxu1  ;;  %3854 = vmatmul.mubr.msk.f32.gmra.mxu1 %vm193_vm1, %v4349_v7  ;;  %3827 = vmatprep.mubr.msk.f32.mxu0 %vm3976_vm0, %v3975_v2 }
  0xee   : > { %v4635_v4 = vadd.f32 %v459_v35, %v322_v34  ;;  %3856 = vmatprep.mubr.msk.f32.mxu1 %vm3976_vm0, %v3975_v2  ;;  %v3496_v5 = vpop.f32.mrf.mxu0 }
  0xef   : > { %v3525_v37 = vpop.f32.mrf.mxu1 }
  0xf0   : > { %v327_v38 = vpop.f32.mrf.mxu0  ;;  %3828 = vmatmul.mubr.msk.f32.gmra.mxu0 %vm193_vm1, %v4360_v8 }
  0xf1   : > { %v464_v39 = vpop.f32.mrf.mxu1  ;;  %3857 = vmatmul.mubr.msk.f32.gmra.mxu1 %vm193_vm1, %v4363_v9  ;;  %3830 = vmatprep.mubr.msk.f32.mxu0 %vm3976_vm0, %v3975_v2 }
  0xf2   : > { %v4645_v6 = vadd.f32 %v464_v39, %v327_v38  ;;  %3859 = vmatprep.mubr.msk.f32.mxu1 %vm3976_vm0, %v3975_v2  ;;  %v3499_v7 = vpop.f32.mrf.mxu0  ;;  %v3273_v39 = vld [vmem:[%s4025_s21 + $0xe2] sm:$0xff] }
  0xf3   : > { %v3528_v40 = vpop.f32.mrf.mxu1  ;;  %v3292_v7 = vld [vmem:[%s4025_s21 + $0x142] sm:$0xff] }
  0xf4   : > { %v572_v41 = vpop.f32.mrf.mxu0  ;;  %3831 = vmatmul.mubr.msk.f32.gmra.mxu0 %vm193_vm1, %v4374_v10 }
  0xf5   : > { %v729_v42 = vpop.f32.mrf.mxu1  ;;  %3860 = vmatmul.mubr.msk.f32.gmra.mxu1 %vm193_vm1, %v4377_v11  ;;  %v616_v8 = vadd.f32 %v572_v41, %v4559_v36  ;;  %3833 = vmatprep.mubr.msk.f32.mxu0 %vm3976_vm0, %v3975_v2 }
  0xf6   : > { %3862 = vmatprep.mubr.msk.f32.mxu1 %vm3976_vm0, %v3975_v2  ;;  %v3533_v9 = vpop.f32.mrf.mxu0 }
  0xf7   : > { %v3562_v44 = vpop.f32.mrf.mxu1  ;;  %v4660_v45 = vadd.f32 %v729_v42, %v616_v8 }
  0xf8   : > { %v577_v46 = vpop.f32.mrf.mxu0  ;;  %3834 = vmatmul.mubr.msk.f32.gmra.mxu0 %vm193_vm1, %v4388_v12  ;;  %v3274_v44 = vld [vmem:[%s4025_s21 + $0xea] sm:$0xff] }
  0xf9   : > { %v734_v47 = vpop.f32.mrf.mxu1  ;;  %3863 = vmatmul.mubr.msk.f32.gmra.mxu1 %vm193_vm1, %v4391_v13  ;;  %v617_v10 = vadd.f32 %v577_v46, %v4569_v43  ;;  %3836 = vmatprep.mubr.msk.f32.mxu0 %vm3976_vm0, %v3975_v2  ;;  %v3293_v46 = vld [vmem:[%s4025_s21 + $0x14a] sm:$0xff] }
  0xfa   : > { %3865 = vmatprep.mubr.msk.f32.mxu1 %vm3976_vm0, %v3975_v2  ;;  %v3536_v11 = vpop.f32.mrf.mxu0 }
  0xfb   : > { %v3565_v36 = vpop.f32.mrf.mxu1  ;;  %v4671_v48 = vadd.f32 %v734_v47, %v617_v10 }
  0xfc   : > { %v582_v49 = vpop.f32.mrf.mxu0  ;;  %3837 = vmatmul.mubr.msk.f32.gmra.mxu0 %vm193_vm1, %v4402_v14 }
  0xfd   : > { %v739_v51 = vpop.f32.mrf.mxu1  ;;  %3866 = vmatmul.mubr.msk.f32.gmra.mxu1 %vm193_vm1, %v4405_v15  ;;  %v618_v12 = vadd.f32 %v582_v49, %v4579_v50  ;;  %3839 = vmatprep.mubr.msk.f32.mxu0 %vm3976_vm0, %v3975_v2 }
  0xfe   : > { %3868 = vmatprep.mubr.msk.f32.mxu1 %vm3976_vm0, %v3975_v2  ;;  %v3539_v13 = vpop.f32.mrf.mxu0 }
  0xff   : > { %v3568_v43 = vpop.f32.mrf.mxu1  ;;  %v4682_v52 = vadd.f32 %v739_v51, %v618_v12  ;;  %v3275_v51 = vld [vmem:[%s4025_s21 + $0xf2] sm:$0xff] }
 0x100   : > { %v587_v53 = vpop.f32.mrf.mxu0  ;;  %3840 = vmatmul.mubr.msk.f32.gmra.mxu0 %vm193_vm1, %v4416_v16  ;;  %v3294_v12 = vld [vmem:[%s4025_s21 + $0x152] sm:$0xff] }
 0x101   : > { %v744_v54 = vpop.f32.mrf.mxu1  ;;  %3869 = vmatmul.mubr.msk.f32.gmra.mxu1 %vm193_vm1, %v4419_v17  ;;  %v619_v14 = vadd.f32 %v587_v53, %v4589_v57  ;;  %3842 = vmatprep.mubr.msk.f32.mxu0 %vm3976_vm0, %v3975_v2  ;;  %v3240_v17 = vld [vmem:[%s4025_s21 + $0x109] sm:$0xff] }
 0x102   : > { %3871 = vmatprep.mubr.msk.f32.mxu1 %vm3976_vm0, %v3975_v2  ;;  %v3542_v15 = vpop.f32.mrf.mxu0  ;;  %v3259_v57 = vld [vmem:[%s4025_s21 + $0x169] sm:$0xff] }
 0x103   : > { %v3571_v50 = vpop.f32.mrf.mxu1  ;;  %v4693_v55 = vadd.f32 %v744_v54, %v619_v14  ;;  %v3276_v15 = vld [vmem:[%s4025_s21 + $0xfa] sm:$0xff] }
 0x104   : > { %v592_v56 = vpop.f32.mrf.mxu0  ;;  %3843 = vmatmul.mubr.msk.f32.gmra.mxu0 %vm193_vm1, %v4430_v18  ;;  %v3295_v50 = vld [vmem:[%s4025_s21 + $0x15a] sm:$0xff] }
 0x105   : > { %v749_v58 = vpop.f32.mrf.mxu1  ;;  %3872 = vmatmul.mubr.msk.f32.gmra.mxu1 %vm193_vm1, %v4433_v19  ;;  %v620_v16 = vadd.f32 %v592_v56, %v4599_v0  ;;  %3845 = vmatprep.mubr.msk.f32.mxu0 %vm3976_vm0, %v3975_v2  ;;  %v3289_v0 = vld [vmem:[%s4025_s21 + $0x12a] sm:$0xff] }
 0x106   : > { %3874 = vmatprep.mubr.msk.f32.mxu1 %vm3976_vm0, %v3975_v2  ;;  %v3545_v59 = vpop.f32.mrf.mxu0 }
 0x107   : > { %v3574_v60 = vpop.f32.mrf.mxu1  ;;  %v4706_v61 = vadd.f32 %v749_v58, %v620_v16  ;;  %v3277_v59 = vld [vmem:[%s4025_s21 + $0x102] sm:$0xff] }
 0x108   : > { %v597_v18 = vpop.f32.mrf.mxu0  ;;  %3846 = vmatmul.mubr.msk.f32.gmra.mxu0 %vm193_vm1, %v3240_v17  ;;  %v3296_v60 = vld [vmem:[%s4025_s21 + $0x162] sm:$0xff] }
 0x109   : > { %v754_v62 = vpop.f32.mrf.mxu1  ;;  %3875 = vmatmul.mubr.msk.f32.gmra.mxu1 %vm193_vm1, %v3259_v57  ;;  %v621_v19 = vadd.f32 %v597_v18, %v4609_v24  ;;  %3879 = vmatprep.mubr.msk.f32.mxu0 %vm3976_vm0, %v3975_v2  ;;  %v3271_v24 = vld [vmem:[%s4025_s21 + $0xd2] sm:$0xff] }
 0x10a   : > { %3908 = vmatprep.mubr.msk.f32.mxu1 %vm3976_vm0, %v3975_v2  ;;  %v3548_v1 = vpop.f32.mrf.mxu0 }
 0x10b   : > { %v3577_v3 = vpop.f32.mrf.mxu1  ;;  %v4717_v20 = vadd.f32 %v754_v62, %v621_v19  ;;  %v3278_v1 = vld [vmem:[%s4025_s21 + $0x10a] sm:$0xff] }
 0x10c   : > { %v602_v21 = vpop.f32.mrf.mxu0  ;;  %3880 = vmatmul.mubr.msk.f32.vlgmr.msra.gmra.mxu0 %vm193_vm1, %v3270_v63  ;;  %v3297_v3 = vld [vmem:[%s4025_s21 + $0x16a] sm:$0xff] }
 0x10d   : > { %v759_v22 = vpop.f32.mrf.mxu1  ;;  %3909 = vmatmul.mubr.msk.f32.vlgmr.msra.gmra.mxu1 %vm193_vm1, %v3289_v0  ;;  %v622_v23 = vadd.f32 %v602_v21, %v4625_v31  ;;  %3882 = vmatprep.mubr.msk.f32.mxu0 %vm3976_vm0, %v3975_v2 }
 0x10e   : > { %3911 = vmatprep.mubr.msk.f32.mxu1 %vm3976_vm0, %v3975_v2  ;;  %v3551_v26 = vpop.f32.mrf.mxu0 }
 0x10f   : > { %v3580_v27 = vpop.f32.mrf.mxu1  ;;  %v4728_v28 = vadd.f32 %v759_v22, %v622_v23 }
 0x110   : > { %v607_v29 = vpop.f32.mrf.mxu0  ;;  %3883 = vmatmul.mubr.msk.f32.gmra.mxu0 %vm193_vm1, %v3271_v24 }
 0x111   : > { %v764_v30 = vpop.f32.mrf.mxu1  ;;  %3912 = vmatmul.mubr.msk.f32.gmra.mxu1 %vm193_vm1, %v3290_v25  ;;  %v623_v31 = vadd.f32 %v607_v29, %v4635_v4  ;;  %3885 = vmatprep.mubr.msk.f32.mxu0 %vm3976_vm0, %v3975_v2 }
 0x112   : > { %3914 = vmatprep.mubr.msk.f32.mxu1 %vm3976_vm0, %v3975_v2  ;;  %v3554_v34 = vpop.f32.mrf.mxu0 }
 0x113   : > { %v3583_v35 = vpop.f32.mrf.mxu1  ;;  %v4739_v5 = vadd.f32 %v764_v30, %v623_v31 }
 0x114   : > { %v612_v37 = vpop.f32.mrf.mxu0  ;;  %3886 = vmatmul.mubr.msk.f32.gmra.mxu0 %vm193_vm1, %v3272_v32 }
 0x115   : > { %v769_v38 = vpop.f32.mrf.mxu1  ;;  %3915 = vmatmul.mubr.msk.f32.gmra.mxu1 %vm193_vm1, %v3291_v33  ;;  %v624_v4 = vadd.f32 %v612_v37, %v4645_v6  ;;  %3888 = vmatprep.mubr.msk.f32.mxu0 %vm3976_vm0, %v3975_v2 }
 0x116   : > { %3917 = vmatprep.mubr.msk.f32.mxu1 %vm3976_vm0, %v3975_v2  ;;  %v3557_v40 = vpop.f32.mrf.mxu0 }
 0x117   : > { %v3586_v41 = vpop.f32.mrf.mxu1  ;;  %v4750_v42 = vadd.f32 %v769_v38, %v624_v4 }
 0x118   : > { %v887_v8 = vpop.f32.mrf.mxu0  ;;  %3889 = vmatmul.mubr.msk.f32.gmra.mxu0 %vm193_vm1, %v3273_v39 }
 0x119   : > { %v1045_v9 = vpop.f32.mrf.mxu1  ;;  %3918 = vmatmul.mubr.msk.f32.gmra.mxu1 %vm193_vm1, %v3292_v7  ;;  %v931_v6 = vadd.f32 %v887_v8, %v4660_v45  ;;  %3891 = vmatprep.mubr.msk.f32.mxu0 %vm3976_vm0, %v3975_v2 }
 0x11a   : > { %3920 = vmatprep.mubr.msk.f32.mxu1 %vm3976_vm0, %v3975_v2  ;;  %v3591_v47 = vpop.f32.mrf.mxu0 }
 0x11b   : > { %v3620_v10 = vpop.f32.mrf.mxu1  ;;  %v4761_v11 = vadd.f32 %v1045_v9, %v931_v6 }
 0x11c   : > { %v892_v36 = vpop.f32.mrf.mxu0  ;;  %3892 = vmatmul.mubr.msk.f32.gmra.mxu0 %vm193_vm1, %v3274_v44 }
 0x11d   : > { %v1050_v49 = vpop.f32.mrf.mxu1  ;;  %3921 = vmatmul.mubr.msk.f32.gmra.mxu1 %vm193_vm1, %v3293_v46  ;;  %v932_v45 = vadd.f32 %v892_v36, %v4671_v48  ;;  %3894 = vmatprep.mubr.msk.f32.mxu0 %vm3976_vm0, %v3975_v2 }
 0x11e   : > { %3923 = vmatprep.mubr.msk.f32.mxu1 %vm3976_vm0, %v3975_v2  ;;  %v3594_v13 = vpop.f32.mrf.mxu0 }
 0x11f   : > { %v3623_v43 = vpop.f32.mrf.mxu1  ;;  %v4772_v53 = vadd.f32 %v1050_v49, %v932_v45 }
 0x120   : > { %v897_v54 = vpop.f32.mrf.mxu0  ;;  %3895 = vmatmul.mubr.msk.f32.gmra.mxu0 %vm193_vm1, %v3275_v51 }
 0x121   : > { %v1055_v14 = vpop.f32.mrf.mxu1  ;;  %3924 = vmatmul.mubr.msk.f32.gmra.mxu1 %vm193_vm1, %v3294_v12  ;;  %v933_v48 = vadd.f32 %v897_v54, %v4682_v52  ;;  %3897 = vmatprep.mubr.msk.f32.mxu0 %vm3976_vm0, %v3975_v2 }
 0x122   : > { %3926 = vmatprep.mubr.msk.f32.mxu1 %vm3976_vm0, %v3975_v2  ;;  %v3597_v56 = vpop.f32.mrf.mxu0 }
 0x123   : > { %v3626_v58 = vpop.f32.mrf.mxu1  ;;  %v4783_v16 = vadd.f32 %v1055_v14, %v933_v48 }
 0x124   : > { %v902_v17 = vpop.f32.mrf.mxu0  ;;  %3898 = vmatmul.mubr.msk.f32.gmra.mxu0 %vm193_vm1, %v3276_v15 }
 0x125   : > { %v1060_v57 = vpop.f32.mrf.mxu1  ;;  %3927 = vmatmul.mubr.msk.f32.gmra.mxu1 %vm193_vm1, %v3295_v50  ;;  %v934_v52 = vadd.f32 %v902_v17, %v4693_v55  ;;  %3900 = vmatprep.mubr.msk.f32.mxu0 %vm3976_vm0, %v3975_v2 }
 0x126   : > { %3929 = vmatprep.mubr.msk.f32.mxu1 %vm3976_vm0, %v3975_v2  ;;  %v3600_v18 = vpop.f32.mrf.mxu0 }
 0x127   : > { %v3629_v62 = vpop.f32.mrf.mxu1  ;;  %v1092_v19 = vadd.f32 %v1060_v57, %v934_v52 }
 0x128   : > { %v907_v63 = vpop.f32.mrf.mxu0  ;;  %3901 = vmatmul.mubr.msk.f32.gmra.mxu0 %vm193_vm1, %v3277_v59 }
 0x129   : > { %v1065_v0 = vpop.f32.mrf.mxu1  ;;  %3930 = vmatmul.mubr.msk.f32.gmra.mxu1 %vm193_vm1, %v3296_v60  ;;  %v935_v55 = vadd.f32 %v907_v63, %v4706_v61  ;;  %3903 = vmatprep.mubr.msk.f32.mxu0 %vm3976_vm0, %v3975_v2 }
 0x12a   : > { %3932 = vmatprep.mubr.msk.f32.mxu1 %vm3976_vm0, %v3975_v2  ;;  %v3603_v21 = vpop.f32.mrf.mxu0 }
 0x12b   : > { %v3632_v22 = vpop.f32.mrf.mxu1  ;;  %v1093_v23 = vadd.f32 %v1065_v0, %v935_v55 }
 0x12c   : > { %v912_v24 = vpop.f32.mrf.mxu0  ;;  %3904 = vmatmul.mubr.msk.f32.gmra.mxu0 %vm193_vm1, %v3278_v1 }
 0x12d   : > { %v1070_v25 = vpop.f32.mrf.mxu1  ;;  %3933 = vmatmul.mubr.msk.f32.gmra.mxu1 %vm193_vm1, %v3297_v3  ;;  %v936_v26 = vadd.f32 %v912_v24, %v4717_v20 }
 0x12e   : > { %v3606_v61 = vpop.f32.mrf.mxu0 }
 0x12f   : > { %v3635_v27 = vpop.f32.mrf.mxu1  ;;  %v1094_v29 = vadd.f32 %v1070_v25, %v936_v26 }
 0x130   : > { %v917_v30 = vpop.f32.mrf.mxu0 }
 0x131   : > { %v1075_v31 = vpop.f32.mrf.mxu1  ;;  %v937_v2 = vadd.f32 %v917_v30, %v4728_v28 }
 0x132   : > { %v3609_v32 = vpop.f32.mrf.mxu0 }
 0x133   : > { %v3638_v33 = vpop.f32.mrf.mxu1  ;;  %v1095_v34 = vadd.f32 %v1075_v31, %v937_v2 }
 0x134   : > { %v922_v35 = vpop.f32.mrf.mxu0 }
 0x135   : > { %v1080_v37 = vpop.f32.mrf.mxu1  ;;  %v938_v38 = vadd.f32 %v922_v35, %v4739_v5 }
 0x136   : > { %v3612_v4 = vpop.f32.mrf.mxu0 }
 0x137   : > { %v3641_v39 = vpop.f32.mrf.mxu1  ;;  %v1096_v7 = vadd.f32 %v1080_v37, %v938_v38 }
 0x138   : > { %v927_v40 = vpop.f32.mrf.mxu0 }
 0x139   : > { %v1085_v41 = vpop.f32.mrf.mxu1  ;;  %v939_v20 = vadd.f32 %v927_v40, %v4750_v42 }
 0x13a   : > { %v3615_v8 = vpop.f32.mrf.mxu0 }
 0x13b   : > { %v3644_v9 = vpop.f32.mrf.mxu1  ;;  %v1097_v6 = vadd.f32 %v1085_v41, %v939_v20 }
 0x13c   : > { %v1202_v44 = vpop.f32.mrf.mxu0 }
 0x13d   : > { %v1359_v46 = vpop.f32.mrf.mxu1  ;;  %v1246_v28 = vadd.f32 %v1202_v44, %v4761_v11 }
 0x13e   : > { %v3649_v47 = vpop.f32.mrf.mxu0 }
 0x13f   : > { %v3678_v10 = vpop.f32.mrf.mxu1  ;;  %v1403_v36 = vadd.f32 %v1359_v46, %v1246_v28 }
 0x140   : > { %v1207_v49 = vpop.f32.mrf.mxu0 }
 0x141   : > { %v1364_v45 = vpop.f32.mrf.mxu1  ;;  %v1247_v5 = vadd.f32 %v1207_v49, %v4772_v53 }
 0x142   : > { %v3652_v51 = vpop.f32.mrf.mxu0 }
 0x143   : > { %v3681_v12 = vpop.f32.mrf.mxu1  ;;  %v1404_v13 = vadd.f32 %v1364_v45, %v1247_v5 }
 0x144   : > { %v1212_v43 = vpop.f32.mrf.mxu0 }
 0x145   : > { %v1369_v54 = vpop.f32.mrf.mxu1  ;;  %v1248_v42 = vadd.f32 %v1212_v43, %v4783_v16 }
 0x146   : > { %v3655_v14 = vpop.f32.mrf.mxu0 }
 0x147   : > { %v3684_v48 = vpop.f32.mrf.mxu1  ;;  %v1405_v15 = vadd.f32 %v1369_v54, %v1248_v42 }
 0x148   : > { %v1217_v50 = vpop.f32.mrf.mxu0 }
 0x149   : > { %v1374_v56 = vpop.f32.mrf.mxu1  ;;  %v1249_v11 = vadd.f32 %v1217_v50, %v1092_v19 }
 0x14a   : > { %v3658_v58 = vpop.f32.mrf.mxu0 }
 0x14b   : > { %v3687_v17 = vpop.f32.mrf.mxu1  ;;  %v1406_v57 = vadd.f32 %v1374_v56, %v1249_v11 }
 0x14c   : > { %v1222_v52 = vpop.f32.mrf.mxu0 }
 0x14d   : > { %v1379_v59 = vpop.f32.mrf.mxu1  ;;  %v1250_v60 = vadd.f32 %v1222_v52, %v1093_v23 }
 0x14e   : > { %v3661_v53 = vpop.f32.mrf.mxu0 }
 0x14f   : > { %v3690_v18 = vpop.f32.mrf.mxu1  ;;  %v1407_v62 = vadd.f32 %v1379_v59, %v1250_v60 }
 0x150   : > { %v1227_v63 = vpop.f32.mrf.mxu0 }
 0x151   : > { %v1384_v0 = vpop.f32.mrf.mxu1  ;;  %v1251_v55 = vadd.f32 %v1227_v63, %v1094_v29 }
 0x152   : > { %v3664_v1 = vpop.f32.mrf.mxu0 }
 0x153   : > { %v3693_v16 = vpop.f32.mrf.mxu1  ;;  %v1408_v3 = vadd.f32 %v1384_v0, %v1251_v55 }
 0x154   : > { %v1232_v21 = vpop.f32.mrf.mxu0 }
 0x155   : > { %v1389_v22 = vpop.f32.mrf.mxu1  ;;  %v1252_v24 = vadd.f32 %v1232_v21, %v1095_v34 }
 0x156   : > { %v3667_v25 = vpop.f32.mrf.mxu0 }
 0x157   : > { %v3696_v19 = vpop.f32.mrf.mxu1  ;;  %v1409_v26 = vadd.f32 %v1389_v22, %v1252_v24 }
 0x158   : > { %v1237_v61 = vpop.f32.mrf.mxu0 }
 0x159   : > { %v1394_v27 = vpop.f32.mrf.mxu1  ;;  %v1253_v30 = vadd.f32 %v1237_v61, %v1096_v7 }
 0x15a   : > { %v3670_v31 = vpop.f32.mrf.mxu0 }
 0x15b   : > { %v3699_v23 = vpop.f32.mrf.mxu1  ;;  %v1410_v2 = vadd.f32 %v1394_v27, %v1253_v30 }
 0x15c   : > { %v1242_v32 = vpop.f32.mrf.mxu0 }
 0x15d   : > { %v1399_v33 = vpop.f32.mrf.mxu1  ;;  %v1254_v35 = vadd.f32 %v1242_v32, %v1097_v6 }
 0x15e   : > { %v3673_v37 = vpop.f32.mrf.mxu0 }
 0x15f   : > { %v3702_v29 = vpop.f32.mrf.mxu1  ;;  %v1411_v38 = vadd.f32 %v1399_v33, %v1254_v35 }
 0x160   : > { %v1516_v4 = vpop.f32.mrf.mxu0 }
 0x161   : > { %v1673_v39 = vpop.f32.mrf.mxu1  ;;  %v1560_v40 = vadd.f32 %v1516_v4, %v1403_v36 }
 0x162   : > { %v3707_v41 = vpop.f32.mrf.mxu0 }
 0x163   : > { %v3736_v34 = vpop.f32.mrf.mxu1  ;;  %v1717_v20 = vadd.f32 %v1673_v39, %v1560_v40 }
 0x164   : > { %v1521_v8 = vpop.f32.mrf.mxu0 }
 0x165   : > { %v1678_v9 = vpop.f32.mrf.mxu1  ;;  %v1561_v44 = vadd.f32 %v1521_v8, %v1404_v13 }
 0x166   : > { %v3710_v46 = vpop.f32.mrf.mxu0 }
 0x167   : > { %v3739_v7 = vpop.f32.mrf.mxu1  ;;  %v1718_v28 = vadd.f32 %v1678_v9, %v1561_v44 }
 0x168   : > { %v1526_v47 = vpop.f32.mrf.mxu0 }
 0x169   : > { %v1683_v10 = vpop.f32.mrf.mxu1  ;;  %v1562_v49 = vadd.f32 %v1526_v47, %v1405_v15 }
 0x16a   : > { %v3713_v45 = vpop.f32.mrf.mxu0 }
 0x16b   : > { %v3742_v6 = vpop.f32.mrf.mxu1  ;;  %v1719_v5 = vadd.f32 %v1683_v10, %v1562_v49 }
 0x16c   : > { %v1531_v51 = vpop.f32.mrf.mxu0 }
 0x16d   : > { %v1688_v12 = vpop.f32.mrf.mxu1  ;;  %v1563_v43 = vadd.f32 %v1531_v51, %v1406_v57 }
 0x16e   : > { %v3716_v54 = vpop.f32.mrf.mxu0 }
 0x16f   : > { %v3745_v36 = vpop.f32.mrf.mxu1  ;;  %v1720_v42 = vadd.f32 %v1688_v12, %v1563_v43 }
 0x170   : > { %v1536_v14 = vpop.f32.mrf.mxu0 }
 0x171   : > { %v1693_v48 = vpop.f32.mrf.mxu1  ;;  %v1564_v50 = vadd.f32 %v1536_v14, %v1407_v62 }
 0x172   : > { %v3719_v56 = vpop.f32.mrf.mxu0 }
 0x173   : > { %v3748_v13 = vpop.f32.mrf.mxu1  ;;  %v1721_v11 = vadd.f32 %v1693_v48, %v1564_v50 }
 0x174   : > { %v1541_v58 = vpop.f32.mrf.mxu0 }
 0x175   : > { %v1698_v17 = vpop.f32.mrf.mxu1  ;;  %v1565_v52 = vadd.f32 %v1541_v58, %v1408_v3 }
 0x176   : > { %v3722_v59 = vpop.f32.mrf.mxu0 }
 0x177   : > { %v3751_v15 = vpop.f32.mrf.mxu1  ;;  %v1722_v60 = vadd.f32 %v1698_v17, %v1565_v52 }
 0x178   : > { %v1546_v53 = vpop.f32.mrf.mxu0 }
 0x179   : > { %v1703_v18 = vpop.f32.mrf.mxu1  ;;  %v1566_v63 = vadd.f32 %v1546_v53, %v1409_v26 }
 0x17a   : > { %v3725_v0 = vpop.f32.mrf.mxu0 }
 0x17b   : > { %v3754_v57 = vpop.f32.mrf.mxu1  ;;  %v1723_v55 = vadd.f32 %v1703_v18, %v1566_v63 }
 0x17c   : > { %v1551_v1 = vpop.f32.mrf.mxu0 }
 0x17d   : > { %v1708_v16 = vpop.f32.mrf.mxu1  ;;  %v1567_v21 = vadd.f32 %v1551_v1, %v1410_v2 }
 0x17e   : > { %v3728_v22 = vpop.f32.mrf.mxu0 }
 0x17f   : > { %v3757_v62 = vpop.f32.mrf.mxu1  ;;  %v1724_v24 = vadd.f32 %v1708_v16, %v1567_v21 }
 0x180   : > { %v1556_v25 = vpop.f32.mrf.mxu0 }
 0x181   : > { %v1713_v19 = vpop.f32.mrf.mxu1  ;;  %v1568_v61 = vadd.f32 %v1556_v25, %v1411_v38 }
 0x182   : > { %v3731_v27 = vpop.f32.mrf.mxu0 }
 0x183   : > { %v3760_v3 = vpop.f32.mrf.mxu1  ;;  %v1725_v30 = vadd.f32 %v1713_v19, %v1568_v61  ;;  %v2684_v19 = vlaneseq }
 0x184   : > { %v1830_v31 = vpop.f32.mrf.mxu0 }
 0x185   : > { %v1987_v23 = vpop.f32.mrf.mxu1  ;;  %v1874_v32 = vadd.f32 %v1830_v31, %v1717_v20  ;;  %v4836_v31 = vshrl.u32 %v2684_v19, 7 }
 0x186   : > { %v3765_v33 = vpop.f32.mrf.mxu0 }
 0x187   : > { %v3794_v26 = vpop.f32.mrf.mxu1  ;;  %v4812_v35 = vadd.f32 %v1987_v23, %v1874_v32  ;;  %v2686_v32 = vadd.s32 8, %v4836_v31  ;;  %v2687_v33 = vadd.s32 16, %v4836_v31 }
 0x188   : > { %v1835_v37 = vpop.f32.mrf.mxu0 }
 0x189   : > { %v1992_v29 = vpop.f32.mrf.mxu1  ;;  %v1875_v4 = vadd.f32 %v1835_v37, %v1718_v28 }
 0x18a   : > { %v3768_v2 = vpop.f32.mrf.mxu0 }
 0x18b   : > { %v3797_v39 = vpop.f32.mrf.mxu1  ;;  %v4814_v40 = vadd.f32 %v1992_v29, %v1875_v4  ;;  %v4845_v29 = vmul.u32.u64.low 3817748708, %v4836_v31  ;;  %v4846_v4 = vmul.u32.u64.high 3817748708, %v4836_v31, %v4845_v29 }
 0x18c   : > { %v1840_v41 = vpop.f32.mrf.mxu0 }
 0x18d   : > { %v1997_v34 = vpop.f32.mrf.mxu1  ;;  %v1876_v38 = vadd.f32 %v1840_v41, %v1719_v5 }
 0x18e   : > { %v3771_v8 = vpop.f32.mrf.mxu0 }
 0x18f   : > { %v3800_v9 = vpop.f32.mrf.mxu1  ;;  %v4816_v44 = vadd.f32 %v1997_v34, %v1876_v38  ;;  %v4852_v41 = vmul.u32.u64.low 3817748708, %v2686_v32  ;;  %v4853_v34 = vmul.u32.u64.high 3817748708, %v2686_v32, %v4852_v41 }
 0x190   : > { %v1845_v46 = vpop.f32.mrf.mxu0  ;;  %v4855_v38 = vmul.u32.u64.low 3817748708, %v2687_v33  ;;  %v4856_v8 = vmul.u32.u64.high 3817748708, %v2687_v33, %v4855_v38 }
 0x191   : > { %v2002_v20 = vpop.f32.mrf.mxu1  ;;  %v1877_v7 = vadd.f32 %v1845_v46, %v1720_v42 }
 0x192   : > { %v3774_v47 = vpop.f32.mrf.mxu0 }
 0x193   : > { %v3803_v10 = vpop.f32.mrf.mxu1  ;;  %v4818_v49 = vadd.f32 %v2002_v20, %v1877_v7  ;;  %v2688_v47 = vadd.s32 24, %v4836_v31 }
 0x194   : > { %v1850_v45 = vpop.f32.mrf.mxu0 }
 0x195   : > { %v2007_v28 = vpop.f32.mrf.mxu1  ;;  %v1878_v6 = vadd.f32 %v1850_v45, %v1721_v11 }
 0x196   : > { %v3777_v51 = vpop.f32.mrf.mxu0 }
 0x197   : > { %v3806_v12 = vpop.f32.mrf.mxu1  ;;  %v4820_v43 = vadd.f32 %v2007_v28, %v1878_v6  ;;  %v2700_v28 = vshrl.u32 %v4846_v4, 3 }
 0x198   : > { %v1855_v54 = vpop.f32.mrf.mxu0 }
 0x199   : > { %v2012_v5 = vpop.f32.mrf.mxu1  ;;  %v1879_v36 = vadd.f32 %v1855_v54, %v1722_v60  ;;  %v4868_v12 = vmul.u32.u64.low 3817748708, %v2688_v47  ;;  %v4869_v54 = vmul.u32.u64.high 3817748708, %v2688_v47, %v4868_v12 }
 0x19a   : > { %v3780_v14 = vpop.f32.mrf.mxu0 }
 0x19b   : > { %v3809_v48 = vpop.f32.mrf.mxu1  ;;  %v4822_v50 = vadd.f32 %v2012_v5, %v1879_v36  ;;  %v2711_v5 = vshrl.u32 %v4853_v34, 3  ;;  %v2722_v36 = vshrl.u32 %v4856_v8, 3 }
 0x19c   : > { %v1860_v56 = vpop.f32.mrf.mxu0 }
 0x19d   : > { %v2017_v42 = vpop.f32.mrf.mxu1  ;;  %v1880_v13 = vadd.f32 %v1860_v56, %v1723_v55  ;;  %v4874_v56 = vadd.s32 32, %v4836_v31 }
 0x19e   : > { %v3783_v58 = vpop.f32.mrf.mxu0 }
 0x19f   : > { %v3812_v17 = vpop.f32.mrf.mxu1  ;;  %v4824_v52 = vadd.f32 %v2017_v42, %v1880_v13  ;;  %v2701_v42 = vmul.u32 9, %v2700_v28 }
 0x1a0   : > { %v1865_v59 = vpop.f32.mrf.mxu0  ;;  %v2712_v17 = vmul.u32 9, %v2711_v5 }
 0x1a1   : > { %v2022_v11 = vpop.f32.mrf.mxu1  ;;  %v1881_v15 = vadd.f32 %v1865_v59, %v1724_v24  ;;  %v2723_v59 = vmul.u32 9, %v2722_v36 }
 0x1a2   : > { %v3786_v53 = vpop.f32.mrf.mxu0 }
 0x1a3   : > { %v3815_v18 = vpop.f32.mrf.mxu1  ;;  %v4826_v63 = vadd.f32 %v2022_v11, %v1881_v15  ;;  %v4881_v11 = vadd.s32 40, %v4836_v31 }
 0x1a4   : > { %v1870_v0 = vpop.f32.mrf.mxu0 }
 0x1a5   : > { %v2027_v60 = vpop.f32.mrf.mxu1  ;;  %v1882_v57 = vadd.f32 %v1870_v0, %v1725_v30  ;;  %v4884_v18 = vmul.u32.u64.low 3817748708, %v4874_v56  ;;  %v4885_v0 = vmul.u32.u64.high 3817748708, %v4874_v56, %v4884_v18 }
 0x1a6   : > { %v3789_v1 = vpop.f32.mrf.mxu0  ;;  %v4959_v18 = vadd.s32 64, %v4836_v31 }
 0x1a7   : > { %v3818_v16 = vpop.f32.mrf.mxu1  ;;  %v4828_v21 = vadd.f32 %v2027_v60, %v1882_v57  ;;  %v2702_v60 = vsub.s32 %v4836_v31, %v2701_v42  ;;  %v4952_v42 = vld [vmem:[%s5225_s2] ss:$0 sm:$0xff] }
 0x1a8   : > { %v2144_v22 = vpop.f32.mrf.mxu0  ;;  %v2733_v16 = vshrl.u32 %v4869_v54, 3 }
 0x1a9   : > { %v4830_v55 = vpop.f32.mrf.mxu1  ;;  %v2188_v29 = vadd.f32 %v2144_v22, %v4812_v35  ;;  %vm2793_vm2 = vcmp.ne.s32.totalorder %v2702_v60, 0  ;;  %vm2802_vm3 = vcmp.lt.s32.totalorder %v2702_v60, 0  ;;  %v2744_v22 = vshrl.u32 %v4885_v0, 3 }
 0x1aa   : > { %v3823_v62 = vpop.f32.mrf.mxu0  ;;  %vm4913_vm8 = vmand %vm2802_vm3, %vm2793_vm2 }
 0x1ab   : > { %v3852_v25 = vpop.f32.mrf.mxu1  ;;  %v4893_v62 = vsub.s32 %v2686_v32, %v2712_v17  ;;  %v2820_v32 = vadd.s32 9, %v2702_v60 }
 0x1ac   : > { %v4832_v61 = vpop.f32.mrf.mxu0  ;;  %v4895_v25 = vsub.s32 %v2687_v33, %v2723_v59  ;;  %v2734_v33 = vmul.u32 9, %v2733_v16  ;;  %v2745_v59 = vmul.u32 9, %v2744_v22 }
 0x1ad   : > { %v4834_v24 = vpop.f32.mrf.mxu1  ;;  %vm2794_vm4 = vcmp.ne.s32.totalorder %v4893_v62, 0  ;;  %vm2803_vm5 = vcmp.lt.s32.totalorder %v4893_v62, 0  ;;  %v2821_v5 = vadd.s32 9, %v4893_v62 }
 0x1ae   : > { %v3826_v27 = vpop.f32.mrf.mxu0  ;;  %vm2795_vm6 = vcmp.ne.s32.totalorder %v4895_v25, 0  ;;  %vm2804_vm7 = vcmp.lt.s32.totalorder %v4895_v25, 0  ;;  %vm4930_vm9 = vmand %vm2803_vm5, %vm2794_vm4  ;;  %v2822_v36 = vadd.s32 9, %v4895_v25 }
 0x1af   : > { %v3855_v3 = vpop.f32.mrf.mxu1  ;;  %v4898_v19 = vmul.u32.u64.low 3817748708, %v4881_v11  ;;  %v4899_v27 = vmul.u32.u64.high 3817748708, %v4881_v11, %v4898_v19  ;;  %vm4944_vm10 = vmand %vm2804_vm7, %vm2795_vm6 }
 0x1b0   : > { %v4838_v23 = vpop.f32.mrf.mxu0 }
 0x1b1   : > { %v4840_v30 = vpop.f32.mrf.mxu1 }
 0x1b2   : > { %v3829_v26 = vpop.f32.mrf.mxu0 }
 0x1b3   : > { %v3858_v37 = vpop.f32.mrf.mxu1 }
 0x1b4   : > { %v4848_v2 = vpop.f32.mrf.mxu0  ;;  %v4902_v37 = vadd.s32 48, %v4836_v31 }
 0x1b5   : > { %v4850_v39 = vpop.f32.mrf.mxu1  ;;  %v2191_v35 = vadd.f32 %v4848_v2, %v4818_v49 }
 0x1b6   : > { %v3832_v9 = vpop.f32.mrf.mxu0 }
 0x1b7   : > { %v3861_v46 = vpop.f32.mrf.mxu1  ;;  %v4919_v8 = vmul.u32.u64.low 3817748708, %v4902_v37  ;;  %v4920_v9 = vmul.u32.u64.high 3817748708, %v4902_v37, %v4919_v8 }
 0x1b8   : > { %v4858_v20 = vpop.f32.mrf.mxu0  ;;  %v4923_v46 = vadd.s32 56, %v4836_v31  ;;  %v2831_v31 = vsel %vm4944_vm10, %v2822_v36, %v4895_v25 }
 0x1b9   : > { %v4860_v7 = vpop.f32.mrf.mxu1  ;;  %vm4994_vm0 = vcmp.lt.s32.totalorder %v2831_v31, 8 }
 0x1ba   : > { %v3835_v10 = vpop.f32.mrf.mxu0 }
 0x1bb   : > { %v3864_v45 = vpop.f32.mrf.mxu1  ;;  %v2345_v10 = vadd.f32 %v4830_v55, %v2188_v29  ;;  %v2829_v55 = vsel %vm4913_vm8, %v2820_v32, %v2702_v60  ;;  %v2190_v60 = vadd.f32 %v4838_v23, %v4816_v44 }
 0x1bc   : > { %v4864_v6 = vpop.f32.mrf.mxu0  ;;  %v2189_v45 = vadd.f32 %v4832_v61, %v4814_v40  ;;  %v2755_v61 = vshrl.u32 %v4899_v27, 3  ;;  %vm4964_vm11 = vcmp.lt.s32.totalorder %v2829_v55, 8  ;;  %v2348_v55 = vadd.f32 %v4850_v39, %v2191_v35 }
 0x1bd   : > { %v4866_v51 = vpop.f32.mrf.mxu1  ;;  %v2347_v25 = vadd.f32 %v4840_v30, %v2190_v60  ;;  %v2192_v40 = vadd.f32 %v4858_v20, %v4820_v43 }
 0x1be   : > { %v3838_v14 = vpop.f32.mrf.mxu0  ;;  %v2346_v0 = vadd.f32 %v4834_v24, %v2189_v45  ;;  %v2756_v23 = vmul.u32 9, %v2755_v61 }
 0x1bf   : > { %v3867_v48 = vpop.f32.mrf.mxu1  ;;  %v4936_v14 = vsub.s32 %v2688_v47, %v2734_v33  ;;  %v4980_v33 = vsub.s32 %v4874_v56, %v2745_v59  ;;  %v2349_v31 = vadd.f32 %v4860_v7, %v2192_v40 }
 0x1c0   : > { %v4876_v13 = vpop.f32.mrf.mxu0 }
 0x1c1   : > { %v4878_v58 = vpop.f32.mrf.mxu1  ;;  %vm2796_vm12 = vcmp.ne.s32.totalorder %v4936_v14, 0  ;;  %vm2805_vm13 = vcmp.lt.s32.totalorder %v4936_v14, 0  ;;  %vm2797_vm2 = vcmp.ne.s32.totalorder %v4980_v33, 0  ;;  %vm2806_vm3 = vcmp.lt.s32.totalorder %v4980_v33, 0 }
 0x1c2   : > { %v3841_v15 = vpop.f32.mrf.mxu0  ;;  %vm5009_vm1 = vmand %vm2805_vm13, %vm2796_vm12  ;;  %v2824_v39 = vadd.s32 9, %v4980_v33 }
 0x1c3   : > { %v3870_v53 = vpop.f32.mrf.mxu1  ;;  %vm5039_vm5 = vmand %vm2806_vm3, %vm2797_vm2 }
 0x1c4   : > { %v4888_v57 = vpop.f32.mrf.mxu0  ;;  %v4955_v15 = vmul.u32.u64.low 3817748708, %v4923_v46  ;;  %v4956_v53 = vmul.u32.u64.high 3817748708, %v4923_v46, %v4955_v15 }
 0x1c5   : > { %v4890_v1 = vpop.f32.mrf.mxu1 }
 0x1c6   : > { %v3844_v3 = vpop.f32.mrf.mxu0 }
 0x1c7   : > { %v3873_v26 = vpop.f32.mrf.mxu1 }
 0x1c8   : > { %v4905_v4 = vpop.f32.mrf.mxu0  ;;  %v2830_v26 = vsel %vm4930_vm9, %v2821_v5, %v4893_v62  ;;  %v2766_v62 = vshrl.u32 %v4920_v9, 3  ;;  %v2823_v9 = vadd.s32 9, %v4936_v14 }
 0x1c9   : > { %v4907_v41 = vpop.f32.mrf.mxu1  ;;  %vm4990_vm15 = vcmp.lt.s32.totalorder %v2830_v26, 8 }
 0x1ca   : > { %v3847_v34 = vpop.f32.mrf.mxu0  ;;  %v2767_v36 = vmul.u32 9, %v2766_v62 }
 0x1cb   : > { %v3876_v38 = vpop.f32.mrf.mxu1 }
 0x1cc   : > { %v2458_v28 = vpop.f32.mrf.mxu0  ;;  %v4984_v34 = vmul.u32.u64.low 3817748708, %v4959_v18  ;;  %v4985_v38 = vmul.u32.u64.high 3817748708, %v4959_v18, %v4984_v34 }
 0x1cd   : > { %v2615_v12 = vpop.f32.mrf.mxu1  ;;  %v2502_v48 = vadd.f32 %v2458_v28, %v2345_v10 }
 0x1ce   : > { %v3881_v47 = vpop.f32.mrf.mxu0  ;;  %v2788_v26 = vshrl.u32 %v4985_v38, 3 }
 0x1cf   : > { %v3910_v17 = vpop.f32.mrf.mxu1  ;;  %v2659_v16 = vadd.f32 %v2615_v12, %v2502_v48  ;;  %v5014_v12 = vsub.s32 %v4881_v11, %v2756_v23  ;;  %v2777_v48 = vshrl.u32 %v4956_v53, 3  ;;  %v2832_v53 = vsel %vm5009_vm1, %v2823_v9, %v4936_v14 }
 0x1d0   : > { %v2463_v27 = vpop.f32.mrf.mxu0  ;;  %v5045_v14 = vsub.s32 %v4902_v37, %v2767_v36  ;;  %vm5055_vm7 = vcmp.lt.s32.totalorder %v2832_v53, 8  ;;  %v2789_v9 = vmul.u32 9, %v2788_v26 }
 0x1d1   : > { %v2620_v3 = vpop.f32.mrf.mxu1  ;;  %v4976_v24 = vadd.f32 %v4952_v42, %v2659_v16  ;;  %v2503_v44 = vadd.f32 %v2463_v27, %v2346_v0  ;;  %vm2798_vm4 = vcmp.ne.s32.totalorder %v5014_v12, 0  ;;  %vm2807_vm6 = vcmp.lt.s32.totalorder %v5014_v12, 0 }
 0x1d2   : > { %v3884_v29 = vpop.f32.mrf.mxu0  ;;  %v2825_v38 = vadd.s32 9, %v5014_v12  ;;  %vm5070_vm8 = vmand %vm2807_vm6, %vm2798_vm4  ;;  %vm2799_vm9 = vcmp.ne.s32.totalorder %v5045_v14, 0  ;;  %vm2808_vm10 = vcmp.lt.s32.totalorder %v5045_v14, 0 }
 0x1d3   : > { %v3913_v32 = vpop.f32.mrf.mxu1  ;;  %v2660_v22 = vadd.f32 %v2620_v3, %v2503_v44  ;;  %v2847_v30 = vsel %vm4964_vm11, %v4976_v24, 0.0  ;;  %v2778_v3 = vmul.u32 9, %v2777_v48  ;;  %v2193_v44 = vadd.f32 %v4864_v6, %v4822_v50  ;;  %vm5099_vm13 = vmand %vm2808_vm10, %vm2799_vm9 }
 0x1d4   : > { %v2468_v10 = vpop.f32.mrf.mxu0  ;;  %v2857_v47 = vsel %vm2856_vm14, %v2847_v30, 0.0  ;;  %v2833_v6 = vsel %vm5039_vm5, %v2824_v39, %v4980_v33  ;;  %v2194_v33 = vadd.f32 %v4876_v13, %v4824_v52 }
 0x1d5   : > { %v2625_v56 = vpop.f32.mrf.mxu1  ;;  %v5003_v49 = vadd.f32 %v4952_v42, %v2660_v22  ;;  %v2504_v2 = vadd.f32 %v2468_v10, %v2347_v25  ;;  %v2350_v30 = vadd.f32 %v4866_v51, %v2193_v44  ;;  %vm5084_vm12 = vcmp.lt.s32.totalorder %v2833_v6, 8 }
 0x1d6   : > { %v3887_v54 = vpop.f32.mrf.mxu0  ;;  %v2834_v51 = vsel %vm5070_vm8, %v2825_v38, %v5014_v12  ;;  %v2790_v12 = vsub.s32 %v4959_v18, %v2789_v9 }
 0x1d7   : > { %v3916_v5 = vpop.f32.mrf.mxu1  ;;  %v2848_v61 = vsel %vm4990_vm15, %v5003_v49, 0.0  ;;  %v2661_v11 = vadd.f32 %v2625_v56, %v2504_v2  ;;  %v2779_v56 = vsub.s32 %v4923_v46, %v2778_v3  ;;  %vm5111_vm3 = vcmp.lt.s32.totalorder %v2834_v51, 8 }
 0x1d8   : > { %v2858_v17 = vsel %vm2856_vm14, %v2848_v61, 0.0  ;;  %v2473_v59 = vpop.f32.mrf.mxu0  ;;  %vm2801_vm5 = vcmp.ne.s32.totalorder %v2790_v12, 0  ;;  %vm2810_vm6 = vcmp.lt.s32.totalorder %v2790_v12, 0 }
 0x1d9   : > { %v2630_v15 = vpop.f32.mrf.mxu1  ;;  %v2859_v0 = vadd.f32 %v2858_v17, %v2857_v47  ;;  %v5032_v43 = vadd.f32 %v4952_v42, %v2661_v11  ;;  %v2505_v20 = vadd.f32 %v2473_v59, %v2348_v55  ;;  %v2826_v55 = vadd.s32 9, %v5045_v14  ;;  %vm5140_vm9 = vmand %vm2810_vm6, %vm2801_vm5 }
 0x1da   : > { %v3890_v60 = vpop.f32.mrf.mxu0  ;;  %vm2800_vm1 = vcmp.ne.s32.totalorder %v2779_v56, 0  ;;  %vm2809_vm2 = vcmp.lt.s32.totalorder %v2779_v56, 0  ;;  %v2351_v47 = vadd.f32 %v4878_v58, %v2194_v33  ;;  %v2195_v17 = vadd.f32 %v4888_v57, %v4826_v63 }
 0x1db   : > { %v3919_v16 = vpop.f32.mrf.mxu1  ;;  %v2849_v23 = vsel %vm4994_vm0, %v5032_v43, 0.0  ;;  %v2662_v29 = vadd.f32 %v2630_v15, %v2505_v20  ;;  %v2827_v60 = vadd.s32 9, %v2779_v56  ;;  %v2835_v63 = vsel %vm5099_vm13, %v2826_v55, %v5045_v14  ;;  %vm5121_vm4 = vmand %vm2809_vm2, %vm2800_vm1 }
 0x1dc   : > { %v2860_v32 = vsel %vm2856_vm14, %v2849_v23, 0.0  ;;  %v2478_v37 = vpop.f32.mrf.mxu0  ;;  %v2352_v26 = vadd.f32 %v4890_v1, %v2195_v17  ;;  %vm5131_vm8 = vcmp.lt.s32.totalorder %v2835_v63, 8 }
 0x1dd   : > { %v2635_v34 = vpop.f32.mrf.mxu1  ;;  %v2861_v25 = vadd.f32 %v2860_v32, %v2859_v0  ;;  %v5061_v7 = vadd.f32 %v4952_v42, %v2662_v29  ;;  %v2506_v50 = vadd.f32 %v2478_v37, %v2349_v31  ;;  %v2196_v31 = vadd.f32 %v4905_v4, %v4828_v21 }
 0x1de   : > { %v3893_v22 = vpop.f32.mrf.mxu0  ;;  %v2828_v21 = vadd.s32 9, %v2790_v12 }
 0x1df   : > { %v3922_v10 = vpop.f32.mrf.mxu1  ;;  %v2850_v2 = vsel %vm5055_vm7, %v5061_v7, 0.0  ;;  %v2663_v28 = vadd.f32 %v2635_v34, %v2506_v50  ;;  %v2836_v34 = vsel %vm5121_vm4, %v2827_v60, %v2779_v56  ;;  %v2353_v35 = vadd.f32 %v4907_v41, %v2196_v31 }
 0x1e0   : > { %v2862_v54 = vsel %vm2856_vm14, %v2850_v2, 0.0  ;;  %v2483_v36 = vpop.f32.mrf.mxu0  ;;  %vm5148_vm10 = vcmp.lt.s32.totalorder %v2836_v34, 8 }
 0x1e1   : > { %v2640_v48 = vpop.f32.mrf.mxu1  ;;  %v2863_v46 = vadd.f32 %v2862_v54, %v2861_v25  ;;  %v5092_v52 = vadd.f32 %v4952_v42, %v2663_v28  ;;  %v2507_v13 = vadd.f32 %v2483_v36, %v2350_v30  ;;  %v2837_v36 = vsel %vm5140_vm9, %v2828_v21, %v2790_v12 }
 0x1e2   : > { %v3896_v40 = vpop.f32.mrf.mxu0  ;;  %vm5158_vm13 = vcmp.lt.s32.totalorder %v2837_v36, 8 }
 0x1e3   : > { %v3925_v61 = vpop.f32.mrf.mxu1  ;;  %v2851_v59 = vsel %vm5084_vm12, %v5092_v52, 0.0  ;;  %v2664_v15 = vadd.f32 %v2640_v48, %v2507_v13 }
 0x1e4   : > { %v2864_v53 = vsel %vm2856_vm14, %v2851_v59, 0.0  ;;  %v2488_v0 = vpop.f32.mrf.mxu0 }
 0x1e5   : > { %v2645_v20 = vpop.f32.mrf.mxu1  ;;  %v2865_v18 = vadd.f32 %v2864_v53, %v2863_v46  ;;  %v2680_v58 = vadd.f32 %v4952_v42, %v2664_v15  ;;  %v2508_v16 = vadd.f32 %v2488_v0, %v2351_v47 }
 0x1e6   : > { %v3899_v27 = vpop.f32.mrf.mxu0 }
 0x1e7   : > { %v3928_v3 = vpop.f32.mrf.mxu1  ;;  %v2852_v44 = vsel %vm5111_vm3, %v2680_v58, 0.0  ;;  %v2665_v23 = vadd.f32 %v2645_v20, %v2508_v16 }
 0x1e8   : > { %v2866_v14 = vsel %vm2856_vm14, %v2852_v44, 0.0  ;;  %v2493_v32 = vpop.f32.mrf.mxu0 }
 0x1e9   : > { %v2650_v37 = vpop.f32.mrf.mxu1  ;;  %v2867_v38 = vadd.f32 %v2866_v14, %v2865_v18  ;;  %v2681_v1 = vadd.f32 %v4952_v42, %v2665_v23  ;;  %v2509_v25 = vadd.f32 %v2493_v32, %v2352_v26 }
 0x1ea   : > { %v3902_v4 = vpop.f32.mrf.mxu0 }
 0x1eb   : > { %v3931_v50 = vpop.f32.mrf.mxu1  ;;  %v2853_v22 = vsel %vm5131_vm8, %v2681_v1, 0.0  ;;  %v2666_v10 = vadd.f32 %v2650_v37, %v2509_v25 }
 0x1ec   : > { %v2868_v56 = vsel %vm2856_vm14, %v2853_v22, 0.0  ;;  %v2498_v30 = vpop.f32.mrf.mxu0 }
 0x1ed   : > { %v2655_v33 = vpop.f32.mrf.mxu1  ;;  %v2869_v2 = vadd.f32 %v2868_v56, %v2867_v38  ;;  %v2682_v28 = vadd.f32 %v4952_v42, %v2666_v10  ;;  %v2510_v54 = vadd.f32 %v2498_v30, %v2353_v35 }
 0x1ee   : > { %v3905_v41 = vpop.f32.mrf.mxu0 }
 0x1ef   : > { %v3934_v48 = vpop.f32.mrf.mxu1  ;;  %v2854_v51 = vsel %vm5148_vm10, %v2682_v28, 0.0  ;;  %v2667_v46 = vadd.f32 %v2655_v33, %v2510_v54 }
 0x1f0   : > { %v2870_v13 = vsel %vm2856_vm14, %v2854_v51, 0.0 }
 0x1f1   : > { %v2871_v40 = vadd.f32 %v2870_v13, %v2869_v2  ;;  %v2683_v61 = vadd.f32 %v4952_v42, %v2667_v46 }
 0x1f3   : > { %v2855_v11 = vsel %vm5158_vm13, %v2683_v61, 0.0 }
 0x1f4   : > { %v2872_v12 = vsel %vm2856_vm14, %v2855_v11, 0.0 }
 0x1f5   : > { %v2873_v47 = vadd.f32 %v2872_v12, %v2871_v40 }
 0x1f7   : > { %v2874_v17 = vrot.slane %v2873_v47, 4 }
 0x1f9   : > { %v2875_v59 = vadd.f32 %v2874_v17, %v2873_v47 }
 0x1fb   : > { %v2876_v15 = vrot.slane %v2875_v59, 2 }
 0x1fd   : > { %v2877_v53 = vadd.f32 %v2876_v15, %v2875_v59 }
 0x1ff   : > { %v2878_v0 = vrot.slane %v2877_v53, 1 }
 0x201   : > { %v2879_v20 = vadd.f32 %v2878_v0, %v2877_v53 }
 0x203   : > { %v2880_v60 = vmul.f32 0.015625, %v2879_v20 }
 0x205   : > { %v2881_v18 = vsub.f32 %v4976_v24, %v2880_v60  ;;  %v2882_v16 = vsub.f32 %v5003_v49, %v2880_v60  ;;  %v2883_v63 = vsub.f32 %v5032_v43, %v2880_v60  ;;  %v2884_v42 = vsub.f32 %v5061_v7, %v2880_v60 }
 0x206   : > { %v2885_v57 = vsub.f32 %v5092_v52, %v2880_v60  ;;  %v2886_v27 = vsub.f32 %v2680_v58, %v2880_v60  ;;  %v2887_v3 = vsub.f32 %v2681_v1, %v2880_v60  ;;  %v2888_v26 = vsub.f32 %v2682_v28, %v2880_v60 }
 0x207   : > { %v2889_v31 = vsub.f32 %v2683_v61, %v2880_v60  ;;  %v2890_v44 = vmul.f32 %v2881_v18, %v2881_v18  ;;  %v2891_v23 = vmul.f32 %v2882_v16, %v2882_v16  ;;  %v2892_v14 = vmul.f32 %v2883_v63, %v2883_v63 }
 0x208   : > { %v2893_v32 = vmul.f32 %v2884_v42, %v2884_v42  ;;  %v2894_v49 = vmul.f32 %v2885_v57, %v2885_v57  ;;  %v2895_v58 = vmul.f32 %v2886_v27, %v2886_v27  ;;  %v2896_v19 = vmul.f32 %v2887_v3, %v2887_v3 }
 0x209   : > { %v2899_v37 = vsel %vm4964_vm11, %v2890_v44, 0.0  ;;  %v2900_v24 = vsel %vm4990_vm15, %v2891_v23, 0.0  ;;  %v2901_v43 = vsel %vm4994_vm0, %v2892_v14, 0.0  ;;  %v2897_v45 = vmul.f32 %v2888_v26, %v2888_v26 }
 0x20a   : > { %v2908_v7 = vsel %vm2856_vm14, %v2899_v37, 0.0  ;;  %v2909_v52 = vsel %vm2856_vm14, %v2900_v24, 0.0  ;;  %v2902_v34 = vsel %vm5055_vm7, %v2893_v32, 0.0  ;;  %v2911_v1 = vsel %vm2856_vm14, %v2901_v43, 0.0 }
 0x20b   : > { %v2910_v38 = vadd.f32 %v2909_v52, %v2908_v7  ;;  %v2903_v8 = vsel %vm5084_vm12, %v2894_v49, 0.0  ;;  %v2913_v21 = vsel %vm2856_vm14, %v2902_v34, 0.0  ;;  %v2904_v4 = vsel %vm5111_vm3, %v2895_v58, 0.0 }
 0x20c   : > { %v2915_v6 = vsel %vm2856_vm14, %v2903_v8, 0.0  ;;  %v2898_v35 = vmul.f32 %v2889_v31, %v2889_v31  ;;  %v2905_v62 = vsel %vm5131_vm8, %v2896_v19, 0.0  ;;  %v2917_v10 = vsel %vm2856_vm14, %v2904_v4, 0.0 }
 0x20d   : > { %v2912_v25 = vadd.f32 %v2911_v1, %v2910_v38  ;;  %v2906_v5 = vsel %vm5148_vm10, %v2897_v45, 0.0  ;;  %v2919_v30 = vsel %vm2856_vm14, %v2905_v62, 0.0 }
 0x20e   : > { %v2907_v39 = vsel %vm5158_vm13, %v2898_v35, 0.0  ;;  %v2921_v2 = vsel %vm2856_vm14, %v2906_v5, 0.0 }
 0x20f   : > { %v2914_v50 = vadd.f32 %v2913_v21, %v2912_v25  ;;  %v2923_v29 = vsel %vm2856_vm14, %v2907_v39, 0.0 }
 0x211   : > { %v2916_v22 = vadd.f32 %v2915_v6, %v2914_v50 }
 0x213   : > { %v2918_v56 = vadd.f32 %v2917_v10, %v2916_v22 }
 0x215   : > { %v2920_v33 = vadd.f32 %v2919_v30, %v2918_v56 }
 0x217   : > { %v2922_v28 = vadd.f32 %v2921_v2, %v2920_v33 }
 0x219   : > { %v2924_v54 = vadd.f32 %v2923_v29, %v2922_v28 }
 0x21b   : > { %v2925_v36 = vrot.slane %v2924_v54, 4 }
 0x21d   : > { %v2926_v41 = vadd.f32 %v2925_v36, %v2924_v54 }
 0x21f   : > { %v2927_v48 = vrot.slane %v2926_v41, 2 }
 0x221   : > { %v2928_v51 = vadd.f32 %v2927_v48, %v2926_v41 }
 0x223   : > { %v2929_v9 = vrot.slane %v2928_v51, 1 }
 0x225   : > { %v2930_v46 = vadd.f32 %v2929_v9, %v2928_v51 }
 0x227   : > { %v2931_v13 = vmul.f32 0.015625, %v2930_v46 }
 0x229   : > { %v2932_v40 = vadd.f32 1e-05, %v2931_v13 }
 0x22b   : > { %3965 = vrsqrt.f32 %v2932_v40 }
 0x238   : > { %v3966_v61 = vpop.eup %3965 }
 0x239   : > { %v2934_v55 = vmul.f32 %v3966_v61, %v2881_v18  ;;  %v2935_v11 = vmul.f32 %v3966_v61, %v2882_v16  ;;  %v2936_v12 = vmul.f32 %v3966_v61, %v2883_v63  ;;  %v2937_v47 = vmul.f32 %v3966_v61, %v2884_v42 }
 0x23a   : > { %v2938_v17 = vmul.f32 %v3966_v61, %v2885_v57  ;;  %v2939_v59 = vmul.f32 %v3966_v61, %v2886_v27  ;;  %v2940_v15 = vmul.f32 %v3966_v61, %v2887_v3  ;;  %v2941_v53 = vmul.f32 %v3966_v61, %v2888_v26 }
 0x23b   : > { %v2942_v0 = vmul.f32 %v3966_v61, %v2889_v31  ;;  %vm2943_vm11 = vcmp.ge.f32.partialorder %v2934_v55, 0.0  ;;  %vm2944_vm15 = vcmp.ge.f32.partialorder %v2935_v11, 0.0  ;;  %vm2945_vm0 = vcmp.ge.f32.partialorder %v2936_v12, 0.0 }
 0x23c   : > { %vm2946_vm7 = vcmp.ge.f32.partialorder %v2937_v47, 0.0  ;;  %vm2947_vm12 = vcmp.ge.f32.partialorder %v2938_v17, 0.0  ;;  %vm2948_vm1 = vcmp.ge.f32.partialorder %v2939_v59, 0.0  ;;  %vm2949_vm2 = vcmp.ge.f32.partialorder %v2940_v15, 0.0 }
 0x23d   : > { %vm2950_vm3 = vcmp.ge.f32.partialorder %v2941_v53, 0.0  ;;  %vm2951_vm4 = vcmp.ge.f32.partialorder %v2942_v0, 0.0  ;;  %v2952_v20 = vmul.f32 0.2, %v2934_v55  ;;  %v2953_v60 = vmul.f32 0.2, %v2935_v11 }
 0x23e   : > { %v2954_v18 = vmul.f32 0.2, %v2936_v12  ;;  %v2955_v16 = vmul.f32 0.2, %v2937_v47  ;;  %v2956_v63 = vmul.f32 0.2, %v2938_v17 }
 0x23f   : > { %v2957_v42 = vmul.f32 0.2, %v2939_v59  ;;  %v2958_v57 = vmul.f32 0.2, %v2940_v15  ;;  %v2959_v27 = vmul.f32 0.2, %v2941_v53  ;;  %v2961_v3 = vsel %vm2943_vm11, %v2934_v55, %v2952_v20 }
 0x240   : > { %v2960_v26 = vmul.f32 0.2, %v2942_v0  ;;  %v2962_v31 = vsel %vm2944_vm15, %v2935_v11, %v2953_v60  ;;  %v2963_v44 = vsel %vm2945_vm0, %v2936_v12, %v2954_v18  ;;  %v2964_v23 = vsel %vm2946_vm7, %v2937_v47, %v2955_v16  ;;  %2970 = vst.msk [vmem:[%s170_s13] sm:$0xff] %vm2856_vm14, %v2961_v3 }
 0x241   : > { %v2965_v14 = vsel %vm2947_vm12, %v2938_v17, %v2956_v63  ;;  %v2966_v32 = vsel %vm2948_vm1, %v2939_v59, %v2957_v42  ;;  %v2967_v37 = vsel %vm2949_vm2, %v2940_v15, %v2958_v57  ;;  %v2968_v24 = vsel %vm2950_vm3, %v2941_v53, %v2959_v27  ;;  %2971 = vst.msk [vmem:[%s170_s13 + $0x8] sm:$0xff] %vm2856_vm14, %v2962_v31 }
 0x242   : > { %2972 = vst.msk [vmem:[%s170_s13 + $0x10] sm:$0xff] %vm2856_vm14, %v2963_v44  ;;  %2973 = vst.msk [vmem:[%s170_s13 + $0x18] sm:$0xff] %vm2856_vm14, %v2964_v23  ;;  %v2969_v49 = vsel %vm2951_vm4, %v2942_v0, %v2960_v26 }
 0x243   : > { %2974 = vst.msk [vmem:[%s170_s13 + $0x20] sm:$0xff] %vm2856_vm14, %v2965_v14  ;;  %2975 = vst.msk [vmem:[%s170_s13 + $0x28] sm:$0xff] %vm2856_vm14, %v2966_v32 }
 0x244   : > { %2976 = vst.msk [vmem:[%s170_s13 + $0x30] sm:$0xff] %vm2856_vm14, %v2967_v37  ;;  %2977 = vst.msk [vmem:[%s170_s13 + $0x38] sm:$0xff] %vm2856_vm14, %v2968_v24 }
 0x245   : > { %2978 = vst.msk [vmem:[%s170_s13 + $0x40] sm:$0xff] %vm2856_vm14, %v2969_v49 }
 0x246 PF: > { %s13_s12 = sadd.s32 1, %s3973_s12  }
 0x247   : > { %p10_p4 = scmp.ge.s32.totalorder %s13_s12, 4  }
 0x249   :  { %12 = sbr.rel (!%p10_p4) target bundleno = 1 (0x1), region = 80 }

// kernel: discriminator_forward.7
= control target key start
LH: loop header
LB: loop body
LE: loop exit
PB: predicated region body
PF: predicated region fallthrough
CT: control target
= control target key end

     0   :  { %s2374_s12 = smov 0   ;;  %s2786_s0 = inlined_call_operand.vmem [shape: f32[2,4,30,16], index: 0, kind: input, shape index: {}]   ;;  %s2787_s1 = inlined_call_operand.vmem [shape: f32[16,16,32], index: 1, kind: input, shape index: {}]   ;;  %s2788_s2 = inlined_call_operand.vmem [shape: f32[1,32], index: 2, kind: input, shape index: {}]   ;;  %s2789_s3 = inlined_call_operand.vmem [shape: f32[2,20,32], index: 3, kind: output, shape index: {}]  }
   0x1 LB: > { %s1911_s13 = sadd.s32 4294967295, %s2350_s12   ;;  %p1915_p0 = scmp.ge.s32.totalorder %s2350_s12, 1  ;;  %s2350_s12 = sphi %s2374_s12, %s13_s12  }
   0x2   : > { %p137_p1 = scmp.lt.s32.totalorder %s2350_s12, 3 }
   0x4   : > { %p138_p2 = pnand %p1915_p0, %p137_p1 }
   0x5   : > { %p161_p3 = scmp.lt.s32.totalorder (!%p138_p2), %s1911_s13, 1 }
   0x6   : > { %141 = sbr.rel (%p138_p2) target bundleno = 375 (0x177), region = 32 }
   0xb   : > { %v1923_v0 = vld [vmem:[%s2787_s1 + $0x18] sm:$0xff]  ;;  %v175_v1 = vld [vmem:[%s2787_s1 + $0x8] sm:$0xff]  ;;  %v2352_v2 = vmov 0.0   ;;  %v1922_v3 = vld [vmem:[%s2787_s1 + $0x10] sm:$0xff]  ;;  %s2803_s13 = smov (!%p161_p3, %s1911_s13), 1  ;;  %vm2353_vm0 = vmmov 0  }
   0xc   : > { %2117 = vmatprep.subr.mxu0 %v2352_v2  ;;  %2130 = vmatprep.subr.mxu1 %v2352_v2  ;;  %v174_v4 = vld [vmem:[%s2787_s1] sm:$0xff]  ;;  %s2036_s22 = sshll.u32 %s2803_s13, 7  ;;  %vm183_vm1 = vcmask 130048   ;;  %v1931_v5 = vld [vmem:[%s2787_s1 + $0x28] sm:$0xff]  ;;  %v1939_v6 = vld [vmem:[%s2787_s1 + $0x38] sm:$0xff]  ;;  %vm1804_vm13 = vcmask 261120  }
   0xd   : > { %2118 = vmatpush3.msra.mxu0 %v1923_v0  ;;  %2131 = vmatpush3.msra.mxu1 %v175_v1  ;;  %s2408_s25 = scalar_lea.vmem %s2786_s0, %s2036_s22  ;;  %v1930_v11 = vld [vmem:[%s2787_s1 + $0x20] sm:$0xff]  ;;  %v1938_v12 = vld [vmem:[%s2787_s1 + $0x30] sm:$0xff]  ;;  %v1947_v17 = vld [vmem:[%s2787_s1 + $0x48] sm:$0xff]  ;;  %vm1808_vm15 = vcmask 257024   ;;  %s2325_s8 = smul.u32 24, %s2803_s13 }
   0xe   : > { %2119 = vmatprep.subr.mxu0 %v2352_v2  ;;  %2132 = vmatprep.subr.mxu1 %v2352_v2  ;;  %v1919_v7 = vld [vmem:[%s2408_s25 + $0x20] sm:$0xff]  ;;  %v1920_v9 = vld [vmem:[%s2408_s25 + $0x28] sm:$0xff]  ;;  %v1921_v13 = vld [vmem:[%s2408_s25 + $0x30] sm:$0xf] }
   0xf   : > { %2120 = vmatpush3.msra.mxu0 %v1922_v3  ;;  %2121 = vmatprep.mubr.msk.f32.mxu0 %vm2353_vm0, %v2352_v2  ;;  %v171_v8 = vld [vmem:[%s2408_s25] sm:$0xff]  ;;  %v172_v10 = vld [vmem:[%s2408_s25 + $0x8] sm:$0xff]  ;;  %v173_v14 = vld [vmem:[%s2408_s25 + $0x10] sm:$0xf]  ;;  %s170_s11 = scalar_lea.vmem %s2789_s3, %s2325_s8 }
  0x10   : > { %2133 = vmatpush3.msra.mxu1 %v174_v4  ;;  %2134 = vmatprep.mubr.msk.f32.mxu1 %vm2353_vm0, %v2352_v2  ;;  %v362_v15 = vld [vmem:[%s2408_s25 + $0x1] sm:$0xff]  ;;  %v1955_v18 = vld [vmem:[%s2787_s1 + $0x58] sm:$0xff]  ;;  %v363_v19 = vld [vmem:[%s2408_s25 + $0x9] sm:$0xff] }
  0x11   : > { %2143 = vmatprep.subr.mxu0 %v2352_v2  ;;  %2156 = vmatprep.subr.mxu1 %v2352_v2  ;;  %v1935_v16 = vld [vmem:[%s2408_s25 + $0x21] sm:$0xff]  ;;  %v1936_v20 = vld [vmem:[%s2408_s25 + $0x29] sm:$0xff]  ;;  %v364_v23 = vld [vmem:[%s2408_s25 + $0x11] sm:$0xf] }
  0x12   : > { %2122 = vmatmul.mubr.msk.f32.vlgmr.msra.gmra.mxu0 %vm183_vm1, %v1919_v7  ;;  %2135 = vmatmul.mubr.msk.f32.vlgmr.msra.gmra.mxu1 %vm183_vm1, %v171_v8  ;;  %v1946_v21 = vld [vmem:[%s2787_s1 + $0x40] sm:$0xff]  ;;  %v1954_v22 = vld [vmem:[%s2787_s1 + $0x50] sm:$0xff]  ;;  %v1963_v27 = vld [vmem:[%s2787_s1 + $0x68] sm:$0xff] }
  0x13   : > { %2144 = vmatpush3.msra.mxu0 %v1931_v5  ;;  %2157 = vmatpush3.msra.mxu1 %v1939_v6  ;;  %v1937_v24 = vld [vmem:[%s2408_s25 + $0x31] sm:$0xf]  ;;  %v1943_v25 = vld [vmem:[%s2408_s25 + $0x40] sm:$0xff]  ;;  %v1971_v28 = vld [vmem:[%s2787_s1 + $0x78] sm:$0xff] }
  0x14   : > { %2124 = vmatprep.mubr.msk.f32.mxu0 %vm2353_vm0, %v2352_v2  ;;  %2137 = vmatprep.mubr.msk.f32.mxu1 %vm2353_vm0, %v2352_v2  ;;  %v1951_v26 = vld [vmem:[%s2408_s25 + $0x60] sm:$0xff]  ;;  %v1944_v29 = vld [vmem:[%s2408_s25 + $0x48] sm:$0xff]  ;;  %v1970_v32 = vld [vmem:[%s2787_s1 + $0x70] sm:$0xff] }
  0x15   : > { %2145 = vmatprep.subr.mxu0 %v2352_v2  ;;  %2158 = vmatprep.subr.mxu1 %v2352_v2  ;;  %v1952_v30 = vld [vmem:[%s2408_s25 + $0x68] sm:$0xff]  ;;  %v1962_v31 = vld [vmem:[%s2787_s1 + $0x60] sm:$0xff]  ;;  %v1945_v33 = vld [vmem:[%s2408_s25 + $0x50] sm:$0xf] }
  0x16   : > { %2125 = vmatmul.mubr.msk.f32.gmra.mxu0 %vm183_vm1, %v1920_v9  ;;  %2138 = vmatmul.mubr.msk.f32.gmra.mxu1 %vm183_vm1, %v172_v10  ;;  %v1953_v34 = vld [vmem:[%s2408_s25 + $0x70] sm:$0xf]  ;;  %v1959_v35 = vld [vmem:[%s2408_s25 + $0x41] sm:$0xff]  ;;  %v1984_v38 = vld [vmem:[%s2787_s1 + $0x98] sm:$0xff] }
  0x17   : > { %2146 = vmatpush3.msra.mxu0 %v1930_v11  ;;  %2127 = vmatprep.mubr.msk.f32.mxu0 %vm2353_vm0, %v2352_v2  ;;  %v1967_v36 = vld [vmem:[%s2408_s25 + $0x61] sm:$0xff]  ;;  %v1960_v39 = vld [vmem:[%s2408_s25 + $0x49] sm:$0xff]  ;;  %v1961_v43 = vld [vmem:[%s2408_s25 + $0x51] sm:$0xf] }
  0x18   : > { %2140 = vmatprep.mubr.msk.f32.mxu1 %vm2353_vm0, %v2352_v2  ;;  %2159 = vmatpush3.msra.mxu1 %v1938_v12  ;;  %v1976_v37 = vld [vmem:[%s2787_s1 + $0x88] sm:$0xff]  ;;  %v1975_v41 = vld [vmem:[%s2787_s1 + $0x80] sm:$0xff]  ;;  %v1983_v42 = vld [vmem:[%s2787_s1 + $0x90] sm:$0xff] }
  0x19   : > { %2169 = vmatprep.subr.mxu0 %v2352_v2  ;;  %2182 = vmatprep.subr.mxu1 %v2352_v2  ;;  %v1968_v40 = vld [vmem:[%s2408_s25 + $0x69] sm:$0xff]  ;;  %v1969_v44 = vld [vmem:[%s2408_s25 + $0x71] sm:$0xf]  ;;  %v1997_v48 = vld [vmem:[%s2787_s1 + $0xb8] sm:$0xff] }
  0x1a   : > { %2128 = vmatmul.mubr.msk.f32.gmra.mxu0 %vm183_vm1, %v1921_v13  ;;  %2141 = vmatmul.mubr.msk.f32.gmra.mxu1 %vm183_vm1, %v173_v14  ;;  %v952_v45 = vld [vmem:[%s2408_s25 + $0x5] sm:$0xff]  ;;  %v953_v49 = vld [vmem:[%s2408_s25 + $0xd] sm:$0xff]  ;;  %v954_v53 = vld [vmem:[%s2408_s25 + $0x15] sm:$0xf] }
  0x1b   : > { %2147 = vmatprep.mubr.msk.f32.mxu0 %vm2353_vm0, %v2352_v2  ;;  %2160 = vmatprep.mubr.msk.f32.mxu1 %vm2353_vm0, %v2352_v2  ;;  %v1980_v46 = vld [vmem:[%s2408_s25 + $0x25] sm:$0xff]  ;;  %v1981_v50 = vld [vmem:[%s2408_s25 + $0x2d] sm:$0xff]  ;;  %v1982_v54 = vld [vmem:[%s2408_s25 + $0x35] sm:$0xf] }
  0x1c   : > { %v1989_v47 = vld [vmem:[%s2787_s1 + $0xa8] sm:$0xff]  ;;  %v1988_v51 = vld [vmem:[%s2787_s1 + $0xa0] sm:$0xff]  ;;  %v1996_v52 = vld [vmem:[%s2787_s1 + $0xb0] sm:$0xff] }
  0x1d   : > { %v1148_v55 = vld [vmem:[%s2408_s25 + $0x6] sm:$0xff]  ;;  %v2013_v58 = vld [vmem:[%s2787_s1 + $0xd8] sm:$0xff]  ;;  %v1149_v59 = vld [vmem:[%s2408_s25 + $0xe] sm:$0xff] }
  0x1e   : > { %2148 = vmatmul.mubr.msk.f32.vlgmr.msra.gmra.mxu0 %vm183_vm1, %v362_v15  ;;  %2161 = vmatmul.mubr.msk.f32.vlgmr.msra.gmra.mxu1 %vm183_vm1, %v1935_v16  ;;  %v1993_v56 = vld [vmem:[%s2408_s25 + $0x26] sm:$0xff]  ;;  %v1994_v60 = vld [vmem:[%s2408_s25 + $0x2e] sm:$0xff]  ;;  %v1150_v63 = vld [vmem:[%s2408_s25 + $0x16] sm:$0xf] }
  0x1f   : > { %2170 = vmatpush3.msra.mxu0 %v1947_v17  ;;  %2183 = vmatpush3.msra.mxu1 %v1955_v18  ;;  %v2005_v57 = vld [vmem:[%s2787_s1 + $0xc8] sm:$0xff]  ;;  %v2004_v61 = vld [vmem:[%s2787_s1 + $0xc0] sm:$0xff]  ;;  %v2012_v62 = vld [vmem:[%s2787_s1 + $0xd0] sm:$0xff] }
  0x20   : > { %2150 = vmatprep.mubr.msk.f32.mxu0 %vm2353_vm0, %v2352_v2  ;;  %2163 = vmatprep.mubr.msk.f32.mxu1 %vm2353_vm0, %v2352_v2  ;;  %v1995_v0 = vld [vmem:[%s2408_s25 + $0x36] sm:$0xf]  ;;  %v2001_v1 = vld [vmem:[%s2408_s25 + $0x45] sm:$0xff]  ;;  %v2002_v6 = vld [vmem:[%s2408_s25 + $0x4d] sm:$0xff] }
  0x21   : > { %2171 = vmatprep.subr.mxu0 %v2352_v2  ;;  %2184 = vmatprep.subr.mxu1 %v2352_v2  ;;  %v2009_v3 = vld [vmem:[%s2408_s25 + $0x65] sm:$0xff]  ;;  %v2029_v5 = vld [vmem:[%s2787_s1 + $0xf8] sm:$0xff]  ;;  %v2010_v7 = vld [vmem:[%s2408_s25 + $0x6d] sm:$0xff] }
  0x22   : > { %2151 = vmatmul.mubr.msk.f32.gmra.mxu0 %vm183_vm1, %v363_v19  ;;  %2164 = vmatmul.mubr.msk.f32.gmra.mxu1 %vm183_vm1, %v1936_v20  ;;  %v2021_v4 = vld [vmem:[%s2787_s1 + $0xe8] sm:$0xff]  ;;  %v2020_v8 = vld [vmem:[%s2787_s1 + $0xe0] sm:$0xff]  ;;  %v2028_v9 = vld [vmem:[%s2787_s1 + $0xf0] sm:$0xff] }
  0x23   : > { %2172 = vmatpush3.msra.mxu0 %v1946_v21  ;;  %2153 = vmatprep.mubr.msk.f32.mxu0 %vm2353_vm0, %v2352_v2  ;;  %v2003_v10 = vld [vmem:[%s2408_s25 + $0x55] sm:$0xf]  ;;  %v2017_v12 = vld [vmem:[%s2408_s25 + $0x46] sm:$0xff] }
  0x24   : > { %2166 = vmatprep.mubr.msk.f32.mxu1 %vm2353_vm0, %v2352_v2  ;;  %2185 = vmatpush3.msra.mxu1 %v1954_v22  ;;  %v2011_v11 = vld [vmem:[%s2408_s25 + $0x75] sm:$0xf]  ;;  %v2025_v13 = vld [vmem:[%s2408_s25 + $0x66] sm:$0xff] }
  0x25   : > { %2195 = vmatprep.subr.mxu0 %v2352_v2  ;;  %2208 = vmatprep.subr.mxu1 %v2352_v2  ;;  %v2018_v14 = vld [vmem:[%s2408_s25 + $0x4e] sm:$0xff]  ;;  %v2019_v16 = vld [vmem:[%s2408_s25 + $0x56] sm:$0xf] }
  0x26   : > { %2154 = vmatmul.mubr.msk.f32.gmra.mxu0 %vm183_vm1, %v364_v23  ;;  %2167 = vmatmul.mubr.msk.f32.gmra.mxu1 %vm183_vm1, %v1937_v24  ;;  %v2026_v15 = vld [vmem:[%s2408_s25 + $0x6e] sm:$0xff]  ;;  %v2027_v17 = vld [vmem:[%s2408_s25 + $0x76] sm:$0xf] }
  0x27   : > { %2173 = vmatprep.mubr.msk.f32.mxu0 %vm2353_vm0, %v2352_v2  ;;  %2186 = vmatprep.mubr.msk.f32.mxu1 %vm2353_vm0, %v2352_v2 }
  0x2a   : > { %2174 = vmatmul.mubr.msk.f32.vlgmr.msra.gmra.mxu0 %vm183_vm1, %v1943_v25  ;;  %2187 = vmatmul.mubr.msk.f32.vlgmr.msra.gmra.mxu1 %vm183_vm1, %v1951_v26 }
  0x2b   : > { %2196 = vmatpush3.msra.mxu0 %v1963_v27  ;;  %2209 = vmatpush3.msra.mxu1 %v1971_v28 }
  0x2c   : > { %2176 = vmatprep.mubr.msk.f32.mxu0 %vm2353_vm0, %v2352_v2  ;;  %2189 = vmatprep.mubr.msk.f32.mxu1 %vm2353_vm0, %v2352_v2 }
  0x2d   : > { %2197 = vmatprep.subr.mxu0 %v2352_v2  ;;  %2210 = vmatprep.subr.mxu1 %v2352_v2 }
  0x2e   : > { %2177 = vmatmul.mubr.msk.f32.gmra.mxu0 %vm183_vm1, %v1944_v29  ;;  %2190 = vmatmul.mubr.msk.f32.gmra.mxu1 %vm183_vm1, %v1952_v30 }
  0x2f   : > { %2198 = vmatpush3.msra.mxu0 %v1962_v31  ;;  %2179 = vmatprep.mubr.msk.f32.mxu0 %vm2353_vm0, %v2352_v2 }
  0x30   : > { %2192 = vmatprep.mubr.msk.f32.mxu1 %vm2353_vm0, %v2352_v2  ;;  %2211 = vmatpush3.msra.mxu1 %v1970_v32 }
  0x31   : > { %2221 = vmatprep.subr.mxu0 %v2352_v2  ;;  %2234 = vmatprep.subr.mxu1 %v2352_v2 }
  0x32   : > { %2180 = vmatmul.mubr.msk.f32.gmra.mxu0 %vm183_vm1, %v1945_v33  ;;  %2193 = vmatmul.mubr.msk.f32.gmra.mxu1 %vm183_vm1, %v1953_v34 }
  0x33   : > { %2199 = vmatprep.mubr.msk.f32.mxu0 %vm2353_vm0, %v2352_v2  ;;  %2212 = vmatprep.mubr.msk.f32.mxu1 %vm2353_vm0, %v2352_v2 }
  0x36   : > { %2200 = vmatmul.mubr.msk.f32.vlgmr.msra.gmra.mxu0 %vm183_vm1, %v1959_v35  ;;  %2213 = vmatmul.mubr.msk.f32.vlgmr.msra.gmra.mxu1 %vm183_vm1, %v1967_v36 }
  0x37   : > { %2222 = vmatpush3.msra.mxu0 %v1976_v37  ;;  %2235 = vmatpush3.msra.mxu1 %v1984_v38 }
  0x38   : > { %2202 = vmatprep.mubr.msk.f32.mxu0 %vm2353_vm0, %v2352_v2  ;;  %2215 = vmatprep.mubr.msk.f32.mxu1 %vm2353_vm0, %v2352_v2 }
  0x39   : > { %2223 = vmatprep.subr.mxu0 %v2352_v2  ;;  %2236 = vmatprep.subr.mxu1 %v2352_v2 }
  0x3a   : > { %2203 = vmatmul.mubr.msk.f32.gmra.mxu0 %vm183_vm1, %v1960_v39  ;;  %2216 = vmatmul.mubr.msk.f32.gmra.mxu1 %vm183_vm1, %v1968_v40 }
  0x3b   : > { %2224 = vmatpush3.msra.mxu0 %v1975_v41  ;;  %2205 = vmatprep.mubr.msk.f32.mxu0 %vm2353_vm0, %v2352_v2 }
  0x3c   : > { %2218 = vmatprep.mubr.msk.f32.mxu1 %vm2353_vm0, %v2352_v2  ;;  %2237 = vmatpush3.msra.mxu1 %v1983_v42 }
  0x3d   : > { %2247 = vmatprep.subr.mxu0 %v2352_v2  ;;  %2260 = vmatprep.subr.mxu1 %v2352_v2 }
  0x3e   : > { %2206 = vmatmul.mubr.msk.f32.gmra.mxu0 %vm183_vm1, %v1961_v43  ;;  %2219 = vmatmul.mubr.msk.f32.gmra.mxu1 %vm183_vm1, %v1969_v44 }
  0x3f   : > { %2225 = vmatprep.mubr.msk.f32.mxu0 %vm2353_vm0, %v2352_v2  ;;  %2238 = vmatprep.mubr.msk.f32.mxu1 %vm2353_vm0, %v2352_v2 }
  0x42   : > { %2226 = vmatmul.mubr.msk.f32.vlgmr.msra.gmra.mxu0 %vm183_vm1, %v952_v45  ;;  %2239 = vmatmul.mubr.msk.f32.vlgmr.msra.gmra.mxu1 %vm183_vm1, %v1980_v46 }
  0x43   : > { %2248 = vmatpush3.msra.mxu0 %v1989_v47  ;;  %2261 = vmatpush3.msra.mxu1 %v1997_v48 }
  0x44   : > { %2228 = vmatprep.mubr.msk.f32.mxu0 %vm2353_vm0, %v2352_v2  ;;  %2241 = vmatprep.mubr.msk.f32.mxu1 %vm2353_vm0, %v2352_v2 }
  0x45   : > { %2249 = vmatprep.subr.mxu0 %v2352_v2  ;;  %2262 = vmatprep.subr.mxu1 %v2352_v2 }
  0x46   : > { %2229 = vmatmul.mubr.msk.f32.gmra.mxu0 %vm183_vm1, %v953_v49  ;;  %2242 = vmatmul.mubr.msk.f32.gmra.mxu1 %vm183_vm1, %v1981_v50 }
  0x47   : > { %2250 = vmatpush3.msra.mxu0 %v1988_v51  ;;  %2231 = vmatprep.mubr.msk.f32.mxu0 %vm2353_vm0, %v2352_v2 }
  0x48   : > { %2244 = vmatprep.mubr.msk.f32.mxu1 %vm2353_vm0, %v2352_v2  ;;  %2263 = vmatpush3.msra.mxu1 %v1996_v52 }
  0x49   : > { %2273 = vmatprep.subr.mxu0 %v2352_v2  ;;  %2286 = vmatprep.subr.mxu1 %v2352_v2 }
  0x4a   : > { %2232 = vmatmul.mubr.msk.f32.gmra.mxu0 %vm183_vm1, %v954_v53  ;;  %2245 = vmatmul.mubr.msk.f32.gmra.mxu1 %vm183_vm1, %v1982_v54 }
  0x4b   : > { %2251 = vmatprep.mubr.msk.f32.mxu0 %vm2353_vm0, %v2352_v2  ;;  %2264 = vmatprep.mubr.msk.f32.mxu1 %vm2353_vm0, %v2352_v2 }
  0x4e   : > { %2252 = vmatmul.mubr.msk.f32.vlgmr.msra.gmra.mxu0 %vm183_vm1, %v1148_v55  ;;  %2265 = vmatmul.mubr.msk.f32.vlgmr.msra.gmra.mxu1 %vm183_vm1, %v1993_v56 }
  0x4f   : > { %2274 = vmatpush3.msra.mxu0 %v2005_v57  ;;  %2287 = vmatpush3.msra.mxu1 %v2013_v58 }
  0x50   : > { %2254 = vmatprep.mubr.msk.f32.mxu0 %vm2353_vm0, %v2352_v2  ;;  %2267 = vmatprep.mubr.msk.f32.mxu1 %vm2353_vm0, %v2352_v2 }
  0x51   : > { %2275 = vmatprep.subr.mxu0 %v2352_v2  ;;  %2288 = vmatprep.subr.mxu1 %v2352_v2 }
  0x52   : > { %2255 = vmatmul.mubr.msk.f32.gmra.mxu0 %vm183_vm1, %v1149_v59  ;;  %2268 = vmatmul.mubr.msk.f32.gmra.mxu1 %vm183_vm1, %v1994_v60 }
  0x53   : > { %2276 = vmatpush3.msra.mxu0 %v2004_v61  ;;  %2257 = vmatprep.mubr.msk.f32.mxu0 %vm2353_vm0, %v2352_v2 }
  0x54   : > { %2270 = vmatprep.mubr.msk.f32.mxu1 %vm2353_vm0, %v2352_v2  ;;  %2289 = vmatpush3.msra.mxu1 %v2012_v62 }
  0x55   : > { %2299 = vmatprep.subr.mxu0 %v2352_v2  ;;  %2312 = vmatprep.subr.mxu1 %v2352_v2 }
  0x56   : > { %2258 = vmatmul.mubr.msk.f32.gmra.mxu0 %vm183_vm1, %v1150_v63  ;;  %2271 = vmatmul.mubr.msk.f32.gmra.mxu1 %vm183_vm1, %v1995_v0 }
  0x57   : > { %2277 = vmatprep.mubr.msk.f32.mxu0 %vm2353_vm0, %v2352_v2  ;;  %2290 = vmatprep.mubr.msk.f32.mxu1 %vm2353_vm0, %v2352_v2 }
  0x5a   : > { %2278 = vmatmul.mubr.msk.f32.vlgmr.msra.gmra.mxu0 %vm183_vm1, %v2001_v1  ;;  %2291 = vmatmul.mubr.msk.f32.vlgmr.msra.gmra.mxu1 %vm183_vm1, %v2009_v3 }
  0x5b   : > { %2300 = vmatpush3.msra.mxu0 %v2021_v4  ;;  %2313 = vmatpush3.msra.mxu1 %v2029_v5 }
  0x5c   : > { %2280 = vmatprep.mubr.msk.f32.mxu0 %vm2353_vm0, %v2352_v2  ;;  %2293 = vmatprep.mubr.msk.f32.mxu1 %vm2353_vm0, %v2352_v2 }
  0x5d   : > { %2301 = vmatprep.subr.mxu0 %v2352_v2  ;;  %2314 = vmatprep.subr.mxu1 %v2352_v2 }
  0x5e   : > { %2281 = vmatmul.mubr.msk.f32.gmra.mxu0 %vm183_vm1, %v2002_v6  ;;  %2294 = vmatmul.mubr.msk.f32.gmra.mxu1 %vm183_vm1, %v2010_v7 }
  0x5f   : > { %2302 = vmatpush3.msra.mxu0 %v2020_v8  ;;  %2283 = vmatprep.mubr.msk.f32.mxu0 %vm2353_vm0, %v2352_v2 }
  0x60   : > { %2296 = vmatprep.mubr.msk.f32.mxu1 %vm2353_vm0, %v2352_v2  ;;  %2315 = vmatpush3.msra.mxu1 %v2028_v9 }
  0x62   : > { %2284 = vmatmul.mubr.msk.f32.gmra.mxu0 %vm183_vm1, %v2003_v10  ;;  %2297 = vmatmul.mubr.msk.f32.gmra.mxu1 %vm183_vm1, %v2011_v11 }
  0x63   : > { %2303 = vmatprep.mubr.msk.f32.mxu0 %vm2353_vm0, %v2352_v2  ;;  %2316 = vmatprep.mubr.msk.f32.mxu1 %vm2353_vm0, %v2352_v2 }
  0x66   : > { %2304 = vmatmul.mubr.msk.f32.vlgmr.msra.gmra.mxu0 %vm183_vm1, %v2017_v12  ;;  %2317 = vmatmul.mubr.msk.f32.vlgmr.msra.gmra.mxu1 %vm183_vm1, %v2025_v13  ;;  %v1746_v13 = vlaneseq }
  0x67   : > { %2306 = vmatprep.mubr.msk.f32.mxu0 %vm2353_vm0, %v2352_v2  ;;  %2319 = vmatprep.mubr.msk.f32.mxu1 %vm2353_vm0, %v2352_v2 }
  0x6a   : > { %2307 = vmatmul.mubr.msk.f32.gmra.mxu0 %vm183_vm1, %v2018_v14  ;;  %2320 = vmatmul.mubr.msk.f32.gmra.mxu1 %vm183_vm1, %v2026_v15 }
  0x6b   : > { %2309 = vmatprep.mubr.msk.f32.mxu0 %vm2353_vm0, %v2352_v2  ;;  %2322 = vmatprep.mubr.msk.f32.mxu1 %vm2353_vm0, %v2352_v2 }
  0x6e   : > { %2310 = vmatmul.mubr.msk.f32.gmra.mxu0 %vm183_vm1, %v2019_v16  ;;  %2323 = vmatmul.mubr.msk.f32.gmra.mxu1 %vm183_vm1, %v2027_v17 }
  0xd2   : > { %v259_v18 = vpop.f32.mrf.mxu0  ;;  %v348_v19 = vpop.f32.mrf.mxu1 }
  0xd3   : > { %v349_v20 = vadd.f32 %v348_v19, %v259_v18 }
  0xd4   : > { %v2123_v21 = vpop.f32.mrf.mxu0  ;;  %v2136_v22 = vpop.f32.mrf.mxu1 }
  0xd6   : > { %v264_v23 = vpop.f32.mrf.mxu0  ;;  %v353_v24 = vpop.f32.mrf.mxu1 }
  0xd7   : > { %v354_v8 = vadd.f32 %v353_v24, %v264_v23 }
  0xd8   : > { %v2126_v25 = vpop.f32.mrf.mxu0  ;;  %v2139_v26 = vpop.f32.mrf.mxu1 }
  0xd9   : > { %v1747_v25 = vshrl.u32 %v1746_v13, 7 }
  0xda   : > { %v269_v27 = vpop.f32.mrf.mxu0  ;;  %v358_v28 = vpop.f32.mrf.mxu1 }
  0xdb   : > { %v359_v16 = vadd.f32 %v358_v28, %v269_v27  ;;  %v1749_v27 = vadd.s32 16, %v1747_v25 }
  0xdc   : > { %v2129_v29 = vpop.f32.mrf.mxu0  ;;  %v2142_v30 = vpop.f32.mrf.mxu1 }
  0xde   : > { %v443_v2 = vpop.f32.mrf.mxu0  ;;  %v541_v31 = vpop.f32.mrf.mxu1 }
  0xdf   : > { %v457_v5 = vadd.f32 %v443_v2, %v349_v20  ;;  %v1748_v2 = vadd.s32 8, %v1747_v25 }
  0xe0   : > { %v2149_v32 = vpop.f32.mrf.mxu0  ;;  %v2162_v33 = vpop.f32.mrf.mxu1 }
  0xe1   : > { %v555_v11 = vadd.f32 %v541_v31, %v457_v5 }
  0xe2   : > { %v448_v34 = vpop.f32.mrf.mxu0  ;;  %v546_v35 = vpop.f32.mrf.mxu1 }
  0xe3   : > { %v458_v12 = vadd.f32 %v448_v34, %v354_v8 }
  0xe4   : > { %v2152_v36 = vpop.f32.mrf.mxu0  ;;  %v2165_v37 = vpop.f32.mrf.mxu1 }
  0xe5   : > { %v556_v21 = vadd.f32 %v546_v35, %v458_v12  ;;  %v2712_v36 = vmul.u32.u64.low 3435973837, %v1747_v25  ;;  %v2713_v37 = vmul.u32.u64.high 3435973837, %v1747_v25, %v2712_v36 }
  0xe6   : > { %v453_v38 = vpop.f32.mrf.mxu0  ;;  %v551_v39 = vpop.f32.mrf.mxu1 }
  0xe7   : > { %v459_v22 = vadd.f32 %v453_v38, %v359_v16  ;;  %v2715_v35 = vmul.u32.u64.low 3435973837, %v1748_v2  ;;  %v2716_v38 = vmul.u32.u64.high 3435973837, %v1748_v2, %v2715_v35 }
  0xe8   : > { %v2155_v40 = vpop.f32.mrf.mxu0  ;;  %v2168_v41 = vpop.f32.mrf.mxu1 }
  0xe9   : > { %v557_v32 = vadd.f32 %v551_v39, %v459_v22 }
  0xea   : > { %v640_v42 = vpop.f32.mrf.mxu0  ;;  %v739_v43 = vpop.f32.mrf.mxu1 }
  0xeb   : > { %v654_v17 = vadd.f32 %v640_v42, %v555_v11 }
  0xec   : > { %v2175_v44 = vpop.f32.mrf.mxu0  ;;  %v2188_v45 = vpop.f32.mrf.mxu1 }
  0xed   : > { %v753_v20 = vadd.f32 %v739_v43, %v654_v17 }
  0xee   : > { %v645_v46 = vpop.f32.mrf.mxu0  ;;  %v744_v47 = vpop.f32.mrf.mxu1 }
  0xef   : > { %v655_v30 = vadd.f32 %v645_v46, %v556_v21 }
  0xf0   : > { %v2178_v48 = vpop.f32.mrf.mxu0  ;;  %v2191_v49 = vpop.f32.mrf.mxu1 }
  0xf1   : > { %v754_v28 = vadd.f32 %v744_v47, %v655_v30  ;;  %v2718_v48 = vmul.u32.u64.low 3435973837, %v1749_v27  ;;  %v2719_v39 = vmul.u32.u64.high 3435973837, %v1749_v27, %v2718_v48 }
  0xf2   : > { %v650_v50 = vpop.f32.mrf.mxu0  ;;  %v749_v51 = vpop.f32.mrf.mxu1 }
  0xf3   : > { %v656_v40 = vadd.f32 %v650_v50, %v557_v32  ;;  %v1778_v8 = vshrl.u32 %v2719_v39, 2 }
  0xf4   : > { %v2181_v52 = vpop.f32.mrf.mxu0  ;;  %v2194_v53 = vpop.f32.mrf.mxu1 }
  0xf5   : > { %v755_v49 = vadd.f32 %v749_v51, %v656_v40  ;;  %v1779_v17 = vmul.u32 5, %v1778_v8 }
  0xf6   : > { %v837_v54 = vpop.f32.mrf.mxu0  ;;  %v935_v55 = vpop.f32.mrf.mxu1 }
  0xf7   : > { %v851_v31 = vadd.f32 %v837_v54, %v753_v20 }
  0xf8   : > { %v2201_v56 = vpop.f32.mrf.mxu0  ;;  %v2214_v57 = vpop.f32.mrf.mxu1 }
  0xf9   : > { %v949_v43 = vadd.f32 %v935_v55, %v851_v31  ;;  %v1767_v55 = vshrl.u32 %v2716_v38, 2 }
  0xfa   : > { %v842_v58 = vpop.f32.mrf.mxu0  ;;  %v940_v59 = vpop.f32.mrf.mxu1 }
  0xfb   : > { %v852_v44 = vadd.f32 %v842_v58, %v754_v28  ;;  %v1768_v11 = vmul.u32 5, %v1767_v55 }
  0xfc   : > { %v2204_v60 = vpop.f32.mrf.mxu0  ;;  %v2217_v61 = vpop.f32.mrf.mxu1 }
  0xfd   : > { %v950_v56 = vadd.f32 %v940_v59, %v852_v44  ;;  %v1756_v60 = vshrl.u32 %v2713_v37, 2 }
  0xfe   : > { %v847_v62 = vpop.f32.mrf.mxu0  ;;  %v2710_v63 = vpop.f32.mrf.mxu1 }
  0xff   : > { %v853_v57 = vadd.f32 %v847_v62, %v755_v49 }
 0x100   : > { %v2207_v0 = vpop.f32.mrf.mxu0  ;;  %v2220_v1 = vpop.f32.mrf.mxu1 }
 0x101   : > { %v951_v5 = vadd.f32 %v2710_v63, %v853_v57  ;;  %v1769_v63 = vsub.s32 %v1748_v2, %v1768_v11 }
 0x102   : > { %v1033_v3 = vpop.f32.mrf.mxu0  ;;  %v1131_v4 = vpop.f32.mrf.mxu1 }
 0x103   : > { %v1047_v52 = vadd.f32 %v1033_v3, %v949_v43  ;;  %v1757_v3 = vmul.u32 5, %v1756_v60  ;;  %vm1784_vm4 = vcmp.ne.s32.totalorder %v1769_v63, 0  ;;  %vm1787_vm5 = vcmp.lt.s32.totalorder %v1769_v63, 0 }
 0x104   : > { %v2227_v6 = vpop.f32.mrf.mxu0  ;;  %v2240_v7 = vpop.f32.mrf.mxu1  ;;  %v1793_v36 = vadd.s32 5, %v1769_v63  ;;  %vm2729_vm7 = vmand %vm1787_vm5, %vm1784_vm4 }
 0x105   : > { %v1145_v61 = vadd.f32 %v1131_v4, %v1047_v52  ;;  %v1758_v16 = vsub.s32 %v1747_v25, %v1757_v3 }
 0x106   : > { %v1038_v9 = vpop.f32.mrf.mxu0  ;;  %v1136_v10 = vpop.f32.mrf.mxu1 }
 0x107   : > { %v1048_v0 = vadd.f32 %v1038_v9, %v950_v56  ;;  %vm1783_vm2 = vcmp.ne.s32.totalorder %v1758_v16, 0  ;;  %vm1786_vm3 = vcmp.lt.s32.totalorder %v1758_v16, 0  ;;  %v1792_v2 = vadd.s32 5, %v1758_v16 }
 0x108   : > { %v2230_v14 = vpop.f32.mrf.mxu0  ;;  %v2243_v15 = vpop.f32.mrf.mxu1  ;;  %vm2725_vm6 = vmand %vm1786_vm3, %vm1783_vm2 }
 0x109   : > { %v1146_v59 = vadd.f32 %v1136_v10, %v1048_v0  ;;  %v1780_v10 = vsub.s32 %v1749_v27, %v1779_v17  ;;  %v1795_v44 = vsel %vm2725_vm6, %v1792_v2, %v1758_v16 }
 0x10a   : > { %v1043_v18 = vpop.f32.mrf.mxu0  ;;  %v1141_v19 = vpop.f32.mrf.mxu1  ;;  %vm2744_vm11 = vcmp.lt.s32.totalorder %v1795_v44, 4 }
 0x10b   : > { %v1049_v62 = vadd.f32 %v1043_v18, %v951_v5  ;;  %vm1785_vm8 = vcmp.ne.s32.totalorder %v1780_v10, 0  ;;  %vm1788_vm9 = vcmp.lt.s32.totalorder %v1780_v10, 0  ;;  %v1794_v48 = vadd.s32 5, %v1780_v10 }
 0x10c   : > { %v2233_v26 = vpop.f32.mrf.mxu0  ;;  %v2246_v29 = vpop.f32.mrf.mxu1  ;;  %vm2740_vm10 = vmand %vm1788_vm9, %vm1785_vm8 }
 0x10d   : > { %v1147_v21 = vadd.f32 %v1141_v19, %v1049_v62  ;;  %v1797_v55 = vsel %vm2740_vm10, %v1794_v48, %v1780_v10 }
 0x10e   : > { %v1229_v23 = vpop.f32.mrf.mxu0  ;;  %v1327_v24 = vpop.f32.mrf.mxu1  ;;  %vm2759_vm14 = vcmp.lt.s32.totalorder %v1797_v55, 4 }
 0x10f   : > { %v1243_v6 = vadd.f32 %v1229_v23, %v1145_v61 }
 0x110   : > { %v2253_v33 = vpop.f32.mrf.mxu0  ;;  %v2266_v34 = vpop.f32.mrf.mxu1 }
 0x111   : > { %v1341_v14 = vadd.f32 %v1327_v24, %v1243_v6 }
 0x112   : > { %v1234_v41 = vpop.f32.mrf.mxu0  ;;  %v1332_v42 = vpop.f32.mrf.mxu1 }
 0x113   : > { %v1244_v4 = vadd.f32 %v1234_v41, %v1146_v59  ;;  %v2033_v41 = vld [vmem:[%s2788_s2] ss:$0 sm:$0xff] }
 0x114   : > { %v2256_v45 = vpop.f32.mrf.mxu0  ;;  %v2269_v46 = vpop.f32.mrf.mxu1 }
 0x115   : > { %v1342_v20 = vadd.f32 %v1332_v42, %v1244_v4  ;;  %v1796_v46 = vsel %vm2729_vm7, %v1793_v36, %v1769_v63 }
 0x116   : > { %v1239_v53 = vpop.f32.mrf.mxu0  ;;  %v1337_v54 = vpop.f32.mrf.mxu1  ;;  %vm2748_vm12 = vcmp.lt.s32.totalorder %v1796_v46, 4 }
 0x117   : > { %v1245_v30 = vadd.f32 %v1239_v53, %v1147_v21 }
 0x118   : > { %v2259_v47 = vpop.f32.mrf.mxu0  ;;  %v2272_v50 = vpop.f32.mrf.mxu1 }
 0x119   : > { %v1343_v25 = vadd.f32 %v1337_v54, %v1245_v30 }
 0x11a   : > { %v1425_v58 = vpop.f32.mrf.mxu0  ;;  %v1523_v1 = vpop.f32.mrf.mxu1 }
 0x11b   : > { %v1439_v22 = vadd.f32 %v1425_v58, %v1341_v14 }
 0x11c   : > { %v2279_v7 = vpop.f32.mrf.mxu0  ;;  %v2292_v51 = vpop.f32.mrf.mxu1 }
 0x11d   : > { %v1537_v18 = vadd.f32 %v1523_v1, %v1439_v22 }
 0x11e   : > { %v1430_v12 = vpop.f32.mrf.mxu0  ;;  %v1528_v13 = vpop.f32.mrf.mxu1 }
 0x11f   : > { %v1440_v31 = vadd.f32 %v1430_v12, %v1342_v20 }
 0x120   : > { %v2282_v9 = vpop.f32.mrf.mxu0  ;;  %v2295_v15 = vpop.f32.mrf.mxu1 }
 0x121   : > { %v1538_v27 = vadd.f32 %v1528_v13, %v1440_v31 }
 0x122   : > { %v1435_v26 = vpop.f32.mrf.mxu0  ;;  %v1533_v29 = vpop.f32.mrf.mxu1 }
 0x123   : > { %v1441_v35 = vadd.f32 %v1435_v26, %v1343_v25 }
 0x124   : > { %v2285_v23 = vpop.f32.mrf.mxu0  ;;  %v2298_v32 = vpop.f32.mrf.mxu1 }
 0x125   : > { %v1539_v53 = vadd.f32 %v1533_v29, %v1441_v35 }
 0x126   : > { %v1621_v24 = vpop.f32.mrf.mxu0  ;;  %v1719_v33 = vpop.f32.mrf.mxu1 }
 0x127   : > { %v1635_v34 = vadd.f32 %v1621_v24, %v1537_v18 }
 0x128   : > { %v2305_v37 = vpop.f32.mrf.mxu0  ;;  %v2318_v28 = vpop.f32.mrf.mxu1 }
 0x129   : > { %v1733_v38 = vadd.f32 %v1719_v33, %v1635_v34 }
 0x12a   : > { %v1626_v42 = vpop.f32.mrf.mxu0  ;;  %v1724_v43 = vpop.f32.mrf.mxu1 }
 0x12b   : > { %v1636_v45 = vadd.f32 %v1626_v42, %v1538_v27  ;;  %v1743_v54 = vadd.f32 %v2033_v41, %v1733_v38 }
 0x12c   : > { %v2308_v39 = vpop.f32.mrf.mxu0  ;;  %v2321_v49 = vpop.f32.mrf.mxu1 }
 0x12d   : > { %v1734_v56 = vadd.f32 %v1724_v43, %v1636_v45  ;;  %v1801_v5 = vsel %vm2744_vm11, %v1743_v54, 0.0 }
 0x12e   : > { %v1631_v50 = vpop.f32.mrf.mxu0  ;;  %v1729_v60 = vpop.f32.mrf.mxu1  ;;  %v1805_v59 = vsel %vm1804_vm13, %v1801_v5, 0.0 }
 0x12f   : > { %v1744_v61 = vadd.f32 %v2033_v41, %v1734_v56  ;;  %v1637_v0 = vadd.f32 %v1631_v50, %v1539_v53 }
 0x130   : > { %v2311_v58 = vpop.f32.mrf.mxu0  ;;  %v2324_v1 = vpop.f32.mrf.mxu1 }
 0x131   : > { %v1802_v6 = vsel %vm2748_vm12, %v1744_v61, 0.0  ;;  %v1735_v7 = vadd.f32 %v1729_v60, %v1637_v0 }
 0x132   : > { %v1806_v51 = vsel %vm1804_vm13, %v1802_v6, 0.0 }
 0x133   : > { %v1745_v8 = vadd.f32 %v2033_v41, %v1735_v7  ;;  %v1807_v62 = vadd.f32 %v1806_v51, %v1805_v59 }
 0x135   : > { %v1803_v11 = vsel %vm2759_vm14, %v1745_v8, 0.0 }
 0x136   : > { %v1809_v12 = vsel %vm1808_vm15, %v1803_v11, 0.0 }
 0x137   : > { %v1810_v13 = vadd.f32 %v1809_v12, %v1807_v62 }
 0x139   : > { %v1811_v14 = vrot.slane %v1810_v13, 4 }
 0x13b   : > { %v1812_v4 = vadd.f32 %v1811_v14, %v1810_v13 }
 0x13d   : > { %v1813_v9 = vrot.slane %v1812_v4, 2 }
 0x13f   : > { %v1814_v15 = vadd.f32 %v1813_v9, %v1812_v4 }
 0x141   : > { %v1815_v16 = vrot.slane %v1814_v15, 1 }
 0x143   : > { %v1816_v17 = vadd.f32 %v1815_v16, %v1814_v15 }
 0x145   : > { %v1817_v21 = vmul.f32 0.0625, %v1816_v17 }
 0x147   : > { %v1818_v22 = vsub.f32 %v1743_v54, %v1817_v21  ;;  %v1819_v63 = vsub.f32 %v1744_v61, %v1817_v21  ;;  %v1820_v26 = vsub.f32 %v1745_v8, %v1817_v21 }
 0x149   : > { %v1821_v29 = vmul.f32 %v1818_v22, %v1818_v22  ;;  %v1822_v20 = vmul.f32 %v1819_v63, %v1819_v63  ;;  %v1823_v30 = vmul.f32 %v1820_v26, %v1820_v26 }
 0x14b   : > { %v1824_v23 = vsel %vm2744_vm11, %v1821_v29, 0.0  ;;  %v1825_v32 = vsel %vm2748_vm12, %v1822_v20, 0.0  ;;  %v1826_v10 = vsel %vm2759_vm14, %v1823_v30, 0.0 }
 0x14c   : > { %v1827_v18 = vsel %vm1804_vm13, %v1824_v23, 0.0  ;;  %v1828_v31 = vsel %vm1804_vm13, %v1825_v32, 0.0  ;;  %v1830_v33 = vsel %vm1808_vm15, %v1826_v10, 0.0 }
 0x14d   : > { %v1829_v24 = vadd.f32 %v1828_v31, %v1827_v18 }
 0x14f   : > { %v1831_v25 = vadd.f32 %v1830_v33, %v1829_v24 }
 0x151   : > { %v1832_v34 = vrot.slane %v1831_v25, 4 }
 0x153   : > { %v1833_v19 = vadd.f32 %v1832_v34, %v1831_v25 }
 0x155   : > { %v1834_v2 = vrot.slane %v1833_v19, 2 }
 0x157   : > { %v1835_v36 = vadd.f32 %v1834_v2, %v1833_v19 }
 0x159   : > { %v1836_v37 = vrot.slane %v1835_v36, 1 }
 0x15b   : > { %v1837_v28 = vadd.f32 %v1836_v37, %v1835_v36 }
 0x15d   : > { %v1838_v40 = vmul.f32 0.0625, %v1837_v28 }
 0x15f   : > { %v1839_v27 = vadd.f32 1e-05, %v1838_v40 }
 0x161   : > { %2342 = vrsqrt.f32 %v1839_v27 }
 0x16e   : > { %v2343_v35 = vpop.eup %2342 }
 0x16f   : > { %v1841_v38 = vmul.f32 %v2343_v35, %v1818_v22  ;;  %v1842_v41 = vmul.f32 %v2343_v35, %v1819_v63  ;;  %v1843_v42 = vmul.f32 %v2343_v35, %v1820_v26 }
 0x171   : > { %vm1844_vm0 = vcmp.ge.f32.partialorder %v1841_v38, 0.0  ;;  %vm1845_vm1 = vcmp.ge.f32.partialorder %v1842_v41, 0.0  ;;  %vm1846_vm2 = vcmp.ge.f32.partialorder %v1843_v42, 0.0  ;;  %v1847_v43 = vmul.f32 0.2, %v1841_v38 }
 0x172   : > { %v1848_v44 = vmul.f32 0.2, %v1842_v41  ;;  %v1849_v45 = vmul.f32 0.2, %v1843_v42 }
 0x173   : > { %v1850_v46 = vsel %vm1844_vm0, %v1841_v38, %v1847_v43 }
 0x174   : > { %v1851_v48 = vsel %vm1845_vm1, %v1842_v41, %v1848_v44  ;;  %v1852_v39 = vsel %vm1846_vm2, %v1843_v42, %v1849_v45  ;;  %1853 = vst.msk [vmem:[%s170_s11] sm:$0xff] %vm1804_vm13, %v1850_v46 }
 0x175   : > { %1854 = vst.msk [vmem:[%s170_s11 + $0x8] sm:$0xff] %vm1804_vm13, %v1851_v48 }
 0x176   : > { %1855 = vst.msk [vmem:[%s170_s11 + $0x10] sm:$0xf] %vm1808_vm15, %v1852_v39 }
 0x177 PF: > { %s13_s12 = sadd.s32 1, %s2350_s12  }
 0x178   : > { %p10_p4 = scmp.ge.s32.totalorder %s13_s12, 4  }
 0x17a   :  { %12 = sbr.rel (!%p10_p4) target bundleno = 1 (0x1), region = 80 }

// kernel: discriminator_forward.8
= control target key start
LH: loop header
LB: loop body
LE: loop exit
PB: predicated region body
PF: predicated region fallthrough
CT: control target
= control target key end

     0   :  { %s2492_s12 = smov 0   ;;  %s3047_s0 = inlined_call_operand.vmem [shape: f32[2,1,42,32], index: 0, kind: input, shape index: {}]   ;;  %s3048_s1 = inlined_call_operand.vmem [shape: f32[16,32,64], index: 1, kind: input, shape index: {}]   ;;  %s3049_s2 = inlined_call_operand.vmem [shape: f32[1,64], index: 2, kind: input, shape index: {}]   ;;  %s3050_s3 = inlined_call_operand.vmem [shape: f32[2,18,64], index: 3, kind: output, shape index: {}]  }
   0x1 LB: > { %s1940_s13 = sadd.s32 4294967295, %s2468_s12   ;;  %p1944_p0 = scmp.ge.s32.totalorder %s2468_s12, 1  ;;  %s2468_s12 = sphi %s2492_s12, %s13_s12  }
   0x2   : > { %p137_p1 = scmp.lt.s32.totalorder %s2468_s12, 3 }
   0x4   : > { %p138_p2 = pnand %p1944_p0, %p137_p1 }
   0x5   : > { %p161_p3 = scmp.lt.s32.totalorder (!%p138_p2), %s1940_s13, 1 }
   0x6   : > { %141 = sbr.rel (%p138_p2) target bundleno = 391 (0x187), region = 32 }
   0xb   : > { %v1950_v0 = vld [vmem:[%s3048_s1 + $0x38] sm:$0xff]  ;;  %v2470_v2 = vmov 0.0   ;;  %v1949_v3 = vld [vmem:[%s3048_s1 + $0x30] sm:$0xff]  ;;  %s3064_s13 = smov (!%p161_p3, %s1940_s13), 1  ;;  %v1948_v5 = vld [vmem:[%s3048_s1 + $0x28] sm:$0xff]  ;;  %vm186_vm0 = vcmask 261120  }
   0xc   : > { %v177_v1 = vld [vmem:[%s3048_s1 + $0x18] sm:$0xff]  ;;  %2170 = vmatprep.subr.mxu0 %v2470_v2  ;;  %2187 = vmatprep.subr.mxu1 %v2470_v2  ;;  %v176_v4 = vld [vmem:[%s3048_s1 + $0x10] sm:$0xff]  ;;  %v175_v6 = vld [vmem:[%s3048_s1 + $0x8] sm:$0xff]  ;;  %s2442_s26 = smul.u32 48, %s3064_s13  ;;  %vm2471_vm1 = vmmov 0   ;;  %vm1833_vm12 = vcmask 523264  }
   0xd   : > { %2171 = vmatpush3.msra.mxu0 %v1950_v0  ;;  %2188 = vmatpush3.msra.mxu1 %v177_v1  ;;  %v1947_v7 = vld [vmem:[%s3048_s1 + $0x20] sm:$0xff]  ;;  %v1960_v11 = vld [vmem:[%s3048_s1 + $0x58] sm:$0xff]  ;;  %v1959_v14 = vld [vmem:[%s3048_s1 + $0x50] sm:$0xff]  ;;  %vm1837_vm15 = vcmask 517120  }
   0xe   : > { %2172 = vmatprep.subr.mxu0 %v2470_v2  ;;  %2189 = vmatprep.subr.mxu1 %v2470_v2  ;;  %s2533_s4 = scalar_lea.vmem %s3047_s0, %s2442_s26  ;;  %v174_v8 = vld [vmem:[%s3048_s1] sm:$0xff]  ;;  %v1967_v12 = vld [vmem:[%s3048_s1 + $0x78] sm:$0xff]  ;;  %v1966_v16 = vld [vmem:[%s3048_s1 + $0x70] sm:$0xff]  ;;  %s2443_s26 = smul.u32 24, %s3064_s13 }
   0xf   : > { %2173 = vmatpush3.msra.mxu0 %v1949_v3  ;;  %2190 = vmatpush3.msra.mxu1 %v176_v4  ;;  %v178_v9 = vld [vmem:[%s2533_s4 + $0x1] sm:$0xff]  ;;  %v2556_v13 = vld [vmem:[%s2533_s4 + $0x9] sm:$0xff]  ;;  %v180_v18 = vld [vmem:[%s2533_s4 + $0x11] sm:$0x3] }
  0x10   : > { %2174 = vmatprep.subr.mxu0 %v2470_v2  ;;  %2191 = vmatprep.subr.mxu1 %v2470_v2  ;;  %v171_v10 = vld [vmem:[%s2533_s4] sm:$0xff]  ;;  %v2565_v15 = vld [vmem:[%s2533_s4 + $0x8] sm:$0xff]  ;;  %v173_v19 = vld [vmem:[%s2533_s4 + $0x10] sm:$0x3]  ;;  %s170_s29 = scalar_lea.vmem %s3050_s3, %s2443_s26 }
  0x11   : > { %2175 = vmatpush3.msra.mxu0 %v1948_v5  ;;  %2192 = vmatpush3.msra.mxu1 %v175_v6  ;;  %v1958_v17 = vld [vmem:[%s3048_s1 + $0x48] sm:$0xff]  ;;  %v1957_v21 = vld [vmem:[%s3048_s1 + $0x40] sm:$0xff]  ;;  %v1974_v25 = vld [vmem:[%s3048_s1 + $0x98] sm:$0xff] }
  0x12   : > { %2176 = vmatprep.subr.mxu0 %v2470_v2  ;;  %2178 = vmatprep.mubr.msk.f32.mxu0 %vm2471_vm1, %v2470_v2  ;;  %v1965_v20 = vld [vmem:[%s3048_s1 + $0x68] sm:$0xff]  ;;  %v1964_v23 = vld [vmem:[%s3048_s1 + $0x60] sm:$0xff]  ;;  %v1981_v26 = vld [vmem:[%s3048_s1 + $0xb8] sm:$0xff] }
  0x13   : > { %2177 = vmatpush3.msra.mxu0 %v1947_v7  ;;  %2193 = vmatprep.subr.mxu1 %v2470_v2  ;;  %v365_v22 = vld [vmem:[%s2533_s4 + $0x2] sm:$0xff]  ;;  %v366_v27 = vld [vmem:[%s2533_s4 + $0xa] sm:$0xff]  ;;  %v367_v32 = vld [vmem:[%s2533_s4 + $0x12] sm:$0x3] }
  0x14   : > { %2179 = vmatmul.mubr.msk.f32.vlgmr.msra.gmra.mxu0 %vm186_vm0, %v178_v9  ;;  %2194 = vmatpush3.msra.mxu1 %v174_v8  ;;  %v465_v24 = vld [vmem:[%s2533_s4 + $0x3] sm:$0xff]  ;;  %v1973_v28 = vld [vmem:[%s3048_s1 + $0x90] sm:$0xff]  ;;  %v1988_v39 = vld [vmem:[%s3048_s1 + $0xd8] sm:$0xff] }
  0x15   : > { %2195 = vmatprep.mubr.msk.f32.mxu1 %vm2471_vm1, %v2470_v2  ;;  %2204 = vmatprep.subr.mxu0 %v2470_v2  ;;  %v466_v29 = vld [vmem:[%s2533_s4 + $0xb] sm:$0xff]  ;;  %v467_v33 = vld [vmem:[%s2533_s4 + $0x13] sm:$0x3]  ;;  %v1971_v35 = vld [vmem:[%s3048_s1 + $0x80] sm:$0xff] }
  0x16   : > { %2196 = vmatmul.mubr.msk.f32.vlgmr.msra.gmra.mxu1 %vm186_vm0, %v171_v10  ;;  %2205 = vmatpush3.msra.mxu0 %v1960_v11  ;;  %v1980_v30 = vld [vmem:[%s3048_s1 + $0xb0] sm:$0xff]  ;;  %v1972_v31 = vld [vmem:[%s3048_s1 + $0x88] sm:$0xff]  ;;  %v1978_v37 = vld [vmem:[%s3048_s1 + $0xa0] sm:$0xff] }
  0x17   : > { %2221 = vmatprep.subr.mxu1 %v2470_v2  ;;  %2181 = vmatprep.mubr.msk.f32.mxu0 %vm2471_vm1, %v2470_v2  ;;  %v1979_v34 = vld [vmem:[%s3048_s1 + $0xa8] sm:$0xff]  ;;  %v1995_v40 = vld [vmem:[%s3048_s1 + $0xf8] sm:$0xff]  ;;  %v1987_v42 = vld [vmem:[%s3048_s1 + $0xd0] sm:$0xff] }
  0x18   : > { %2206 = vmatprep.subr.mxu0 %v2470_v2  ;;  %2222 = vmatpush3.msra.mxu1 %v1967_v12  ;;  %v565_v36 = vld [vmem:[%s2533_s4 + $0x6] sm:$0xff]  ;;  %v2674_v41 = vld [vmem:[%s2533_s4 + $0xe] sm:$0xff]  ;;  %v567_v46 = vld [vmem:[%s2533_s4 + $0x16] sm:$0x3] }
  0x19   : > { %2182 = vmatmul.mubr.msk.f32.gmra.mxu0 %vm186_vm0, %v2556_v13  ;;  %2198 = vmatprep.mubr.msk.f32.mxu1 %vm2471_vm1, %v2470_v2  ;;  %v665_v38 = vld [vmem:[%s2533_s4 + $0x7] sm:$0xff]  ;;  %v2683_v43 = vld [vmem:[%s2533_s4 + $0xf] sm:$0xff]  ;;  %v667_v47 = vld [vmem:[%s2533_s4 + $0x17] sm:$0x3] }
  0x1a   : > { %2207 = vmatpush3.msra.mxu0 %v1959_v14  ;;  %2199 = vmatmul.mubr.msk.f32.gmra.mxu1 %vm186_vm0, %v2565_v15  ;;  %v1994_v44 = vld [vmem:[%s3048_s1 + $0xf0] sm:$0xff]  ;;  %v1986_v45 = vld [vmem:[%s3048_s1 + $0xc8] sm:$0xff]  ;;  %v1985_v49 = vld [vmem:[%s3048_s1 + $0xc0] sm:$0xff] }
  0x1b   : > { %2223 = vmatprep.subr.mxu1 %v2470_v2  ;;  %2208 = vmatprep.subr.mxu0 %v2470_v2  ;;  %v1993_v48 = vld [vmem:[%s3048_s1 + $0xe8] sm:$0xff]  ;;  %v1992_v50 = vld [vmem:[%s3048_s1 + $0xe0] sm:$0xff]  ;;  %v2002_v51 = vld [vmem:[%s3048_s1 + $0x118] sm:$0xff] }
  0x1c   : > { %2224 = vmatpush3.msra.mxu1 %v1966_v16  ;;  %2184 = vmatprep.mubr.msk.f32.mxu0 %vm2471_vm1, %v2470_v2  ;;  %v2009_v52 = vld [vmem:[%s3048_s1 + $0x138] sm:$0xff]  ;;  %v766_v53 = vld [vmem:[%s2533_s4 + $0x10] sm:$0xff]  ;;  %v2000_v57 = vld [vmem:[%s3048_s1 + $0x108] sm:$0xff] }
  0x1d   : > { %2209 = vmatpush3.msra.mxu0 %v1958_v17  ;;  %2201 = vmatprep.mubr.msk.f32.mxu1 %vm2471_vm1, %v2470_v2  ;;  %v2001_v54 = vld [vmem:[%s3048_s1 + $0x110] sm:$0xff]  ;;  %v767_v58 = vld [vmem:[%s2533_s4 + $0x18] sm:$0x3]  ;;  %v2007_v60 = vld [vmem:[%s3048_s1 + $0x128] sm:$0xff] }
  0x1e   : > { %2185 = vmatmul.mubr.msk.f32.gmra.mxu0 %vm186_vm0, %v180_v18  ;;  %2225 = vmatprep.subr.mxu1 %v2470_v2  ;;  %v866_v55 = vld [vmem:[%s2533_s4 + $0x11] sm:$0xff]  ;;  %v867_v59 = vld [vmem:[%s2533_s4 + $0x19] sm:$0x3]  ;;  %v1999_v61 = vld [vmem:[%s3048_s1 + $0x100] sm:$0xff] }
  0x1f   : > { %2202 = vmatmul.mubr.msk.f32.gmra.mxu1 %vm186_vm0, %v173_v19  ;;  %2210 = vmatprep.subr.mxu0 %v2470_v2  ;;  %v2008_v56 = vld [vmem:[%s3048_s1 + $0x130] sm:$0xff]  ;;  %v2006_v63 = vld [vmem:[%s3048_s1 + $0x120] sm:$0xff]  ;;  %v2016_v1 = vld [vmem:[%s3048_s1 + $0x158] sm:$0xff] }
  0x20   : > { %2226 = vmatpush3.msra.mxu1 %v1965_v20  ;;  %2211 = vmatpush3.msra.mxu0 %v1957_v21  ;;  %v965_v62 = vld [vmem:[%s2533_s4 + $0xc] sm:$0xff]  ;;  %v2023_v3 = vld [vmem:[%s3048_s1 + $0x178] sm:$0xff]  ;;  %v2013_v12 = vld [vmem:[%s3048_s1 + $0x140] sm:$0xff] }
  0x21   : > { %2212 = vmatprep.mubr.msk.f32.mxu0 %vm2471_vm1, %v2470_v2  ;;  %2227 = vmatprep.subr.mxu1 %v2470_v2  ;;  %v1065_v0 = vld [vmem:[%s2533_s4 + $0xd] sm:$0xff]  ;;  %v2801_v6 = vld [vmem:[%s2533_s4 + $0x15] sm:$0xff]  ;;  %v1067_v10 = vld [vmem:[%s2533_s4 + $0x1d] sm:$0x3] }
  0x22   : > { %2213 = vmatmul.mubr.msk.f32.vlgmr.msra.gmra.mxu0 %vm186_vm0, %v365_v22  ;;  %2228 = vmatpush3.msra.mxu1 %v1964_v23  ;;  %v2792_v4 = vld [vmem:[%s2533_s4 + $0x14] sm:$0xff]  ;;  %v2014_v8 = vld [vmem:[%s3048_s1 + $0x148] sm:$0xff]  ;;  %v967_v9 = vld [vmem:[%s2533_s4 + $0x1c] sm:$0x3] }
  0x23   : > { %2229 = vmatprep.mubr.msk.f32.mxu1 %vm2471_vm1, %v2470_v2  ;;  %2238 = vmatprep.subr.mxu0 %v2470_v2  ;;  %v2015_v5 = vld [vmem:[%s3048_s1 + $0x150] sm:$0xff]  ;;  %v2021_v11 = vld [vmem:[%s3048_s1 + $0x168] sm:$0xff]  ;;  %v2030_v14 = vld [vmem:[%s3048_s1 + $0x198] sm:$0xff] }
  0x24   : > { %2230 = vmatmul.mubr.msk.f32.vlgmr.msra.gmra.mxu1 %vm186_vm0, %v465_v24  ;;  %2239 = vmatpush3.msra.mxu0 %v1974_v25  ;;  %v2022_v7 = vld [vmem:[%s3048_s1 + $0x170] sm:$0xff]  ;;  %v2028_v20 = vld [vmem:[%s3048_s1 + $0x188] sm:$0xff]  ;;  %v1167_v21 = vld [vmem:[%s2533_s4 + $0x1e] sm:$0x3] }
  0x25   : > { %2255 = vmatprep.subr.mxu1 %v2470_v2  ;;  %2215 = vmatprep.mubr.msk.f32.mxu0 %vm2471_vm1, %v2470_v2  ;;  %v1166_v16 = vld [vmem:[%s2533_s4 + $0x16] sm:$0xff]  ;;  %v1267_v22 = vld [vmem:[%s2533_s4 + $0x1f] sm:$0x3]  ;;  %v2035_v23 = vld [vmem:[%s3048_s1 + $0x1a8] sm:$0xff] }
  0x26   : > { %2240 = vmatprep.subr.mxu0 %v2470_v2  ;;  %2256 = vmatpush3.msra.mxu1 %v1981_v26  ;;  %v2029_v17 = vld [vmem:[%s3048_s1 + $0x190] sm:$0xff]  ;;  %v2027_v24 = vld [vmem:[%s3048_s1 + $0x180] sm:$0xff] }
  0x27   : > { %2216 = vmatmul.mubr.msk.f32.gmra.mxu0 %vm186_vm0, %v366_v27  ;;  %2232 = vmatprep.mubr.msk.f32.mxu1 %vm2471_vm1, %v2470_v2  ;;  %v1266_v18 = vld [vmem:[%s2533_s4 + $0x17] sm:$0xff]  ;;  %v2034_v26 = vld [vmem:[%s3048_s1 + $0x1a0] sm:$0xff] }
  0x28   : > { %2241 = vmatpush3.msra.mxu0 %v1973_v28  ;;  %2233 = vmatmul.mubr.msk.f32.gmra.mxu1 %vm186_vm0, %v466_v29  ;;  %v2036_v19 = vld [vmem:[%s3048_s1 + $0x1b0] sm:$0xff]  ;;  %v2044_v28 = vld [vmem:[%s3048_s1 + $0x1d8] sm:$0xff] }
  0x29   : > { %2257 = vmatprep.subr.mxu1 %v2470_v2  ;;  %2242 = vmatprep.subr.mxu0 %v2470_v2  ;;  %v1365_v25 = vld [vmem:[%s2533_s4 + $0x12] sm:$0xff] }
  0x2a   : > { %2258 = vmatpush3.msra.mxu1 %v1980_v30  ;;  %2218 = vmatprep.mubr.msk.f32.mxu0 %vm2471_vm1, %v2470_v2  ;;  %v1465_v27 = vld [vmem:[%s2533_s4 + $0x13] sm:$0xff] }
  0x2b   : > { %2243 = vmatpush3.msra.mxu0 %v1972_v31  ;;  %2235 = vmatprep.mubr.msk.f32.mxu1 %vm2471_vm1, %v2470_v2  ;;  %v2051_v29 = vld [vmem:[%s3048_s1 + $0x1f8] sm:$0xff]  ;;  %v2043_v31 = vld [vmem:[%s3048_s1 + $0x1d0] sm:$0xff] }
  0x2c   : > { %2219 = vmatmul.mubr.msk.f32.gmra.mxu0 %vm186_vm0, %v367_v32  ;;  %2259 = vmatprep.subr.mxu1 %v2470_v2  ;;  %v1366_v30 = vld [vmem:[%s2533_s4 + $0x1a] sm:$0xff] }
  0x2d   : > { %2236 = vmatmul.mubr.msk.f32.gmra.mxu1 %vm186_vm0, %v467_v33  ;;  %2244 = vmatprep.subr.mxu0 %v2470_v2  ;;  %v1466_v32 = vld [vmem:[%s2533_s4 + $0x1b] sm:$0xff]  ;;  %v2050_v33 = vld [vmem:[%s3048_s1 + $0x1f0] sm:$0xff] }
  0x2e   : > { %2260 = vmatpush3.msra.mxu1 %v1979_v34  ;;  %2245 = vmatpush3.msra.mxu0 %v1971_v35  ;;  %v2042_v34 = vld [vmem:[%s3048_s1 + $0x1c8] sm:$0xff]  ;;  %v1367_v35 = vld [vmem:[%s2533_s4 + $0x22] sm:$0x3] }
  0x2f   : > { %2246 = vmatprep.mubr.msk.f32.mxu0 %vm2471_vm1, %v2470_v2  ;;  %2261 = vmatprep.subr.mxu1 %v2470_v2 }
  0x30   : > { %2247 = vmatmul.mubr.msk.f32.vlgmr.msra.gmra.mxu0 %vm186_vm0, %v565_v36  ;;  %2262 = vmatpush3.msra.mxu1 %v1978_v37  ;;  %v1467_v36 = vld [vmem:[%s2533_s4 + $0x23] sm:$0x3]  ;;  %v2049_v37 = vld [vmem:[%s3048_s1 + $0x1e8] sm:$0xff] }
  0x31   : > { %2263 = vmatprep.mubr.msk.f32.mxu1 %vm2471_vm1, %v2470_v2  ;;  %2272 = vmatprep.subr.mxu0 %v2470_v2 }
  0x32   : > { %2264 = vmatmul.mubr.msk.f32.vlgmr.msra.gmra.mxu1 %vm186_vm0, %v665_v38  ;;  %2273 = vmatpush3.msra.mxu0 %v1988_v39  ;;  %v2041_v38 = vld [vmem:[%s3048_s1 + $0x1c0] sm:$0xff] }
  0x33   : > { %2289 = vmatprep.subr.mxu1 %v2470_v2  ;;  %2249 = vmatprep.mubr.msk.f32.mxu0 %vm2471_vm1, %v2470_v2  ;;  %v2048_v39 = vld [vmem:[%s3048_s1 + $0x1e0] sm:$0xff] }
  0x34   : > { %2274 = vmatprep.subr.mxu0 %v2470_v2  ;;  %2290 = vmatpush3.msra.mxu1 %v1995_v40  ;;  %v1566_v40 = vld [vmem:[%s2533_s4 + $0x1c] sm:$0xff] }
  0x35   : > { %2250 = vmatmul.mubr.msk.f32.gmra.mxu0 %vm186_vm0, %v2674_v41  ;;  %2266 = vmatprep.mubr.msk.f32.mxu1 %vm2471_vm1, %v2470_v2 }
  0x36   : > { %2275 = vmatpush3.msra.mxu0 %v1987_v42  ;;  %2267 = vmatmul.mubr.msk.f32.gmra.mxu1 %vm186_vm0, %v2683_v43  ;;  %v1567_v42 = vld [vmem:[%s2533_s4 + $0x24] sm:$0x3] }
  0x37   : > { %2291 = vmatprep.subr.mxu1 %v2470_v2  ;;  %2276 = vmatprep.subr.mxu0 %v2470_v2 }
  0x38   : > { %2292 = vmatpush3.msra.mxu1 %v1994_v44  ;;  %2252 = vmatprep.mubr.msk.f32.mxu0 %vm2471_vm1, %v2470_v2 }
  0x39   : > { %2277 = vmatpush3.msra.mxu0 %v1986_v45  ;;  %2269 = vmatprep.mubr.msk.f32.mxu1 %vm2471_vm1, %v2470_v2 }
  0x3a   : > { %2253 = vmatmul.mubr.msk.f32.gmra.mxu0 %vm186_vm0, %v567_v46  ;;  %2293 = vmatprep.subr.mxu1 %v2470_v2 }
  0x3b   : > { %2270 = vmatmul.mubr.msk.f32.gmra.mxu1 %vm186_vm0, %v667_v47  ;;  %2278 = vmatprep.subr.mxu0 %v2470_v2 }
  0x3c   : > { %2294 = vmatpush3.msra.mxu1 %v1993_v48  ;;  %2279 = vmatpush3.msra.mxu0 %v1985_v49 }
  0x3d   : > { %2280 = vmatprep.mubr.msk.f32.mxu0 %vm2471_vm1, %v2470_v2  ;;  %2295 = vmatprep.subr.mxu1 %v2470_v2 }
  0x3e   : > { %2281 = vmatmul.mubr.msk.f32.vlgmr.msra.gmra.mxu0 %vm186_vm0, %v2565_v15  ;;  %2296 = vmatpush3.msra.mxu1 %v1992_v50  ;;  %v2037_v15 = vld [vmem:[%s3048_s1 + $0x1b8] sm:$0xff] }
  0x3f   : > { %2297 = vmatprep.mubr.msk.f32.mxu1 %vm2471_vm1, %v2470_v2  ;;  %2306 = vmatprep.subr.mxu0 %v2470_v2 }
  0x40   : > { %2298 = vmatmul.mubr.msk.f32.vlgmr.msra.gmra.mxu1 %vm186_vm0, %v2556_v13  ;;  %2307 = vmatpush3.msra.mxu0 %v2002_v51  ;;  %v2020_v13 = vld [vmem:[%s3048_s1 + $0x160] sm:$0xff] }
  0x41   : > { %2323 = vmatprep.subr.mxu1 %v2470_v2  ;;  %2283 = vmatprep.mubr.msk.f32.mxu0 %vm2471_vm1, %v2470_v2 }
  0x42   : > { %2308 = vmatprep.subr.mxu0 %v2470_v2  ;;  %2324 = vmatpush3.msra.mxu1 %v2009_v52 }
  0x43   : > { %2284 = vmatmul.mubr.msk.f32.gmra.mxu0 %vm186_vm0, %v766_v53  ;;  %2300 = vmatprep.mubr.msk.f32.mxu1 %vm2471_vm1, %v2470_v2 }
  0x44   : > { %2309 = vmatpush3.msra.mxu0 %v2001_v54  ;;  %2301 = vmatmul.mubr.msk.f32.gmra.mxu1 %vm186_vm0, %v866_v55 }
  0x45   : > { %2325 = vmatprep.subr.mxu1 %v2470_v2  ;;  %2310 = vmatprep.subr.mxu0 %v2470_v2 }
  0x46   : > { %2326 = vmatpush3.msra.mxu1 %v2008_v56  ;;  %2286 = vmatprep.mubr.msk.f32.mxu0 %vm2471_vm1, %v2470_v2 }
  0x47   : > { %2311 = vmatpush3.msra.mxu0 %v2000_v57  ;;  %2303 = vmatprep.mubr.msk.f32.mxu1 %vm2471_vm1, %v2470_v2 }
  0x48   : > { %2287 = vmatmul.mubr.msk.f32.gmra.mxu0 %vm186_vm0, %v767_v58  ;;  %2327 = vmatprep.subr.mxu1 %v2470_v2 }
  0x49   : > { %2304 = vmatmul.mubr.msk.f32.gmra.mxu1 %vm186_vm0, %v867_v59  ;;  %2312 = vmatprep.subr.mxu0 %v2470_v2 }
  0x4a   : > { %2328 = vmatpush3.msra.mxu1 %v2007_v60  ;;  %2313 = vmatpush3.msra.mxu0 %v1999_v61 }
  0x4b   : > { %2314 = vmatprep.mubr.msk.f32.mxu0 %vm2471_vm1, %v2470_v2  ;;  %2329 = vmatprep.subr.mxu1 %v2470_v2 }
  0x4c   : > { %2315 = vmatmul.mubr.msk.f32.vlgmr.msra.gmra.mxu0 %vm186_vm0, %v965_v62  ;;  %2330 = vmatpush3.msra.mxu1 %v2006_v63 }
  0x4d   : > { %2331 = vmatprep.mubr.msk.f32.mxu1 %vm2471_vm1, %v2470_v2  ;;  %2340 = vmatprep.subr.mxu0 %v2470_v2 }
  0x4e   : > { %2332 = vmatmul.mubr.msk.f32.vlgmr.msra.gmra.mxu1 %vm186_vm0, %v1065_v0  ;;  %2341 = vmatpush3.msra.mxu0 %v2016_v1 }
  0x4f   : > { %2357 = vmatprep.subr.mxu1 %v2470_v2  ;;  %2317 = vmatprep.mubr.msk.f32.mxu0 %vm2471_vm1, %v2470_v2 }
  0x50   : > { %2342 = vmatprep.subr.mxu0 %v2470_v2  ;;  %2358 = vmatpush3.msra.mxu1 %v2023_v3 }
  0x51   : > { %2318 = vmatmul.mubr.msk.f32.gmra.mxu0 %vm186_vm0, %v2792_v4  ;;  %2334 = vmatprep.mubr.msk.f32.mxu1 %vm2471_vm1, %v2470_v2 }
  0x52   : > { %2343 = vmatpush3.msra.mxu0 %v2015_v5  ;;  %2335 = vmatmul.mubr.msk.f32.gmra.mxu1 %vm186_vm0, %v2801_v6 }
  0x53   : > { %2359 = vmatprep.subr.mxu1 %v2470_v2  ;;  %2344 = vmatprep.subr.mxu0 %v2470_v2 }
  0x54   : > { %2360 = vmatpush3.msra.mxu1 %v2022_v7  ;;  %2320 = vmatprep.mubr.msk.f32.mxu0 %vm2471_vm1, %v2470_v2 }
  0x55   : > { %2345 = vmatpush3.msra.mxu0 %v2014_v8  ;;  %2337 = vmatprep.mubr.msk.f32.mxu1 %vm2471_vm1, %v2470_v2 }
  0x56   : > { %2321 = vmatmul.mubr.msk.f32.gmra.mxu0 %vm186_vm0, %v967_v9  ;;  %2361 = vmatprep.subr.mxu1 %v2470_v2 }
  0x57   : > { %2338 = vmatmul.mubr.msk.f32.gmra.mxu1 %vm186_vm0, %v1067_v10  ;;  %2346 = vmatprep.subr.mxu0 %v2470_v2 }
  0x58   : > { %2362 = vmatpush3.msra.mxu1 %v2021_v11  ;;  %2347 = vmatpush3.msra.mxu0 %v2013_v12 }
  0x59   : > { %2348 = vmatprep.mubr.msk.f32.mxu0 %vm2471_vm1, %v2470_v2  ;;  %2363 = vmatprep.subr.mxu1 %v2470_v2 }
  0x5a   : > { %2349 = vmatmul.mubr.msk.f32.vlgmr.msra.gmra.mxu0 %vm186_vm0, %v2674_v41  ;;  %2364 = vmatpush3.msra.mxu1 %v2020_v13  ;;  %v1666_v41 = vld [vmem:[%s2533_s4 + $0x1d] sm:$0xff] }
  0x5b   : > { %2365 = vmatprep.mubr.msk.f32.mxu1 %vm2471_vm1, %v2470_v2  ;;  %2374 = vmatprep.subr.mxu0 %v2470_v2 }
  0x5c   : > { %2366 = vmatmul.mubr.msk.f32.vlgmr.msra.gmra.mxu1 %vm186_vm0, %v2683_v43  ;;  %2375 = vmatpush3.msra.mxu0 %v2030_v14  ;;  %v1667_v43 = vld [vmem:[%s2533_s4 + $0x25] sm:$0x3] }
  0x5d   : > { %2391 = vmatprep.subr.mxu1 %v2470_v2  ;;  %2351 = vmatprep.mubr.msk.f32.mxu0 %vm2471_vm1, %v2470_v2 }
  0x5e   : > { %2376 = vmatprep.subr.mxu0 %v2470_v2  ;;  %2392 = vmatpush3.msra.mxu1 %v2037_v15 }
  0x5f   : > { %2352 = vmatmul.mubr.msk.f32.gmra.mxu0 %vm186_vm0, %v1166_v16  ;;  %2368 = vmatprep.mubr.msk.f32.mxu1 %vm2471_vm1, %v2470_v2 }
  0x60   : > { %2377 = vmatpush3.msra.mxu0 %v2029_v17  ;;  %2369 = vmatmul.mubr.msk.f32.gmra.mxu1 %vm186_vm0, %v1266_v18 }
  0x61   : > { %2393 = vmatprep.subr.mxu1 %v2470_v2  ;;  %2378 = vmatprep.subr.mxu0 %v2470_v2 }
  0x62   : > { %2394 = vmatpush3.msra.mxu1 %v2036_v19  ;;  %2354 = vmatprep.mubr.msk.f32.mxu0 %vm2471_vm1, %v2470_v2 }
  0x63   : > { %2379 = vmatpush3.msra.mxu0 %v2028_v20  ;;  %2371 = vmatprep.mubr.msk.f32.mxu1 %vm2471_vm1, %v2470_v2 }
  0x64   : > { %2355 = vmatmul.mubr.msk.f32.gmra.mxu0 %vm186_vm0, %v1167_v21  ;;  %2395 = vmatprep.subr.mxu1 %v2470_v2 }
  0x65   : > { %2372 = vmatmul.mubr.msk.f32.gmra.mxu1 %vm186_vm0, %v1267_v22  ;;  %2380 = vmatprep.subr.mxu0 %v2470_v2 }
  0x66   : > { %2396 = vmatpush3.msra.mxu1 %v2035_v23  ;;  %2381 = vmatpush3.msra.mxu0 %v2027_v24 }
  0x67   : > { %2382 = vmatprep.mubr.msk.f32.mxu0 %vm2471_vm1, %v2470_v2  ;;  %2397 = vmatprep.subr.mxu1 %v2470_v2 }
  0x68   : > { %2383 = vmatmul.mubr.msk.f32.vlgmr.msra.gmra.mxu0 %vm186_vm0, %v1365_v25  ;;  %2398 = vmatpush3.msra.mxu1 %v2034_v26 }
  0x69   : > { %2399 = vmatprep.mubr.msk.f32.mxu1 %vm2471_vm1, %v2470_v2  ;;  %2408 = vmatprep.subr.mxu0 %v2470_v2 }
  0x6a   : > { %2400 = vmatmul.mubr.msk.f32.vlgmr.msra.gmra.mxu1 %vm186_vm0, %v1465_v27  ;;  %2409 = vmatpush3.msra.mxu0 %v2044_v28 }
  0x6b   : > { %2425 = vmatprep.subr.mxu1 %v2470_v2  ;;  %2385 = vmatprep.mubr.msk.f32.mxu0 %vm2471_vm1, %v2470_v2 }
  0x6c   : > { %2410 = vmatprep.subr.mxu0 %v2470_v2  ;;  %2426 = vmatpush3.msra.mxu1 %v2051_v29 }
  0x6d   : > { %2386 = vmatmul.mubr.msk.f32.gmra.mxu0 %vm186_vm0, %v1366_v30  ;;  %2402 = vmatprep.mubr.msk.f32.mxu1 %vm2471_vm1, %v2470_v2 }
  0x6e   : > { %2411 = vmatpush3.msra.mxu0 %v2043_v31  ;;  %2403 = vmatmul.mubr.msk.f32.gmra.mxu1 %vm186_vm0, %v1466_v32 }
  0x6f   : > { %2427 = vmatprep.subr.mxu1 %v2470_v2  ;;  %2412 = vmatprep.subr.mxu0 %v2470_v2 }
  0x70   : > { %2428 = vmatpush3.msra.mxu1 %v2050_v33  ;;  %2388 = vmatprep.mubr.msk.f32.mxu0 %vm2471_vm1, %v2470_v2 }
  0x71   : > { %2413 = vmatpush3.msra.mxu0 %v2042_v34  ;;  %2405 = vmatprep.mubr.msk.f32.mxu1 %vm2471_vm1, %v2470_v2 }
  0x72   : > { %2389 = vmatmul.mubr.msk.f32.gmra.mxu0 %vm186_vm0, %v1367_v35  ;;  %2429 = vmatprep.subr.mxu1 %v2470_v2 }
  0x73   : > { %2406 = vmatmul.mubr.msk.f32.gmra.mxu1 %vm186_vm0, %v1467_v36  ;;  %2414 = vmatprep.subr.mxu0 %v2470_v2 }
  0x74   : > { %2430 = vmatpush3.msra.mxu1 %v2049_v37  ;;  %2415 = vmatpush3.msra.mxu0 %v2041_v38 }
  0x75   : > { %2416 = vmatprep.mubr.msk.f32.mxu0 %vm2471_vm1, %v2470_v2  ;;  %2431 = vmatprep.subr.mxu1 %v2470_v2 }
  0x76   : > { %2417 = vmatmul.mubr.msk.f32.vlgmr.msra.gmra.mxu0 %vm186_vm0, %v2792_v4  ;;  %2432 = vmatpush3.msra.mxu1 %v2048_v39 }
  0x77   : > { %2433 = vmatprep.mubr.msk.f32.mxu1 %vm2471_vm1, %v2470_v2  ;;  %2419 = vmatprep.mubr.msk.f32.mxu0 %vm2471_vm1, %v2470_v2 }
  0x78   : > { %2434 = vmatmul.mubr.msk.f32.vlgmr.msra.gmra.mxu1 %vm186_vm0, %v2801_v6 }
  0x79   : > { %2436 = vmatprep.mubr.msk.f32.mxu1 %vm2471_vm1, %v2470_v2 }
  0x7a   : > { %2420 = vmatmul.mubr.msk.f32.gmra.mxu0 %vm186_vm0, %v1566_v40 }
  0x7b   : > { %2422 = vmatprep.mubr.msk.f32.mxu0 %vm2471_vm1, %v2470_v2 }
  0x7c   : > { %2437 = vmatmul.mubr.msk.f32.gmra.mxu1 %vm186_vm0, %v1666_v41 }
  0x7d   : > { %2439 = vmatprep.mubr.msk.f32.mxu1 %vm2471_vm1, %v2470_v2 }
  0x7e   : > { %2423 = vmatmul.mubr.msk.f32.gmra.mxu0 %vm186_vm0, %v1567_v42  ;;  %v1775_v42 = vlaneseq }
  0x80   : > { %2440 = vmatmul.mubr.msk.f32.gmra.mxu1 %vm186_vm0, %v1667_v43 }
  0xd4   : > { %v262_v44 = vpop.f32.mrf.mxu0 }
  0xd6   : > { %v351_v45 = vpop.f32.mrf.mxu1  ;;  %v2180_v46 = vpop.f32.mrf.mxu0 }
  0xd7   : > { %v352_v47 = vadd.f32 %v351_v45, %v262_v44 }
  0xd8   : > { %v2197_v48 = vpop.f32.mrf.mxu1 }
  0xd9   : > { %v267_v49 = vpop.f32.mrf.mxu0 }
  0xda   : > { %v356_v50 = vpop.f32.mrf.mxu1 }
  0xdb   : > { %v357_v51 = vadd.f32 %v356_v50, %v267_v49  ;;  %v2183_v52 = vpop.f32.mrf.mxu0  ;;  %v1776_v49 = vshrl.u32 %v1775_v42, 7 }
  0xdc   : > { %v2200_v53 = vpop.f32.mrf.mxu1 }
  0xde   : > { %v272_v54 = vpop.f32.mrf.mxu0 }
  0xdf   : > { %v361_v55 = vpop.f32.mrf.mxu1 }
  0xe0   : > { %v362_v56 = vadd.f32 %v361_v55, %v272_v54  ;;  %v2186_v57 = vpop.f32.mrf.mxu0 }
  0xe1   : > { %v2203_v2 = vpop.f32.mrf.mxu1 }
  0xe2   : > { %v448_v58 = vpop.f32.mrf.mxu0  ;;  %v1777_v2 = vadd.s32 8, %v1776_v49 }
  0xe3   : > { %v462_v59 = vadd.f32 %v448_v58, %v352_v47 }
  0xe4   : > { %v548_v60 = vpop.f32.mrf.mxu1  ;;  %v2214_v61 = vpop.f32.mrf.mxu0 }
  0xe5   : > { %v562_v62 = vadd.f32 %v548_v60, %v462_v59  ;;  %v2974_v59 = vmul.u32.u64.low 2863311531, %v1776_v49  ;;  %v2975_v60 = vmul.u32.u64.high 2863311531, %v1776_v49, %v2974_v59 }
  0xe6   : > { %v2231_v63 = vpop.f32.mrf.mxu1 }
  0xe7   : > { %v453_v0 = vpop.f32.mrf.mxu0 }
  0xe8   : > { %v553_v1 = vpop.f32.mrf.mxu1  ;;  %v463_v43 = vadd.f32 %v453_v0, %v357_v51 }
  0xe9   : > { %v2217_v3 = vpop.f32.mrf.mxu0 }
  0xea   : > { %v2234_v4 = vpop.f32.mrf.mxu1  ;;  %v563_v50 = vadd.f32 %v553_v1, %v463_v43  ;;  %v1778_v3 = vadd.s32 16, %v1776_v49 }
  0xec   : > { %v458_v5 = vpop.f32.mrf.mxu0 }
  0xed   : > { %v558_v6 = vpop.f32.mrf.mxu1  ;;  %v464_v52 = vadd.f32 %v458_v5, %v362_v56 }
  0xee   : > { %v2220_v7 = vpop.f32.mrf.mxu0 }
  0xef   : > { %v2237_v8 = vpop.f32.mrf.mxu1  ;;  %v564_v61 = vadd.f32 %v558_v6, %v464_v52 }
  0xf0   : > { %v648_v9 = vpop.f32.mrf.mxu0  ;;  %v2977_v8 = vmul.u32.u64.low 2863311531, %v1777_v2  ;;  %v2978_v1 = vmul.u32.u64.high 2863311531, %v1777_v2, %v2977_v8 }
  0xf1   : > { %v662_v46 = vadd.f32 %v648_v9, %v562_v62 }
  0xf2   : > { %v748_v10 = vpop.f32.mrf.mxu1  ;;  %v2248_v11 = vpop.f32.mrf.mxu0 }
  0xf3   : > { %v762_v55 = vadd.f32 %v748_v10, %v662_v46 }
  0xf4   : > { %v2265_v12 = vpop.f32.mrf.mxu1 }
  0xf5   : > { %v653_v13 = vpop.f32.mrf.mxu0  ;;  %v2980_v11 = vmul.u32.u64.low 2863311531, %v1778_v3  ;;  %v2981_v12 = vmul.u32.u64.high 2863311531, %v1778_v3, %v2980_v11 }
  0xf6   : > { %v753_v14 = vpop.f32.mrf.mxu1  ;;  %v663_v57 = vadd.f32 %v653_v13, %v563_v50 }
  0xf7   : > { %v2251_v15 = vpop.f32.mrf.mxu0 }
  0xf8   : > { %v2268_v16 = vpop.f32.mrf.mxu1  ;;  %v763_v62 = vadd.f32 %v753_v14, %v663_v57 }
  0xfa   : > { %v658_v17 = vpop.f32.mrf.mxu0 }
  0xfb   : > { %v758_v18 = vpop.f32.mrf.mxu1  ;;  %v664_v4 = vadd.f32 %v658_v17, %v564_v61 }
  0xfc   : > { %v2254_v19 = vpop.f32.mrf.mxu0 }
  0xfd   : > { %v2271_v20 = vpop.f32.mrf.mxu1  ;;  %v764_v13 = vadd.f32 %v758_v18, %v664_v4  ;;  %v1785_v19 = vshrl.u32 %v2975_v60, 2  ;;  %v1807_v18 = vshrl.u32 %v2981_v12, 2 }
  0xfe   : > { %v848_v21 = vpop.f32.mrf.mxu0 }
  0xff   : > { %v862_v63 = vadd.f32 %v848_v21, %v762_v55 }
 0x100   : > { %v948_v22 = vpop.f32.mrf.mxu1  ;;  %v2282_v23 = vpop.f32.mrf.mxu0 }
 0x101   : > { %v962_v5 = vadd.f32 %v948_v22, %v862_v63  ;;  %v2055_v63 = vld [vmem:[%s3049_s2] ss:$0 sm:$0xff] }
 0x102   : > { %v2299_v24 = vpop.f32.mrf.mxu1 }
 0x103   : > { %v853_v25 = vpop.f32.mrf.mxu0 }
 0x104   : > { %v953_v26 = vpop.f32.mrf.mxu1  ;;  %v863_v9 = vadd.f32 %v853_v25, %v763_v62 }
 0x105   : > { %v2285_v27 = vpop.f32.mrf.mxu0 }
 0x106   : > { %v2302_v28 = vpop.f32.mrf.mxu1  ;;  %v963_v20 = vadd.f32 %v953_v26, %v863_v9  ;;  %v1796_v27 = vshrl.u32 %v2978_v1, 2 }
 0x107   : > { %v1786_v28 = vmul.u32 6, %v1785_v19 }
 0x108   : > { %v858_v29 = vpop.f32.mrf.mxu0 }
 0x109   : > { %v958_v30 = vpop.f32.mrf.mxu1  ;;  %v864_v14 = vadd.f32 %v858_v29, %v764_v13  ;;  %v1787_v29 = vsub.s32 %v1776_v49, %v1786_v28 }
 0x10a   : > { %v2288_v31 = vpop.f32.mrf.mxu0 }
 0x10b   : > { %v2305_v32 = vpop.f32.mrf.mxu1  ;;  %v964_v31 = vadd.f32 %v958_v30, %v864_v14  ;;  %vm1812_vm2 = vcmp.ne.s32.totalorder %v1787_v29, 0  ;;  %vm1815_vm3 = vcmp.lt.s32.totalorder %v1787_v29, 0 }
 0x10c   : > { %v1048_v33 = vpop.f32.mrf.mxu0  ;;  %vm2986_vm4 = vmand %vm1815_vm3, %vm1812_vm2 }
 0x10d   : > { %v1062_v15 = vadd.f32 %v1048_v33, %v962_v5 }
 0x10e   : > { %v1148_v34 = vpop.f32.mrf.mxu1  ;;  %v2316_v35 = vpop.f32.mrf.mxu0 }
 0x10f   : > { %v1162_v23 = vadd.f32 %v1148_v34, %v1062_v15 }
 0x110   : > { %v2333_v36 = vpop.f32.mrf.mxu1 }
 0x111   : > { %v1053_v37 = vpop.f32.mrf.mxu0 }
 0x112   : > { %v1153_v38 = vpop.f32.mrf.mxu1  ;;  %v1063_v24 = vadd.f32 %v1053_v37, %v963_v20 }
 0x113   : > { %v2319_v39 = vpop.f32.mrf.mxu0 }
 0x114   : > { %v2336_v40 = vpop.f32.mrf.mxu1  ;;  %v1163_v33 = vadd.f32 %v1153_v38, %v1063_v24 }
 0x115   : > { %v1797_v40 = vmul.u32 6, %v1796_v27 }
 0x116   : > { %v1058_v41 = vpop.f32.mrf.mxu0 }
 0x117   : > { %v1158_v44 = vpop.f32.mrf.mxu1  ;;  %v1064_v36 = vadd.f32 %v1058_v41, %v964_v31  ;;  %v1798_v50 = vsub.s32 %v1777_v2, %v1797_v40  ;;  %v1821_v41 = vadd.s32 6, %v1787_v29 }
 0x118   : > { %v2322_v45 = vpop.f32.mrf.mxu0 }
 0x119   : > { %v2339_v47 = vpop.f32.mrf.mxu1  ;;  %v1808_v45 = vmul.u32 6, %v1807_v18  ;;  %v1164_v46 = vadd.f32 %v1158_v44, %v1064_v36  ;;  %vm1813_vm5 = vcmp.ne.s32.totalorder %v1798_v50, 0  ;;  %vm1816_vm6 = vcmp.lt.s32.totalorder %v1798_v50, 0 }
 0x11a   : > { %v1248_v48 = vpop.f32.mrf.mxu0  ;;  %v1822_v60 = vadd.s32 6, %v1798_v50  ;;  %vm2995_vm7 = vmand %vm1816_vm6, %vm1813_vm5 }
 0x11b   : > { %v1262_v32 = vadd.f32 %v1248_v48, %v1162_v23  ;;  %v1809_v55 = vsub.s32 %v1778_v3, %v1808_v45 }
 0x11c   : > { %v1348_v53 = vpop.f32.mrf.mxu1  ;;  %v2350_v54 = vpop.f32.mrf.mxu0  ;;  %v1825_v9 = vsel %vm2995_vm7, %v1822_v60, %v1798_v50 }
 0x11d   : > { %v1362_v42 = vadd.f32 %v1348_v53, %v1262_v32  ;;  %vm1814_vm8 = vcmp.ne.s32.totalorder %v1809_v55, 0  ;;  %vm1817_vm9 = vcmp.lt.s32.totalorder %v1809_v55, 0  ;;  %vm3009_vm13 = vcmp.lt.s32.totalorder %v1825_v9, 3 }
 0x11e   : > { %v2367_v58 = vpop.f32.mrf.mxu1  ;;  %vm3005_vm11 = vmand %vm1817_vm9, %vm1814_vm8 }
 0x11f   : > { %v1253_v51 = vpop.f32.mrf.mxu0 }
 0x120   : > { %v1353_v0 = vpop.f32.mrf.mxu1  ;;  %v1263_v43 = vadd.f32 %v1253_v51, %v1163_v33  ;;  %v1824_v51 = vsel %vm2986_vm4, %v1821_v41, %v1787_v29 }
 0x121   : > { %v2353_v7 = vpop.f32.mrf.mxu0  ;;  %vm3001_vm10 = vcmp.lt.s32.totalorder %v1824_v51, 3 }
 0x122   : > { %v2370_v56 = vpop.f32.mrf.mxu1  ;;  %v1363_v30 = vadd.f32 %v1353_v0, %v1263_v43 }
 0x124   : > { %v1258_v10 = vpop.f32.mrf.mxu0 }
 0x125   : > { %v1358_v6 = vpop.f32.mrf.mxu1  ;;  %v1264_v48 = vadd.f32 %v1258_v10, %v1164_v46  ;;  %v1823_v10 = vadd.s32 6, %v1809_v55 }
 0x126   : > { %v2356_v16 = vpop.f32.mrf.mxu0 }
 0x127   : > { %v2373_v17 = vpop.f32.mrf.mxu1  ;;  %v1364_v2 = vadd.f32 %v1358_v6, %v1264_v48  ;;  %v1826_v24 = vsel %vm3005_vm11, %v1823_v10, %v1809_v55 }
 0x128   : > { %v1448_v21 = vpop.f32.mrf.mxu0  ;;  %vm3021_vm14 = vcmp.lt.s32.totalorder %v1826_v24, 3 }
 0x129   : > { %v1462_v47 = vadd.f32 %v1448_v21, %v1362_v42 }
 0x12a   : > { %v1548_v22 = vpop.f32.mrf.mxu1  ;;  %v2384_v25 = vpop.f32.mrf.mxu0 }
 0x12b   : > { %v1562_v57 = vadd.f32 %v1548_v22, %v1462_v47 }
 0x12c   : > { %v2401_v35 = vpop.f32.mrf.mxu1 }
 0x12d   : > { %v1453_v39 = vpop.f32.mrf.mxu0 }
 0x12e   : > { %v1553_v26 = vpop.f32.mrf.mxu1  ;;  %v1463_v58 = vadd.f32 %v1453_v39, %v1363_v30 }
 0x12f   : > { %v2387_v34 = vpop.f32.mrf.mxu0 }
 0x130   : > { %v2404_v37 = vpop.f32.mrf.mxu1  ;;  %v1563_v62 = vadd.f32 %v1553_v26, %v1463_v58 }
 0x132   : > { %v1458_v52 = vpop.f32.mrf.mxu0 }
 0x133   : > { %v1558_v54 = vpop.f32.mrf.mxu1  ;;  %v1464_v4 = vadd.f32 %v1458_v52, %v1364_v2 }
 0x134   : > { %v2390_v38 = vpop.f32.mrf.mxu0 }
 0x135   : > { %v2407_v49 = vpop.f32.mrf.mxu1  ;;  %v1564_v6 = vadd.f32 %v1558_v54, %v1464_v4 }
 0x136   : > { %v1648_v44 = vpop.f32.mrf.mxu0 }
 0x137   : > { %v1662_v59 = vadd.f32 %v1648_v44, %v1562_v57 }
 0x138   : > { %v1748_v61 = vpop.f32.mrf.mxu1  ;;  %v2418_v0 = vpop.f32.mrf.mxu0 }
 0x139   : > { %v1762_v7 = vadd.f32 %v1748_v61, %v1662_v59 }
 0x13a   : > { %v2435_v8 = vpop.f32.mrf.mxu1  ;;  %v1653_v1 = vpop.f32.mrf.mxu0 }
 0x13b   : > { %v1772_v56 = vadd.f32 %v2055_v63, %v1762_v7  ;;  %v1663_v5 = vadd.f32 %v1653_v1, %v1563_v62 }
 0x13c   : > { %v1753_v12 = vpop.f32.mrf.mxu1  ;;  %v2421_v13 = vpop.f32.mrf.mxu0 }
 0x13d   : > { %v1763_v16 = vadd.f32 %v1753_v12, %v1663_v5  ;;  %v1830_v17 = vsel %vm3001_vm10, %v1772_v56, 0.0 }
 0x13e   : > { %v2438_v20 = vpop.f32.mrf.mxu1  ;;  %v1658_v14 = vpop.f32.mrf.mxu0  ;;  %v1834_v31 = vsel %vm1833_vm12, %v1830_v17, 0.0 }
 0x13f   : > { %v1773_v21 = vadd.f32 %v2055_v63, %v1763_v16  ;;  %v1664_v23 = vadd.f32 %v1658_v14, %v1564_v6 }
 0x140   : > { %v1758_v27 = vpop.f32.mrf.mxu1  ;;  %v2424_v22 = vpop.f32.mrf.mxu0 }
 0x141   : > { %v1831_v25 = vsel %vm3009_vm13, %v1773_v21, 0.0  ;;  %v1764_v28 = vadd.f32 %v1758_v27, %v1664_v23 }
 0x142   : > { %v1835_v32 = vsel %vm1833_vm12, %v1831_v25, 0.0  ;;  %v2441_v18 = vpop.f32.mrf.mxu1 }
 0x143   : > { %v1836_v33 = vadd.f32 %v1835_v32, %v1834_v31  ;;  %v1774_v36 = vadd.f32 %v2055_v63, %v1764_v28 }
 0x145   : > { %v1832_v39 = vsel %vm3021_vm14, %v1774_v36, 0.0 }
 0x146   : > { %v1838_v40 = vsel %vm1837_vm15, %v1832_v39, 0.0 }
 0x147   : > { %v1839_v26 = vadd.f32 %v1838_v40, %v1836_v33 }
 0x149   : > { %v1840_v29 = vrot.slane %v1839_v26, 4 }
 0x14b   : > { %v1841_v42 = vadd.f32 %v1840_v29, %v1839_v26 }
 0x14d   : > { %v1842_v43 = vrot.slane %v1841_v42, 2 }
 0x14f   : > { %v1843_v34 = vadd.f32 %v1842_v43, %v1841_v42 }
 0x151   : > { %v1844_v37 = vrot.slane %v1843_v34, 1 }
 0x153   : > { %v1845_v45 = vadd.f32 %v1844_v37, %v1843_v34 }
 0x155   : > { %v1846_v46 = vmul.f32 0.11111111, %v1845_v45 }
 0x157   : > { %v1847_v47 = vsub.f32 %v1772_v56, %v1846_v46  ;;  %v1848_v50 = vsub.f32 %v1773_v21, %v1846_v46  ;;  %v1849_v52 = vsub.f32 %v1774_v36, %v1846_v46 }
 0x159   : > { %v1850_v30 = vmul.f32 %v1847_v47, %v1847_v47  ;;  %v1851_v48 = vmul.f32 %v1848_v50, %v1848_v50  ;;  %v1852_v54 = vmul.f32 %v1849_v52, %v1849_v52 }
 0x15b   : > { %v1853_v38 = vsel %vm3001_vm10, %v1850_v30, 0.0  ;;  %v1854_v41 = vsel %vm3009_vm13, %v1851_v48, 0.0  ;;  %v1855_v55 = vsel %vm3021_vm14, %v1852_v54, 0.0 }
 0x15c   : > { %v1856_v57 = vsel %vm1833_vm12, %v1853_v38, 0.0  ;;  %v1857_v58 = vsel %vm1833_vm12, %v1854_v41, 0.0  ;;  %v1859_v53 = vsel %vm1837_vm15, %v1855_v55, 0.0 }
 0x15d   : > { %v1858_v49 = vadd.f32 %v1857_v58, %v1856_v57 }
 0x15f   : > { %v1860_v44 = vadd.f32 %v1859_v53, %v1858_v49 }
 0x161   : > { %v1861_v2 = vrot.slane %v1860_v44, 4 }
 0x163   : > { %v1862_v59 = vadd.f32 %v1861_v2, %v1860_v44 }
 0x165   : > { %v1863_v60 = vrot.slane %v1862_v59, 2 }
 0x167   : > { %v1864_v61 = vadd.f32 %v1863_v60, %v1862_v59 }
 0x169   : > { %v1865_v63 = vrot.slane %v1864_v61, 1 }
 0x16b   : > { %v1866_v51 = vadd.f32 %v1865_v63, %v1864_v61 }
 0x16d   : > { %v1867_v0 = vmul.f32 0.11111111, %v1866_v51 }
 0x16f   : > { %v1868_v3 = vadd.f32 1e-05, %v1867_v0 }
 0x171   : > { %2460 = vrsqrt.f32 %v1868_v3 }
 0x17e   : > { %v2461_v62 = vpop.eup %2460 }
 0x17f   : > { %v1870_v4 = vmul.f32 %v2461_v62, %v1847_v47  ;;  %v1871_v7 = vmul.f32 %v2461_v62, %v1848_v50  ;;  %v1872_v8 = vmul.f32 %v2461_v62, %v1849_v52 }
 0x181   : > { %vm1873_vm0 = vcmp.ge.f32.partialorder %v1870_v4, 0.0  ;;  %vm1874_vm1 = vcmp.ge.f32.partialorder %v1871_v7, 0.0  ;;  %vm1875_vm2 = vcmp.ge.f32.partialorder %v1872_v8, 0.0  ;;  %v1876_v1 = vmul.f32 0.2, %v1870_v4 }
 0x182   : > { %v1877_v56 = vmul.f32 0.2, %v1871_v7  ;;  %v1878_v5 = vmul.f32 0.2, %v1872_v8 }
 0x183   : > { %v1879_v9 = vsel %vm1873_vm0, %v1870_v4, %v1876_v1 }
 0x184   : > { %v1880_v10 = vsel %vm1874_vm1, %v1871_v7, %v1877_v56  ;;  %v1881_v11 = vsel %vm1875_vm2, %v1872_v8, %v1878_v5  ;;  %1882 = vst.msk [vmem:[%s170_s29] sm:$0xff] %vm1833_vm12, %v1879_v9 }
 0x185   : > { %1883 = vst.msk [vmem:[%s170_s29 + $0x8] sm:$0xff] %vm1833_vm12, %v1880_v10 }
 0x186   : > { %1884 = vst.msk [vmem:[%s170_s29 + $0x10] sm:$0x3] %vm1837_vm15, %v1881_v11 }
 0x187 PF: > { %s13_s12 = sadd.s32 1, %s2468_s12  }
 0x188   : > { %p10_p4 = scmp.ge.s32.totalorder %s13_s12, 4  }
 0x18a   :  { %12 = sbr.rel (!%p10_p4) target bundleno = 1 (0x1), region = 77 }

// kernel: discriminator_forward.9
= control target key start
LH: loop header
LB: loop body
LE: loop exit
PB: predicated region body
PF: predicated region fallthrough
CT: control target
= control target key end

     0   :  { %s2443_s12 = smov 0   ;;  %s2925_s0 = inlined_call_operand.vmem [shape: f32[2,1,30,64], index: 0, kind: input, shape index: {}]   ;;  %s2926_s1 = inlined_call_operand.vmem [shape: f32[16,64,8], index: 1, kind: input, shape index: {}]   ;;  %s2927_s2 = inlined_call_operand.vmem [shape: f32[1,8], index: 2, kind: input, shape index: {}]   ;;  %s2928_s3 = inlined_call_operand.vmem [shape: f32[2,1,8], index: 3, kind: output, shape index: {}]  }
   0x1 LB: > { %s1776_s13 = sadd.s32 4294967295, %s2421_s12   ;;  %p1780_p0 = scmp.ge.s32.totalorder %s2421_s12, 1  ;;  %s2421_s12 = sphi %s2443_s12, %s13_s12  }
   0x2   : > { %p137_p1 = scmp.lt.s32.totalorder %s2421_s12, 3 }
   0x4   : > { %p138_p2 = pnand %p1780_p0, %p137_p1 }
   0x5   : > { %p159_p3 = scmp.lt.s32.totalorder (!%p138_p2), %s1776_s13, 1 }
   0x6   : > { %141 = sbr.rel (%p138_p2) target bundleno = 375 (0x177), region = 32 }
   0xb   : > { %v1790_v0 = vld [vmem:[%s2926_s1 + $0x78] sm:$0xff]  ;;  %v1789_v2 = vld [vmem:[%s2926_s1 + $0x70] sm:$0xff]  ;;  %v1788_v4 = vld [vmem:[%s2926_s1 + $0x68] sm:$0xff]  ;;  %s2930_s13 = smov (!%p159_p3, %s1776_s13), 1  ;;  %vm188_vm0 = vcmask 523264   ;;  %vm1717_vm9 = vcmask 58368  }
   0xc   : > { %v176_v1 = vld [vmem:[%s2926_s1 + $0x38] sm:$0xff]  ;;  %2099 = vmatprep.subr.mxu0 %v1790_v0  ;;  %v175_v3 = vld [vmem:[%s2926_s1 + $0x30] sm:$0xff]  ;;  %v174_v5 = vld [vmem:[%s2926_s1 + $0x28] sm:$0xff]  ;;  %s1938_s7 = sshll.u32 %s2930_s13, 5  ;;  %vm1715_vm10 = vcmask 64512   ;;  %s166_s9 = scalar_lea.vmem %s2928_s3, %s2930_s13  ;;  %vm1727_vm11 = vcmask 57344  }
   0xd   : > { %2118 = vmatprep.subr.mxu1 %v176_v1  ;;  %2100 = vmatpush3.msra.mxu0 %v1790_v0  ;;  %v1787_v6 = vld [vmem:[%s2926_s1 + $0x60] sm:$0xff]  ;;  %v1786_v8 = vld [vmem:[%s2926_s1 + $0x58] sm:$0xff]  ;;  %v1785_v10 = vld [vmem:[%s2926_s1 + $0x50] sm:$0xff]  ;;  %s2499_s20 = scalar_lea.vmem %s2925_s0, %s1938_s7 }
   0xe   : > { %2119 = vmatpush3.msra.mxu1 %v176_v1  ;;  %2101 = vmatprep.subr.mxu0 %v1789_v2  ;;  %v173_v7 = vld [vmem:[%s2926_s1 + $0x20] sm:$0xff]  ;;  %v172_v9 = vld [vmem:[%s2926_s1 + $0x18] sm:$0xff]  ;;  %v171_v11 = vld [vmem:[%s2926_s1 + $0x10] sm:$0xff] }
   0xf   : > { %2120 = vmatprep.subr.mxu1 %v175_v3  ;;  %2102 = vmatpush3.msra.mxu0 %v1789_v2  ;;  %v1784_v12 = vld [vmem:[%s2926_s1 + $0x48] sm:$0xff]  ;;  %v1783_v14 = vld [vmem:[%s2926_s1 + $0x40] sm:$0xff]  ;;  %v1802_v20 = vld [vmem:[%s2926_s1 + $0xb8] sm:$0xff] }
  0x10   : > { %2121 = vmatpush3.msra.mxu1 %v175_v3  ;;  %2103 = vmatprep.subr.mxu0 %v1788_v4  ;;  %v170_v13 = vld [vmem:[%s2926_s1 + $0x8] sm:$0xff]  ;;  %v169_v15 = vld [vmem:[%s2926_s1] sm:$0xff]  ;;  %v1812_v21 = vld [vmem:[%s2926_s1 + $0xf8] sm:$0xff] }
  0x11   : > { %2122 = vmatprep.subr.mxu1 %v174_v5  ;;  %2104 = vmatpush3.msra.mxu0 %v1788_v4  ;;  %v177_v16 = vld [vmem:[%s2499_s20 + $0x1] sm:$0xff]  ;;  %v178_v18 = vld [vmem:[%s2499_s20 + $0x9] sm:$0x3]  ;;  %v1801_v22 = vld [vmem:[%s2926_s1 + $0xb0] sm:$0xff] }
  0x12   : > { %2123 = vmatpush3.msra.mxu1 %v174_v5  ;;  %2105 = vmatprep.subr.mxu0 %v1787_v6  ;;  %v167_v17 = vld [vmem:[%s2499_s20] sm:$0xff]  ;;  %v168_v19 = vld [vmem:[%s2499_s20 + $0x8] sm:$0x3]  ;;  %v1811_v23 = vld [vmem:[%s2926_s1 + $0xf0] sm:$0xff] }
  0x13   : > { %2124 = vmatprep.subr.mxu1 %v173_v7  ;;  %2106 = vmatpush3.msra.mxu0 %v1787_v6  ;;  %v1800_v24 = vld [vmem:[%s2926_s1 + $0xa8] sm:$0xff]  ;;  %v1799_v26 = vld [vmem:[%s2926_s1 + $0xa0] sm:$0xff]  ;;  %v1798_v28 = vld [vmem:[%s2926_s1 + $0x98] sm:$0xff] }
  0x14   : > { %2125 = vmatpush3.msra.mxu1 %v173_v7  ;;  %2107 = vmatprep.subr.mxu0 %v1786_v8  ;;  %v1810_v25 = vld [vmem:[%s2926_s1 + $0xe8] sm:$0xff]  ;;  %v1809_v27 = vld [vmem:[%s2926_s1 + $0xe0] sm:$0xff]  ;;  %v1808_v29 = vld [vmem:[%s2926_s1 + $0xd8] sm:$0xff] }
  0x15   : > { %2126 = vmatprep.subr.mxu1 %v172_v9  ;;  %2108 = vmatpush3.msra.mxu0 %v1786_v8  ;;  %v1797_v30 = vld [vmem:[%s2926_s1 + $0x90] sm:$0xff]  ;;  %v1796_v32 = vld [vmem:[%s2926_s1 + $0x88] sm:$0xff]  ;;  %v1795_v34 = vld [vmem:[%s2926_s1 + $0x80] sm:$0xff] }
  0x16   : > { %2127 = vmatpush3.msra.mxu1 %v172_v9  ;;  %2109 = vmatprep.subr.mxu0 %v1785_v10  ;;  %v1807_v31 = vld [vmem:[%s2926_s1 + $0xd0] sm:$0xff]  ;;  %v1806_v33 = vld [vmem:[%s2926_s1 + $0xc8] sm:$0xff]  ;;  %v1805_v35 = vld [vmem:[%s2926_s1 + $0xc0] sm:$0xff] }
  0x17   : > { %2128 = vmatprep.subr.mxu1 %v171_v11  ;;  %2110 = vmatpush3.msra.mxu0 %v1785_v10  ;;  %v351_v36 = vld [vmem:[%s2499_s20 + $0x2] sm:$0xff]  ;;  %v352_v37 = vld [vmem:[%s2499_s20 + $0xa] sm:$0x3]  ;;  %v1822_v39 = vld [vmem:[%s2926_s1 + $0x138] sm:$0xff] }
  0x18   : > { %2129 = vmatpush3.msra.mxu1 %v171_v11  ;;  %2111 = vmatprep.subr.mxu0 %v1784_v12  ;;  %v445_v38 = vld [vmem:[%s2499_s20 + $0x3] sm:$0xff]  ;;  %v1832_v40 = vld [vmem:[%s2926_s1 + $0x178] sm:$0xff]  ;;  %v446_v41 = vld [vmem:[%s2499_s20 + $0xb] sm:$0x3] }
  0x19   : > { %2130 = vmatprep.subr.mxu1 %v170_v13  ;;  %2112 = vmatpush3.msra.mxu0 %v1784_v12  ;;  %v1821_v42 = vld [vmem:[%s2926_s1 + $0x130] sm:$0xff]  ;;  %v1820_v44 = vld [vmem:[%s2926_s1 + $0x128] sm:$0xff]  ;;  %v1819_v46 = vld [vmem:[%s2926_s1 + $0x120] sm:$0xff] }
  0x1a   : > { %2131 = vmatpush3.msra.mxu1 %v170_v13  ;;  %2113 = vmatprep.subr.mxu0 %v1783_v14  ;;  %v1831_v43 = vld [vmem:[%s2926_s1 + $0x170] sm:$0xff]  ;;  %v1830_v45 = vld [vmem:[%s2926_s1 + $0x168] sm:$0xff]  ;;  %v1829_v47 = vld [vmem:[%s2926_s1 + $0x160] sm:$0xff] }
  0x1b   : > { %2132 = vmatprep.subr.mxu1 %v169_v15  ;;  %2114 = vmatpush3.msra.mxu0 %v1783_v14  ;;  %v1818_v48 = vld [vmem:[%s2926_s1 + $0x118] sm:$0xff]  ;;  %v1817_v50 = vld [vmem:[%s2926_s1 + $0x110] sm:$0xff]  ;;  %v1816_v52 = vld [vmem:[%s2926_s1 + $0x108] sm:$0xff] }
  0x1c   : > { %2115 = vmatprep.mubr.msk.f32.mxu0 %vm188_vm0, %v177_v16  ;;  %2133 = vmatpush3.msra.mxu1 %v169_v15  ;;  %v1828_v49 = vld [vmem:[%s2926_s1 + $0x158] sm:$0xff]  ;;  %v1827_v51 = vld [vmem:[%s2926_s1 + $0x150] sm:$0xff]  ;;  %v1826_v53 = vld [vmem:[%s2926_s1 + $0x148] sm:$0xff] }
  0x1d   : > { %2134 = vmatprep.mubr.msk.f32.mxu1 %vm188_vm0, %v167_v17  ;;  %2116 = vmatmul.mubr.msk.f32.vlgmr.msra.gmra.mxu0 %vm188_vm0, %v178_v18  ;;  %v1815_v54 = vld [vmem:[%s2926_s1 + $0x100] sm:$0xff]  ;;  %v540_v57 = vld [vmem:[%s2499_s20 + $0xd] sm:$0x3]  ;;  %v1842_v59 = vld [vmem:[%s2926_s1 + $0x1b8] sm:$0xff] }
  0x1e   : > { %2135 = vmatmul.mubr.msk.f32.vlgmr.msra.gmra.mxu1 %vm188_vm0, %v168_v19  ;;  %2137 = vmatprep.subr.mxu0 %v1802_v20  ;;  %v1825_v55 = vld [vmem:[%s2926_s1 + $0x140] sm:$0xff]  ;;  %v1852_v60 = vld [vmem:[%s2926_s1 + $0x1f8] sm:$0xff]  ;;  %v634_v61 = vld [vmem:[%s2499_s20 + $0xe] sm:$0x3] }
  0x1f   : > { %2156 = vmatprep.subr.mxu1 %v1812_v21  ;;  %2138 = vmatpush3.msra.mxu0 %v1802_v20  ;;  %v539_v56 = vld [vmem:[%s2499_s20 + $0x5] sm:$0xff]  ;;  %v1841_v62 = vld [vmem:[%s2926_s1 + $0x1b0] sm:$0xff]  ;;  %v1838_v4 = vld [vmem:[%s2926_s1 + $0x198] sm:$0xff] }
  0x20   : > { %2157 = vmatpush3.msra.mxu1 %v1812_v21  ;;  %2139 = vmatprep.subr.mxu0 %v1801_v22  ;;  %v633_v58 = vld [vmem:[%s2499_s20 + $0x6] sm:$0xff]  ;;  %v1851_v63 = vld [vmem:[%s2926_s1 + $0x1f0] sm:$0xff]  ;;  %v1848_v5 = vld [vmem:[%s2926_s1 + $0x1d8] sm:$0xff] }
  0x21   : > { %2158 = vmatprep.subr.mxu1 %v1811_v23  ;;  %2140 = vmatpush3.msra.mxu0 %v1801_v22  ;;  %v1840_v0 = vld [vmem:[%s2926_s1 + $0x1a8] sm:$0xff]  ;;  %v1839_v2 = vld [vmem:[%s2926_s1 + $0x1a0] sm:$0xff]  ;;  %v1837_v6 = vld [vmem:[%s2926_s1 + $0x190] sm:$0xff] }
  0x22   : > { %2159 = vmatpush3.msra.mxu1 %v1811_v23  ;;  %2141 = vmatprep.subr.mxu0 %v1800_v24  ;;  %v1850_v1 = vld [vmem:[%s2926_s1 + $0x1e8] sm:$0xff]  ;;  %v1849_v3 = vld [vmem:[%s2926_s1 + $0x1e0] sm:$0xff]  ;;  %v1847_v7 = vld [vmem:[%s2926_s1 + $0x1d0] sm:$0xff] }
  0x23   : > { %2160 = vmatprep.subr.mxu1 %v1810_v25  ;;  %2142 = vmatpush3.msra.mxu0 %v1800_v24  ;;  %v1836_v8 = vld [vmem:[%s2926_s1 + $0x188] sm:$0xff]  ;;  %v1835_v10 = vld [vmem:[%s2926_s1 + $0x180] sm:$0xff]  ;;  %v1862_v15 = vld [vmem:[%s2926_s1 + $0x238] sm:$0xff] }
  0x24   : > { %2161 = vmatpush3.msra.mxu1 %v1810_v25  ;;  %2143 = vmatprep.subr.mxu0 %v1799_v26  ;;  %v1846_v9 = vld [vmem:[%s2926_s1 + $0x1c8] sm:$0xff]  ;;  %v1845_v11 = vld [vmem:[%s2926_s1 + $0x1c0] sm:$0xff]  ;;  %v1872_v16 = vld [vmem:[%s2926_s1 + $0x278] sm:$0xff] }
  0x25   : > { %2162 = vmatprep.subr.mxu1 %v1809_v27  ;;  %2144 = vmatpush3.msra.mxu0 %v1799_v26  ;;  %v727_v12 = vld [vmem:[%s2499_s20 + $0x7] sm:$0xff]  ;;  %v728_v13 = vld [vmem:[%s2499_s20 + $0xf] sm:$0x3]  ;;  %v1858_v24 = vld [vmem:[%s2926_s1 + $0x218] sm:$0xff] }
  0x26   : > { %2163 = vmatpush3.msra.mxu1 %v1809_v27  ;;  %2145 = vmatprep.subr.mxu0 %v1798_v28  ;;  %v821_v14 = vld [vmem:[%s2499_s20 + $0x8] sm:$0xff]  ;;  %v822_v17 = vld [vmem:[%s2499_s20 + $0x10] sm:$0x3]  ;;  %v1859_v22 = vld [vmem:[%s2926_s1 + $0x220] sm:$0xff] }
  0x27   : > { %2164 = vmatprep.subr.mxu1 %v1808_v29  ;;  %2146 = vmatpush3.msra.mxu0 %v1798_v28  ;;  %v1861_v18 = vld [vmem:[%s2926_s1 + $0x230] sm:$0xff]  ;;  %v1860_v20 = vld [vmem:[%s2926_s1 + $0x228] sm:$0xff]  ;;  %v1869_v23 = vld [vmem:[%s2926_s1 + $0x260] sm:$0xff] }
  0x28   : > { %2165 = vmatpush3.msra.mxu1 %v1808_v29  ;;  %2147 = vmatprep.subr.mxu0 %v1797_v30  ;;  %v1871_v19 = vld [vmem:[%s2926_s1 + $0x270] sm:$0xff]  ;;  %v1870_v21 = vld [vmem:[%s2926_s1 + $0x268] sm:$0xff]  ;;  %v1868_v25 = vld [vmem:[%s2926_s1 + $0x258] sm:$0xff] }
  0x29   : > { %2166 = vmatprep.subr.mxu1 %v1807_v31  ;;  %2148 = vmatpush3.msra.mxu0 %v1797_v30  ;;  %v1857_v26 = vld [vmem:[%s2926_s1 + $0x210] sm:$0xff]  ;;  %v1856_v28 = vld [vmem:[%s2926_s1 + $0x208] sm:$0xff]  ;;  %v1855_v30 = vld [vmem:[%s2926_s1 + $0x200] sm:$0xff] }
  0x2a   : > { %2167 = vmatpush3.msra.mxu1 %v1807_v31  ;;  %2149 = vmatprep.subr.mxu0 %v1796_v32  ;;  %v1867_v27 = vld [vmem:[%s2926_s1 + $0x250] sm:$0xff]  ;;  %v1866_v29 = vld [vmem:[%s2926_s1 + $0x248] sm:$0xff]  ;;  %v1865_v31 = vld [vmem:[%s2926_s1 + $0x240] sm:$0xff] }
  0x2b   : > { %2168 = vmatprep.subr.mxu1 %v1806_v33  ;;  %2150 = vmatpush3.msra.mxu0 %v1796_v32  ;;  %v915_v32 = vld [vmem:[%s2499_s20 + $0xa] sm:$0xff] }
  0x2c   : > { %2169 = vmatpush3.msra.mxu1 %v1806_v33  ;;  %2151 = vmatprep.subr.mxu0 %v1795_v34  ;;  %v916_v33 = vld [vmem:[%s2499_s20 + $0x12] sm:$0x3] }
  0x2d   : > { %2170 = vmatprep.subr.mxu1 %v1805_v35  ;;  %2152 = vmatpush3.msra.mxu0 %v1795_v34  ;;  %v1009_v34 = vld [vmem:[%s2499_s20 + $0xb] sm:$0xff] }
  0x2e   : > { %2153 = vmatprep.mubr.msk.f32.mxu0 %vm188_vm0, %v351_v36  ;;  %2171 = vmatpush3.msra.mxu1 %v1805_v35  ;;  %v1882_v35 = vld [vmem:[%s2926_s1 + $0x2b8] sm:$0xff] }
  0x2f   : > { %2154 = vmatmul.mubr.msk.f32.vlgmr.msra.gmra.mxu0 %vm188_vm0, %v352_v37  ;;  %2172 = vmatprep.mubr.msk.f32.mxu1 %vm188_vm0, %v445_v38  ;;  %v1892_v36 = vld [vmem:[%s2926_s1 + $0x2f8] sm:$0xff]  ;;  %v1010_v37 = vld [vmem:[%s2499_s20 + $0x13] sm:$0x3] }
  0x30   : > { %2175 = vmatprep.subr.mxu0 %v1822_v39  ;;  %2194 = vmatprep.subr.mxu1 %v1832_v40  ;;  %v1881_v38 = vld [vmem:[%s2926_s1 + $0x2b0] sm:$0xff] }
  0x31   : > { %2173 = vmatmul.mubr.msk.f32.vlgmr.msra.gmra.mxu1 %vm188_vm0, %v446_v41  ;;  %2176 = vmatpush3.msra.mxu0 %v1822_v39  ;;  %v1891_v39 = vld [vmem:[%s2926_s1 + $0x2f0] sm:$0xff]  ;;  %v1890_v41 = vld [vmem:[%s2926_s1 + $0x2e8] sm:$0xff] }
  0x32   : > { %2195 = vmatpush3.msra.mxu1 %v1832_v40  ;;  %2177 = vmatprep.subr.mxu0 %v1821_v42  ;;  %v1880_v40 = vld [vmem:[%s2926_s1 + $0x2a8] sm:$0xff] }
  0x33   : > { %2196 = vmatprep.subr.mxu1 %v1831_v43  ;;  %2178 = vmatpush3.msra.mxu0 %v1821_v42  ;;  %v1879_v42 = vld [vmem:[%s2926_s1 + $0x2a0] sm:$0xff] }
  0x34   : > { %2197 = vmatpush3.msra.mxu1 %v1831_v43  ;;  %2179 = vmatprep.subr.mxu0 %v1820_v44  ;;  %v1889_v43 = vld [vmem:[%s2926_s1 + $0x2e0] sm:$0xff] }
  0x35   : > { %2198 = vmatprep.subr.mxu1 %v1830_v45  ;;  %2180 = vmatpush3.msra.mxu0 %v1820_v44  ;;  %v1878_v44 = vld [vmem:[%s2926_s1 + $0x298] sm:$0xff] }
  0x36   : > { %2199 = vmatpush3.msra.mxu1 %v1830_v45  ;;  %2181 = vmatprep.subr.mxu0 %v1819_v46  ;;  %v1888_v45 = vld [vmem:[%s2926_s1 + $0x2d8] sm:$0xff] }
  0x37   : > { %2200 = vmatprep.subr.mxu1 %v1829_v47  ;;  %2182 = vmatpush3.msra.mxu0 %v1819_v46  ;;  %v1877_v46 = vld [vmem:[%s2926_s1 + $0x290] sm:$0xff] }
  0x38   : > { %2201 = vmatpush3.msra.mxu1 %v1829_v47  ;;  %2183 = vmatprep.subr.mxu0 %v1818_v48  ;;  %v1887_v47 = vld [vmem:[%s2926_s1 + $0x2d0] sm:$0xff] }
  0x39   : > { %2202 = vmatprep.subr.mxu1 %v1828_v49  ;;  %2184 = vmatpush3.msra.mxu0 %v1818_v48  ;;  %v1876_v48 = vld [vmem:[%s2926_s1 + $0x288] sm:$0xff] }
  0x3a   : > { %2203 = vmatpush3.msra.mxu1 %v1828_v49  ;;  %2185 = vmatprep.subr.mxu0 %v1817_v50  ;;  %v1886_v49 = vld [vmem:[%s2926_s1 + $0x2c8] sm:$0xff] }
  0x3b   : > { %2204 = vmatprep.subr.mxu1 %v1827_v51  ;;  %2186 = vmatpush3.msra.mxu0 %v1817_v50  ;;  %v1875_v50 = vld [vmem:[%s2926_s1 + $0x280] sm:$0xff] }
  0x3c   : > { %2205 = vmatpush3.msra.mxu1 %v1827_v51  ;;  %2187 = vmatprep.subr.mxu0 %v1816_v52  ;;  %v1885_v51 = vld [vmem:[%s2926_s1 + $0x2c0] sm:$0xff] }
  0x3d   : > { %2206 = vmatprep.subr.mxu1 %v1826_v53  ;;  %2188 = vmatpush3.msra.mxu0 %v1816_v52  ;;  %v1103_v52 = vld [vmem:[%s2499_s20 + $0xc] sm:$0xff] }
  0x3e   : > { %2207 = vmatpush3.msra.mxu1 %v1826_v53  ;;  %2189 = vmatprep.subr.mxu0 %v1815_v54  ;;  %v1104_v53 = vld [vmem:[%s2499_s20 + $0x14] sm:$0x3] }
  0x3f   : > { %2208 = vmatprep.subr.mxu1 %v1825_v55  ;;  %2190 = vmatpush3.msra.mxu0 %v1815_v54  ;;  %v1197_v54 = vld [vmem:[%s2499_s20 + $0xd] sm:$0xff] }
  0x40   : > { %2191 = vmatprep.mubr.msk.f32.mxu0 %vm188_vm0, %v539_v56  ;;  %2209 = vmatpush3.msra.mxu1 %v1825_v55  ;;  %v1902_v55 = vld [vmem:[%s2926_s1 + $0x338] sm:$0xff] }
  0x41   : > { %2192 = vmatmul.mubr.msk.f32.vlgmr.msra.gmra.mxu0 %vm188_vm0, %v540_v57  ;;  %2210 = vmatprep.mubr.msk.f32.mxu1 %vm188_vm0, %v633_v58  ;;  %v1912_v56 = vld [vmem:[%s2926_s1 + $0x378] sm:$0xff]  ;;  %v1198_v57 = vld [vmem:[%s2499_s20 + $0x15] sm:$0x3] }
  0x42   : > { %2213 = vmatprep.subr.mxu0 %v1842_v59  ;;  %2232 = vmatprep.subr.mxu1 %v1852_v60  ;;  %v1901_v58 = vld [vmem:[%s2926_s1 + $0x330] sm:$0xff] }
  0x43   : > { %2211 = vmatmul.mubr.msk.f32.vlgmr.msra.gmra.mxu1 %vm188_vm0, %v634_v61  ;;  %2214 = vmatpush3.msra.mxu0 %v1842_v59  ;;  %v1911_v59 = vld [vmem:[%s2926_s1 + $0x370] sm:$0xff]  ;;  %v1910_v61 = vld [vmem:[%s2926_s1 + $0x368] sm:$0xff] }
  0x44   : > { %2233 = vmatpush3.msra.mxu1 %v1852_v60  ;;  %2215 = vmatprep.subr.mxu0 %v1841_v62  ;;  %v1900_v60 = vld [vmem:[%s2926_s1 + $0x328] sm:$0xff] }
  0x45   : > { %2234 = vmatprep.subr.mxu1 %v1851_v63  ;;  %2216 = vmatpush3.msra.mxu0 %v1841_v62  ;;  %v1899_v62 = vld [vmem:[%s2926_s1 + $0x320] sm:$0xff] }
  0x46   : > { %2235 = vmatpush3.msra.mxu1 %v1851_v63  ;;  %2217 = vmatprep.subr.mxu0 %v1840_v0  ;;  %v1909_v63 = vld [vmem:[%s2926_s1 + $0x360] sm:$0xff] }
  0x47   : > { %2236 = vmatprep.subr.mxu1 %v1850_v1  ;;  %2218 = vmatpush3.msra.mxu0 %v1840_v0  ;;  %v1898_v0 = vld [vmem:[%s2926_s1 + $0x318] sm:$0xff] }
  0x48   : > { %2237 = vmatpush3.msra.mxu1 %v1850_v1  ;;  %2219 = vmatprep.subr.mxu0 %v1839_v2  ;;  %v1908_v1 = vld [vmem:[%s2926_s1 + $0x358] sm:$0xff] }
  0x49   : > { %2238 = vmatprep.subr.mxu1 %v1849_v3  ;;  %2220 = vmatpush3.msra.mxu0 %v1839_v2  ;;  %v1897_v2 = vld [vmem:[%s2926_s1 + $0x310] sm:$0xff] }
  0x4a   : > { %2239 = vmatpush3.msra.mxu1 %v1849_v3  ;;  %2221 = vmatprep.subr.mxu0 %v1838_v4  ;;  %v1907_v3 = vld [vmem:[%s2926_s1 + $0x350] sm:$0xff] }
  0x4b   : > { %2240 = vmatprep.subr.mxu1 %v1848_v5  ;;  %2222 = vmatpush3.msra.mxu0 %v1838_v4  ;;  %v1896_v4 = vld [vmem:[%s2926_s1 + $0x308] sm:$0xff] }
  0x4c   : > { %2241 = vmatpush3.msra.mxu1 %v1848_v5  ;;  %2223 = vmatprep.subr.mxu0 %v1837_v6  ;;  %v1906_v5 = vld [vmem:[%s2926_s1 + $0x348] sm:$0xff] }
  0x4d   : > { %2242 = vmatprep.subr.mxu1 %v1847_v7  ;;  %2224 = vmatpush3.msra.mxu0 %v1837_v6  ;;  %v1895_v6 = vld [vmem:[%s2926_s1 + $0x300] sm:$0xff] }
  0x4e   : > { %2243 = vmatpush3.msra.mxu1 %v1847_v7  ;;  %2225 = vmatprep.subr.mxu0 %v1836_v8  ;;  %v1905_v7 = vld [vmem:[%s2926_s1 + $0x340] sm:$0xff] }
  0x4f   : > { %2244 = vmatprep.subr.mxu1 %v1846_v9  ;;  %2226 = vmatpush3.msra.mxu0 %v1836_v8  ;;  %v1291_v8 = vld [vmem:[%s2499_s20 + $0xf] sm:$0xff] }
  0x50   : > { %2245 = vmatpush3.msra.mxu1 %v1846_v9  ;;  %2227 = vmatprep.subr.mxu0 %v1835_v10  ;;  %v1292_v9 = vld [vmem:[%s2499_s20 + $0x17] sm:$0x3] }
  0x51   : > { %2246 = vmatprep.subr.mxu1 %v1845_v11  ;;  %2228 = vmatpush3.msra.mxu0 %v1835_v10  ;;  %v1385_v10 = vld [vmem:[%s2499_s20 + $0x10] sm:$0xff] }
  0x52   : > { %2229 = vmatprep.mubr.msk.f32.mxu0 %vm188_vm0, %v727_v12  ;;  %2247 = vmatpush3.msra.mxu1 %v1845_v11  ;;  %v1922_v11 = vld [vmem:[%s2926_s1 + $0x3b8] sm:$0xff] }
  0x53   : > { %2230 = vmatmul.mubr.msk.f32.vlgmr.msra.gmra.mxu0 %vm188_vm0, %v728_v13  ;;  %2248 = vmatprep.mubr.msk.f32.mxu1 %vm188_vm0, %v821_v14  ;;  %v1932_v12 = vld [vmem:[%s2926_s1 + $0x3f8] sm:$0xff]  ;;  %v1921_v14 = vld [vmem:[%s2926_s1 + $0x3b0] sm:$0xff] }
  0x54   : > { %2251 = vmatprep.subr.mxu0 %v1862_v15  ;;  %2270 = vmatprep.subr.mxu1 %v1872_v16  ;;  %v1386_v13 = vld [vmem:[%s2499_s20 + $0x18] sm:$0x3] }
  0x55   : > { %2249 = vmatmul.mubr.msk.f32.vlgmr.msra.gmra.mxu1 %vm188_vm0, %v822_v17  ;;  %2252 = vmatpush3.msra.mxu0 %v1862_v15  ;;  %v1931_v15 = vld [vmem:[%s2926_s1 + $0x3f0] sm:$0xff]  ;;  %v1930_v17 = vld [vmem:[%s2926_s1 + $0x3e8] sm:$0xff] }
  0x56   : > { %2271 = vmatpush3.msra.mxu1 %v1872_v16  ;;  %2253 = vmatprep.subr.mxu0 %v1861_v18  ;;  %v1920_v16 = vld [vmem:[%s2926_s1 + $0x3a8] sm:$0xff] }
  0x57   : > { %2272 = vmatprep.subr.mxu1 %v1871_v19  ;;  %2254 = vmatpush3.msra.mxu0 %v1861_v18  ;;  %v1919_v18 = vld [vmem:[%s2926_s1 + $0x3a0] sm:$0xff] }
  0x58   : > { %2273 = vmatpush3.msra.mxu1 %v1871_v19  ;;  %2255 = vmatprep.subr.mxu0 %v1860_v20  ;;  %v1929_v19 = vld [vmem:[%s2926_s1 + $0x3e0] sm:$0xff] }
  0x59   : > { %2274 = vmatprep.subr.mxu1 %v1870_v21  ;;  %2256 = vmatpush3.msra.mxu0 %v1860_v20  ;;  %v1918_v20 = vld [vmem:[%s2926_s1 + $0x398] sm:$0xff] }
  0x5a   : > { %2275 = vmatpush3.msra.mxu1 %v1870_v21  ;;  %2257 = vmatprep.subr.mxu0 %v1859_v22  ;;  %v1928_v21 = vld [vmem:[%s2926_s1 + $0x3d8] sm:$0xff] }
  0x5b   : > { %2276 = vmatprep.subr.mxu1 %v1869_v23  ;;  %2258 = vmatpush3.msra.mxu0 %v1859_v22  ;;  %v1917_v22 = vld [vmem:[%s2926_s1 + $0x390] sm:$0xff] }
  0x5c   : > { %2277 = vmatpush3.msra.mxu1 %v1869_v23  ;;  %2259 = vmatprep.subr.mxu0 %v1858_v24  ;;  %v1927_v23 = vld [vmem:[%s2926_s1 + $0x3d0] sm:$0xff] }
  0x5d   : > { %2278 = vmatprep.subr.mxu1 %v1868_v25  ;;  %2260 = vmatpush3.msra.mxu0 %v1858_v24  ;;  %v1916_v24 = vld [vmem:[%s2926_s1 + $0x388] sm:$0xff] }
  0x5e   : > { %2279 = vmatpush3.msra.mxu1 %v1868_v25  ;;  %2261 = vmatprep.subr.mxu0 %v1857_v26  ;;  %v1926_v25 = vld [vmem:[%s2926_s1 + $0x3c8] sm:$0xff] }
  0x5f   : > { %2280 = vmatprep.subr.mxu1 %v1867_v27  ;;  %2262 = vmatpush3.msra.mxu0 %v1857_v26  ;;  %v1915_v26 = vld [vmem:[%s2926_s1 + $0x380] sm:$0xff] }
  0x60   : > { %2281 = vmatpush3.msra.mxu1 %v1867_v27  ;;  %2263 = vmatprep.subr.mxu0 %v1856_v28  ;;  %v1925_v27 = vld [vmem:[%s2926_s1 + $0x3c0] sm:$0xff] }
  0x61   : > { %2282 = vmatprep.subr.mxu1 %v1866_v29  ;;  %2264 = vmatpush3.msra.mxu0 %v1856_v28  ;;  %v1479_v28 = vld [vmem:[%s2499_s20 + $0x11] sm:$0xff] }
  0x62   : > { %2283 = vmatpush3.msra.mxu1 %v1866_v29  ;;  %2265 = vmatprep.subr.mxu0 %v1855_v30  ;;  %v1573_v29 = vld [vmem:[%s2499_s20 + $0x12] sm:$0xff] }
  0x63   : > { %2284 = vmatprep.subr.mxu1 %v1865_v31  ;;  %2266 = vmatpush3.msra.mxu0 %v1855_v30  ;;  %v1480_v30 = vld [vmem:[%s2499_s20 + $0x19] sm:$0x3] }
  0x64   : > { %2267 = vmatprep.mubr.msk.f32.mxu0 %vm188_vm0, %v915_v32  ;;  %2285 = vmatpush3.msra.mxu1 %v1865_v31  ;;  %v1574_v31 = vld [vmem:[%s2499_s20 + $0x1a] sm:$0x3] }
  0x65   : > { %2268 = vmatmul.mubr.msk.f32.vlgmr.msra.gmra.mxu0 %vm188_vm0, %v916_v33  ;;  %2286 = vmatprep.mubr.msk.f32.mxu1 %vm188_vm0, %v1009_v34 }
  0x66   : > { %2289 = vmatprep.subr.mxu0 %v1882_v35  ;;  %2308 = vmatprep.subr.mxu1 %v1892_v36 }
  0x67   : > { %2287 = vmatmul.mubr.msk.f32.vlgmr.msra.gmra.mxu1 %vm188_vm0, %v1010_v37  ;;  %2290 = vmatpush3.msra.mxu0 %v1882_v35 }
  0x68   : > { %2309 = vmatpush3.msra.mxu1 %v1892_v36  ;;  %2291 = vmatprep.subr.mxu0 %v1881_v38 }
  0x69   : > { %2310 = vmatprep.subr.mxu1 %v1891_v39  ;;  %2292 = vmatpush3.msra.mxu0 %v1881_v38  ;;  %v1676_v38 = vlaneseq }
  0x6a   : > { %2311 = vmatpush3.msra.mxu1 %v1891_v39  ;;  %2293 = vmatprep.subr.mxu0 %v1880_v40 }
  0x6b   : > { %2312 = vmatprep.subr.mxu1 %v1890_v41  ;;  %2294 = vmatpush3.msra.mxu0 %v1880_v40 }
  0x6c   : > { %2313 = vmatpush3.msra.mxu1 %v1890_v41  ;;  %2295 = vmatprep.subr.mxu0 %v1879_v42 }
  0x6d   : > { %2314 = vmatprep.subr.mxu1 %v1889_v43  ;;  %2296 = vmatpush3.msra.mxu0 %v1879_v42 }
  0x6e   : > { %2315 = vmatpush3.msra.mxu1 %v1889_v43  ;;  %2297 = vmatprep.subr.mxu0 %v1878_v44 }
  0x6f   : > { %2316 = vmatprep.subr.mxu1 %v1888_v45  ;;  %2298 = vmatpush3.msra.mxu0 %v1878_v44 }
  0x70   : > { %2317 = vmatpush3.msra.mxu1 %v1888_v45  ;;  %2299 = vmatprep.subr.mxu0 %v1877_v46  ;;  %v1677_v45 = vshrl.u32 %v1676_v38, 7 }
  0x71   : > { %2318 = vmatprep.subr.mxu1 %v1887_v47  ;;  %2300 = vmatpush3.msra.mxu0 %v1877_v46 }
  0x72   : > { %2319 = vmatpush3.msra.mxu1 %v1887_v47  ;;  %2301 = vmatprep.subr.mxu0 %v1876_v48 }
  0x73   : > { %2320 = vmatprep.subr.mxu1 %v1886_v49  ;;  %2302 = vmatpush3.msra.mxu0 %v1876_v48 }
  0x74   : > { %2321 = vmatpush3.msra.mxu1 %v1886_v49  ;;  %2303 = vmatprep.subr.mxu0 %v1875_v50 }
  0x75   : > { %2322 = vmatprep.subr.mxu1 %v1885_v51  ;;  %2304 = vmatpush3.msra.mxu0 %v1875_v50 }
  0x76   : > { %2305 = vmatprep.mubr.msk.f32.mxu0 %vm188_vm0, %v1103_v52  ;;  %2323 = vmatpush3.msra.mxu1 %v1885_v51  ;;  %v1678_v52 = vadd.s32 8, %v1677_v45 }
  0x77   : > { %2306 = vmatmul.mubr.msk.f32.vlgmr.msra.gmra.mxu0 %vm188_vm0, %v1104_v53  ;;  %2324 = vmatprep.mubr.msk.f32.mxu1 %vm188_vm0, %v1197_v54 }
  0x78   : > { %2327 = vmatprep.subr.mxu0 %v1902_v55  ;;  %2346 = vmatprep.subr.mxu1 %v1912_v56 }
  0x79   : > { %2325 = vmatmul.mubr.msk.f32.vlgmr.msra.gmra.mxu1 %vm188_vm0, %v1198_v57  ;;  %2328 = vmatpush3.msra.mxu0 %v1902_v55 }
  0x7a   : > { %2347 = vmatpush3.msra.mxu1 %v1912_v56  ;;  %2329 = vmatprep.subr.mxu0 %v1901_v58 }
  0x7b   : > { %2348 = vmatprep.subr.mxu1 %v1911_v59  ;;  %2330 = vmatpush3.msra.mxu0 %v1901_v58  ;;  %v2907_v57 = vmul.u32.u64.low 3435973837, %v1678_v52  ;;  %v2908_v58 = vmul.u32.u64.high 3435973837, %v1678_v52, %v2907_v57 }
  0x7c   : > { %2349 = vmatpush3.msra.mxu1 %v1911_v59  ;;  %2331 = vmatprep.subr.mxu0 %v1900_v60 }
  0x7d   : > { %2350 = vmatprep.subr.mxu1 %v1910_v61  ;;  %2332 = vmatpush3.msra.mxu0 %v1900_v60 }
  0x7e   : > { %2351 = vmatpush3.msra.mxu1 %v1910_v61  ;;  %2333 = vmatprep.subr.mxu0 %v1899_v62 }
  0x7f   : > { %2352 = vmatprep.subr.mxu1 %v1909_v63  ;;  %2334 = vmatpush3.msra.mxu0 %v1899_v62 }
  0x80   : > { %2353 = vmatpush3.msra.mxu1 %v1909_v63  ;;  %2335 = vmatprep.subr.mxu0 %v1898_v0 }
  0x81   : > { %2354 = vmatprep.subr.mxu1 %v1908_v1  ;;  %2336 = vmatpush3.msra.mxu0 %v1898_v0  ;;  %v2910_v63 = vmul.u32.u64.low 3435973837, %v1677_v45  ;;  %v2911_v0 = vmul.u32.u64.high 3435973837, %v1677_v45, %v2910_v63 }
  0x82   : > { %2355 = vmatpush3.msra.mxu1 %v1908_v1  ;;  %2337 = vmatprep.subr.mxu0 %v1897_v2 }
  0x83   : > { %2356 = vmatprep.subr.mxu1 %v1907_v3  ;;  %2338 = vmatpush3.msra.mxu0 %v1897_v2 }
  0x84   : > { %2357 = vmatpush3.msra.mxu1 %v1907_v3  ;;  %2339 = vmatprep.subr.mxu0 %v1896_v4 }
  0x85   : > { %2358 = vmatprep.subr.mxu1 %v1906_v5  ;;  %2340 = vmatpush3.msra.mxu0 %v1896_v4 }
  0x86   : > { %2359 = vmatpush3.msra.mxu1 %v1906_v5  ;;  %2341 = vmatprep.subr.mxu0 %v1895_v6 }
  0x87   : > { %2360 = vmatprep.subr.mxu1 %v1905_v7  ;;  %2342 = vmatpush3.msra.mxu0 %v1895_v6 }
  0x88   : > { %2343 = vmatprep.mubr.msk.f32.mxu0 %vm188_vm0, %v1291_v8  ;;  %2361 = vmatpush3.msra.mxu1 %v1905_v7 }
  0x89   : > { %2344 = vmatmul.mubr.msk.f32.vlgmr.msra.gmra.mxu0 %vm188_vm0, %v1292_v9  ;;  %2362 = vmatprep.mubr.msk.f32.mxu1 %vm188_vm0, %v1385_v10  ;;  %v1696_v9 = vshrl.u32 %v2908_v58, 2 }
  0x8a   : > { %2365 = vmatprep.subr.mxu0 %v1922_v11  ;;  %2384 = vmatprep.subr.mxu1 %v1932_v12 }
  0x8b   : > { %2363 = vmatmul.mubr.msk.f32.vlgmr.msra.gmra.mxu1 %vm188_vm0, %v1386_v13  ;;  %2366 = vmatpush3.msra.mxu0 %v1922_v11 }
  0x8c   : > { %2385 = vmatpush3.msra.mxu1 %v1932_v12  ;;  %2367 = vmatprep.subr.mxu0 %v1921_v14  ;;  %v1685_v12 = vshrl.u32 %v2911_v0, 2 }
  0x8d   : > { %2386 = vmatprep.subr.mxu1 %v1931_v15  ;;  %2368 = vmatpush3.msra.mxu0 %v1921_v14 }
  0x8e   : > { %2387 = vmatpush3.msra.mxu1 %v1931_v15  ;;  %2369 = vmatprep.subr.mxu0 %v1920_v16  ;;  %v1697_v15 = vmul.u32 5, %v1696_v9 }
  0x8f   : > { %2388 = vmatprep.subr.mxu1 %v1930_v17  ;;  %2370 = vmatpush3.msra.mxu0 %v1920_v16 }
  0x90   : > { %2389 = vmatpush3.msra.mxu1 %v1930_v17  ;;  %2371 = vmatprep.subr.mxu0 %v1919_v18 }
  0x91   : > { %2390 = vmatprep.subr.mxu1 %v1929_v19  ;;  %2372 = vmatpush3.msra.mxu0 %v1919_v18 }
  0x92   : > { %2391 = vmatpush3.msra.mxu1 %v1929_v19  ;;  %2373 = vmatprep.subr.mxu0 %v1918_v20 }
  0x93   : > { %2392 = vmatprep.subr.mxu1 %v1928_v21  ;;  %2374 = vmatpush3.msra.mxu0 %v1918_v20  ;;  %v1686_v20 = vmul.u32 5, %v1685_v12 }
  0x94   : > { %2393 = vmatpush3.msra.mxu1 %v1928_v21  ;;  %2375 = vmatprep.subr.mxu0 %v1917_v22 }
  0x95   : > { %2394 = vmatprep.subr.mxu1 %v1927_v23  ;;  %2376 = vmatpush3.msra.mxu0 %v1917_v22 }
  0x96   : > { %2395 = vmatpush3.msra.mxu1 %v1927_v23  ;;  %2377 = vmatprep.subr.mxu0 %v1916_v24  ;;  %v1698_v23 = vsub.s32 %v1678_v52, %v1697_v15 }
  0x97   : > { %2396 = vmatprep.subr.mxu1 %v1926_v25  ;;  %2378 = vmatpush3.msra.mxu0 %v1916_v24 }
  0x98   : > { %2397 = vmatpush3.msra.mxu1 %v1926_v25  ;;  %2379 = vmatprep.subr.mxu0 %v1915_v26  ;;  %vm1702_vm1 = vcmp.ne.s32.totalorder %v1698_v23, 0  ;;  %vm1704_vm2 = vcmp.lt.s32.totalorder %v1698_v23, 0 }
  0x99   : > { %2398 = vmatprep.subr.mxu1 %v1925_v27  ;;  %2380 = vmatpush3.msra.mxu0 %v1915_v26  ;;  %v1687_v26 = vsub.s32 %v1677_v45, %v1686_v20  ;;  %vm1706_vm5 = vmand %vm1704_vm2, %vm1702_vm1 }
  0x9a   : > { %2381 = vmatprep.mubr.msk.f32.mxu0 %vm188_vm0, %v1479_v28  ;;  %2399 = vmatpush3.msra.mxu1 %v1925_v27 }
  0x9b   : > { %2400 = vmatprep.mubr.msk.f32.mxu1 %vm188_vm0, %v1573_v29  ;;  %2382 = vmatmul.mubr.msk.f32.vlgmr.msra.gmra.mxu0 %vm188_vm0, %v1480_v30  ;;  %vm1701_vm3 = vcmp.ne.s32.totalorder %v1687_v26, 0  ;;  %vm1703_vm4 = vcmp.lt.s32.totalorder %v1687_v26, 0 }
  0x9c   : > { %2401 = vmatmul.mubr.msk.f32.vlgmr.msra.gmra.mxu1 %vm188_vm0, %v1574_v31  ;;  %vm1705_vm6 = vmand %vm1703_vm4, %vm1701_vm3 }
  0xdd   : > { %v2117_v32 = vpop.f32.mrf.mxu0 }
  0xde   : > { %v2136_v33 = vpop.f32.mrf.mxu1 }
  0xdf   : > { %v261_v34 = vpop.f32.mrf.mxu0  ;;  %v348_v37 = vadd.f32 %v2136_v33, %v2117_v32  ;;  %v1708_v32 = vadd.s32 5, %v1698_v23 }
  0xe0   : > { %v342_v36 = vpop.f32.mrf.mxu1 }
  0xe1   : > { %v343_v41 = vadd.f32 %v342_v36, %v261_v34 }
  0xef   : > { %v2155_v35 = vpop.f32.mrf.mxu0 }
  0xf0   : > { %v444_v42 = vadd.f32 %v2155_v35, %v348_v37  ;;  %v1707_v35 = vadd.s32 5, %v1687_v26 }
  0xf1   : > { %v2174_v39 = vpop.f32.mrf.mxu1  ;;  %v434_v40 = vpop.f32.mrf.mxu0 }
  0xf2   : > { %v443_v44 = vadd.f32 %v434_v40, %v343_v41  ;;  %v538_v47 = vadd.f32 %v2174_v39, %v444_v42  ;;  %v1710_v40 = vsel %vm1706_vm5, %v1708_v32, %v1698_v23  ;;  %v1935_v41 = vld [vmem:[%s2927_s2] ss:$0 sm:$0xff]  ;;  %v1709_v45 = vsel %vm1705_vm6, %v1707_v35, %v1687_v26 }
  0xf3   : > { %v528_v46 = vpop.f32.mrf.mxu1  ;;  %vm1712_vm7 = vcmp.lt.s32.totalorder %v1710_v40, 2  ;;  %vm1711_vm8 = vcmp.lt.s32.totalorder %v1709_v45, 2 }
  0xf4   : > { %v537_v50 = vadd.f32 %v528_v46, %v443_v44 }
 0x101   : > { %v2193_v43 = vpop.f32.mrf.mxu0 }
 0x102   : > { %v632_v51 = vadd.f32 %v2193_v43, %v538_v47 }
 0x103   : > { %v2212_v48 = vpop.f32.mrf.mxu1  ;;  %v622_v49 = vpop.f32.mrf.mxu0 }
 0x104   : > { %v631_v54 = vadd.f32 %v622_v49, %v537_v50  ;;  %v726_v56 = vadd.f32 %v2212_v48, %v632_v51 }
 0x105   : > { %v716_v55 = vpop.f32.mrf.mxu1 }
 0x106   : > { %v725_v61 = vadd.f32 %v716_v55, %v631_v54 }
 0x113   : > { %v2231_v53 = vpop.f32.mrf.mxu0 }
 0x114   : > { %v820_v62 = vadd.f32 %v2231_v53, %v726_v56 }
 0x115   : > { %v2250_v59 = vpop.f32.mrf.mxu1  ;;  %v810_v60 = vpop.f32.mrf.mxu0 }
 0x116   : > { %v819_v2 = vadd.f32 %v810_v60, %v725_v61  ;;  %v914_v4 = vadd.f32 %v2250_v59, %v820_v62 }
 0x117   : > { %v904_v3 = vpop.f32.mrf.mxu1 }
 0x118   : > { %v913_v7 = vadd.f32 %v904_v3, %v819_v2 }
 0x125   : > { %v2269_v1 = vpop.f32.mrf.mxu0 }
 0x126   : > { %v1008_v8 = vadd.f32 %v2269_v1, %v914_v4 }
 0x127   : > { %v2288_v5 = vpop.f32.mrf.mxu1  ;;  %v998_v6 = vpop.f32.mrf.mxu0 }
 0x128   : > { %v1007_v11 = vadd.f32 %v998_v6, %v913_v7  ;;  %v1102_v14 = vadd.f32 %v2288_v5, %v1008_v8 }
 0x129   : > { %v1092_v13 = vpop.f32.mrf.mxu1 }
 0x12a   : > { %v1101_v18 = vadd.f32 %v1092_v13, %v1007_v11 }
 0x137   : > { %v2307_v10 = vpop.f32.mrf.mxu0 }
 0x138   : > { %v1196_v19 = vadd.f32 %v2307_v10, %v1102_v14 }
 0x139   : > { %v2326_v16 = vpop.f32.mrf.mxu1  ;;  %v1186_v17 = vpop.f32.mrf.mxu0 }
 0x13a   : > { %v1195_v22 = vadd.f32 %v1186_v17, %v1101_v18  ;;  %v1290_v25 = vadd.f32 %v2326_v16, %v1196_v19 }
 0x13b   : > { %v1280_v24 = vpop.f32.mrf.mxu1 }
 0x13c   : > { %v1289_v29 = vadd.f32 %v1280_v24, %v1195_v22 }
 0x149   : > { %v2345_v21 = vpop.f32.mrf.mxu0 }
 0x14a   : > { %v1384_v30 = vadd.f32 %v2345_v21, %v1290_v25 }
 0x14b   : > { %v2364_v27 = vpop.f32.mrf.mxu1  ;;  %v1374_v28 = vpop.f32.mrf.mxu0 }
 0x14c   : > { %v1383_v31 = vadd.f32 %v1374_v28, %v1289_v29  ;;  %v1478_v34 = vadd.f32 %v2364_v27, %v1384_v30 }
 0x14d   : > { %v1468_v33 = vpop.f32.mrf.mxu1 }
 0x14e   : > { %v1477_v38 = vadd.f32 %v1468_v33, %v1383_v31 }
 0x15b   : > { %v2383_v36 = vpop.f32.mrf.mxu0 }
 0x15c   : > { %v2402_v37 = vpop.f32.mrf.mxu1  ;;  %v1572_v39 = vadd.f32 %v2383_v36, %v1478_v34 }
 0x15d   : > { %v1562_v42 = vpop.f32.mrf.mxu0 }
 0x15e   : > { %v1666_v43 = vadd.f32 %v2402_v37, %v1572_v39  ;;  %v1571_v44 = vadd.f32 %v1562_v42, %v1477_v38  ;;  %v1656_v46 = vpop.f32.mrf.mxu1 }
 0x160   : > { %v1675_v47 = vadd.f32 %v1935_v41, %v1666_v43  ;;  %v1665_v48 = vadd.f32 %v1656_v46, %v1571_v44 }
 0x162   : > { %v1714_v49 = vsel %vm1712_vm7, %v1675_v47, 0.0  ;;  %v1674_v50 = vadd.f32 %v1935_v41, %v1665_v48 }
 0x163   : > { %v1718_v52 = vsel %vm1717_vm9, %v1714_v49, 0.0 }
 0x164   : > { %v1713_v51 = vsel %vm1711_vm8, %v1674_v50, 0.0 }
 0x165   : > { %v1716_v53 = vsel %vm1715_vm10, %v1713_v51, 0.0 }
 0x166   : > { %v1719_v54 = vadd.f32 %v1718_v52, %v1716_v53 }
 0x168   : > { %v1720_v55 = vrot.slane %v1719_v54, 4 }
 0x16a   : > { %v1721_v56 = vadd.f32 %v1720_v55, %v1719_v54 }
 0x16c   : > { %v1722_v57 = vrot.slane %v1721_v56, 2 }
 0x16e   : > { %v1723_v58 = vadd.f32 %v1722_v57, %v1721_v56 }
 0x170   : > { %v1724_v59 = vrot.slane %v1723_v58, 1 }
 0x172   : > { %v1725_v60 = vadd.f32 %v1724_v59, %v1723_v58 }
 0x174   : > { %v1726_v61 = vmul.f32 0.25, %v1725_v60 }
 0x176   : > { %1728 = vst.msk [vmem:[%s166_s9] sm:$0x1] %vm1727_vm11, %v1726_v61 }
 0x177 PF: > { %s13_s12 = sadd.s32 1, %s2421_s12  }
 0x178   : > { %p10_p4 = scmp.ge.s32.totalorder %s13_s12, 4  }
 0x17a   :  { %12 = sbr.rel (!%p10_p4) target bundleno = 1 (0x1), region = 77 }

</bundles_post_ra>
